<compile_context>
chip_gen: v5e
topology: v5e:2x2
jax: 0.10.0
libtpu: 0.0.40
codegen_flags: <defaults>
</compile_context>

<pallas_src>
import functools

import jax
import jax.numpy as jnp
from jax.experimental import pallas as pl
from jax.experimental.pallas import tpu as pltpu


def _round_up(x, m):
    return ((x + m - 1) // m) * m


def _largest_tile(total, candidates):
    for c in candidates:
        if total % c == 0:
            return c
    return candidates[-1]


# --------------------- GEMM (+bias, +LeakyReLU) kernel ----------------------

def _matmul_bias_act_kernel(x_ref, w_ref, b_ref, o_ref, acc_ref, *,
                            has_bias, apply_lrelu, neg_slope):
    @pl.when(pl.program_id(2) == 0)
    def _():
        acc_ref[...] = jnp.zeros_like(acc_ref)

    acc_ref[...] += jnp.dot(x_ref[...], w_ref[...],
                            preferred_element_type=jnp.float32)

    @pl.when(pl.program_id(2) == pl.num_programs(2) - 1)
    def _():
        acc = acc_ref[...]
        if has_bias:
            acc = acc + b_ref[...]                 # [1, bn] broadcasts over rows
        if apply_lrelu:
            acc = jnp.where(acc >= 0.0, acc, neg_slope * acc)
        o_ref[...] = acc.astype(o_ref.dtype)


def pallas_matmul_bias_act(patches, w, b, *, has_bias, apply_lrelu,
                           neg_slope=0.2, out_dtype=jnp.bfloat16):
    """patches: [M, K], w: [K, Cout], b: [Cout] -> [M, Cout] (out_dtype)."""
    M, K = patches.shape
    Cout = w.shape[1]

    # Lane-dense output / MXU-friendly K: pad K and Cout to 128 multiples.
    K_p = _round_up(K, 128)
    Cout_p = _round_up(Cout, 128)
    if K_p != K:
        patches = jnp.pad(patches, ((0, 0), (0, K_p - K)))
        w = jnp.pad(w, ((0, K_p - K), (0, 0)))
    if Cout_p != Cout:
        w = jnp.pad(w, ((0, 0), (0, Cout_p - Cout)))
        b = jnp.pad(b, (0, Cout_p - Cout))

    # Tile sizes: large M tiles amortize per-step overhead, 128/256-lane N
    # tiles for the MXU, K tiles <= 1024 so VMEM stays bounded at real sizes.
    bm = min(512, _round_up(M, 16))
    bn = 256 if (Cout_p % 256 == 0) else 128
    bk = _largest_tile(K_p, (1024, 512, 256, 128))

    grid = (pl.cdiv(M, bm), Cout_p // bn, K_p // bk)

    # bf16 operands for the MXU; accumulation stays f32 in the scratch.
    x_bf = patches.astype(jnp.bfloat16)
    w_bf = w.astype(jnp.bfloat16)
    b2 = b.reshape(1, Cout_p).astype(jnp.float32)

    kernel = functools.partial(_matmul_bias_act_kernel, has_bias=has_bias,
                               apply_lrelu=apply_lrelu, neg_slope=neg_slope)

    out = pl.pallas_call(
        kernel,
        out_shape=jax.ShapeDtypeStruct((M, Cout_p), out_dtype),
        grid=grid,
        in_specs=[
            pl.BlockSpec((bm, bk), lambda i, j, k: (i, k)),
            pl.BlockSpec((bk, bn), lambda i, j, k: (k, j)),
            pl.BlockSpec((1, bn), lambda i, j, k: (0, j)),
        ],
        out_specs=pl.BlockSpec((bm, bn), lambda i, j, k: (i, j)),
        scratch_shapes=[pltpu.VMEM((bm, bn), jnp.float32)],
        compiler_params=pltpu.CompilerParams(
            dimension_semantics=("parallel", "parallel", "arbitrary"),
            vmem_limit_bytes=32 * 1024 * 1024),
    )(x_bf, w_bf, b2)

    return out[:, :Cout] if Cout_p != Cout else out


# ------------------- InstanceNorm3d + LeakyReLU kernel ----------------------

def _instnorm_lrelu_kernel(x_ref, o_ref, *, eps, neg_slope):
    x = x_ref[...].astype(jnp.float32)               # [1, S, Cb]
    mean = jnp.mean(x, axis=1, keepdims=True)
    xc = x - mean
    var = jnp.mean(xc * xc, axis=1, keepdims=True)   # biased var (PyTorch IN)
    y = xc * jax.lax.rsqrt(var + eps)
    o_ref[...] = jnp.where(y >= 0.0, y, neg_slope * y).astype(o_ref.dtype)


def pallas_instnorm_lrelu(x_ndhwc, eps=1e-5, neg_slope=0.2):
    """Per-(n, c) normalization over D*H*W, then LeakyReLU(0.2)."""
    N, D, H, W, C = x_ndhwc.shape
    S = D * H * W
    x3 = x_ndhwc.reshape(N, S, C)
    cb = 128 if (C % 128 == 0) else C                # lane-block of channels
    grid = (N, C // cb)
    kernel = functools.partial(_instnorm_lrelu_kernel, eps=eps,
                               neg_slope=neg_slope)
    y3 = pl.pallas_call(
        kernel,
        out_shape=jax.ShapeDtypeStruct((N, S, C), x_ndhwc.dtype),
        grid=grid,
        in_specs=[pl.BlockSpec((1, S, cb), lambda n, c: (n, 0, c))],
        out_specs=pl.BlockSpec((1, S, cb), lambda n, c: (n, 0, c)),
        compiler_params=pltpu.CompilerParams(
            dimension_semantics=("parallel", "parallel")),
    )(x3)
    return y3.reshape(N, D, H, W, C)


# ------------------------------ conv3d via GEMM ----------------------------

def _im2col_3d_ndhwc(x, ksize, stride, padding):
    """x: [N, D, H, W, C] -> patches [N*Do*Ho*Wo, k^3*C] (kd,kh,kw major; C minor)."""
    N, Din, Hin, Win, C = x.shape
    xp = jnp.pad(x, ((0, 0), (padding, padding), (padding, padding),
                     (padding, padding), (0, 0)))
    Dp, Hp, Wp = Din + 2 * padding, Hin + 2 * padding, Win + 2 * padding
    Do = (Dp - ksize) // stride + 1
    Ho = (Hp - ksize) // stride + 1
    Wo = (Wp - ksize) // stride + 1
    slabs = []
    for kd in range(ksize):
        for kh in range(ksize):
            for kw in range(ksize):
                slabs.append(xp[:,
                                kd: kd + (Do - 1) * stride + 1: stride,
                                kh: kh + (Ho - 1) * stride + 1: stride,
                                kw: kw + (Wo - 1) * stride + 1: stride, :])
    p = jnp.concatenate(slabs, axis=-1)              # [N, Do, Ho, Wo, k^3*C]
    return p.reshape(N * Do * Ho * Wo, ksize ** 3 * C), (N, Do, Ho, Wo)


def conv3d_pallas(x_ndhwc, w, b, *, stride, padding, has_bias, apply_lrelu):
    """x: [N,D,H,W,C]; w: [Cout, Cin, k, k, k] (PyTorch layout); b: [Cout]."""
    Cout, Cin, k = w.shape[0], w.shape[1], w.shape[2]
    patches, (N, Do, Ho, Wo) = _im2col_3d_ndhwc(x_ndhwc, k, stride, padding)
    # reorder weight to (kd, kh, kw, Cin) flatten order to match the patches
    w2 = jnp.transpose(w, (2, 3, 4, 1, 0)).reshape(k ** 3 * Cin, Cout)
    out = pallas_matmul_bias_act(patches, w2, b, has_bias=has_bias,
                                 apply_lrelu=apply_lrelu,
                                 out_dtype=x_ndhwc.dtype)
    return out.reshape(N, Do, Ho, Wo, Cout)          # stays channels-last


# --------------------------- NLayerDiscriminator ---------------------------

class NLayerDiscriminatorPallas:
    """Mirror of the PyTorch NLayerDiscriminator forward pass."""

    def __init__(self, input_nc, output_nc=1, ndf=64, n_layers=3,
                 key=jax.random.PRNGKey(0)):
        # (cin, cout, stride, use_bias, post) ; post in {"lrelu","norm_lrelu","none"}
        cfgs = [(input_nc, ndf, 2, True, "lrelu")]          # Conv3d(bias=True)+LReLU
        nf_mult = 1
        for n in range(1, n_layers):
            nf_mult_prev, nf_mult = nf_mult, min(2 ** n, 8)
            cfgs.append((ndf * nf_mult_prev, ndf * nf_mult, 2, False, "norm_lrelu"))
        nf_mult_prev, nf_mult = nf_mult, min(2 ** n_layers, 8)
        cfgs.append((ndf * nf_mult_prev, ndf * nf_mult, 1, False, "norm_lrelu"))
        cfgs.append((ndf * nf_mult, output_nc, 1, True, "none"))  # final Conv3d
        self.cfgs = cfgs

        params = []
        for (cin, cout, _stride, use_bias, _post) in cfgs:
            key, wk, bk = jax.random.split(key, 3)
            fan_in = cin * 4 ** 3
            w = jax.random.normal(wk, (cout, cin, 4, 4, 4), jnp.float32) / jnp.sqrt(
                jnp.float32(fan_in))
            b = (jax.random.normal(bk, (cout,), jnp.float32) * 0.01
                 if use_bias else jnp.zeros((cout,), jnp.float32))
            params.append((w, b))
        self.params = params

    def __call__(self, x_ncdhw):
        # NDHWC + bf16 internally: one transpose/cast in, one out.
        x = jnp.transpose(x_ncdhw, (0, 2, 3, 4, 1)).astype(jnp.bfloat16)
        for (cin, cout, stride, use_bias, post), (w, b) in zip(self.cfgs,
                                                               self.params):
            x = conv3d_pallas(x, w, b, stride=stride, padding=1,
                              has_bias=use_bias,
                              apply_lrelu=(post == "lrelu"))
            if post == "norm_lrelu":
                x = pallas_instnorm_lrelu(x)
        out = jnp.transpose(x, (0, 4, 1, 2, 3))              # back to NCDHW
        return out.astype(jnp.float32)


# ----------------------------------- main -----------------------------------

if __name__ == "__main__":
    # Spatial size 32 is the smallest "nice" size that survives the 5 convs
    # (16 collapses to an empty output through the k=4, s=1, p=1 stages).
    key = jax.random.PRNGKey(0)
    x = jax.random.normal(key, (2, 4, 32, 32, 32), jnp.float32)

    model = NLayerDiscriminatorPallas(input_nc=4, output_nc=1, ndf=8, n_layers=3,
                                      key=jax.random.PRNGKey(1))
    fwd = jax.jit(lambda inp: model(inp))
    out = fwd(x)
    out = jax.block_until_ready(out)

    # 32 ->16 ->8 ->4 (stride 2 x3) -> 3 (s1) -> 2 (s1); channels -> output_nc=1
    assert out.shape == (2, 1, 2, 2, 2), out.shape
    assert bool(jnp.all(jnp.isfinite(out)))
    print("KERNEL_OK")
</pallas_src>

<mosaic_0001>
module attributes {stable_mosaic.version = 11 : i64} {
  func.func @_matmul_bias_act_kernel(%arg0: i32, %arg1: i32, %arg2: i32, %arg3: memref<512x256xbf16, #tpu.memory_space<vmem>>, %arg4: memref<256x128xbf16, #tpu.memory_space<vmem>>, %arg5: memref<1x128xf32, #tpu.memory_space<vmem>>, %arg6: memref<512x128xbf16, #tpu.memory_space<vmem>>, %arg7: memref<512x128xf32, #tpu.memory_space<vmem>>) attributes {dimension_semantics = [#tpu.dimension_semantics<parallel>, #tpu.dimension_semantics<parallel>, #tpu.dimension_semantics<arbitrary>], iteration_bounds = array<i64: 16, 1, 1>, scalar_prefetch = 0 : i64, scratch_operands = 1 : i64, tpu.core_type = #tpu.core_type<tc>, window_params = [{transform_indices = @transform_0, window_bounds = array<i64: 512, 256>}, {transform_indices = @transform_1, window_bounds = array<i64: 256, 128>}, {transform_indices = @transform_2, window_bounds = array<i64: 1, 128>}, {transform_indices = @transform_3, window_bounds = array<i64: 512, 128>}]} {
    %c0_i32 = arith.constant 0 : i32
    %0 = arith.cmpi eq, %arg2, %c0_i32 : i32
    %1 = arith.extui %0 : i1 to i32
    %c0_i32_0 = arith.constant 0 : i32
    %2 = arith.cmpi ne, %1, %c0_i32_0 : i32
    scf.if %2 {
      %cst_10 = arith.constant 0.000000e+00 : f32
      %12 = vector.broadcast %cst_10 : f32 to vector<512x128xf32>
      %c0_11 = arith.constant 0 : index
      %c0_12 = arith.constant 0 : index
      %13 = vector.load %arg7[%c0_11, %c0_12] : memref<512x128xf32, #tpu.memory_space<vmem>>, vector<512x128xf32>
      tpu.vector_store %arg7[%c0_11, %c0_12], %12 {strides = array<i32>} : memref<512x128xf32, #tpu.memory_space<vmem>>, vector<512x128xf32>,
    } else {
    }
    %c0 = arith.constant 0 : index
    %c0_1 = arith.constant 0 : index
    %3 = vector.load %arg7[%c0, %c0_1] : memref<512x128xf32, #tpu.memory_space<vmem>>, vector<512x128xf32>
    %c0_2 = arith.constant 0 : index
    %c0_3 = arith.constant 0 : index
    %4 = vector.load %arg3[%c0_2, %c0_3] : memref<512x256xbf16, #tpu.memory_space<vmem>>, vector<512x256xbf16>
    %c0_4 = arith.constant 0 : index
    %c0_5 = arith.constant 0 : index
    %5 = vector.load %arg4[%c0_4, %c0_5] : memref<256x128xbf16, #tpu.memory_space<vmem>>, vector<256x128xbf16>
    %cst = arith.constant dense<0.000000e+00> : vector<512x128xf32>
    %6 = tpu.matmul %4, %5, %cst {dimension_numbers = #tpu.dot_dimension_numbers<[1], [0], [0], [1], [0, 0, 1, 1], [], []>} : vector<512x256xbf16>, vector<256x128xbf16>, vector<512x128xf32> -> vector<512x128xf32>
    %7 = arith.addf %3, %6 : vector<512x128xf32>
    %c0_6 = arith.constant 0 : index
    %c0_7 = arith.constant 0 : index
    %8 = vector.load %arg7[%c0_6, %c0_7] : memref<512x128xf32, #tpu.memory_space<vmem>>, vector<512x128xf32>
    tpu.vector_store %arg7[%c0_6, %c0_7], %7 {strides = array<i32>} : memref<512x128xf32, #tpu.memory_space<vmem>>, vector<512x128xf32>,
    %c0_i32_8 = arith.constant 0 : i32
    %9 = arith.cmpi eq, %arg2, %c0_i32_8 : i32
    %10 = arith.extui %9 : i1 to i32
    %c0_i32_9 = arith.constant 0 : i32
    %11 = arith.cmpi ne, %10, %c0_i32_9 : i32
    scf.if %11 {
      %c0_10 = arith.constant 0 : index
      %c0_11 = arith.constant 0 : index
      %12 = vector.load %arg7[%c0_10, %c0_11] : memref<512x128xf32, #tpu.memory_space<vmem>>, vector<512x128xf32>
      %c0_12 = arith.constant 0 : index
      %c0_13 = arith.constant 0 : index
      %13 = vector.load %arg5[%c0_12, %c0_13] : memref<1x128xf32, #tpu.memory_space<vmem>>, vector<1x128xf32>
      %14 = vector.broadcast %13 : vector<1x128xf32> to vector<512x128xf32>
      %15 = arith.addf %12, %14 : vector<512x128xf32>
      %cst_14 = arith.constant 0.000000e+00 : f32
      %16 = vector.broadcast %cst_14 : f32 to vector<512x128xf32>
      %17 = arith.cmpf oge, %15, %16 : vector<512x128xf32>
      %cst_15 = arith.constant 2.000000e-01 : f32
      %18 = vector.broadcast %cst_15 : f32 to vector<512x128xf32>
      %19 = arith.mulf %18, %15 : vector<512x128xf32>
      %20 = arith.select %17, %15, %19 : vector<512x128xi1>, vector<512x128xf32>
      %21 = arith.truncf %20 : vector<512x128xf32> to vector<512x128xbf16>
      %c0_16 = arith.constant 0 : index
      %c0_17 = arith.constant 0 : index
      %22 = vector.load %arg6[%c0_16, %c0_17] : memref<512x128xbf16, #tpu.memory_space<vmem>>, vector<512x128xbf16>
      tpu.vector_store %arg6[%c0_16, %c0_17], %21 {strides = array<i32>} : memref<512x128xbf16, #tpu.memory_space<vmem>>, vector<512x128xbf16>,
    } else {
    }
    return
  }
  func.func @transform_0(%arg0: i32, %arg1: i32, %arg2: i32) -> (i32, i32) {
    %c0_i32 = arith.constant 0 : i32
    return %arg0, %arg2 : i32, i32
  }
  func.func @transform_1(%arg0: i32, %arg1: i32, %arg2: i32) -> (i32, i32) {
    %c0_i32 = arith.constant 0 : i32
    return %arg2, %arg1 : i32, i32
  }
  func.func @transform_2(%arg0: i32, %arg1: i32, %arg2: i32) -> (i32, i32) {
    %c0_i32 = arith.constant 0 : i32
    %c0_i32_0 = arith.constant 0 : i32
    return %c0_i32, %arg1 : i32, i32
  }
  func.func @transform_3(%arg0: i32, %arg1: i32, %arg2: i32) -> (i32, i32) {
    %c0_i32 = arith.constant 0 : i32
    return %arg0, %arg1 : i32, i32
  }
}

module attributes {stable_mosaic.version = 11 : i64} {
  func.func @_matmul_bias_act_kernel(%arg0: i32, %arg1: i32, %arg2: i32, %arg3: memref<512x512xbf16, #tpu.memory_space<vmem>>, %arg4: memref<512x128xbf16, #tpu.memory_space<vmem>>, %arg5: memref<1x128xf32, #tpu.memory_space<vmem>>, %arg6: memref<512x128xbf16, #tpu.memory_space<vmem>>, %arg7: memref<512x128xf32, #tpu.memory_space<vmem>>) attributes {dimension_semantics = [#tpu.dimension_semantics<parallel>, #tpu.dimension_semantics<parallel>, #tpu.dimension_semantics<arbitrary>], iteration_bounds = array<i64: 2, 1, 1>, scalar_prefetch = 0 : i64, scratch_operands = 1 : i64, tpu.core_type = #tpu.core_type<tc>, window_params = [{transform_indices = @transform_0, window_bounds = array<i64: 512, 512>}, {transform_indices = @transform_1, window_bounds = array<i64: 512, 128>}, {transform_indices = @transform_2, window_bounds = array<i64: 1, 128>}, {transform_indices = @transform_3, window_bounds = array<i64: 512, 128>}]} {
    %c0_i32 = arith.constant 0 : i32
    %0 = arith.cmpi eq, %arg2, %c0_i32 : i32
    %1 = arith.extui %0 : i1 to i32
    %c0_i32_0 = arith.constant 0 : i32
    %2 = arith.cmpi ne, %1, %c0_i32_0 : i32
    scf.if %2 {
      %cst_10 = arith.constant 0.000000e+00 : f32
      %12 = vector.broadcast %cst_10 : f32 to vector<512x128xf32>
      %c0_11 = arith.constant 0 : index
      %c0_12 = arith.constant 0 : index
      %13 = vector.load %arg7[%c0_11, %c0_12] : memref<512x128xf32, #tpu.memory_space<vmem>>, vector<512x128xf32>
      tpu.vector_store %arg7[%c0_11, %c0_12], %12 {strides = array<i32>} : memref<512x128xf32, #tpu.memory_space<vmem>>, vector<512x128xf32>,
    } else {
    }
    %c0 = arith.constant 0 : index
    %c0_1 = arith.constant 0 : index
    %3 = vector.load %arg7[%c0, %c0_1] : memref<512x128xf32, #tpu.memory_space<vmem>>, vector<512x128xf32>
    %c0_2 = arith.constant 0 : index
    %c0_3 = arith.constant 0 : index
    %4 = vector.load %arg3[%c0_2, %c0_3] : memref<512x512xbf16, #tpu.memory_space<vmem>>, vector<512x512xbf16>
    %c0_4 = arith.constant 0 : index
    %c0_5 = arith.constant 0 : index
    %5 = vector.load %arg4[%c0_4, %c0_5] : memref<512x128xbf16, #tpu.memory_space<vmem>>, vector<512x128xbf16>
    %cst = arith.constant dense<0.000000e+00> : vector<512x128xf32>
    %6 = tpu.matmul %4, %5, %cst {dimension_numbers = #tpu.dot_dimension_numbers<[1], [0], [0], [1], [0, 0, 1, 1], [], []>} : vector<512x512xbf16>, vector<512x128xbf16>, vector<512x128xf32> -> vector<512x128xf32>
    %7 = arith.addf %3, %6 : vector<512x128xf32>
    %c0_6 = arith.constant 0 : index
    %c0_7 = arith.constant 0 : index
    %8 = vector.load %arg7[%c0_6, %c0_7] : memref<512x128xf32, #tpu.memory_space<vmem>>, vector<512x128xf32>
    tpu.vector_store %arg7[%c0_6, %c0_7], %7 {strides = array<i32>} : memref<512x128xf32, #tpu.memory_space<vmem>>, vector<512x128xf32>,
    %c0_i32_8 = arith.constant 0 : i32
    %9 = arith.cmpi eq, %arg2, %c0_i32_8 : i32
    %10 = arith.extui %9 : i1 to i32
    %c0_i32_9 = arith.constant 0 : i32
    %11 = arith.cmpi ne, %10, %c0_i32_9 : i32
    scf.if %11 {
      %c0_10 = arith.constant 0 : index
      %c0_11 = arith.constant 0 : index
      %12 = vector.load %arg7[%c0_10, %c0_11] : memref<512x128xf32, #tpu.memory_space<vmem>>, vector<512x128xf32>
      %13 = arith.truncf %12 : vector<512x128xf32> to vector<512x128xbf16>
      %c0_12 = arith.constant 0 : index
      %c0_13 = arith.constant 0 : index
      %14 = vector.load %arg6[%c0_12, %c0_13] : memref<512x128xbf16, #tpu.memory_space<vmem>>, vector<512x128xbf16>
      tpu.vector_store %arg6[%c0_12, %c0_13], %13 {strides = array<i32>} : memref<512x128xbf16, #tpu.memory_space<vmem>>, vector<512x128xbf16>,
    } else {
    }
    return
  }
  func.func @transform_0(%arg0: i32, %arg1: i32, %arg2: i32) -> (i32, i32) {
    %c0_i32 = arith.constant 0 : i32
    return %arg0, %arg2 : i32, i32
  }
  func.func @transform_1(%arg0: i32, %arg1: i32, %arg2: i32) -> (i32, i32) {
    %c0_i32 = arith.constant 0 : i32
    return %arg2, %arg1 : i32, i32
  }
  func.func @transform_2(%arg0: i32, %arg1: i32, %arg2: i32) -> (i32, i32) {
    %c0_i32 = arith.constant 0 : i32
    %c0_i32_0 = arith.constant 0 : i32
    return %c0_i32, %arg1 : i32, i32
  }
  func.func @transform_3(%arg0: i32, %arg1: i32, %arg2: i32) -> (i32, i32) {
    %c0_i32 = arith.constant 0 : i32
    return %arg0, %arg1 : i32, i32
  }
}

module attributes {stable_mosaic.version = 11 : i64} {
  func.func @_instnorm_lrelu_kernel(%arg0: i32, %arg1: i32, %arg2: memref<1x512x16xbf16, #tpu.memory_space<vmem>>, %arg3: memref<1x512x16xbf16, #tpu.memory_space<vmem>>) attributes {dimension_semantics = [#tpu.dimension_semantics<parallel>, #tpu.dimension_semantics<parallel>], iteration_bounds = array<i64: 2, 1>, scalar_prefetch = 0 : i64, scratch_operands = 0 : i64, tpu.core_type = #tpu.core_type<tc>, window_params = [{transform_indices = @transform_0, window_bounds = array<i64: 1, 512, 16>}, {transform_indices = @transform_1, window_bounds = array<i64: 1, 512, 16>}]} {
    %c0 = arith.constant 0 : index
    %c0_0 = arith.constant 0 : index
    %c0_1 = arith.constant 0 : index
    %0 = vector.load %arg2[%c0, %c0_0, %c0_1] : memref<1x512x16xbf16, #tpu.memory_space<vmem>>, vector<1x512x16xbf16>
    %1 = arith.extf %0 : vector<1x512x16xbf16> to vector<1x512x16xf32>
    %cst = arith.constant dense<0.000000e+00> : vector<1x16xf32>
    %2 = vector.multi_reduction <add>, %1, %cst [1] : vector<1x512x16xf32> to vector<1x16xf32>
    %3 = vector.shape_cast %2 : vector<1x16xf32> to vector<1x1x16xf32>
    %cst_2 = arith.constant 5.120000e+02 : f32
    %4 = vector.broadcast %cst_2 : f32 to vector<1x1x16xf32>
    %5 = arith.divf %3, %4 : vector<1x1x16xf32>
    %6 = vector.broadcast %5 : vector<1x1x16xf32> to vector<1x512x16xf32>
    %7 = arith.subf %1, %6 : vector<1x512x16xf32>
    %8 = arith.mulf %7, %7 : vector<1x512x16xf32>
    %cst_3 = arith.constant dense<0.000000e+00> : vector<1x16xf32>
    %9 = vector.multi_reduction <add>, %8, %cst_3 [1] : vector<1x512x16xf32> to vector<1x16xf32>
    %10 = vector.shape_cast %9 : vector<1x16xf32> to vector<1x1x16xf32>
    %cst_4 = arith.constant 5.120000e+02 : f32
    %11 = vector.broadcast %cst_4 : f32 to vector<1x1x16xf32>
    %12 = arith.divf %10, %11 : vector<1x1x16xf32>
    %cst_5 = arith.constant 9.99999974E-6 : f32
    %13 = vector.broadcast %cst_5 : f32 to vector<1x1x16xf32>
    %14 = arith.addf %12, %13 : vector<1x1x16xf32>
    %15 = math.rsqrt %14 : vector<1x1x16xf32>
    %16 = vector.broadcast %15 : vector<1x1x16xf32> to vector<1x512x16xf32>
    %17 = arith.mulf %7, %16 : vector<1x512x16xf32>
    %cst_6 = arith.constant 0.000000e+00 : f32
    %18 = vector.broadcast %cst_6 : f32 to vector<1x512x16xf32>
    %19 = arith.cmpf oge, %17, %18 : vector<1x512x16xf32>
    %cst_7 = arith.constant 2.000000e-01 : f32
    %20 = vector.broadcast %cst_7 : f32 to vector<1x512x16xf32>
    %21 = arith.mulf %20, %17 : vector<1x512x16xf32>
    %22 = arith.select %19, %17, %21 : vector<1x512x16xi1>, vector<1x512x16xf32>
    %23 = arith.truncf %22 : vector<1x512x16xf32> to vector<1x512x16xbf16>
    %c0_8 = arith.constant 0 : index
    %c0_9 = arith.constant 0 : index
    %c0_10 = arith.constant 0 : index
    %24 = vector.load %arg3[%c0_8, %c0_9, %c0_10] : memref<1x512x16xbf16, #tpu.memory_space<vmem>>, vector<1x512x16xbf16>
    tpu.vector_store %arg3[%c0_8, %c0_9, %c0_10], %23 {strides = array<i32>} : memref<1x512x16xbf16, #tpu.memory_space<vmem>>, vector<1x512x16xbf16>,
    return
  }
  func.func @transform_0(%arg0: i32, %arg1: i32) -> (i32, i32, i32) {
    %c0_i32 = arith.constant 0 : i32
    %c0_i32_0 = arith.constant 0 : i32
    return %arg0, %c0_i32, %arg1 : i32, i32, i32
  }
  func.func @transform_1(%arg0: i32, %arg1: i32) -> (i32, i32, i32) {
    %c0_i32 = arith.constant 0 : i32
    %c0_i32_0 = arith.constant 0 : i32
    return %arg0, %c0_i32, %arg1 : i32, i32, i32
  }
}

module attributes {stable_mosaic.version = 11 : i64} {
  func.func @_matmul_bias_act_kernel(%arg0: i32, %arg1: i32, %arg2: i32, %arg3: memref<128x1024xbf16, #tpu.memory_space<vmem>>, %arg4: memref<1024x128xbf16, #tpu.memory_space<vmem>>, %arg5: memref<1x128xf32, #tpu.memory_space<vmem>>, %arg6: memref<128x128xbf16, #tpu.memory_space<vmem>>, %arg7: memref<128x128xf32, #tpu.memory_space<vmem>>) attributes {dimension_semantics = [#tpu.dimension_semantics<parallel>, #tpu.dimension_semantics<parallel>, #tpu.dimension_semantics<arbitrary>], iteration_bounds = array<i64: 1, 1, 1>, scalar_prefetch = 0 : i64, scratch_operands = 1 : i64, tpu.core_type = #tpu.core_type<tc>, window_params = [{transform_indices = @transform_0, window_bounds = array<i64: 128, 1024>}, {transform_indices = @transform_1, window_bounds = array<i64: 1024, 128>}, {transform_indices = @transform_2, window_bounds = array<i64: 1, 128>}, {transform_indices = @transform_3, window_bounds = array<i64: 128, 128>}]} {
    %c0_i32 = arith.constant 0 : i32
    %0 = arith.cmpi eq, %arg2, %c0_i32 : i32
    %1 = arith.extui %0 : i1 to i32
    %c0_i32_0 = arith.constant 0 : i32
    %2 = arith.cmpi ne, %1, %c0_i32_0 : i32
    scf.if %2 {
      %cst_10 = arith.constant 0.000000e+00 : f32
      %12 = vector.broadcast %cst_10 : f32 to vector<128x128xf32>
      %c0_11 = arith.constant 0 : index
      %c0_12 = arith.constant 0 : index
      %13 = vector.load %arg7[%c0_11, %c0_12] : memref<128x128xf32, #tpu.memory_space<vmem>>, vector<128x128xf32>
      tpu.vector_store %arg7[%c0_11, %c0_12], %12 {strides = array<i32>} : memref<128x128xf32, #tpu.memory_space<vmem>>, vector<128x128xf32>,
    } else {
    }
    %c0 = arith.constant 0 : index
    %c0_1 = arith.constant 0 : index
    %3 = vector.load %arg7[%c0, %c0_1] : memref<128x128xf32, #tpu.memory_space<vmem>>, vector<128x128xf32>
    %c0_2 = arith.constant 0 : index
    %c0_3 = arith.constant 0 : index
    %4 = vector.load %arg3[%c0_2, %c0_3] : memref<128x1024xbf16, #tpu.memory_space<vmem>>, vector<128x1024xbf16>
    %c0_4 = arith.constant 0 : index
    %c0_5 = arith.constant 0 : index
    %5 = vector.load %arg4[%c0_4, %c0_5] : memref<1024x128xbf16, #tpu.memory_space<vmem>>, vector<1024x128xbf16>
    %cst = arith.constant dense<0.000000e+00> : vector<128x128xf32>
    %6 = tpu.matmul %4, %5, %cst {dimension_numbers = #tpu.dot_dimension_numbers<[1], [0], [0], [1], [0, 0, 1, 1], [], []>} : vector<128x1024xbf16>, vector<1024x128xbf16>, vector<128x128xf32> -> vector<128x128xf32>
    %7 = arith.addf %3, %6 : vector<128x128xf32>
    %c0_6 = arith.constant 0 : index
    %c0_7 = arith.constant 0 : index
    %8 = vector.load %arg7[%c0_6, %c0_7] : memref<128x128xf32, #tpu.memory_space<vmem>>, vector<128x128xf32>
    tpu.vector_store %arg7[%c0_6, %c0_7], %7 {strides = array<i32>} : memref<128x128xf32, #tpu.memory_space<vmem>>, vector<128x128xf32>,
    %c0_i32_8 = arith.constant 0 : i32
    %9 = arith.cmpi eq, %arg2, %c0_i32_8 : i32
    %10 = arith.extui %9 : i1 to i32
    %c0_i32_9 = arith.constant 0 : i32
    %11 = arith.cmpi ne, %10, %c0_i32_9 : i32
    scf.if %11 {
      %c0_10 = arith.constant 0 : index
      %c0_11 = arith.constant 0 : index
      %12 = vector.load %arg7[%c0_10, %c0_11] : memref<128x128xf32, #tpu.memory_space<vmem>>, vector<128x128xf32>
      %13 = arith.truncf %12 : vector<128x128xf32> to vector<128x128xbf16>
      %c0_12 = arith.constant 0 : index
      %c0_13 = arith.constant 0 : index
      %14 = vector.load %arg6[%c0_12, %c0_13] : memref<128x128xbf16, #tpu.memory_space<vmem>>, vector<128x128xbf16>
      tpu.vector_store %arg6[%c0_12, %c0_13], %13 {strides = array<i32>} : memref<128x128xbf16, #tpu.memory_space<vmem>>, vector<128x128xbf16>,
    } else {
    }
    return
  }
  func.func @transform_0(%arg0: i32, %arg1: i32, %arg2: i32) -> (i32, i32) {
    %c0_i32 = arith.constant 0 : i32
    return %arg0, %arg2 : i32, i32
  }
  func.func @transform_1(%arg0: i32, %arg1: i32, %arg2: i32) -> (i32, i32) {
    %c0_i32 = arith.constant 0 : i32
    return %arg2, %arg1 : i32, i32
  }
  func.func @transform_2(%arg0: i32, %arg1: i32, %arg2: i32) -> (i32, i32) {
    %c0_i32 = arith.constant 0 : i32
    %c0_i32_0 = arith.constant 0 : i32
    return %c0_i32, %arg1 : i32, i32
  }
  func.func @transform_3(%arg0: i32, %arg1: i32, %arg2: i32) -> (i32, i32) {
    %c0_i32 = arith.constant 0 : i32
    return %arg0, %arg1 : i32, i32
  }
}

module attributes {stable_mosaic.version = 11 : i64} {
  func.func @_instnorm_lrelu_kernel(%arg0: i32, %arg1: i32, %arg2: memref<1x64x32xbf16, #tpu.memory_space<vmem>>, %arg3: memref<1x64x32xbf16, #tpu.memory_space<vmem>>) attributes {dimension_semantics = [#tpu.dimension_semantics<parallel>, #tpu.dimension_semantics<parallel>], iteration_bounds = array<i64: 2, 1>, scalar_prefetch = 0 : i64, scratch_operands = 0 : i64, tpu.core_type = #tpu.core_type<tc>, window_params = [{transform_indices = @transform_0, window_bounds = array<i64: 1, 64, 32>}, {transform_indices = @transform_1, window_bounds = array<i64: 1, 64, 32>}]} {
    %c0 = arith.constant 0 : index
    %c0_0 = arith.constant 0 : index
    %c0_1 = arith.constant 0 : index
    %0 = vector.load %arg2[%c0, %c0_0, %c0_1] : memref<1x64x32xbf16, #tpu.memory_space<vmem>>, vector<1x64x32xbf16>
    %1 = arith.extf %0 : vector<1x64x32xbf16> to vector<1x64x32xf32>
    %cst = arith.constant dense<0.000000e+00> : vector<1x32xf32>
    %2 = vector.multi_reduction <add>, %1, %cst [1] : vector<1x64x32xf32> to vector<1x32xf32>
    %3 = vector.shape_cast %2 : vector<1x32xf32> to vector<1x1x32xf32>
    %cst_2 = arith.constant 6.400000e+01 : f32
    %4 = vector.broadcast %cst_2 : f32 to vector<1x1x32xf32>
    %5 = arith.divf %3, %4 : vector<1x1x32xf32>
    %6 = vector.broadcast %5 : vector<1x1x32xf32> to vector<1x64x32xf32>
    %7 = arith.subf %1, %6 : vector<1x64x32xf32>
    %8 = arith.mulf %7, %7 : vector<1x64x32xf32>
    %cst_3 = arith.constant dense<0.000000e+00> : vector<1x32xf32>
    %9 = vector.multi_reduction <add>, %8, %cst_3 [1] : vector<1x64x32xf32> to vector<1x32xf32>
    %10 = vector.shape_cast %9 : vector<1x32xf32> to vector<1x1x32xf32>
    %cst_4 = arith.constant 6.400000e+01 : f32
    %11 = vector.broadcast %cst_4 : f32 to vector<1x1x32xf32>
    %12 = arith.divf %10, %11 : vector<1x1x32xf32>
    %cst_5 = arith.constant 9.99999974E-6 : f32
    %13 = vector.broadcast %cst_5 : f32 to vector<1x1x32xf32>
    %14 = arith.addf %12, %13 : vector<1x1x32xf32>
    %15 = math.rsqrt %14 : vector<1x1x32xf32>
    %16 = vector.broadcast %15 : vector<1x1x32xf32> to vector<1x64x32xf32>
    %17 = arith.mulf %7, %16 : vector<1x64x32xf32>
    %cst_6 = arith.constant 0.000000e+00 : f32
    %18 = vector.broadcast %cst_6 : f32 to vector<1x64x32xf32>
    %19 = arith.cmpf oge, %17, %18 : vector<1x64x32xf32>
    %cst_7 = arith.constant 2.000000e-01 : f32
    %20 = vector.broadcast %cst_7 : f32 to vector<1x64x32xf32>
    %21 = arith.mulf %20, %17 : vector<1x64x32xf32>
    %22 = arith.select %19, %17, %21 : vector<1x64x32xi1>, vector<1x64x32xf32>
    %23 = arith.truncf %22 : vector<1x64x32xf32> to vector<1x64x32xbf16>
    %c0_8 = arith.constant 0 : index
    %c0_9 = arith.constant 0 : index
    %c0_10 = arith.constant 0 : index
    %24 = vector.load %arg3[%c0_8, %c0_9, %c0_10] : memref<1x64x32xbf16, #tpu.memory_space<vmem>>, vector<1x64x32xbf16>
    tpu.vector_store %arg3[%c0_8, %c0_9, %c0_10], %23 {strides = array<i32>} : memref<1x64x32xbf16, #tpu.memory_space<vmem>>, vector<1x64x32xbf16>,
    return
  }
  func.func @transform_0(%arg0: i32, %arg1: i32) -> (i32, i32, i32) {
    %c0_i32 = arith.constant 0 : i32
    %c0_i32_0 = arith.constant 0 : i32
    return %arg0, %c0_i32, %arg1 : i32, i32, i32
  }
  func.func @transform_1(%arg0: i32, %arg1: i32) -> (i32, i32, i32) {
    %c0_i32 = arith.constant 0 : i32
    %c0_i32_0 = arith.constant 0 : i32
    return %arg0, %c0_i32, %arg1 : i32, i32, i32
  }
}

module attributes {stable_mosaic.version = 11 : i64} {
  func.func @_matmul_bias_act_kernel(%arg0: i32, %arg1: i32, %arg2: i32, %arg3: memref<64x1024xbf16, #tpu.memory_space<vmem>>, %arg4: memref<1024x128xbf16, #tpu.memory_space<vmem>>, %arg5: memref<1x128xf32, #tpu.memory_space<vmem>>, %arg6: memref<64x128xbf16, #tpu.memory_space<vmem>>, %arg7: memref<64x128xf32, #tpu.memory_space<vmem>>) attributes {dimension_semantics = [#tpu.dimension_semantics<parallel>, #tpu.dimension_semantics<parallel>, #tpu.dimension_semantics<arbitrary>], iteration_bounds = array<i64: 1, 1, 2>, scalar_prefetch = 0 : i64, scratch_operands = 1 : i64, tpu.core_type = #tpu.core_type<tc>, window_params = [{transform_indices = @transform_0, window_bounds = array<i64: 64, 1024>}, {transform_indices = @transform_1, window_bounds = array<i64: 1024, 128>}, {transform_indices = @transform_2, window_bounds = array<i64: 1, 128>}, {transform_indices = @transform_3, window_bounds = array<i64: 64, 128>}]} {
    %c0_i32 = arith.constant 0 : i32
    %0 = arith.cmpi eq, %arg2, %c0_i32 : i32
    %1 = arith.extui %0 : i1 to i32
    %c0_i32_0 = arith.constant 0 : i32
    %2 = arith.cmpi ne, %1, %c0_i32_0 : i32
    scf.if %2 {
      %cst_9 = arith.constant 0.000000e+00 : f32
      %12 = vector.broadcast %cst_9 : f32 to vector<64x128xf32>
      %c0_10 = arith.constant 0 : index
      %c0_11 = arith.constant 0 : index
      %13 = vector.load %arg7[%c0_10, %c0_11] : memref<64x128xf32, #tpu.memory_space<vmem>>, vector<64x128xf32>
      tpu.vector_store %arg7[%c0_10, %c0_11], %12 {strides = array<i32>} : memref<64x128xf32, #tpu.memory_space<vmem>>, vector<64x128xf32>,
    } else {
    }
    %c0 = arith.constant 0 : index
    %c0_1 = arith.constant 0 : index
    %3 = vector.load %arg7[%c0, %c0_1] : memref<64x128xf32, #tpu.memory_space<vmem>>, vector<64x128xf32>
    %c0_2 = arith.constant 0 : index
    %c0_3 = arith.constant 0 : index
    %4 = vector.load %arg3[%c0_2, %c0_3] : memref<64x1024xbf16, #tpu.memory_space<vmem>>, vector<64x1024xbf16>
    %c0_4 = arith.constant 0 : index
    %c0_5 = arith.constant 0 : index
    %5 = vector.load %arg4[%c0_4, %c0_5] : memref<1024x128xbf16, #tpu.memory_space<vmem>>, vector<1024x128xbf16>
    %cst = arith.constant dense<0.000000e+00> : vector<64x128xf32>
    %6 = tpu.matmul %4, %5, %cst {dimension_numbers = #tpu.dot_dimension_numbers<[1], [0], [0], [1], [0, 0, 1, 1], [], []>} : vector<64x1024xbf16>, vector<1024x128xbf16>, vector<64x128xf32> -> vector<64x128xf32>
    %7 = arith.addf %3, %6 : vector<64x128xf32>
    %c0_6 = arith.constant 0 : index
    %c0_7 = arith.constant 0 : index
    %8 = vector.load %arg7[%c0_6, %c0_7] : memref<64x128xf32, #tpu.memory_space<vmem>>, vector<64x128xf32>
    tpu.vector_store %arg7[%c0_6, %c0_7], %7 {strides = array<i32>} : memref<64x128xf32, #tpu.memory_space<vmem>>, vector<64x128xf32>,
    %c1_i32 = arith.constant 1 : i32
    %9 = arith.cmpi eq, %arg2, %c1_i32 : i32
    %10 = arith.extui %9 : i1 to i32
    %c0_i32_8 = arith.constant 0 : i32
    %11 = arith.cmpi ne, %10, %c0_i32_8 : i32
    scf.if %11 {
      %c0_9 = arith.constant 0 : index
      %c0_10 = arith.constant 0 : index
      %12 = vector.load %arg7[%c0_9, %c0_10] : memref<64x128xf32, #tpu.memory_space<vmem>>, vector<64x128xf32>
      %13 = arith.truncf %12 : vector<64x128xf32> to vector<64x128xbf16>
      %c0_11 = arith.constant 0 : index
      %c0_12 = arith.constant 0 : index
      %14 = vector.load %arg6[%c0_11, %c0_12] : memref<64x128xbf16, #tpu.memory_space<vmem>>, vector<64x128xbf16>
      tpu.vector_store %arg6[%c0_11, %c0_12], %13 {strides = array<i32>} : memref<64x128xbf16, #tpu.memory_space<vmem>>, vector<64x128xbf16>,
    } else {
    }
    return
  }
  func.func @transform_0(%arg0: i32, %arg1: i32, %arg2: i32) -> (i32, i32) {
    %c0_i32 = arith.constant 0 : i32
    return %arg0, %arg2 : i32, i32
  }
  func.func @transform_1(%arg0: i32, %arg1: i32, %arg2: i32) -> (i32, i32) {
    %c0_i32 = arith.constant 0 : i32
    return %arg2, %arg1 : i32, i32
  }
  func.func @transform_2(%arg0: i32, %arg1: i32, %arg2: i32) -> (i32, i32) {
    %c0_i32 = arith.constant 0 : i32
    %c0_i32_0 = arith.constant 0 : i32
    return %c0_i32, %arg1 : i32, i32
  }
  func.func @transform_3(%arg0: i32, %arg1: i32, %arg2: i32) -> (i32, i32) {
    %c0_i32 = arith.constant 0 : i32
    return %arg0, %arg1 : i32, i32
  }
}

module attributes {stable_mosaic.version = 11 : i64} {
  func.func @_instnorm_lrelu_kernel(%arg0: i32, %arg1: i32, %arg2: memref<1x27x64xbf16, #tpu.memory_space<vmem>>, %arg3: memref<1x27x64xbf16, #tpu.memory_space<vmem>>) attributes {dimension_semantics = [#tpu.dimension_semantics<parallel>, #tpu.dimension_semantics<parallel>], iteration_bounds = array<i64: 2, 1>, scalar_prefetch = 0 : i64, scratch_operands = 0 : i64, tpu.core_type = #tpu.core_type<tc>, window_params = [{transform_indices = @transform_0, window_bounds = array<i64: 1, 27, 64>}, {transform_indices = @transform_1, window_bounds = array<i64: 1, 27, 64>}]} {
    %c0 = arith.constant 0 : index
    %c0_0 = arith.constant 0 : index
    %c0_1 = arith.constant 0 : index
    %0 = vector.load %arg2[%c0, %c0_0, %c0_1] : memref<1x27x64xbf16, #tpu.memory_space<vmem>>, vector<1x27x64xbf16>
    %1 = arith.extf %0 : vector<1x27x64xbf16> to vector<1x27x64xf32>
    %cst = arith.constant dense<0.000000e+00> : vector<1x64xf32>
    %2 = vector.multi_reduction <add>, %1, %cst [1] : vector<1x27x64xf32> to vector<1x64xf32>
    %3 = vector.shape_cast %2 : vector<1x64xf32> to vector<1x1x64xf32>
    %cst_2 = arith.constant 2.700000e+01 : f32
    %4 = vector.broadcast %cst_2 : f32 to vector<1x1x64xf32>
    %5 = arith.divf %3, %4 : vector<1x1x64xf32>
    %6 = vector.broadcast %5 : vector<1x1x64xf32> to vector<1x27x64xf32>
    %7 = arith.subf %1, %6 : vector<1x27x64xf32>
    %8 = arith.mulf %7, %7 : vector<1x27x64xf32>
    %cst_3 = arith.constant dense<0.000000e+00> : vector<1x64xf32>
    %9 = vector.multi_reduction <add>, %8, %cst_3 [1] : vector<1x27x64xf32> to vector<1x64xf32>
    %10 = vector.shape_cast %9 : vector<1x64xf32> to vector<1x1x64xf32>
    %cst_4 = arith.constant 2.700000e+01 : f32
    %11 = vector.broadcast %cst_4 : f32 to vector<1x1x64xf32>
    %12 = arith.divf %10, %11 : vector<1x1x64xf32>
    %cst_5 = arith.constant 9.99999974E-6 : f32
    %13 = vector.broadcast %cst_5 : f32 to vector<1x1x64xf32>
    %14 = arith.addf %12, %13 : vector<1x1x64xf32>
    %15 = math.rsqrt %14 : vector<1x1x64xf32>
    %16 = vector.broadcast %15 : vector<1x1x64xf32> to vector<1x27x64xf32>
    %17 = arith.mulf %7, %16 : vector<1x27x64xf32>
    %cst_6 = arith.constant 0.000000e+00 : f32
    %18 = vector.broadcast %cst_6 : f32 to vector<1x27x64xf32>
    %19 = arith.cmpf oge, %17, %18 : vector<1x27x64xf32>
    %cst_7 = arith.constant 2.000000e-01 : f32
    %20 = vector.broadcast %cst_7 : f32 to vector<1x27x64xf32>
    %21 = arith.mulf %20, %17 : vector<1x27x64xf32>
    %22 = arith.select %19, %17, %21 : vector<1x27x64xi1>, vector<1x27x64xf32>
    %23 = arith.truncf %22 : vector<1x27x64xf32> to vector<1x27x64xbf16>
    %c0_8 = arith.constant 0 : index
    %c0_9 = arith.constant 0 : index
    %c0_10 = arith.constant 0 : index
    %24 = vector.load %arg3[%c0_8, %c0_9, %c0_10] : memref<1x27x64xbf16, #tpu.memory_space<vmem>>, vector<1x27x64xbf16>
    tpu.vector_store %arg3[%c0_8, %c0_9, %c0_10], %23 {strides = array<i32>} : memref<1x27x64xbf16, #tpu.memory_space<vmem>>, vector<1x27x64xbf16>,
    return
  }
  func.func @transform_0(%arg0: i32, %arg1: i32) -> (i32, i32, i32) {
    %c0_i32 = arith.constant 0 : i32
    %c0_i32_0 = arith.constant 0 : i32
    return %arg0, %c0_i32, %arg1 : i32, i32, i32
  }
  func.func @transform_1(%arg0: i32, %arg1: i32) -> (i32, i32, i32) {
    %c0_i32 = arith.constant 0 : i32
    %c0_i32_0 = arith.constant 0 : i32
    return %arg0, %c0_i32, %arg1 : i32, i32, i32
  }
}

module attributes {stable_mosaic.version = 11 : i64} {
  func.func @_matmul_bias_act_kernel(%arg0: i32, %arg1: i32, %arg2: i32, %arg3: memref<16x1024xbf16, #tpu.memory_space<vmem>>, %arg4: memref<1024x128xbf16, #tpu.memory_space<vmem>>, %arg5: memref<1x128xf32, #tpu.memory_space<vmem>>, %arg6: memref<16x128xbf16, #tpu.memory_space<vmem>>, %arg7: memref<16x128xf32, #tpu.memory_space<vmem>>) attributes {dimension_semantics = [#tpu.dimension_semantics<parallel>, #tpu.dimension_semantics<parallel>, #tpu.dimension_semantics<arbitrary>], iteration_bounds = array<i64: 1, 1, 4>, scalar_prefetch = 0 : i64, scratch_operands = 1 : i64, tpu.core_type = #tpu.core_type<tc>, window_params = [{transform_indices = @transform_0, window_bounds = array<i64: 16, 1024>}, {transform_indices = @transform_1, window_bounds = array<i64: 1024, 128>}, {transform_indices = @transform_2, window_bounds = array<i64: 1, 128>}, {transform_indices = @transform_3, window_bounds = array<i64: 16, 128>}]} {
    %c0_i32 = arith.constant 0 : i32
    %0 = arith.cmpi eq, %arg2, %c0_i32 : i32
    %1 = arith.extui %0 : i1 to i32
    %c0_i32_0 = arith.constant 0 : i32
    %2 = arith.cmpi ne, %1, %c0_i32_0 : i32
    scf.if %2 {
      %cst_9 = arith.constant 0.000000e+00 : f32
      %12 = vector.broadcast %cst_9 : f32 to vector<16x128xf32>
      %c0_10 = arith.constant 0 : index
      %c0_11 = arith.constant 0 : index
      %13 = vector.load %arg7[%c0_10, %c0_11] : memref<16x128xf32, #tpu.memory_space<vmem>>, vector<16x128xf32>
      tpu.vector_store %arg7[%c0_10, %c0_11], %12 {strides = array<i32>} : memref<16x128xf32, #tpu.memory_space<vmem>>, vector<16x128xf32>,
    } else {
    }
    %c0 = arith.constant 0 : index
    %c0_1 = arith.constant 0 : index
    %3 = vector.load %arg7[%c0, %c0_1] : memref<16x128xf32, #tpu.memory_space<vmem>>, vector<16x128xf32>
    %c0_2 = arith.constant 0 : index
    %c0_3 = arith.constant 0 : index
    %4 = vector.load %arg3[%c0_2, %c0_3] : memref<16x1024xbf16, #tpu.memory_space<vmem>>, vector<16x1024xbf16>
    %c0_4 = arith.constant 0 : index
    %c0_5 = arith.constant 0 : index
    %5 = vector.load %arg4[%c0_4, %c0_5] : memref<1024x128xbf16, #tpu.memory_space<vmem>>, vector<1024x128xbf16>
    %cst = arith.constant dense<0.000000e+00> : vector<16x128xf32>
    %6 = tpu.matmul %4, %5, %cst {dimension_numbers = #tpu.dot_dimension_numbers<[1], [0], [0], [1], [0, 0, 1, 1], [], []>} : vector<16x1024xbf16>, vector<1024x128xbf16>, vector<16x128xf32> -> vector<16x128xf32>
    %7 = arith.addf %3, %6 : vector<16x128xf32>
    %c0_6 = arith.constant 0 : index
    %c0_7 = arith.constant 0 : index
    %8 = vector.load %arg7[%c0_6, %c0_7] : memref<16x128xf32, #tpu.memory_space<vmem>>, vector<16x128xf32>
    tpu.vector_store %arg7[%c0_6, %c0_7], %7 {strides = array<i32>} : memref<16x128xf32, #tpu.memory_space<vmem>>, vector<16x128xf32>,
    %c3_i32 = arith.constant 3 : i32
    %9 = arith.cmpi eq, %arg2, %c3_i32 : i32
    %10 = arith.extui %9 : i1 to i32
    %c0_i32_8 = arith.constant 0 : i32
    %11 = arith.cmpi ne, %10, %c0_i32_8 : i32
    scf.if %11 {
      %c0_9 = arith.constant 0 : index
      %c0_10 = arith.constant 0 : index
      %12 = vector.load %arg7[%c0_9, %c0_10] : memref<16x128xf32, #tpu.memory_space<vmem>>, vector<16x128xf32>
      %c0_11 = arith.constant 0 : index
      %c0_12 = arith.constant 0 : index
      %13 = vector.load %arg5[%c0_11, %c0_12] : memref<1x128xf32, #tpu.memory_space<vmem>>, vector<1x128xf32>
      %14 = vector.broadcast %13 : vector<1x128xf32> to vector<16x128xf32>
      %15 = arith.addf %12, %14 : vector<16x128xf32>
      %16 = arith.truncf %15 : vector<16x128xf32> to vector<16x128xbf16>
      %c0_13 = arith.constant 0 : index
      %c0_14 = arith.constant 0 : index
      %17 = vector.load %arg6[%c0_13, %c0_14] : memref<16x128xbf16, #tpu.memory_space<vmem>>, vector<16x128xbf16>
      tpu.vector_store %arg6[%c0_13, %c0_14], %16 {strides = array<i32>} : memref<16x128xbf16, #tpu.memory_space<vmem>>, vector<16x128xbf16>,
    } else {
    }
    return
  }
  func.func @transform_0(%arg0: i32, %arg1: i32, %arg2: i32) -> (i32, i32) {
    %c0_i32 = arith.constant 0 : i32
    return %arg0, %arg2 : i32, i32
  }
  func.func @transform_1(%arg0: i32, %arg1: i32, %arg2: i32) -> (i32, i32) {
    %c0_i32 = arith.constant 0 : i32
    return %arg2, %arg1 : i32, i32
  }
  func.func @transform_2(%arg0: i32, %arg1: i32, %arg2: i32) -> (i32, i32) {
    %c0_i32 = arith.constant 0 : i32
    %c0_i32_0 = arith.constant 0 : i32
    return %c0_i32, %arg1 : i32, i32
  }
  func.func @transform_3(%arg0: i32, %arg1: i32, %arg2: i32) -> (i32, i32) {
    %c0_i32 = arith.constant 0 : i32
    return %arg0, %arg1 : i32, i32
  }
}

</mosaic_0001>

<bundles_post_ra>
// kernel: _lambda_.8
= control target key start
LH: loop header
LB: loop body
LE: loop exit
PB: predicated region body
PF: predicated region fallthrough
CT: control target
= control target key end

     0   :  { %s2638_s12 = smov 0   ;;  %s2640_s13 = smov 0   ;;  %s2964_s0 = inlined_call_operand.vmem [shape: bf16[8192,256], index: 0, kind: input, shape index: {}]   ;;  %s2965_s1 = inlined_call_operand.vmem [shape: bf16[256,128], index: 1, kind: input, shape index: {}]   ;;  %s2966_s2 = inlined_call_operand.vmem [shape: f32[1,128], index: 2, kind: input, shape index: {}]   ;;  %s2967_s3 = inlined_call_operand.vmem [shape: bf16[8192,128], index: 3, kind: output, shape index: {}]  }
   0x1   :  { %s2642_s14 = smov 0  }
   0x2 LB: > { %s32_s15 = sadd.s32 1, %s2612_s13  ;;  %p1952_p0 = scmp.ge.s32.totalorder %s2616_s14, 1  ;;  %s2616_s14 = sphi %s2642_s14, %s13_s14   ;;  %s2612_s13 = sphi %s2640_s13, %s2969_s13   ;;  %s2608_s12 = sphi %s2638_s12, %s2968_s12  }
   0x3   : > { %p34_p1 = scmp.ge.s32.totalorder %s32_s15, 16  ;;  %p191_p2 = scmp.lt.s32.totalorder %s2616_s14, 17 }
   0x5   : > { %s2971_s15 = smov (%p34_p1, %s32_s15), 0  ;;  %p192_p3 = pnand %p1952_p0, %p191_p2 }
   0x6   : > { %s1953_s28 = sshll.u32 (!%p192_p3), %s2608_s12, 6 }
   0x7   : > { %195 = sbr.rel (%p192_p3) target bundleno = 435 (0x1b3), region = 32  ;;  %p236_p4 = scmp.lt.s32.totalorder (!%p192_p3), %s1953_s28, 1023 }
   0xc   : > { %v2352_v0 = vld [vmem:[%s2965_s1 + $0x38] sm:$0xff]  ;;  %v2351_v2 = vld [vmem:[%s2965_s1 + $0x30] sm:$0xff]  ;;  %v2350_v4 = vld [vmem:[%s2965_s1 + $0x28] sm:$0xff]  ;;  %s2973_s28 = smov (!%p236_p4, %s1953_s28), 1023 }
   0xd   : > { %v2360_v1 = vld [vmem:[%s2965_s1 + $0x78] sm:$0xff]  ;;  %911 = vmatpush.bf16.msra.mxu0 %v2352_v0  ;;  %2552 = vmatpush.bf16.msra.mxu2 %v2352_v0  ;;  %v2359_v3 = vld [vmem:[%s2965_s1 + $0x70] sm:$0xff]  ;;  %v2358_v5 = vld [vmem:[%s2965_s1 + $0x68] sm:$0xff]  ;;  %s2280_s17 = sshll.u32 %s2973_s28, 3  ;;  %s1957_s5 = sshll.u32 %s2973_s28, 2 }
   0xe   : > { %1080 = vmatpush.bf16.msra.mxu1 %v2360_v1  ;;  %2560 = vmatpush.bf16.msra.mxu3 %v2360_v1  ;;  %v2349_v6 = vld [vmem:[%s2965_s1 + $0x20] sm:$0xff]  ;;  %v2348_v8 = vld [vmem:[%s2965_s1 + $0x18] sm:$0xff]  ;;  %v2347_v10 = vld [vmem:[%s2965_s1 + $0x10] sm:$0xff]  ;;  %s2704_s22 = scalar_lea.vmem %s2964_s0, %s2280_s17  ;;  %s2807_s8 = scalar_lea.vmem %s2967_s3, %s1957_s5 }
   0xf   : > { %v2357_v7 = vld [vmem:[%s2965_s1 + $0x60] sm:$0xff]  ;;  %v2356_v9 = vld [vmem:[%s2965_s1 + $0x58] sm:$0xff]  ;;  %v2355_v11 = vld [vmem:[%s2965_s1 + $0x50] sm:$0xff] }
  0x10   : > { %v2346_v12 = vld [vmem:[%s2965_s1 + $0x8] sm:$0xff]  ;;  %v2345_v14 = vld [vmem:[%s2965_s1] sm:$0xff]  ;;  %v1968_v28 = vld [vmem:[%s2704_s22 + $0x10] sm:$0xf] }
  0x11   : > { %912 = vmatpush.bf16.msra.mxu0 %v2351_v2  ;;  %2553 = vmatpush.bf16.msra.mxu2 %v2351_v2  ;;  %v2354_v13 = vld [vmem:[%s2965_s1 + $0x48] sm:$0xff]  ;;  %v2353_v15 = vld [vmem:[%s2965_s1 + $0x40] sm:$0xff]  ;;  %v2284_v29 = vld [vmem:[%s2704_s22 + $0x14] sm:$0xf0] }
  0x12   : > { %1081 = vmatpush.bf16.msra.mxu1 %v2359_v3  ;;  %2561 = vmatpush.bf16.msra.mxu3 %v2359_v3  ;;  %v1960_v16 = vld [vmem:[%s2704_s22] sm:$0xf]  ;;  %v2282_v17 = vld [vmem:[%s2704_s22 + $0x4] sm:$0xf0]  ;;  %v2281_v20 = vld [vmem:[%s2704_s22 + $0x4] sm:$0xf]  ;;  %v1969_v36 = vor.u32 %v2284_v29, %v1968_v28 }
  0x13   : > { %v2088_v18 = vld [vmem:[%s2704_s22 + $0x100] sm:$0xf]  ;;  %v2314_v19 = vld [vmem:[%s2704_s22 + $0x104] sm:$0xf0]  ;;  %v1962_v21 = vld [vmem:[%s2704_s22 + $0x8] sm:$0xf0]  ;;  %v1961_v24 = vor.u32 %v2282_v17, %v1960_v16 }
  0x14   : > { %v2313_v22 = vld [vmem:[%s2704_s22 + $0x104] sm:$0xf]  ;;  %v2090_v23 = vld [vmem:[%s2704_s22 + $0x108] sm:$0xf0]  ;;  %v2089_v25 = vor.u32 %v2314_v19, %v2088_v18  ;;  %v1965_v26 = vor.u32 %v2281_v20, %v1962_v21  ;;  %v2096_v30 = vld [vmem:[%s2704_s22 + $0x110] sm:$0xf] }
  0x15   : > { %913 = vmatpush.bf16.msra.mxu0 %v2350_v4  ;;  %2554 = vmatpush.bf16.msra.mxu2 %v2350_v4  ;;  %v2093_v27 = vor.u32 %v2313_v22, %v2090_v23  ;;  %v2316_v31 = vld [vmem:[%s2704_s22 + $0x114] sm:$0xf0]  ;;  %v2283_v32 = vld [vmem:[%s2704_s22 + $0x14] sm:$0xf]  ;;  %v1970_v33 = vld [vmem:[%s2704_s22 + $0x18] sm:$0xf0] }
  0x16   : > { %1082 = vmatpush.bf16.msra.mxu1 %v2358_v5  ;;  %2562 = vmatpush.bf16.msra.mxu3 %v2358_v5  ;;  %v2315_v34 = vld [vmem:[%s2704_s22 + $0x114] sm:$0xf]  ;;  %v2098_v35 = vld [vmem:[%s2704_s22 + $0x118] sm:$0xf0]  ;;  %v2097_v37 = vor.u32 %v2316_v31, %v2096_v30  ;;  %v1973_v38 = vor.u32 %v2283_v32, %v1970_v33  ;;  %v1976_v40 = vld [vmem:[%s2704_s22 + $0x20] sm:$0xf] }
  0x17   : > { %v2101_v39 = vor.u32 %v2315_v34, %v2098_v35  ;;  %v2286_v41 = vld [vmem:[%s2704_s22 + $0x24] sm:$0xf0]  ;;  %v2104_v42 = vld [vmem:[%s2704_s22 + $0x120] sm:$0xf]  ;;  %v2285_v44 = vld [vmem:[%s2704_s22 + $0x24] sm:$0xf] }
  0x18   : > { %v2318_v43 = vld [vmem:[%s2704_s22 + $0x124] sm:$0xf0]  ;;  %v1978_v45 = vld [vmem:[%s2704_s22 + $0x28] sm:$0xf0]  ;;  %v2317_v46 = vld [vmem:[%s2704_s22 + $0x124] sm:$0xf]  ;;  %v1977_v48 = vor.u32 %v2286_v41, %v1976_v40 }
  0x19   : > { %914 = vmatpush.bf16.msra.mxu0 %v2349_v6  ;;  %2555 = vmatpush.bf16.msra.mxu2 %v2349_v6  ;;  %v2106_v47 = vld [vmem:[%s2704_s22 + $0x128] sm:$0xf0]  ;;  %v2105_v49 = vor.u32 %v2318_v43, %v2104_v42  ;;  %v1981_v50 = vor.u32 %v2285_v44, %v1978_v45  ;;  %v1984_v52 = vld [vmem:[%s2704_s22 + $0x30] sm:$0xf]  ;;  %v2288_v53 = vld [vmem:[%s2704_s22 + $0x34] sm:$0xf0] }
  0x1a   : > { %1083 = vmatpush.bf16.msra.mxu1 %v2357_v7  ;;  %2563 = vmatpush.bf16.msra.mxu3 %v2357_v7  ;;  %v2109_v51 = vor.u32 %v2317_v46, %v2106_v47  ;;  %v2112_v54 = vld [vmem:[%s2704_s22 + $0x130] sm:$0xf]  ;;  %v2320_v55 = vld [vmem:[%s2704_s22 + $0x134] sm:$0xf0]  ;;  %v2287_v56 = vld [vmem:[%s2704_s22 + $0x34] sm:$0xf]  ;;  %v1985_v60 = vor.u32 %v2288_v53, %v1984_v52 }
  0x1b   : > { %v1986_v57 = vld [vmem:[%s2704_s22 + $0x38] sm:$0xf0]  ;;  %v2319_v58 = vld [vmem:[%s2704_s22 + $0x134] sm:$0xf]  ;;  %v2113_v61 = vor.u32 %v2320_v55, %v2112_v54  ;;  %v1992_v0 = vld [vmem:[%s2704_s22 + $0x40] sm:$0xf] }
  0x1c   : > { %v2114_v59 = vld [vmem:[%s2704_s22 + $0x138] sm:$0xf0]  ;;  %v1989_v62 = vor.u32 %v2287_v56, %v1986_v57  ;;  %v2290_v1 = vld [vmem:[%s2704_s22 + $0x44] sm:$0xf0]  ;;  %v2120_v2 = vld [vmem:[%s2704_s22 + $0x140] sm:$0xf] }
  0x1d   : > { %915 = vmatpush.bf16.msra.mxu0 %v2348_v8  ;;  %2556 = vmatpush.bf16.msra.mxu2 %v2348_v8  ;;  %v2117_v63 = vor.u32 %v2319_v58, %v2114_v59  ;;  %v2322_v3 = vld [vmem:[%s2704_s22 + $0x144] sm:$0xf0]  ;;  %v2289_v4 = vld [vmem:[%s2704_s22 + $0x44] sm:$0xf]  ;;  %v1994_v5 = vld [vmem:[%s2704_s22 + $0x48] sm:$0xf0]  ;;  %v1993_v8 = vor.u32 %v2290_v1, %v1992_v0 }
  0x1e   : > { %1084 = vmatpush.bf16.msra.mxu1 %v2356_v9  ;;  %2564 = vmatpush.bf16.msra.mxu3 %v2356_v9  ;;  %v2321_v6 = vld [vmem:[%s2704_s22 + $0x144] sm:$0xf]  ;;  %v2122_v7 = vld [vmem:[%s2704_s22 + $0x148] sm:$0xf0]  ;;  %v2121_v9 = vor.u32 %v2322_v3, %v2120_v2  ;;  %v2291_v16 = vld [vmem:[%s2704_s22 + $0x54] sm:$0xf] }
  0x1f   : > { %v2002_v17 = vld [vmem:[%s2704_s22 + $0x58] sm:$0xf0]  ;;  %v2323_v18 = vld [vmem:[%s2704_s22 + $0x154] sm:$0xf]  ;;  %v2293_v28 = vld [vmem:[%s2704_s22 + $0x64] sm:$0xf] }
  0x20   : > { %v2130_v19 = vld [vmem:[%s2704_s22 + $0x158] sm:$0xf0]  ;;  %v2005_v22 = vor.u32 %v2291_v16, %v2002_v17  ;;  %v2010_v29 = vld [vmem:[%s2704_s22 + $0x68] sm:$0xf0]  ;;  %v2325_v30 = vld [vmem:[%s2704_s22 + $0x164] sm:$0xf] }
  0x21   : > { %916 = vmatpush.bf16.msra.mxu0 %v2347_v10  ;;  %2557 = vmatpush.bf16.msra.mxu2 %v2347_v10  ;;  %v1997_v10 = vor.u32 %v2289_v4, %v1994_v5  ;;  %v2133_v23 = vor.u32 %v2323_v18, %v2130_v19  ;;  %v2138_v31 = vld [vmem:[%s2704_s22 + $0x168] sm:$0xf0]  ;;  %v2013_v34 = vor.u32 %v2293_v28, %v2010_v29  ;;  %v2295_v40 = vld [vmem:[%s2704_s22 + $0x74] sm:$0xf]  ;;  %v2018_v41 = vld [vmem:[%s2704_s22 + $0x78] sm:$0xf0] }
  0x22   : > { %1085 = vmatpush.bf16.msra.mxu1 %v2355_v11  ;;  %2565 = vmatpush.bf16.msra.mxu3 %v2355_v11  ;;  %v2125_v11 = vor.u32 %v2321_v6, %v2122_v7  ;;  %v2141_v35 = vor.u32 %v2325_v30, %v2138_v31  ;;  %v2327_v42 = vld [vmem:[%s2704_s22 + $0x174] sm:$0xf]  ;;  %v2146_v43 = vld [vmem:[%s2704_s22 + $0x178] sm:$0xf0]  ;;  %v2021_v46 = vor.u32 %v2295_v40, %v2018_v41  ;;  %v2297_v52 = vld [vmem:[%s2704_s22 + $0x84] sm:$0xf] }
  0x23   : > { %v2149_v47 = vor.u32 %v2327_v42, %v2146_v43  ;;  %v2026_v53 = vld [vmem:[%s2704_s22 + $0x88] sm:$0xf0]  ;;  %v2329_v54 = vld [vmem:[%s2704_s22 + $0x184] sm:$0xf]  ;;  %v2032_v7 = vld [vmem:[%s2704_s22 + $0x90] sm:$0xf] }
  0x24   : > { %v2154_v55 = vld [vmem:[%s2704_s22 + $0x188] sm:$0xf0]  ;;  %v2029_v59 = vor.u32 %v2297_v52, %v2026_v53  ;;  %v2162_v16 = vld [vmem:[%s2704_s22 + $0x198] sm:$0xf0]  ;;  %v2333_v53 = vld [vmem:[%s2704_s22 + $0x1a4] sm:$0xf] }
  0x25   : > { %917 = vmatpush.bf16.msra.mxu0 %v2346_v12  ;;  %2558 = vmatpush.bf16.msra.mxu2 %v2346_v12  ;;  %v2000_v12 = vld [vmem:[%s2704_s22 + $0x50] sm:$0xf]  ;;  %v2042_v52 = vld [vmem:[%s2704_s22 + $0xa8] sm:$0xf0] }
  0x26   : > { %1086 = vmatpush.bf16.msra.mxu1 %v2354_v13  ;;  %2566 = vmatpush.bf16.msra.mxu3 %v2354_v13  ;;  %v2292_v13 = vld [vmem:[%s2704_s22 + $0x54] sm:$0xf0] }
  0x27   : > { %v2001_v20 = vor.u32 %v2292_v13, %v2000_v12  ;;  %v2299_v13 = vld [vmem:[%s2704_s22 + $0x94] sm:$0xf] }
  0x29   : > { %918 = vmatpush.bf16.msra.mxu0 %v2345_v14  ;;  %2559 = vmatpush.bf16.msra.mxu2 %v2345_v14  ;;  %v2128_v14 = vld [vmem:[%s2704_s22 + $0x150] sm:$0xf] }
  0x2a   : > { %1087 = vmatpush.bf16.msra.mxu1 %v2353_v15  ;;  %2567 = vmatpush.bf16.msra.mxu3 %v2353_v15  ;;  %v2324_v15 = vld [vmem:[%s2704_s22 + $0x154] sm:$0xf0] }
  0x2b   : > { %v2129_v21 = vor.u32 %v2324_v15, %v2128_v14  ;;  %v2034_v14 = vld [vmem:[%s2704_s22 + $0x98] sm:$0xf0]  ;;  %v2331_v15 = vld [vmem:[%s2704_s22 + $0x194] sm:$0xf] }
  0x2c   : > { %919 = vmatmul.bf16.vlgmr.msra.gmra.mxu0 %v1961_v24  ;;  %999 = vmatmul.bf16.vlgmr.msra.gmra.mxu2 %v2089_v25  ;;  %v2008_v24 = vld [vmem:[%s2704_s22 + $0x60] sm:$0xf]  ;;  %v2294_v25 = vld [vmem:[%s2704_s22 + $0x64] sm:$0xf0]  ;;  %v2165_v28 = vor.u32 %v2331_v15, %v2162_v16 }
  0x2d   : > { %1088 = vmatmul.bf16.vlgmr.msra.gmra.mxu1 %v1965_v26  ;;  %1168 = vmatmul.bf16.vlgmr.msra.gmra.mxu3 %v2093_v27  ;;  %v2136_v26 = vld [vmem:[%s2704_s22 + $0x160] sm:$0xf]  ;;  %v2326_v27 = vld [vmem:[%s2704_s22 + $0x164] sm:$0xf0]  ;;  %v2009_v32 = vor.u32 %v2294_v25, %v2008_v24 }
  0x2e   : > { %v2137_v33 = vor.u32 %v2326_v27, %v2136_v26 }
  0x3c   : > { %924 = vmatmul.bf16.gmra.mxu0 %v1969_v36  ;;  %1004 = vmatmul.bf16.gmra.mxu2 %v2097_v37  ;;  %v2016_v36 = vld [vmem:[%s2704_s22 + $0x70] sm:$0xf]  ;;  %v2296_v37 = vld [vmem:[%s2704_s22 + $0x74] sm:$0xf0] }
  0x3d   : > { %1093 = vmatmul.bf16.gmra.mxu1 %v1973_v38  ;;  %1173 = vmatmul.bf16.gmra.mxu3 %v2101_v39  ;;  %v2144_v38 = vld [vmem:[%s2704_s22 + $0x170] sm:$0xf]  ;;  %v2328_v39 = vld [vmem:[%s2704_s22 + $0x174] sm:$0xf0]  ;;  %v2017_v44 = vor.u32 %v2296_v37, %v2016_v36 }
  0x3e   : > { %v2145_v45 = vor.u32 %v2328_v39, %v2144_v38 }
  0x4c   : > { %929 = vmatmul.bf16.gmra.mxu0 %v1977_v48  ;;  %1009 = vmatmul.bf16.gmra.mxu2 %v2105_v49  ;;  %v2024_v48 = vld [vmem:[%s2704_s22 + $0x80] sm:$0xf]  ;;  %v2298_v49 = vld [vmem:[%s2704_s22 + $0x84] sm:$0xf0] }
  0x4d   : > { %1098 = vmatmul.bf16.gmra.mxu1 %v1981_v50  ;;  %1178 = vmatmul.bf16.gmra.mxu3 %v2109_v51  ;;  %v2152_v50 = vld [vmem:[%s2704_s22 + $0x180] sm:$0xf]  ;;  %v2330_v51 = vld [vmem:[%s2704_s22 + $0x184] sm:$0xf0]  ;;  %v2025_v56 = vor.u32 %v2298_v49, %v2024_v48 }
  0x4e   : > { %v2153_v57 = vor.u32 %v2330_v51, %v2152_v50  ;;  %v2334_v48 = vld [vmem:[%s2704_s22 + $0x1a4] sm:$0xf0]  ;;  %v2301_v51 = vld [vmem:[%s2704_s22 + $0xa4] sm:$0xf] }
  0x5c   : > { %934 = vmatmul.bf16.gmra.mxu0 %v1985_v60  ;;  %1014 = vmatmul.bf16.gmra.mxu2 %v2113_v61  ;;  %v2157_v60 = vor.u32 %v2329_v54, %v2154_v55  ;;  %v2170_v54 = vld [vmem:[%s2704_s22 + $0x1a8] sm:$0xf0] }
  0x5d   : > { %1103 = vmatmul.bf16.gmra.mxu1 %v1989_v62  ;;  %1183 = vmatmul.bf16.gmra.mxu3 %v2117_v63  ;;  %v2790_v63 = vld [vmem:[%s2966_s2] ss:$0 sm:$0xff] }
  0x6c   : > { %939 = vmatmul.bf16.gmra.mxu0 %v1993_v8  ;;  %1019 = vmatmul.bf16.gmra.mxu2 %v2121_v9  ;;  %v2300_v8 = vld [vmem:[%s2704_s22 + $0x94] sm:$0xf0]  ;;  %v2160_v9 = vld [vmem:[%s2704_s22 + $0x190] sm:$0xf] }
  0x6d   : > { %1108 = vmatmul.bf16.gmra.mxu1 %v1997_v10  ;;  %1188 = vmatmul.bf16.gmra.mxu3 %v2125_v11  ;;  %v2332_v10 = vld [vmem:[%s2704_s22 + $0x194] sm:$0xf0] }
  0x7c   : > { %944 = vmatmul.bf16.gmra.mxu0 %v2001_v20  ;;  %1024 = vmatmul.bf16.gmra.mxu2 %v2129_v21  ;;  %v2033_v21 = vor.u32 %v2300_v8, %v2032_v7 }
  0x7d   : > { %1113 = vmatmul.bf16.gmra.mxu1 %v2005_v22  ;;  %1193 = vmatmul.bf16.gmra.mxu3 %v2133_v23  ;;  %v2161_v22 = vor.u32 %v2332_v10, %v2160_v9  ;;  %v2037_v23 = vor.u32 %v2299_v13, %v2034_v14 }
  0x8c   : > { %949 = vmatmul.bf16.gmra.mxu0 %v2009_v32  ;;  %1029 = vmatmul.bf16.gmra.mxu2 %v2137_v33 }
  0x8d   : > { %1118 = vmatmul.bf16.gmra.mxu1 %v2013_v34  ;;  %1198 = vmatmul.bf16.gmra.mxu3 %v2141_v35 }
  0x9c   : > { %954 = vmatmul.bf16.gmra.mxu0 %v2017_v44  ;;  %1034 = vmatmul.bf16.gmra.mxu2 %v2145_v45  ;;  %v2040_v45 = vld [vmem:[%s2704_s22 + $0xa0] sm:$0xf] }
  0x9d   : > { %1123 = vmatmul.bf16.gmra.mxu1 %v2021_v46  ;;  %1203 = vmatmul.bf16.gmra.mxu3 %v2149_v47  ;;  %v2302_v46 = vld [vmem:[%s2704_s22 + $0xa4] sm:$0xf0]  ;;  %v2168_v47 = vld [vmem:[%s2704_s22 + $0x1a0] sm:$0xf] }
  0xa9   : > { %v920_v58 = vpop.f32.mrf.mxu0 }
  0xaa   : > { %v1089_v61 = vpop.f32.mrf.mxu1 }
  0xab   : > { %v1090_v62 = vadd.f32 %v1089_v61, %v920_v58  ;;  %v2045_v61 = vor.u32 %v2301_v51, %v2042_v52 }
  0xac   : > { %959 = vmatmul.bf16.gmra.mxu0 %v2025_v56  ;;  %1039 = vmatmul.bf16.gmra.mxu2 %v2153_v57 }
  0xad   : > { %1128 = vmatmul.bf16.gmra.mxu1 %v2029_v59  ;;  %1208 = vmatmul.bf16.gmra.mxu3 %v2157_v60  ;;  %v1448_v2 = vadd.f32 %v2790_v63, %v1090_v62  ;;  %v2041_v59 = vor.u32 %v2302_v46, %v2040_v45  ;;  %v2169_v60 = vor.u32 %v2334_v48, %v2168_v47 }
  0xaf   : > { %v1000_v0 = vpop.f32.mrf.mxu2  ;;  %v1576_v11 = vmul.f32 0.2, %v1448_v2  ;;  %vm1512_vm0 = vcmp.ge.f32.partialorder %v1448_v2, 0.0 }
  0xb0   : > { %v1169_v1 = vpop.f32.mrf.mxu3 }
  0xb1   : > { %v922_v3 = vpop.f32.mrf.mxu0  ;;  %v1170_v5 = vadd.f32 %v1169_v1, %v1000_v0  ;;  %v1640_v24 = vsel %vm1512_vm0, %v1448_v2, %v1576_v11 }
  0xb2   : > { %v1091_v4 = vpop.f32.mrf.mxu1 }
  0xb3   : > { %v1092_v6 = vadd.f32 %v1091_v4, %v922_v3  ;;  %v1480_v17 = vadd.f32 %v2790_v63, %v1170_v5  ;;  %v2173_v3 = vor.u32 %v2333_v53, %v2170_v54 }
  0xb5   : > { %v1449_v12 = vadd.f32 %v2790_v63, %v1092_v6  ;;  %v1608_v31 = vmul.f32 0.2, %v1480_v17  ;;  %vm1544_vm2 = vcmp.ge.f32.partialorder %v1480_v17, 0.0 }
  0xb7   : > { %vm1513_vm1 = vcmp.ge.f32.partialorder %v1449_v12, 0.0  ;;  %v1577_v18 = vmul.f32 0.2, %v1449_v12  ;;  %v1002_v19 = vpop.f32.mrf.mxu2  ;;  %v1672_v35 = vsel %vm1544_vm2, %v1480_v17, %v1608_v31 }
  0xb8   : > { %v1171_v20 = vpop.f32.mrf.mxu3 }
  0xb9   : > { %v1641_v25 = vsel %vm1513_vm1, %v1449_v12, %v1577_v18  ;;  %v1172_v26 = vadd.f32 %v1171_v20, %v1002_v19  ;;  %v925_v27 = vpop.f32.mrf.mxu0  ;;  %v2048_v20 = vld [vmem:[%s2704_s22 + $0xb0] sm:$0xf] }
  0xba   : > { %v2364_v29 = vpack.c.bf16 %v1641_v25, %v1640_v24  ;;  %v1094_v30 = vpop.f32.mrf.mxu1 }
  0xbb   : > { %v1481_v32 = vadd.f32 %v2790_v63, %v1172_v26  ;;  %v1095_v34 = vadd.f32 %v1094_v30, %v925_v27  ;;  %v2303_v26 = vld [vmem:[%s2704_s22 + $0xb4] sm:$0xf]  ;;  %v2050_v27 = vld [vmem:[%s2704_s22 + $0xb8] sm:$0xf0] }
  0xbc   : > { %2365 = vst [vmem:[%s2807_s8] sm:$0xff] %v2364_v29   ;;  %964 = vmatmul.bf16.gmra.mxu0 %v2033_v21  ;;  %1044 = vmatmul.bf16.gmra.mxu2 %v2161_v22  ;;  %v2304_v21 = vld [vmem:[%s2704_s22 + $0xb4] sm:$0xf0]  ;;  %v2176_v22 = vld [vmem:[%s2704_s22 + $0x1b0] sm:$0xf]  ;;  %v2178_v29 = vld [vmem:[%s2704_s22 + $0x1b8] sm:$0xf0] }
  0xbd   : > { %vm1545_vm3 = vcmp.ge.f32.partialorder %v1481_v32, 0.0  ;;  %v1609_v33 = vmul.f32 0.2, %v1481_v32  ;;  %1133 = vmatmul.bf16.gmra.mxu1 %v2037_v23  ;;  %1213 = vmatmul.bf16.gmra.mxu3 %v2165_v28  ;;  %v1450_v40 = vadd.f32 %v2790_v63, %v1095_v34  ;;  %v2336_v23 = vld [vmem:[%s2704_s22 + $0x1b4] sm:$0xf0]  ;;  %v2049_v34 = vor.u32 %v2304_v21, %v2048_v20 }
  0xbe   : > { %v2335_v28 = vld [vmem:[%s2704_s22 + $0x1b4] sm:$0xf] }
  0xbf   : > { %v1673_v36 = vsel %vm1545_vm3, %v1481_v32, %v1609_v33  ;;  %v1005_v37 = vpop.f32.mrf.mxu2  ;;  %v1578_v49 = vmul.f32 0.2, %v1450_v40  ;;  %vm1514_vm4 = vcmp.ge.f32.partialorder %v1450_v40, 0.0 }
  0xc0   : > { %v2444_v38 = vpack.c.bf16 %v1673_v36, %v1672_v35  ;;  %v1174_v39 = vpop.f32.mrf.mxu3  ;;  %v2177_v35 = vor.u32 %v2336_v23, %v2176_v22  ;;  %v2053_v36 = vor.u32 %v2303_v26, %v2050_v27 }
  0xc1   : > { %v927_v41 = vpop.f32.mrf.mxu0  ;;  %v1175_v43 = vadd.f32 %v1174_v39, %v1005_v37  ;;  %v1642_v62 = vsel %vm1514_vm4, %v1450_v40, %v1578_v49 }
  0xc2   : > { %2536 = vst [vmem:[%s2807_s8 + $0x80] sm:$0xff] %v2444_v38   ;;  %v1096_v42 = vpop.f32.mrf.mxu1 }
  0xc3   : > { %v1097_v44 = vadd.f32 %v1096_v42, %v927_v41  ;;  %v1482_v55 = vadd.f32 %v2790_v63, %v1175_v43  ;;  %v2181_v41 = vor.u32 %v2335_v28, %v2178_v29 }
  0xc5   : > { %v1451_v50 = vadd.f32 %v2790_v63, %v1097_v44  ;;  %v1610_v6 = vmul.f32 0.2, %v1482_v55  ;;  %vm1546_vm6 = vcmp.ge.f32.partialorder %v1482_v55, 0.0 }
  0xc7   : > { %vm1515_vm5 = vcmp.ge.f32.partialorder %v1451_v50, 0.0  ;;  %v1579_v56 = vmul.f32 0.2, %v1451_v50  ;;  %v1007_v57 = vpop.f32.mrf.mxu2  ;;  %v1674_v10 = vsel %vm1546_vm6, %v1482_v55, %v1610_v6 }
  0xc8   : > { %v1176_v58 = vpop.f32.mrf.mxu3 }
  0xc9   : > { %v1643_v0 = vsel %vm1515_vm5, %v1451_v50, %v1579_v56  ;;  %v1177_v1 = vadd.f32 %v1176_v58, %v1007_v57  ;;  %v930_v2 = vpop.f32.mrf.mxu0  ;;  %v2056_v58 = vld [vmem:[%s2704_s22 + $0xc0] sm:$0xf] }
  0xca   : > { %v2369_v4 = vpack.c.bf16 %v1643_v0, %v1642_v62  ;;  %v1099_v5 = vpop.f32.mrf.mxu1 }
  0xcb   : > { %v1483_v7 = vadd.f32 %v2790_v63, %v1177_v1  ;;  %v1100_v9 = vadd.f32 %v1099_v5, %v930_v2  ;;  %v2305_v1 = vld [vmem:[%s2704_s22 + $0xc4] sm:$0xf]  ;;  %v2058_v2 = vld [vmem:[%s2704_s22 + $0xc8] sm:$0xf0] }
  0xcc   : > { %2521 = vst [vmem:[%s2807_s8 + $0x8] sm:$0xff] %v2369_v4   ;;  %969 = vmatmul.bf16.gmra.mxu0 %v2041_v59  ;;  %1049 = vmatmul.bf16.gmra.mxu2 %v2169_v60  ;;  %v2306_v59 = vld [vmem:[%s2704_s22 + $0xc4] sm:$0xf0]  ;;  %v2184_v60 = vld [vmem:[%s2704_s22 + $0x1c0] sm:$0xf] }
  0xcd   : > { %vm1547_vm7 = vcmp.ge.f32.partialorder %v1483_v7, 0.0  ;;  %v1611_v8 = vmul.f32 0.2, %v1483_v7  ;;  %1138 = vmatmul.bf16.gmra.mxu1 %v2045_v61  ;;  %1218 = vmatmul.bf16.gmra.mxu3 %v2173_v3  ;;  %v1452_v15 = vadd.f32 %v2790_v63, %v1100_v9  ;;  %v2338_v61 = vld [vmem:[%s2704_s22 + $0x1c4] sm:$0xf0]  ;;  %v2057_v9 = vor.u32 %v2306_v59, %v2056_v58 }
  0xce   : > { %v2337_v3 = vld [vmem:[%s2704_s22 + $0x1c4] sm:$0xf]  ;;  %v2186_v4 = vld [vmem:[%s2704_s22 + $0x1c8] sm:$0xf0] }
  0xcf   : > { %v1675_v11 = vsel %vm1547_vm7, %v1483_v7, %v1611_v8  ;;  %v1010_v12 = vpop.f32.mrf.mxu2  ;;  %v1580_v24 = vmul.f32 0.2, %v1452_v15  ;;  %vm1516_vm8 = vcmp.ge.f32.partialorder %v1452_v15, 0.0 }
  0xd0   : > { %v2449_v13 = vpack.c.bf16 %v1675_v11, %v1674_v10  ;;  %v1179_v14 = vpop.f32.mrf.mxu3  ;;  %v2185_v10 = vor.u32 %v2338_v61, %v2184_v60  ;;  %v2061_v11 = vor.u32 %v2305_v1, %v2058_v2 }
  0xd1   : > { %v932_v16 = vpop.f32.mrf.mxu0  ;;  %v1180_v18 = vadd.f32 %v1179_v14, %v1010_v12  ;;  %v1644_v37 = vsel %vm1516_vm8, %v1452_v15, %v1580_v24 }
  0xd2   : > { %2537 = vst [vmem:[%s2807_s8 + $0x88] sm:$0xff] %v2449_v13   ;;  %v1101_v17 = vpop.f32.mrf.mxu1 }
  0xd3   : > { %v1102_v19 = vadd.f32 %v1101_v17, %v932_v16  ;;  %v1484_v30 = vadd.f32 %v2790_v63, %v1180_v18  ;;  %v2189_v16 = vor.u32 %v2337_v3, %v2186_v4 }
  0xd5   : > { %v1453_v25 = vadd.f32 %v2790_v63, %v1102_v19  ;;  %v1612_v44 = vmul.f32 0.2, %v1484_v30  ;;  %vm1548_vm10 = vcmp.ge.f32.partialorder %v1484_v30, 0.0 }
  0xd7   : > { %vm1517_vm9 = vcmp.ge.f32.partialorder %v1453_v25, 0.0  ;;  %v1581_v31 = vmul.f32 0.2, %v1453_v25  ;;  %v1012_v32 = vpop.f32.mrf.mxu2  ;;  %v1676_v48 = vsel %vm1548_vm10, %v1484_v30, %v1612_v44 }
  0xd8   : > { %v1181_v33 = vpop.f32.mrf.mxu3 }
  0xd9   : > { %v1645_v38 = vsel %vm1517_vm9, %v1453_v25, %v1581_v31  ;;  %v1182_v39 = vadd.f32 %v1181_v33, %v1012_v32  ;;  %v935_v40 = vpop.f32.mrf.mxu0  ;;  %v2064_v33 = vld [vmem:[%s2704_s22 + $0xd0] sm:$0xf] }
  0xda   : > { %v2374_v42 = vpack.c.bf16 %v1645_v38, %v1644_v37  ;;  %v1104_v43 = vpop.f32.mrf.mxu1 }
  0xdb   : > { %v1485_v45 = vadd.f32 %v2790_v63, %v1182_v39  ;;  %v1105_v47 = vadd.f32 %v1104_v43, %v935_v40  ;;  %v2307_v39 = vld [vmem:[%s2704_s22 + $0xd4] sm:$0xf]  ;;  %v2066_v40 = vld [vmem:[%s2704_s22 + $0xd8] sm:$0xf0] }
  0xdc   : > { %2522 = vst [vmem:[%s2807_s8 + $0x10] sm:$0xff] %v2374_v42   ;;  %974 = vmatmul.bf16.gmra.mxu0 %v2049_v34  ;;  %1054 = vmatmul.bf16.gmra.mxu2 %v2177_v35  ;;  %v2308_v34 = vld [vmem:[%s2704_s22 + $0xd4] sm:$0xf0]  ;;  %v2192_v35 = vld [vmem:[%s2704_s22 + $0x1d0] sm:$0xf] }
  0xdd   : > { %vm1549_vm11 = vcmp.ge.f32.partialorder %v1485_v45, 0.0  ;;  %v1613_v46 = vmul.f32 0.2, %v1485_v45  ;;  %1143 = vmatmul.bf16.gmra.mxu1 %v2053_v36  ;;  %1223 = vmatmul.bf16.gmra.mxu3 %v2181_v41  ;;  %v1454_v53 = vadd.f32 %v2790_v63, %v1105_v47  ;;  %v2340_v36 = vld [vmem:[%s2704_s22 + $0x1d4] sm:$0xf0]  ;;  %v2065_v47 = vor.u32 %v2308_v34, %v2064_v33 }
  0xde   : > { %v2339_v41 = vld [vmem:[%s2704_s22 + $0x1d4] sm:$0xf]  ;;  %v2194_v42 = vld [vmem:[%s2704_s22 + $0x1d8] sm:$0xf0] }
  0xdf   : > { %v1677_v49 = vsel %vm1549_vm11, %v1485_v45, %v1613_v46  ;;  %v1015_v50 = vpop.f32.mrf.mxu2  ;;  %v1582_v62 = vmul.f32 0.2, %v1454_v53  ;;  %vm1518_vm12 = vcmp.ge.f32.partialorder %v1454_v53, 0.0 }
  0xe0   : > { %v2454_v51 = vpack.c.bf16 %v1677_v49, %v1676_v48  ;;  %v1184_v52 = vpop.f32.mrf.mxu3  ;;  %v2193_v48 = vor.u32 %v2340_v36, %v2192_v35  ;;  %v2069_v49 = vor.u32 %v2307_v39, %v2066_v40 }
  0xe1   : > { %v937_v54 = vpop.f32.mrf.mxu0  ;;  %v1185_v56 = vadd.f32 %v1184_v52, %v1015_v50  ;;  %v1646_v12 = vsel %vm1518_vm12, %v1454_v53, %v1582_v62 }
  0xe2   : > { %2538 = vst [vmem:[%s2807_s8 + $0x90] sm:$0xff] %v2454_v51   ;;  %v1106_v55 = vpop.f32.mrf.mxu1 }
  0xe3   : > { %v1107_v57 = vadd.f32 %v1106_v55, %v937_v54  ;;  %v1486_v5 = vadd.f32 %v2790_v63, %v1185_v56  ;;  %v2197_v54 = vor.u32 %v2339_v41, %v2194_v42 }
  0xe5   : > { %v1455_v0 = vadd.f32 %v2790_v63, %v1107_v57  ;;  %v1614_v19 = vmul.f32 0.2, %v1486_v5  ;;  %vm1550_vm14 = vcmp.ge.f32.partialorder %v1486_v5, 0.0 }
  0xe7   : > { %vm1519_vm13 = vcmp.ge.f32.partialorder %v1455_v0, 0.0  ;;  %v1583_v6 = vmul.f32 0.2, %v1455_v0  ;;  %v1017_v7 = vpop.f32.mrf.mxu2  ;;  %v1678_v23 = vsel %vm1550_vm14, %v1486_v5, %v1614_v19 }
  0xe8   : > { %v1186_v8 = vpop.f32.mrf.mxu3 }
  0xe9   : > { %v1647_v13 = vsel %vm1519_vm13, %v1455_v0, %v1583_v6  ;;  %v1187_v14 = vadd.f32 %v1186_v8, %v1017_v7  ;;  %v940_v15 = vpop.f32.mrf.mxu0  ;;  %v2072_v8 = vld [vmem:[%s2704_s22 + $0xe0] sm:$0xf] }
  0xea   : > { %v2379_v17 = vpack.c.bf16 %v1647_v13, %v1646_v12  ;;  %v1109_v18 = vpop.f32.mrf.mxu1 }
  0xeb   : > { %v1487_v20 = vadd.f32 %v2790_v63, %v1187_v14  ;;  %v1110_v22 = vadd.f32 %v1109_v18, %v940_v15  ;;  %v2309_v14 = vld [vmem:[%s2704_s22 + $0xe4] sm:$0xf]  ;;  %v2074_v15 = vld [vmem:[%s2704_s22 + $0xe8] sm:$0xf0] }
  0xec   : > { %2523 = vst [vmem:[%s2807_s8 + $0x18] sm:$0xff] %v2379_v17   ;;  %979 = vmatmul.bf16.gmra.mxu0 %v2057_v9  ;;  %1059 = vmatmul.bf16.gmra.mxu2 %v2185_v10  ;;  %v2310_v9 = vld [vmem:[%s2704_s22 + $0xe4] sm:$0xf0]  ;;  %v2200_v10 = vld [vmem:[%s2704_s22 + $0x1e0] sm:$0xf] }
  0xed   : > { %vm1551_vm15 = vcmp.ge.f32.partialorder %v1487_v20, 0.0  ;;  %v1615_v21 = vmul.f32 0.2, %v1487_v20  ;;  %1148 = vmatmul.bf16.gmra.mxu1 %v2061_v11  ;;  %1228 = vmatmul.bf16.gmra.mxu3 %v2189_v16  ;;  %v1456_v28 = vadd.f32 %v2790_v63, %v1110_v22  ;;  %v2342_v11 = vld [vmem:[%s2704_s22 + $0x1e4] sm:$0xf0]  ;;  %v2073_v22 = vor.u32 %v2310_v9, %v2072_v8 }
  0xee   : > { %v2341_v16 = vld [vmem:[%s2704_s22 + $0x1e4] sm:$0xf]  ;;  %v2202_v17 = vld [vmem:[%s2704_s22 + $0x1e8] sm:$0xf0] }
  0xef   : > { %v1679_v24 = vsel %vm1551_vm15, %v1487_v20, %v1615_v21  ;;  %v1020_v25 = vpop.f32.mrf.mxu2  ;;  %v1584_v37 = vmul.f32 0.2, %v1456_v28  ;;  %vm1520_vm0 = vcmp.ge.f32.partialorder %v1456_v28, 0.0 }
  0xf0   : > { %v2459_v26 = vpack.c.bf16 %v1679_v24, %v1678_v23  ;;  %v1189_v27 = vpop.f32.mrf.mxu3  ;;  %v2201_v23 = vor.u32 %v2342_v11, %v2200_v10  ;;  %v2077_v24 = vor.u32 %v2309_v14, %v2074_v15 }
  0xf1   : > { %v942_v29 = vpop.f32.mrf.mxu0  ;;  %v1190_v31 = vadd.f32 %v1189_v27, %v1020_v25  ;;  %v1648_v50 = vsel %vm1520_vm0, %v1456_v28, %v1584_v37 }
  0xf2   : > { %2539 = vst [vmem:[%s2807_s8 + $0x98] sm:$0xff] %v2459_v26   ;;  %v1111_v30 = vpop.f32.mrf.mxu1 }
  0xf3   : > { %v1112_v32 = vadd.f32 %v1111_v30, %v942_v29  ;;  %v1488_v43 = vadd.f32 %v2790_v63, %v1190_v31  ;;  %v2205_v29 = vor.u32 %v2341_v16, %v2202_v17 }
  0xf5   : > { %v1457_v38 = vadd.f32 %v2790_v63, %v1112_v32  ;;  %v1616_v57 = vmul.f32 0.2, %v1488_v43  ;;  %vm1552_vm2 = vcmp.ge.f32.partialorder %v1488_v43, 0.0 }
  0xf7   : > { %vm1521_vm1 = vcmp.ge.f32.partialorder %v1457_v38, 0.0  ;;  %v1585_v44 = vmul.f32 0.2, %v1457_v38  ;;  %v1022_v45 = vpop.f32.mrf.mxu2  ;;  %v1680_v61 = vsel %vm1552_vm2, %v1488_v43, %v1616_v57 }
  0xf8   : > { %v1191_v46 = vpop.f32.mrf.mxu3 }
  0xf9   : > { %v1649_v51 = vsel %vm1521_vm1, %v1457_v38, %v1585_v44  ;;  %v1192_v52 = vadd.f32 %v1191_v46, %v1022_v45  ;;  %v945_v53 = vpop.f32.mrf.mxu0  ;;  %v2080_v46 = vld [vmem:[%s2704_s22 + $0xf0] sm:$0xf] }
  0xfa   : > { %v2384_v55 = vpack.c.bf16 %v1649_v51, %v1648_v50  ;;  %v1114_v56 = vpop.f32.mrf.mxu1 }
  0xfb   : > { %v1489_v58 = vadd.f32 %v2790_v63, %v1192_v52  ;;  %v1115_v60 = vadd.f32 %v1114_v56, %v945_v53  ;;  %v2311_v52 = vld [vmem:[%s2704_s22 + $0xf4] sm:$0xf]  ;;  %v2082_v53 = vld [vmem:[%s2704_s22 + $0xf8] sm:$0xf0] }
  0xfc   : > { %2524 = vst [vmem:[%s2807_s8 + $0x20] sm:$0xff] %v2384_v55   ;;  %984 = vmatmul.bf16.gmra.mxu0 %v2065_v47  ;;  %1064 = vmatmul.bf16.gmra.mxu2 %v2193_v48  ;;  %v2312_v47 = vld [vmem:[%s2704_s22 + $0xf4] sm:$0xf0]  ;;  %v2208_v48 = vld [vmem:[%s2704_s22 + $0x1f0] sm:$0xf] }
  0xfd   : > { %vm1553_vm3 = vcmp.ge.f32.partialorder %v1489_v58, 0.0  ;;  %v1617_v59 = vmul.f32 0.2, %v1489_v58  ;;  %1153 = vmatmul.bf16.gmra.mxu1 %v2069_v49  ;;  %1233 = vmatmul.bf16.gmra.mxu3 %v2197_v54  ;;  %v1458_v3 = vadd.f32 %v2790_v63, %v1115_v60  ;;  %v2344_v49 = vld [vmem:[%s2704_s22 + $0x1f4] sm:$0xf0]  ;;  %v2081_v60 = vor.u32 %v2312_v47, %v2080_v46 }
  0xfe   : > { %v2343_v54 = vld [vmem:[%s2704_s22 + $0x1f4] sm:$0xf]  ;;  %v2210_v55 = vld [vmem:[%s2704_s22 + $0x1f8] sm:$0xf0] }
  0xff   : > { %v1681_v62 = vsel %vm1553_vm3, %v1489_v58, %v1617_v59  ;;  %v1025_v0 = vpop.f32.mrf.mxu2  ;;  %v1586_v12 = vmul.f32 0.2, %v1458_v3  ;;  %vm1522_vm4 = vcmp.ge.f32.partialorder %v1458_v3, 0.0 }
 0x100   : > { %v2464_v1 = vpack.c.bf16 %v1681_v62, %v1680_v61  ;;  %v1194_v2 = vpop.f32.mrf.mxu3  ;;  %v2209_v61 = vor.u32 %v2344_v49, %v2208_v48  ;;  %v2085_v62 = vor.u32 %v2311_v52, %v2082_v53 }
 0x101   : > { %v947_v4 = vpop.f32.mrf.mxu0  ;;  %v1195_v6 = vadd.f32 %v1194_v2, %v1025_v0  ;;  %v1650_v25 = vsel %vm1522_vm4, %v1458_v3, %v1586_v12 }
 0x102   : > { %2540 = vst [vmem:[%s2807_s8 + $0xa0] sm:$0xff] %v2464_v1   ;;  %v1116_v5 = vpop.f32.mrf.mxu1 }
 0x103   : > { %v1117_v7 = vadd.f32 %v1116_v5, %v947_v4  ;;  %v1490_v18 = vadd.f32 %v2790_v63, %v1195_v6  ;;  %v2213_v4 = vor.u32 %v2343_v54, %v2210_v55 }
 0x105   : > { %v1459_v13 = vadd.f32 %v2790_v63, %v1117_v7  ;;  %v1618_v32 = vmul.f32 0.2, %v1490_v18  ;;  %vm1554_vm6 = vcmp.ge.f32.partialorder %v1490_v18, 0.0 }
 0x107   : > { %vm1523_vm5 = vcmp.ge.f32.partialorder %v1459_v13, 0.0  ;;  %v1587_v19 = vmul.f32 0.2, %v1459_v13  ;;  %v1027_v20 = vpop.f32.mrf.mxu2  ;;  %v1682_v36 = vsel %vm1554_vm6, %v1490_v18, %v1618_v32 }
 0x108   : > { %v1196_v21 = vpop.f32.mrf.mxu3 }
 0x109   : > { %v1651_v26 = vsel %vm1523_vm5, %v1459_v13, %v1587_v19  ;;  %v1197_v27 = vadd.f32 %v1196_v21, %v1027_v20  ;;  %v950_v28 = vpop.f32.mrf.mxu0 }
 0x10a   : > { %v2389_v30 = vpack.c.bf16 %v1651_v26, %v1650_v25  ;;  %v1119_v31 = vpop.f32.mrf.mxu1 }
 0x10b   : > { %v1491_v33 = vadd.f32 %v2790_v63, %v1197_v27  ;;  %v1120_v35 = vadd.f32 %v1119_v31, %v950_v28 }
 0x10c   : > { %2525 = vst [vmem:[%s2807_s8 + $0x28] sm:$0xff] %v2389_v30   ;;  %989 = vmatmul.bf16.gmra.mxu0 %v2073_v22  ;;  %1069 = vmatmul.bf16.gmra.mxu2 %v2201_v23 }
 0x10d   : > { %vm1555_vm7 = vcmp.ge.f32.partialorder %v1491_v33, 0.0  ;;  %v1619_v34 = vmul.f32 0.2, %v1491_v33  ;;  %1158 = vmatmul.bf16.gmra.mxu1 %v2077_v24  ;;  %1238 = vmatmul.bf16.gmra.mxu3 %v2205_v29  ;;  %v1460_v41 = vadd.f32 %v2790_v63, %v1120_v35 }
 0x10f   : > { %v1683_v37 = vsel %vm1555_vm7, %v1491_v33, %v1619_v34  ;;  %v1030_v38 = vpop.f32.mrf.mxu2  ;;  %v1588_v50 = vmul.f32 0.2, %v1460_v41  ;;  %vm1524_vm8 = vcmp.ge.f32.partialorder %v1460_v41, 0.0 }
 0x110   : > { %v2469_v39 = vpack.c.bf16 %v1683_v37, %v1682_v36  ;;  %v1199_v40 = vpop.f32.mrf.mxu3 }
 0x111   : > { %v952_v42 = vpop.f32.mrf.mxu0  ;;  %v1200_v44 = vadd.f32 %v1199_v40, %v1030_v38  ;;  %v1652_v0 = vsel %vm1524_vm8, %v1460_v41, %v1588_v50 }
 0x112   : > { %2541 = vst [vmem:[%s2807_s8 + $0xa8] sm:$0xff] %v2469_v39   ;;  %v1121_v43 = vpop.f32.mrf.mxu1 }
 0x113   : > { %v1122_v45 = vadd.f32 %v1121_v43, %v952_v42  ;;  %v1492_v56 = vadd.f32 %v2790_v63, %v1200_v44 }
 0x115   : > { %v1461_v51 = vadd.f32 %v2790_v63, %v1122_v45  ;;  %v1620_v7 = vmul.f32 0.2, %v1492_v56  ;;  %vm1556_vm10 = vcmp.ge.f32.partialorder %v1492_v56, 0.0 }
 0x117   : > { %vm1525_vm9 = vcmp.ge.f32.partialorder %v1461_v51, 0.0  ;;  %v1589_v57 = vmul.f32 0.2, %v1461_v51  ;;  %v1032_v58 = vpop.f32.mrf.mxu2  ;;  %v1684_v11 = vsel %vm1556_vm10, %v1492_v56, %v1620_v7 }
 0x118   : > { %v1201_v59 = vpop.f32.mrf.mxu3 }
 0x119   : > { %v1653_v1 = vsel %vm1525_vm9, %v1461_v51, %v1589_v57  ;;  %v1202_v2 = vadd.f32 %v1201_v59, %v1032_v58  ;;  %v955_v3 = vpop.f32.mrf.mxu0 }
 0x11a   : > { %v2394_v5 = vpack.c.bf16 %v1653_v1, %v1652_v0  ;;  %v1124_v6 = vpop.f32.mrf.mxu1 }
 0x11b   : > { %v1493_v8 = vadd.f32 %v2790_v63, %v1202_v2  ;;  %v1125_v10 = vadd.f32 %v1124_v6, %v955_v3 }
 0x11c   : > { %2526 = vst [vmem:[%s2807_s8 + $0x30] sm:$0xff] %v2394_v5   ;;  %994 = vmatmul.bf16.gmra.mxu0 %v2081_v60  ;;  %1074 = vmatmul.bf16.gmra.mxu2 %v2209_v61 }
 0x11d   : > { %vm1557_vm11 = vcmp.ge.f32.partialorder %v1493_v8, 0.0  ;;  %v1621_v9 = vmul.f32 0.2, %v1493_v8  ;;  %1163 = vmatmul.bf16.gmra.mxu1 %v2085_v62  ;;  %1243 = vmatmul.bf16.gmra.mxu3 %v2213_v4  ;;  %v1462_v16 = vadd.f32 %v2790_v63, %v1125_v10 }
 0x11f   : > { %v1685_v12 = vsel %vm1557_vm11, %v1493_v8, %v1621_v9  ;;  %v1035_v13 = vpop.f32.mrf.mxu2  ;;  %v1590_v21 = vmul.f32 0.2, %v1462_v16  ;;  %vm1526_vm12 = vcmp.ge.f32.partialorder %v1462_v16, 0.0 }
 0x120   : > { %v2474_v14 = vpack.c.bf16 %v1685_v12, %v1684_v11  ;;  %v1204_v15 = vpop.f32.mrf.mxu3 }
 0x121   : > { %v957_v17 = vpop.f32.mrf.mxu0  ;;  %v1205_v19 = vadd.f32 %v1204_v15, %v1035_v13  ;;  %v1654_v27 = vsel %vm1526_vm12, %v1462_v16, %v1590_v21 }
 0x122   : > { %2542 = vst [vmem:[%s2807_s8 + $0xb0] sm:$0xff] %v2474_v14   ;;  %v1126_v18 = vpop.f32.mrf.mxu1 }
 0x123   : > { %v1127_v20 = vadd.f32 %v1126_v18, %v957_v17  ;;  %v1494_v23 = vadd.f32 %v2790_v63, %v1205_v19 }
 0x125   : > { %v1463_v22 = vadd.f32 %v2790_v63, %v1127_v20  ;;  %v1622_v33 = vmul.f32 0.2, %v1494_v23  ;;  %vm1558_vm14 = vcmp.ge.f32.partialorder %v1494_v23, 0.0 }
 0x127   : > { %vm1527_vm13 = vcmp.ge.f32.partialorder %v1463_v22, 0.0  ;;  %v1591_v24 = vmul.f32 0.2, %v1463_v22  ;;  %v1037_v25 = vpop.f32.mrf.mxu2  ;;  %v1686_v37 = vsel %vm1558_vm14, %v1494_v23, %v1622_v33 }
 0x128   : > { %v1206_v26 = vpop.f32.mrf.mxu3 }
 0x129   : > { %v1655_v28 = vsel %vm1527_vm13, %v1463_v22, %v1591_v24  ;;  %v1207_v29 = vadd.f32 %v1206_v26, %v1037_v25  ;;  %v960_v30 = vpop.f32.mrf.mxu0 }
 0x12a   : > { %v2399_v31 = vpack.c.bf16 %v1655_v28, %v1654_v27  ;;  %v1129_v32 = vpop.f32.mrf.mxu1 }
 0x12b   : > { %v1495_v34 = vadd.f32 %v2790_v63, %v1207_v29  ;;  %v1130_v36 = vadd.f32 %v1129_v32, %v960_v30 }
 0x12c   : > { %2527 = vst [vmem:[%s2807_s8 + $0x38] sm:$0xff] %v2399_v31  }
 0x12d   : > { %vm1559_vm15 = vcmp.ge.f32.partialorder %v1495_v34, 0.0  ;;  %v1623_v35 = vmul.f32 0.2, %v1495_v34  ;;  %v1464_v42 = vadd.f32 %v2790_v63, %v1130_v36 }
 0x12f   : > { %v1687_v38 = vsel %vm1559_vm15, %v1495_v34, %v1623_v35  ;;  %v1040_v39 = vpop.f32.mrf.mxu2  ;;  %v1592_v47 = vmul.f32 0.2, %v1464_v42  ;;  %vm1528_vm0 = vcmp.ge.f32.partialorder %v1464_v42, 0.0 }
 0x130   : > { %v2479_v40 = vpack.c.bf16 %v1687_v38, %v1686_v37  ;;  %v1209_v41 = vpop.f32.mrf.mxu3 }
 0x131   : > { %v962_v43 = vpop.f32.mrf.mxu0  ;;  %v1210_v45 = vadd.f32 %v1209_v41, %v1040_v39  ;;  %v1656_v53 = vsel %vm1528_vm0, %v1464_v42, %v1592_v47 }
 0x132   : > { %2543 = vst [vmem:[%s2807_s8 + $0xb8] sm:$0xff] %v2479_v40   ;;  %v1131_v44 = vpop.f32.mrf.mxu1 }
 0x133   : > { %v1132_v46 = vadd.f32 %v1131_v44, %v962_v43  ;;  %v1496_v49 = vadd.f32 %v2790_v63, %v1210_v45 }
 0x135   : > { %v1465_v48 = vadd.f32 %v2790_v63, %v1132_v46  ;;  %v1624_v59 = vmul.f32 0.2, %v1496_v49  ;;  %vm1560_vm2 = vcmp.ge.f32.partialorder %v1496_v49, 0.0 }
 0x137   : > { %vm1529_vm1 = vcmp.ge.f32.partialorder %v1465_v48, 0.0  ;;  %v1593_v50 = vmul.f32 0.2, %v1465_v48  ;;  %v1042_v51 = vpop.f32.mrf.mxu2  ;;  %v1688_v0 = vsel %vm1560_vm2, %v1496_v49, %v1624_v59 }
 0x138   : > { %v1211_v52 = vpop.f32.mrf.mxu3 }
 0x139   : > { %v1657_v54 = vsel %vm1529_vm1, %v1465_v48, %v1593_v50  ;;  %v1212_v55 = vadd.f32 %v1211_v52, %v1042_v51  ;;  %v965_v56 = vpop.f32.mrf.mxu0 }
 0x13a   : > { %v2404_v57 = vpack.c.bf16 %v1657_v54, %v1656_v53  ;;  %v1134_v58 = vpop.f32.mrf.mxu1 }
 0x13b   : > { %v1497_v60 = vadd.f32 %v2790_v63, %v1212_v55  ;;  %v1135_v62 = vadd.f32 %v1134_v58, %v965_v56 }
 0x13c   : > { %2528 = vst [vmem:[%s2807_s8 + $0x40] sm:$0xff] %v2404_v57  }
 0x13d   : > { %vm1561_vm3 = vcmp.ge.f32.partialorder %v1497_v60, 0.0  ;;  %v1625_v61 = vmul.f32 0.2, %v1497_v60  ;;  %v1466_v5 = vadd.f32 %v2790_v63, %v1135_v62 }
 0x13f   : > { %v1689_v1 = vsel %vm1561_vm3, %v1497_v60, %v1625_v61  ;;  %v1045_v2 = vpop.f32.mrf.mxu2  ;;  %v1594_v10 = vmul.f32 0.2, %v1466_v5  ;;  %vm1530_vm4 = vcmp.ge.f32.partialorder %v1466_v5, 0.0 }
 0x140   : > { %v2484_v3 = vpack.c.bf16 %v1689_v1, %v1688_v0  ;;  %v1214_v4 = vpop.f32.mrf.mxu3 }
 0x141   : > { %v967_v6 = vpop.f32.mrf.mxu0  ;;  %v1215_v8 = vadd.f32 %v1214_v4, %v1045_v2  ;;  %v1658_v16 = vsel %vm1530_vm4, %v1466_v5, %v1594_v10 }
 0x142   : > { %2544 = vst [vmem:[%s2807_s8 + $0xc0] sm:$0xff] %v2484_v3   ;;  %v1136_v7 = vpop.f32.mrf.mxu1 }
 0x143   : > { %v1137_v9 = vadd.f32 %v1136_v7, %v967_v6  ;;  %v1498_v12 = vadd.f32 %v2790_v63, %v1215_v8 }
 0x145   : > { %v1467_v11 = vadd.f32 %v2790_v63, %v1137_v9  ;;  %v1626_v22 = vmul.f32 0.2, %v1498_v12  ;;  %vm1562_vm6 = vcmp.ge.f32.partialorder %v1498_v12, 0.0 }
 0x147   : > { %vm1531_vm5 = vcmp.ge.f32.partialorder %v1467_v11, 0.0  ;;  %v1595_v13 = vmul.f32 0.2, %v1467_v11  ;;  %v1047_v14 = vpop.f32.mrf.mxu2  ;;  %v1690_v26 = vsel %vm1562_vm6, %v1498_v12, %v1626_v22 }
 0x148   : > { %v1216_v15 = vpop.f32.mrf.mxu3 }
 0x149   : > { %v1659_v17 = vsel %vm1531_vm5, %v1467_v11, %v1595_v13  ;;  %v1217_v18 = vadd.f32 %v1216_v15, %v1047_v14  ;;  %v970_v19 = vpop.f32.mrf.mxu0 }
 0x14a   : > { %v2409_v20 = vpack.c.bf16 %v1659_v17, %v1658_v16  ;;  %v1139_v21 = vpop.f32.mrf.mxu1 }
 0x14b   : > { %v1499_v23 = vadd.f32 %v2790_v63, %v1217_v18  ;;  %v1140_v25 = vadd.f32 %v1139_v21, %v970_v19 }
 0x14c   : > { %2529 = vst [vmem:[%s2807_s8 + $0x48] sm:$0xff] %v2409_v20  }
 0x14d   : > { %vm1563_vm7 = vcmp.ge.f32.partialorder %v1499_v23, 0.0  ;;  %v1627_v24 = vmul.f32 0.2, %v1499_v23  ;;  %v1468_v31 = vadd.f32 %v2790_v63, %v1140_v25 }
 0x14f   : > { %v1691_v27 = vsel %vm1563_vm7, %v1499_v23, %v1627_v24  ;;  %v1050_v28 = vpop.f32.mrf.mxu2  ;;  %v1596_v36 = vmul.f32 0.2, %v1468_v31  ;;  %vm1532_vm8 = vcmp.ge.f32.partialorder %v1468_v31, 0.0 }
 0x150   : > { %v2489_v29 = vpack.c.bf16 %v1691_v27, %v1690_v26  ;;  %v1219_v30 = vpop.f32.mrf.mxu3 }
 0x151   : > { %v972_v32 = vpop.f32.mrf.mxu0  ;;  %v1220_v34 = vadd.f32 %v1219_v30, %v1050_v28  ;;  %v1660_v42 = vsel %vm1532_vm8, %v1468_v31, %v1596_v36 }
 0x152   : > { %2545 = vst [vmem:[%s2807_s8 + $0xc8] sm:$0xff] %v2489_v29   ;;  %v1141_v33 = vpop.f32.mrf.mxu1 }
 0x153   : > { %v1142_v35 = vadd.f32 %v1141_v33, %v972_v32  ;;  %v1500_v38 = vadd.f32 %v2790_v63, %v1220_v34 }
 0x155   : > { %v1469_v37 = vadd.f32 %v2790_v63, %v1142_v35  ;;  %v1628_v48 = vmul.f32 0.2, %v1500_v38  ;;  %vm1564_vm10 = vcmp.ge.f32.partialorder %v1500_v38, 0.0 }
 0x157   : > { %vm1533_vm9 = vcmp.ge.f32.partialorder %v1469_v37, 0.0  ;;  %v1597_v39 = vmul.f32 0.2, %v1469_v37  ;;  %v1052_v40 = vpop.f32.mrf.mxu2  ;;  %v1692_v52 = vsel %vm1564_vm10, %v1500_v38, %v1628_v48  ;;  %v2932_v38 = vld [vmem:[%s2966_s2] ss:$0 sm:$0xff] }
 0x158   : > { %v1221_v41 = vpop.f32.mrf.mxu3 }
 0x159   : > { %v1661_v43 = vsel %vm1533_vm9, %v1469_v37, %v1597_v39  ;;  %v1222_v44 = vadd.f32 %v1221_v41, %v1052_v40  ;;  %v975_v45 = vpop.f32.mrf.mxu0 }
 0x15a   : > { %v2414_v46 = vpack.c.bf16 %v1661_v43, %v1660_v42  ;;  %v1144_v47 = vpop.f32.mrf.mxu1 }
 0x15b   : > { %v1501_v49 = vadd.f32 %v2790_v63, %v1222_v44  ;;  %v1145_v51 = vadd.f32 %v1144_v47, %v975_v45 }
 0x15c   : > { %2530 = vst [vmem:[%s2807_s8 + $0x50] sm:$0xff] %v2414_v46  }
 0x15d   : > { %vm1565_vm11 = vcmp.ge.f32.partialorder %v1501_v49, 0.0  ;;  %v1629_v50 = vmul.f32 0.2, %v1501_v49  ;;  %v1470_v57 = vadd.f32 %v2790_v63, %v1145_v51 }
 0x15f   : > { %v1693_v53 = vsel %vm1565_vm11, %v1501_v49, %v1629_v50  ;;  %v1055_v54 = vpop.f32.mrf.mxu2  ;;  %v1598_v62 = vmul.f32 0.2, %v1470_v57  ;;  %vm1534_vm12 = vcmp.ge.f32.partialorder %v1470_v57, 0.0 }
 0x160   : > { %v2494_v55 = vpack.c.bf16 %v1693_v53, %v1692_v52  ;;  %v1224_v56 = vpop.f32.mrf.mxu3 }
 0x161   : > { %v977_v58 = vpop.f32.mrf.mxu0  ;;  %v1225_v60 = vadd.f32 %v1224_v56, %v1055_v54  ;;  %v1662_v5 = vsel %vm1534_vm12, %v1470_v57, %v1598_v62 }
 0x162   : > { %2546 = vst [vmem:[%s2807_s8 + $0xd0] sm:$0xff] %v2494_v55   ;;  %v1146_v59 = vpop.f32.mrf.mxu1 }
 0x163   : > { %v1147_v61 = vadd.f32 %v1146_v59, %v977_v58  ;;  %v1502_v1 = vadd.f32 %v2790_v63, %v1225_v60 }
 0x165   : > { %v1471_v0 = vadd.f32 %v2790_v63, %v1147_v61  ;;  %v1630_v11 = vmul.f32 0.2, %v1502_v1  ;;  %vm1566_vm14 = vcmp.ge.f32.partialorder %v1502_v1, 0.0 }
 0x167   : > { %vm1535_vm13 = vcmp.ge.f32.partialorder %v1471_v0, 0.0  ;;  %v1599_v2 = vmul.f32 0.2, %v1471_v0  ;;  %v1057_v3 = vpop.f32.mrf.mxu2  ;;  %v1694_v15 = vsel %vm1566_vm14, %v1502_v1, %v1630_v11 }
 0x168   : > { %v1226_v4 = vpop.f32.mrf.mxu3 }
 0x169   : > { %v1663_v6 = vsel %vm1535_vm13, %v1471_v0, %v1599_v2  ;;  %v1227_v7 = vadd.f32 %v1226_v4, %v1057_v3  ;;  %v980_v8 = vpop.f32.mrf.mxu0 }
 0x16a   : > { %v2419_v9 = vpack.c.bf16 %v1663_v6, %v1662_v5  ;;  %v1149_v10 = vpop.f32.mrf.mxu1 }
 0x16b   : > { %v1503_v12 = vadd.f32 %v2790_v63, %v1227_v7  ;;  %v1150_v14 = vadd.f32 %v1149_v10, %v980_v8 }
 0x16c   : > { %2531 = vst [vmem:[%s2807_s8 + $0x58] sm:$0xff] %v2419_v9  }
 0x16d   : > { %vm1567_vm15 = vcmp.ge.f32.partialorder %v1503_v12, 0.0  ;;  %v1631_v13 = vmul.f32 0.2, %v1503_v12  ;;  %v1472_v20 = vadd.f32 %v2790_v63, %v1150_v14 }
 0x16f   : > { %v1695_v16 = vsel %vm1567_vm15, %v1503_v12, %v1631_v13  ;;  %v1060_v17 = vpop.f32.mrf.mxu2  ;;  %v1600_v25 = vmul.f32 0.2, %v1472_v20  ;;  %vm1536_vm0 = vcmp.ge.f32.partialorder %v1472_v20, 0.0 }
 0x170   : > { %v2499_v18 = vpack.c.bf16 %v1695_v16, %v1694_v15  ;;  %v1229_v19 = vpop.f32.mrf.mxu3 }
 0x171   : > { %v982_v21 = vpop.f32.mrf.mxu0  ;;  %v1230_v23 = vadd.f32 %v1229_v19, %v1060_v17  ;;  %v1664_v31 = vsel %vm1536_vm0, %v1472_v20, %v1600_v25 }
 0x172   : > { %2547 = vst [vmem:[%s2807_s8 + $0xd8] sm:$0xff] %v2499_v18   ;;  %v1151_v22 = vpop.f32.mrf.mxu1 }
 0x173   : > { %v1152_v24 = vadd.f32 %v1151_v22, %v982_v21  ;;  %v1504_v27 = vadd.f32 %v2790_v63, %v1230_v23 }
 0x175   : > { %v1473_v26 = vadd.f32 %v2790_v63, %v1152_v24  ;;  %v1632_v37 = vmul.f32 0.2, %v1504_v27  ;;  %vm1568_vm2 = vcmp.ge.f32.partialorder %v1504_v27, 0.0 }
 0x177   : > { %vm1537_vm1 = vcmp.ge.f32.partialorder %v1473_v26, 0.0  ;;  %v1601_v28 = vmul.f32 0.2, %v1473_v26  ;;  %v1062_v29 = vpop.f32.mrf.mxu2  ;;  %v1696_v41 = vsel %vm1568_vm2, %v1504_v27, %v1632_v37 }
 0x178   : > { %v1231_v30 = vpop.f32.mrf.mxu3 }
 0x179   : > { %v1665_v32 = vsel %vm1537_vm1, %v1473_v26, %v1601_v28  ;;  %v1232_v33 = vadd.f32 %v1231_v30, %v1062_v29  ;;  %v985_v34 = vpop.f32.mrf.mxu0 }
 0x17a   : > { %v2424_v35 = vpack.c.bf16 %v1665_v32, %v1664_v31  ;;  %v1154_v36 = vpop.f32.mrf.mxu1 }
 0x17b   : > { %v1505_v39 = vadd.f32 %v2932_v38, %v1232_v33  ;;  %v1155_v40 = vadd.f32 %v1154_v36, %v985_v34 }
 0x17c   : > { %2532 = vst [vmem:[%s2807_s8 + $0x60] sm:$0xff] %v2424_v35  }
 0x17d   : > { %vm1569_vm3 = vcmp.ge.f32.partialorder %v1505_v39, 0.0  ;;  %v1633_v63 = vmul.f32 0.2, %v1505_v39  ;;  %v1474_v46 = vadd.f32 %v2932_v38, %v1155_v40 }
 0x17f   : > { %v1697_v42 = vsel %vm1569_vm3, %v1505_v39, %v1633_v63  ;;  %v1065_v43 = vpop.f32.mrf.mxu2  ;;  %v1602_v51 = vmul.f32 0.2, %v1474_v46  ;;  %vm1538_vm4 = vcmp.ge.f32.partialorder %v1474_v46, 0.0 }
 0x180   : > { %v2504_v44 = vpack.c.bf16 %v1697_v42, %v1696_v41  ;;  %v1234_v45 = vpop.f32.mrf.mxu3 }
 0x181   : > { %v987_v47 = vpop.f32.mrf.mxu0  ;;  %v1235_v49 = vadd.f32 %v1234_v45, %v1065_v43  ;;  %v1666_v57 = vsel %vm1538_vm4, %v1474_v46, %v1602_v51 }
 0x182   : > { %2548 = vst [vmem:[%s2807_s8 + $0xe0] sm:$0xff] %v2504_v44   ;;  %v1156_v48 = vpop.f32.mrf.mxu1 }
 0x183   : > { %v1157_v50 = vadd.f32 %v1156_v48, %v987_v47  ;;  %v1506_v53 = vadd.f32 %v2932_v38, %v1235_v49 }
 0x185   : > { %v1475_v52 = vadd.f32 %v2932_v38, %v1157_v50  ;;  %v1634_v0 = vmul.f32 0.2, %v1506_v53  ;;  %vm1570_vm6 = vcmp.ge.f32.partialorder %v1506_v53, 0.0 }
 0x187   : > { %vm1539_vm5 = vcmp.ge.f32.partialorder %v1475_v52, 0.0  ;;  %v1603_v54 = vmul.f32 0.2, %v1475_v52  ;;  %v1067_v55 = vpop.f32.mrf.mxu2  ;;  %v1698_v4 = vsel %vm1570_vm6, %v1506_v53, %v1634_v0 }
 0x188   : > { %v1236_v56 = vpop.f32.mrf.mxu3 }
 0x189   : > { %v1667_v58 = vsel %vm1539_vm5, %v1475_v52, %v1603_v54  ;;  %v1237_v59 = vadd.f32 %v1236_v56, %v1067_v55  ;;  %v990_v60 = vpop.f32.mrf.mxu0 }
 0x18a   : > { %v2429_v61 = vpack.c.bf16 %v1667_v58, %v1666_v57  ;;  %v1159_v62 = vpop.f32.mrf.mxu1 }
 0x18b   : > { %v1507_v1 = vadd.f32 %v2932_v38, %v1237_v59  ;;  %v1160_v3 = vadd.f32 %v1159_v62, %v990_v60 }
 0x18c   : > { %2533 = vst [vmem:[%s2807_s8 + $0x68] sm:$0xff] %v2429_v61  }
 0x18d   : > { %vm1571_vm7 = vcmp.ge.f32.partialorder %v1507_v1, 0.0  ;;  %v1635_v2 = vmul.f32 0.2, %v1507_v1  ;;  %v1476_v9 = vadd.f32 %v2932_v38, %v1160_v3 }
 0x18f   : > { %v1699_v5 = vsel %vm1571_vm7, %v1507_v1, %v1635_v2  ;;  %v1070_v6 = vpop.f32.mrf.mxu2  ;;  %v1604_v14 = vmul.f32 0.2, %v1476_v9  ;;  %vm1540_vm8 = vcmp.ge.f32.partialorder %v1476_v9, 0.0 }
 0x190   : > { %v2509_v7 = vpack.c.bf16 %v1699_v5, %v1698_v4  ;;  %v1239_v8 = vpop.f32.mrf.mxu3 }
 0x191   : > { %v992_v10 = vpop.f32.mrf.mxu0  ;;  %v1240_v12 = vadd.f32 %v1239_v8, %v1070_v6  ;;  %v1668_v20 = vsel %vm1540_vm8, %v1476_v9, %v1604_v14 }
 0x192   : > { %2549 = vst [vmem:[%s2807_s8 + $0xe8] sm:$0xff] %v2509_v7   ;;  %v1161_v11 = vpop.f32.mrf.mxu1 }
 0x193   : > { %v1162_v13 = vadd.f32 %v1161_v11, %v992_v10  ;;  %v1508_v16 = vadd.f32 %v2932_v38, %v1240_v12 }
 0x195   : > { %v1477_v15 = vadd.f32 %v2932_v38, %v1162_v13  ;;  %v1636_v26 = vmul.f32 0.2, %v1508_v16  ;;  %vm1572_vm10 = vcmp.ge.f32.partialorder %v1508_v16, 0.0 }
 0x197   : > { %vm1541_vm9 = vcmp.ge.f32.partialorder %v1477_v15, 0.0  ;;  %v1605_v17 = vmul.f32 0.2, %v1477_v15  ;;  %v1072_v18 = vpop.f32.mrf.mxu2  ;;  %v1700_v30 = vsel %vm1572_vm10, %v1508_v16, %v1636_v26 }
 0x198   : > { %v1241_v19 = vpop.f32.mrf.mxu3 }
 0x199   : > { %v1669_v21 = vsel %vm1541_vm9, %v1477_v15, %v1605_v17  ;;  %v1242_v22 = vadd.f32 %v1241_v19, %v1072_v18  ;;  %v995_v23 = vpop.f32.mrf.mxu0 }
 0x19a   : > { %v2434_v24 = vpack.c.bf16 %v1669_v21, %v1668_v20  ;;  %v1164_v25 = vpop.f32.mrf.mxu1 }
 0x19b   : > { %v1509_v27 = vadd.f32 %v2932_v38, %v1242_v22  ;;  %v1165_v29 = vadd.f32 %v1164_v25, %v995_v23 }
 0x19c   : > { %2534 = vst [vmem:[%s2807_s8 + $0x70] sm:$0xff] %v2434_v24  }
 0x19d   : > { %vm1573_vm11 = vcmp.ge.f32.partialorder %v1509_v27, 0.0  ;;  %v1637_v28 = vmul.f32 0.2, %v1509_v27  ;;  %v1478_v35 = vadd.f32 %v2932_v38, %v1165_v29 }
 0x19f   : > { %v1701_v31 = vsel %vm1573_vm11, %v1509_v27, %v1637_v28  ;;  %v1075_v32 = vpop.f32.mrf.mxu2  ;;  %v1606_v40 = vmul.f32 0.2, %v1478_v35  ;;  %vm1542_vm12 = vcmp.ge.f32.partialorder %v1478_v35, 0.0 }
 0x1a0   : > { %v2514_v33 = vpack.c.bf16 %v1701_v31, %v1700_v30  ;;  %v1244_v34 = vpop.f32.mrf.mxu3 }
 0x1a1   : > { %v997_v36 = vpop.f32.mrf.mxu0  ;;  %v1245_v39 = vadd.f32 %v1244_v34, %v1075_v32  ;;  %v1670_v46 = vsel %vm1542_vm12, %v1478_v35, %v1606_v40 }
 0x1a2   : > { %2550 = vst [vmem:[%s2807_s8 + $0xf0] sm:$0xff] %v2514_v33   ;;  %v1166_v37 = vpop.f32.mrf.mxu1 }
 0x1a3   : > { %v1167_v63 = vadd.f32 %v1166_v37, %v997_v36  ;;  %v1510_v42 = vadd.f32 %v2932_v38, %v1245_v39 }
 0x1a5   : > { %v1479_v41 = vadd.f32 %v2932_v38, %v1167_v63  ;;  %v1638_v50 = vmul.f32 0.2, %v1510_v42  ;;  %vm1574_vm14 = vcmp.ge.f32.partialorder %v1510_v42, 0.0 }
 0x1a7   : > { %vm1543_vm13 = vcmp.ge.f32.partialorder %v1479_v41, 0.0  ;;  %v1607_v43 = vmul.f32 0.2, %v1479_v41  ;;  %v1077_v44 = vpop.f32.mrf.mxu2  ;;  %v1702_v53 = vsel %vm1574_vm14, %v1510_v42, %v1638_v50 }
 0x1a8   : > { %v1246_v45 = vpop.f32.mrf.mxu3 }
 0x1a9   : > { %v1671_v47 = vsel %vm1543_vm13, %v1479_v41, %v1607_v43  ;;  %v1247_v48 = vadd.f32 %v1246_v45, %v1077_v44 }
 0x1aa   : > { %v2439_v49 = vpack.c.bf16 %v1671_v47, %v1670_v46 }
 0x1ab   : > { %v1511_v51 = vadd.f32 %v2932_v38, %v1247_v48 }
 0x1ac   : > { %2535 = vst [vmem:[%s2807_s8 + $0x78] sm:$0xff] %v2439_v49  }
 0x1ad   : > { %vm1575_vm15 = vcmp.ge.f32.partialorder %v1511_v51, 0.0  ;;  %v1639_v52 = vmul.f32 0.2, %v1511_v51 }
 0x1af   : > { %v1703_v54 = vsel %vm1575_vm15, %v1511_v51, %v1639_v52 }
 0x1b0   : > { %v2519_v55 = vpack.c.bf16 %v1703_v54, %v1702_v53 }
 0x1b2   : > { %2551 = vst [vmem:[%s2807_s8 + $0xf8] sm:$0xff] %v2519_v55  }
 0x1b3 PF: > { %s13_s14 = sadd.s32 1, %s2616_s14   ;;  %s2968_s12 = smov %s2612_s13 }
 0x1b4   : > { %p10_p5 = scmp.ge.s32.totalorder %s13_s14, 18   ;;  %s2969_s13 = smov %s2971_s15 }
 0x1b6   :  { %12 = sbr.rel (!%p10_p5) target bundleno = 2 (0x2), region = 76 }

// kernel: _lambda_.10
= control target key start
LH: loop header
LB: loop body
LE: loop exit
PB: predicated region body
PF: predicated region fallthrough
CT: control target
= control target key end

     0   :  { %s1395_s6 = smov 0   ;;  %s1397_s7 = smov 0   ;;  %s2567_s0 = inlined_call_operand.vmem [shape: bf16[2,512,16], index: 0, kind: input, shape index: {}]   ;;  %s2568_s1 = inlined_call_operand.vmem [shape: bf16[2,512,16], index: 1, kind: output, shape index: {}]  }
   0x1   :  { %s1399_s8 = smov 0  }
   0x2 LB: > { %s23_s9 = sadd.s32 1, %s1378_s7  ;;  %p1163_p0 = scmp.ge.s32.totalorder %s1382_s8, 1  ;;  %s1382_s8 = sphi %s1399_s8, %s11_s8   ;;  %s1378_s7 = sphi %s1397_s7, %s2736_s7   ;;  %s1374_s6 = sphi %s1395_s6, %s2735_s6  }
   0x3   : > { %p25_p1 = scmp.ge.s32.totalorder %s23_s9, 2  ;;  %p106_p2 = scmp.lt.s32.totalorder %s1382_s8, 3 }
   0x5   : > { %s2738_s9 = smov (%p25_p1, %s23_s9), 0  ;;  %p107_p3 = pnand %p1163_p0, %p106_p2 }
   0x7   : > { %110 = sbr.rel (%p107_p3) target bundleno = 411 (0x19b), region = 24 }
   0xc   : > { %p132_p4 = scmp.lt.s32.totalorder %s1374_s6, 1  ;;  %vm276_vm0 = vcmask 130048   ;;  %vm1011_vm5 = vcmask 125952  }
   0xe   : > { %s2740_s6 = smov (!%p132_p4, %s1374_s6), 1 }
   0xf   : > { %s1170_s10 = sshll.u32 %s2740_s6, 8 }
  0x10   : > { %s1421_s13 = scalar_lea.vmem %s2567_s0, %s1170_s10  ;;  %s2316_s16 = scalar_lea.vmem %s2568_s1, %s1170_s10 }
  0x11   : > { %v1424_v0 = vld [vmem:[%s1421_s13] sm:$0xff]   ;;  %v1427_v1 = vld [vmem:[%s1421_s13 + $0x8] sm:$0xff]   ;;  %v1433_v5 = vld [vmem:[%s1421_s13 + $0x10] sm:$0xff]  }
  0x12   : > { %v1174_v2 = vunpack.c.l.bf16 %v1424_v0  ;;  %v1175_v3 = vunpack.c.h.bf16 %v1424_v0  ;;  %v1178_v4 = vunpack.c.l.bf16 %v1427_v1  ;;  %v1179_v6 = vunpack.c.h.bf16 %v1427_v1  ;;  %v1447_v11 = vld [vmem:[%s1421_s13 + $0x18] sm:$0xff]   ;;  %v1458_v18 = vld [vmem:[%s1421_s13 + $0x20] sm:$0xff]   ;;  %v1469_v25 = vld [vmem:[%s1421_s13 + $0x28] sm:$0xff]  }
  0x13   : > { %v1182_v7 = vunpack.c.l.bf16 %v1433_v5  ;;  %v1183_v13 = vunpack.c.h.bf16 %v1433_v5  ;;  %v1186_v16 = vunpack.c.l.bf16 %v1447_v11  ;;  %v1187_v20 = vunpack.c.h.bf16 %v1447_v11  ;;  %v1480_v32 = vld [vmem:[%s1421_s13 + $0x30] sm:$0xff]   ;;  %v1491_v39 = vld [vmem:[%s1421_s13 + $0x38] sm:$0xff]   ;;  %v1502_v46 = vld [vmem:[%s1421_s13 + $0x40] sm:$0xff]  }
  0x14   : > { %v277_v8 = vsel %vm276_vm0, %v1174_v2, 0.0  ;;  %v278_v9 = vsel %vm276_vm0, %v1175_v3, 0.0  ;;  %v280_v10 = vsel %vm276_vm0, %v1178_v4, 0.0  ;;  %v282_v14 = vsel %vm276_vm0, %v1179_v6, 0.0  ;;  %v1513_v53 = vld [vmem:[%s1421_s13 + $0x48] sm:$0xff]   ;;  %v1524_v60 = vld [vmem:[%s1421_s13 + $0x50] sm:$0xff]  }
  0x15   : > { %v279_v12 = vadd.f32 %v278_v9, %v277_v8  ;;  %v284_v17 = vsel %vm276_vm0, %v1182_v7, 0.0  ;;  %v286_v21 = vsel %vm276_vm0, %v1183_v13, 0.0  ;;  %v1190_v23 = vunpack.c.l.bf16 %v1458_v18 }
  0x16   : > { %v288_v24 = vsel %vm276_vm0, %v1186_v16, 0.0  ;;  %v1191_v27 = vunpack.c.h.bf16 %v1458_v18  ;;  %v290_v28 = vsel %vm276_vm0, %v1187_v20, 0.0  ;;  %v1194_v30 = vunpack.c.l.bf16 %v1469_v25 }
  0x17   : > { %v281_v15 = vadd.f32 %v280_v10, %v279_v12  ;;  %v292_v31 = vsel %vm276_vm0, %v1190_v23, 0.0  ;;  %v1195_v34 = vunpack.c.h.bf16 %v1469_v25  ;;  %v1198_v37 = vunpack.c.l.bf16 %v1480_v32  ;;  %v1535_v12 = vld [vmem:[%s1421_s13 + $0x58] sm:$0xff]  }
  0x18   : > { %v294_v35 = vsel %vm276_vm0, %v1191_v27, 0.0  ;;  %v296_v38 = vsel %vm276_vm0, %v1194_v30, 0.0  ;;  %v1199_v41 = vunpack.c.h.bf16 %v1480_v32  ;;  %v2616_v44 = vunpack.c.l.bf16 %v1491_v39 }
  0x19   : > { %v283_v19 = vadd.f32 %v282_v14, %v281_v15  ;;  %v298_v42 = vsel %vm276_vm0, %v1195_v34, 0.0  ;;  %v300_v45 = vsel %vm276_vm0, %v1198_v37, 0.0  ;;  %v2615_v48 = vunpack.c.h.bf16 %v1491_v39 }
  0x1a   : > { %v302_v49 = vsel %vm276_vm0, %v1199_v41, 0.0  ;;  %v2614_v51 = vunpack.c.l.bf16 %v1502_v46  ;;  %v304_v52 = vsel %vm276_vm0, %v2616_v44, 0.0  ;;  %v2612_v55 = vunpack.c.h.bf16 %v1502_v46 }
  0x1b   : > { %v285_v22 = vadd.f32 %v284_v17, %v283_v19  ;;  %v306_v56 = vsel %vm276_vm0, %v2615_v48, 0.0  ;;  %v2611_v58 = vunpack.c.l.bf16 %v1513_v53  ;;  %v2606_v62 = vunpack.c.h.bf16 %v1513_v53 }
  0x1c   : > { %v308_v59 = vsel %vm276_vm0, %v2614_v51, 0.0  ;;  %v310_v63 = vsel %vm276_vm0, %v2612_v55, 0.0  ;;  %v2603_v9 = vunpack.c.l.bf16 %v1524_v60  ;;  %v2600_v15 = vunpack.c.h.bf16 %v1524_v60 }
  0x1d   : > { %v287_v26 = vadd.f32 %v286_v21, %v285_v22  ;;  %v312_v10 = vsel %vm276_vm0, %v2611_v58, 0.0  ;;  %v314_v17 = vsel %vm276_vm0, %v2606_v62, 0.0  ;;  %v2596_v21 = vunpack.c.l.bf16 %v1535_v12 }
  0x1e   : > { %v316_v22 = vsel %vm276_vm0, %v2603_v9, 0.0  ;;  %v2642_v32 = vunpack.c.h.bf16 %v1491_v39 }
  0x1f   : > { %v289_v29 = vadd.f32 %v288_v24, %v287_v26  ;;  %v1546_v24 = vld [vmem:[%s1421_s13 + $0x60] sm:$0xff]  }
  0x21   : > { %v291_v33 = vadd.f32 %v290_v28, %v289_v29  ;;  %v2594_v28 = vunpack.c.h.bf16 %v1535_v12  ;;  %v318_v29 = vsel %vm276_vm0, %v2600_v15, 0.0 }
  0x23   : > { %v293_v36 = vadd.f32 %v292_v31, %v291_v33  ;;  %v2591_v33 = vunpack.c.l.bf16 %v1546_v24 }
  0x25   : > { %v295_v40 = vadd.f32 %v294_v35, %v293_v36  ;;  %v320_v35 = vsel %vm276_vm0, %v2596_v21, 0.0  ;;  %v1557_v36 = vld [vmem:[%s1421_s13 + $0x68] sm:$0xff]  }
  0x27   : > { %v297_v43 = vadd.f32 %v296_v38, %v295_v40  ;;  %v2588_v40 = vunpack.c.h.bf16 %v1546_v24 }
  0x29   : > { %v299_v47 = vadd.f32 %v298_v42, %v297_v43  ;;  %v322_v42 = vsel %vm276_vm0, %v2594_v28, 0.0 }
  0x2b   : > { %v301_v50 = vadd.f32 %v300_v45, %v299_v47  ;;  %v2585_v45 = vunpack.c.l.bf16 %v1557_v36  ;;  %v324_v47 = vsel %vm276_vm0, %v2591_v33, 0.0 }
  0x2d   : > { %v303_v54 = vadd.f32 %v302_v49, %v301_v50  ;;  %v1568_v49 = vld [vmem:[%s1421_s13 + $0x70] sm:$0xff]  }
  0x2f   : > { %v305_v57 = vadd.f32 %v304_v52, %v303_v54  ;;  %v2582_v52 = vunpack.c.h.bf16 %v1557_v36  ;;  %v326_v54 = vsel %vm276_vm0, %v2588_v40, 0.0 }
  0x31   : > { %v307_v61 = vadd.f32 %v306_v56, %v305_v57  ;;  %v2579_v57 = vunpack.c.l.bf16 %v1568_v49 }
  0x33   : > { %v309_v8 = vadd.f32 %v308_v59, %v307_v61  ;;  %v328_v59 = vsel %vm276_vm0, %v2585_v45, 0.0  ;;  %v1579_v61 = vld [vmem:[%s1421_s13 + $0x78] sm:$0xff]  }
  0x35   : > { %v311_v14 = vadd.f32 %v310_v63, %v309_v8  ;;  %v2576_v8 = vunpack.c.h.bf16 %v1568_v49 }
  0x37   : > { %v313_v19 = vadd.f32 %v312_v10, %v311_v14  ;;  %v330_v10 = vsel %vm276_vm0, %v2582_v52, 0.0 }
  0x39   : > { %v315_v26 = vadd.f32 %v314_v17, %v313_v19  ;;  %v2573_v17 = vunpack.c.l.bf16 %v1579_v61  ;;  %v332_v19 = vsel %vm276_vm0, %v2579_v57, 0.0 }
  0x3b   : > { %v317_v31 = vadd.f32 %v316_v22, %v315_v26  ;;  %v1590_v22 = vld [vmem:[%s1421_s13 + $0x80] sm:$0xff]  }
  0x3d   : > { %v319_v38 = vadd.f32 %v318_v29, %v317_v31  ;;  %v2570_v29 = vunpack.c.h.bf16 %v1579_v61  ;;  %v334_v31 = vsel %vm276_vm0, %v2576_v8, 0.0 }
  0x3f   : > { %v321_v43 = vadd.f32 %v320_v35, %v319_v38  ;;  %v2569_v38 = vunpack.c.l.bf16 %v1590_v22 }
  0x41   : > { %v323_v50 = vadd.f32 %v322_v42, %v321_v43  ;;  %v336_v42 = vsel %vm276_vm0, %v2573_v17, 0.0  ;;  %v1601_v43 = vld [vmem:[%s1421_s13 + $0x88] sm:$0xff]  }
  0x43   : > { %v325_v56 = vadd.f32 %v324_v47, %v323_v50  ;;  %v2571_v50 = vunpack.c.h.bf16 %v1590_v22 }
  0x45   : > { %v327_v63 = vadd.f32 %v326_v54, %v325_v56  ;;  %v338_v54 = vsel %vm276_vm0, %v2570_v29, 0.0 }
  0x47   : > { %v329_v14 = vadd.f32 %v328_v59, %v327_v63  ;;  %v2572_v59 = vunpack.c.l.bf16 %v1601_v43  ;;  %v340_v63 = vsel %vm276_vm0, %v2569_v38, 0.0 }
  0x49   : > { %v331_v26 = vadd.f32 %v330_v10, %v329_v14  ;;  %v1612_v10 = vld [vmem:[%s1421_s13 + $0x90] sm:$0xff]  }
  0x4a   : > { %v2577_v29 = vunpack.c.h.bf16 %v1612_v10 }
  0x4b   : > { %v333_v35 = vadd.f32 %v332_v19, %v331_v26  ;;  %v2574_v19 = vunpack.c.h.bf16 %v1601_v43  ;;  %v342_v26 = vsel %vm276_vm0, %v2571_v50, 0.0 }
  0x4d   : > { %v335_v47 = vadd.f32 %v334_v31, %v333_v35  ;;  %v2575_v35 = vunpack.c.l.bf16 %v1612_v10 }
  0x4f   : > { %v337_v56 = vadd.f32 %v336_v42, %v335_v47  ;;  %v344_v42 = vsel %vm276_vm0, %v2572_v59, 0.0  ;;  %v1623_v47 = vld [vmem:[%s1421_s13 + $0x98] sm:$0xff]  }
  0x50   : > { %v2578_v50 = vunpack.c.l.bf16 %v1623_v47  ;;  %v2580_v17 = vunpack.c.h.bf16 %v1623_v47 }
  0x51   : > { %v339_v14 = vadd.f32 %v338_v54, %v337_v56  ;;  %v346_v54 = vsel %vm276_vm0, %v2574_v19, 0.0 }
  0x53   : > { %v341_v31 = vadd.f32 %v340_v63, %v339_v14  ;;  %v348_v63 = vsel %vm276_vm0, %v2575_v35, 0.0  ;;  %v1634_v14 = vld [vmem:[%s1421_s13 + $0xa0] sm:$0xff]  }
  0x54   : > { %v2581_v19 = vunpack.c.l.bf16 %v1634_v14  ;;  %v2583_v8 = vunpack.c.h.bf16 %v1634_v14 }
  0x55   : > { %v343_v38 = vadd.f32 %v342_v26, %v341_v31  ;;  %v350_v26 = vsel %vm276_vm0, %v2577_v29, 0.0 }
  0x57   : > { %v345_v56 = vadd.f32 %v344_v42, %v343_v38  ;;  %v352_v38 = vsel %vm276_vm0, %v2578_v50, 0.0  ;;  %v1645_v42 = vld [vmem:[%s1421_s13 + $0xa8] sm:$0xff]  }
  0x58   : > { %v2584_v29 = vunpack.c.l.bf16 %v1645_v42  ;;  %v2586_v57 = vunpack.c.h.bf16 %v1645_v42 }
  0x59   : > { %v347_v59 = vadd.f32 %v346_v54, %v345_v56  ;;  %v354_v54 = vsel %vm276_vm0, %v2580_v17, 0.0 }
  0x5b   : > { %v349_v31 = vadd.f32 %v348_v63, %v347_v59  ;;  %v356_v59 = vsel %vm276_vm0, %v2581_v19, 0.0  ;;  %v1656_v63 = vld [vmem:[%s1421_s13 + $0xb0] sm:$0xff]  }
  0x5c   : > { %v2587_v17 = vunpack.c.l.bf16 %v1656_v63  ;;  %v2589_v52 = vunpack.c.h.bf16 %v1656_v63 }
  0x5d   : > { %v351_v35 = vadd.f32 %v350_v26, %v349_v31  ;;  %v358_v26 = vsel %vm276_vm0, %v2583_v8, 0.0 }
  0x5f   : > { %v353_v56 = vadd.f32 %v352_v38, %v351_v35  ;;  %v360_v35 = vsel %vm276_vm0, %v2584_v29, 0.0  ;;  %v1667_v38 = vld [vmem:[%s1421_s13 + $0xb8] sm:$0xff]  }
  0x60   : > { %v2590_v8 = vunpack.c.l.bf16 %v1667_v38  ;;  %v2592_v45 = vunpack.c.h.bf16 %v1667_v38 }
  0x61   : > { %v355_v50 = vadd.f32 %v354_v54, %v353_v56  ;;  %v362_v54 = vsel %vm276_vm0, %v2586_v57, 0.0 }
  0x63   : > { %v357_v31 = vadd.f32 %v356_v59, %v355_v50  ;;  %v364_v50 = vsel %vm276_vm0, %v2587_v17, 0.0  ;;  %v1678_v59 = vld [vmem:[%s1421_s13 + $0xc0] sm:$0xff]  }
  0x64   : > { %v2593_v57 = vunpack.c.l.bf16 %v1678_v59  ;;  %v2595_v40 = vunpack.c.h.bf16 %v1678_v59 }
  0x65   : > { %v359_v19 = vadd.f32 %v358_v26, %v357_v31  ;;  %v366_v26 = vsel %vm276_vm0, %v2589_v52, 0.0 }
  0x67   : > { %v361_v56 = vadd.f32 %v360_v35, %v359_v19  ;;  %v368_v19 = vsel %vm276_vm0, %v2590_v8, 0.0  ;;  %v1689_v35 = vld [vmem:[%s1421_s13 + $0xc8] sm:$0xff]  }
  0x68   : > { %v2597_v52 = vunpack.c.l.bf16 %v1689_v35  ;;  %v2598_v33 = vunpack.c.h.bf16 %v1689_v35 }
  0x69   : > { %v363_v29 = vadd.f32 %v362_v54, %v361_v56  ;;  %v370_v54 = vsel %vm276_vm0, %v2592_v45, 0.0 }
  0x6b   : > { %v365_v31 = vadd.f32 %v364_v50, %v363_v29  ;;  %v372_v29 = vsel %vm276_vm0, %v2593_v57, 0.0  ;;  %v1700_v50 = vld [vmem:[%s1421_s13 + $0xd0] sm:$0xff]  }
  0x6c   : > { %v2599_v45 = vunpack.c.l.bf16 %v1700_v50  ;;  %v2601_v28 = vunpack.c.h.bf16 %v1700_v50 }
  0x6d   : > { %v367_v17 = vadd.f32 %v366_v26, %v365_v31  ;;  %v374_v26 = vsel %vm276_vm0, %v2595_v40, 0.0 }
  0x6f   : > { %v369_v56 = vadd.f32 %v368_v19, %v367_v17  ;;  %v376_v17 = vsel %vm276_vm0, %v2597_v52, 0.0  ;;  %v1711_v19 = vld [vmem:[%s1421_s13 + $0xd8] sm:$0xff]  }
  0x70   : > { %v2602_v40 = vunpack.c.l.bf16 %v1711_v19  ;;  %v2604_v52 = vunpack.c.h.bf16 %v1711_v19 }
  0x71   : > { %v371_v8 = vadd.f32 %v370_v54, %v369_v56  ;;  %v378_v54 = vsel %vm276_vm0, %v2598_v33, 0.0 }
  0x73   : > { %v373_v31 = vadd.f32 %v372_v29, %v371_v8  ;;  %v380_v8 = vsel %vm276_vm0, %v2599_v45, 0.0  ;;  %v1722_v29 = vld [vmem:[%s1421_s13 + $0xe0] sm:$0xff]  }
  0x74   : > { %v2605_v33 = vunpack.c.l.bf16 %v1722_v29  ;;  %v2607_v15 = vunpack.c.h.bf16 %v1722_v29 }
  0x75   : > { %v375_v57 = vadd.f32 %v374_v26, %v373_v31  ;;  %v382_v26 = vsel %vm276_vm0, %v2601_v28, 0.0 }
  0x77   : > { %v377_v56 = vadd.f32 %v376_v17, %v375_v57  ;;  %v384_v57 = vsel %vm276_vm0, %v2602_v40, 0.0  ;;  %v1733_v17 = vld [vmem:[%s1421_s13 + $0xe8] sm:$0xff]  }
  0x78   : > { %v2608_v28 = vunpack.c.l.bf16 %v1733_v17  ;;  %v2609_v40 = vunpack.c.h.bf16 %v1733_v17 }
  0x79   : > { %v379_v21 = vadd.f32 %v378_v54, %v377_v56  ;;  %v386_v54 = vsel %vm276_vm0, %v2604_v52, 0.0 }
  0x7b   : > { %v381_v31 = vadd.f32 %v380_v8, %v379_v21  ;;  %v388_v21 = vsel %vm276_vm0, %v2605_v33, 0.0 }
  0x7d   : > { %v383_v45 = vadd.f32 %v382_v26, %v381_v31  ;;  %v390_v26 = vsel %vm276_vm0, %v2607_v15, 0.0  ;;  %v1748_v31 = vld [vmem:[%s1421_s13 + $0xf0] sm:$0xff]  }
  0x7e   : > { %v2610_v52 = vunpack.c.l.bf16 %v1748_v31  ;;  %v2613_v62 = vunpack.c.h.bf16 %v1748_v31 }
  0x7f   : > { %v385_v56 = vadd.f32 %v384_v57, %v383_v45  ;;  %v392_v45 = vsel %vm276_vm0, %v2608_v28, 0.0 }
  0x80   : > { %v396_v15 = vsel %vm276_vm0, %v2610_v52, 0.0 }
  0x81   : > { %v387_v8 = vadd.f32 %v386_v54, %v385_v56  ;;  %v394_v54 = vsel %vm276_vm0, %v2609_v40, 0.0 }
  0x83   : > { %v389_v9 = vadd.f32 %v388_v21, %v387_v8  ;;  %v1762_v21 = vld [vmem:[%s1421_s13 + $0xf8] sm:$0xff]  }
  0x84   : > { %v2617_v28 = vunpack.c.l.bf16 %v1762_v21  ;;  %v2618_v40 = vunpack.c.h.bf16 %v1762_v21 }
  0x85   : > { %v391_v57 = vadd.f32 %v390_v26, %v389_v9  ;;  %v398_v9 = vsel %vm276_vm0, %v2613_v62, 0.0 }
  0x87   : > { %v393_v56 = vadd.f32 %v392_v45, %v391_v57  ;;  %v400_v45 = vsel %vm276_vm0, %v2617_v28, 0.0 }
  0x89   : > { %v395_v33 = vadd.f32 %v394_v54, %v393_v56  ;;  %v402_v54 = vsel %vm276_vm0, %v2618_v40, 0.0 }
  0x8b   : > { %v397_v8 = vadd.f32 %v396_v15, %v395_v33  ;;  %v1384_v15 = vmov 512.0  }
  0x8c   : > { %1356 = vrcp.f32 %v1384_v15 }
  0x8d   : > { %v399_v26 = vadd.f32 %v398_v9, %v397_v8 }
  0x8f   : > { %v401_v57 = vadd.f32 %v400_v45, %v399_v26 }
  0x91   : > { %v403_v56 = vadd.f32 %v402_v54, %v401_v57 }
  0x92   : > { %v1357_v52 = vpop.eup %1356 }
  0x93   : > { %v404_v33 = vrot.slane %v403_v56, 4  ;;  %v411_v55 = vmul.f32 512.0, %v1357_v52  ;;  %vm415_vm1 = vweird.f32 %v1357_v52 }
  0x95   : > { %v405_v58 = vadd.f32 %v404_v33, %v403_v56  ;;  %v412_v8 = vsub.f32 1.0, %v411_v55 }
  0x97   : > { %v406_v62 = vrot.slane %v405_v58, 2  ;;  %v413_v51 = vmul.f32 %v1357_v52, %v412_v8 }
  0x99   : > { %v407_v9 = vadd.f32 %v406_v62, %v405_v58  ;;  %v414_v44 = vadd.f32 %v1357_v52, %v413_v51 }
  0x9b   : > { %v408_v48 = vrot.slane %v407_v9, 1  ;;  %v1775_v26 = vsel %vm415_vm1, %v1357_v52, %v414_v44 }
  0x9d   : > { %v409_v28 = vadd.f32 %v408_v48, %v407_v9 }
  0x9f   : > { %v1778_v45 = vmul.f32 %v1775_v26, %v409_v28 }
  0xa1   : > { %v1783_v57 = vsub.f32 %v1174_v2, %v1778_v45  ;;  %v1788_v55 = vsub.f32 %v1175_v3, %v1778_v45  ;;  %v1793_v51 = vsub.f32 %v1178_v4, %v1778_v45  ;;  %v1798_v44 = vsub.f32 %v1179_v6, %v1778_v45 }
  0xa2   : > { %v1803_v2 = vsub.f32 %v1182_v7, %v1778_v45  ;;  %v1814_v1 = vsub.f32 %v1183_v13, %v1778_v45  ;;  %v1821_v7 = vsub.f32 %v1186_v16, %v1778_v45  ;;  %v1831_v13 = vsub.f32 %v1187_v20, %v1778_v45 }
  0xa3   : > { %v482_v0 = vmul.f32 %v1783_v57, %v1783_v57  ;;  %v483_v3 = vmul.f32 %v1788_v55, %v1788_v55  ;;  %v484_v4 = vmul.f32 %v1793_v51, %v1793_v51  ;;  %v485_v6 = vmul.f32 %v1798_v44, %v1798_v44 }
  0xa4   : > { %v486_v48 = vmul.f32 %v1803_v2, %v1803_v2  ;;  %v487_v52 = vmul.f32 %v1814_v1, %v1814_v1  ;;  %v1839_v56 = vsub.f32 %v1190_v23, %v1778_v45  ;;  %v488_v15 = vmul.f32 %v1821_v7, %v1821_v7 }
  0xa5   : > { %v546_v58 = vsel %vm276_vm0, %v482_v0, 0.0  ;;  %v547_v62 = vsel %vm276_vm0, %v483_v3, 0.0  ;;  %v549_v28 = vsel %vm276_vm0, %v484_v4, 0.0  ;;  %v551_v16 = vsel %vm276_vm0, %v485_v6, 0.0 }
  0xa6   : > { %v548_v5 = vadd.f32 %v547_v62, %v546_v58  ;;  %v553_v33 = vsel %vm276_vm0, %v486_v48, 0.0  ;;  %v1847_v11 = vsub.f32 %v1191_v27, %v1778_v45  ;;  %v489_v20 = vmul.f32 %v1831_v13, %v1831_v13 }
  0xa7   : > { %v555_v9 = vsel %vm276_vm0, %v487_v52, 0.0  ;;  %v1855_v23 = vsub.f32 %v1194_v30, %v1778_v45  ;;  %v490_v3 = vmul.f32 %v1839_v56, %v1839_v56  ;;  %v557_v4 = vsel %vm276_vm0, %v488_v15, 0.0 }
  0xa8   : > { %v550_v54 = vadd.f32 %v549_v28, %v548_v5  ;;  %v1863_v18 = vsub.f32 %v1195_v34, %v1778_v45  ;;  %v491_v27 = vmul.f32 %v1847_v11, %v1847_v11  ;;  %v559_v48 = vsel %vm276_vm0, %v489_v20, 0.0 }
  0xa9   : > { %v1871_v30 = vsub.f32 %v1198_v37, %v1778_v45  ;;  %v492_v62 = vmul.f32 %v1855_v23, %v1855_v23  ;;  %v561_v28 = vsel %vm276_vm0, %v490_v3, 0.0  ;;  %v1879_v25 = vsub.f32 %v1199_v41, %v1778_v45 }
  0xaa   : > { %v552_v8 = vadd.f32 %v551_v16, %v550_v54  ;;  %v493_v34 = vmul.f32 %v1863_v18, %v1863_v18  ;;  %v563_v52 = vsel %vm276_vm0, %v491_v27, 0.0  ;;  %v2641_v37 = vunpack.c.l.bf16 %v1491_v39 }
  0xab   : > { %v494_v15 = vmul.f32 %v1871_v30, %v1871_v30  ;;  %v1895_v41 = vsub.f32 %v2642_v32, %v1778_v45  ;;  %v495_v20 = vmul.f32 %v1879_v25, %v1879_v25  ;;  %v2643_v3 = vunpack.c.l.bf16 %v1502_v46 }
  0xac   : > { %v554_v0 = vadd.f32 %v553_v33, %v552_v8  ;;  %v1887_v54 = vsub.f32 %v2641_v37, %v1778_v45  ;;  %v565_v33 = vsel %vm276_vm0, %v492_v62, 0.0  ;;  %v2644_v39 = vunpack.c.h.bf16 %v1502_v46 }
  0xad   : > { %v569_v27 = vsel %vm276_vm0, %v494_v15, 0.0  ;;  %v497_v62 = vmul.f32 %v1895_v41, %v1895_v41  ;;  %v2646_v46 = vunpack.c.h.bf16 %v1513_v53 }
  0xae   : > { %v556_v6 = vadd.f32 %v555_v9, %v554_v0  ;;  %v567_v9 = vsel %vm276_vm0, %v493_v34, 0.0  ;;  %v2645_v34 = vunpack.c.l.bf16 %v1513_v53  ;;  %v2648_v53 = vunpack.c.h.bf16 %v1524_v60 }
  0xaf   : > { %v575_v32 = vsel %vm276_vm0, %v497_v62, 0.0 }
  0xb0   : > { %v558_v58 = vadd.f32 %v557_v4, %v556_v6  ;;  %v1903_v4 = vsub.f32 %v2643_v3, %v1778_v45  ;;  %v496_v6 = vmul.f32 %v1887_v54, %v1887_v54 }
  0xb2   : > { %v560_v5 = vadd.f32 %v559_v48, %v558_v58  ;;  %v1911_v58 = vsub.f32 %v2644_v39, %v1778_v45  ;;  %v573_v37 = vsel %vm276_vm0, %v496_v6, 0.0 }
  0xb4   : > { %v562_v16 = vadd.f32 %v561_v28, %v560_v5  ;;  %v571_v28 = vsel %vm276_vm0, %v495_v20, 0.0 }
  0xb6   : > { %v564_v8 = vadd.f32 %v563_v52, %v562_v16  ;;  %v1919_v52 = vsub.f32 %v2645_v34, %v1778_v45  ;;  %v498_v16 = vmul.f32 %v1903_v4, %v1903_v4 }
  0xb8   : > { %v566_v0 = vadd.f32 %v565_v33, %v564_v8  ;;  %v1927_v33 = vsub.f32 %v2646_v46, %v1778_v45  ;;  %v499_v8 = vmul.f32 %v1911_v58, %v1911_v58  ;;  %v500_v3 = vmul.f32 %v1919_v52, %v1919_v52 }
  0xb9   : > { %v577_v6 = vsel %vm276_vm0, %v498_v16, 0.0 }
  0xba   : > { %v568_v48 = vadd.f32 %v567_v9, %v566_v0  ;;  %v2647_v9 = vunpack.c.l.bf16 %v1524_v60  ;;  %v501_v39 = vmul.f32 %v1927_v33, %v1927_v33  ;;  %v579_v62 = vsel %vm276_vm0, %v499_v8, 0.0 }
  0xbb   : > { %v2650_v60 = vunpack.c.h.bf16 %v1535_v12 }
  0xbc   : > { %v570_v5 = vadd.f32 %v569_v27, %v568_v48  ;;  %v1935_v0 = vsub.f32 %v2647_v9, %v1778_v45  ;;  %v1943_v48 = vsub.f32 %v2648_v53, %v1778_v45  ;;  %v2651_v9 = vunpack.c.l.bf16 %v1546_v24 }
  0xbd   : > { %v1959_v46 = vsub.f32 %v2650_v60, %v1778_v45 }
  0xbe   : > { %v572_v15 = vadd.f32 %v571_v28, %v570_v5  ;;  %v2649_v5 = vunpack.c.l.bf16 %v1535_v12  ;;  %v502_v16 = vmul.f32 %v1935_v0, %v1935_v0  ;;  %v503_v8 = vmul.f32 %v1943_v48, %v1943_v48 }
  0xbf   : > { %v2652_v12 = vunpack.c.h.bf16 %v1546_v24  ;;  %v2654_v24 = vunpack.c.h.bf16 %v1557_v36 }
  0xc0   : > { %v574_v20 = vadd.f32 %v573_v37, %v572_v15  ;;  %v1951_v34 = vsub.f32 %v2649_v5, %v1778_v45  ;;  %v581_v37 = vsel %vm276_vm0, %v500_v3, 0.0 }
  0xc2   : > { %v576_v27 = vadd.f32 %v575_v32, %v574_v20  ;;  %v583_v32 = vsel %vm276_vm0, %v501_v39, 0.0  ;;  %v504_v3 = vmul.f32 %v1951_v34, %v1951_v34  ;;  %v505_v39 = vmul.f32 %v1959_v46, %v1959_v46 }
  0xc4   : > { %v578_v28 = vadd.f32 %v577_v6, %v576_v27  ;;  %v1967_v6 = vsub.f32 %v2651_v9, %v1778_v45  ;;  %v585_v27 = vsel %vm276_vm0, %v502_v16, 0.0  ;;  %v589_v60 = vsel %vm276_vm0, %v504_v3, 0.0 }
  0xc5   : > { %v591_v9 = vsel %vm276_vm0, %v505_v39, 0.0 }
  0xc6   : > { %v580_v15 = vadd.f32 %v579_v62, %v578_v28  ;;  %v1975_v62 = vsub.f32 %v2652_v12, %v1778_v45  ;;  %v587_v28 = vsel %vm276_vm0, %v503_v8, 0.0  ;;  %v506_v16 = vmul.f32 %v1967_v6, %v1967_v6 }
  0xc8   : > { %v582_v20 = vadd.f32 %v581_v37, %v580_v15  ;;  %v2653_v37 = vunpack.c.l.bf16 %v1557_v36  ;;  %v507_v8 = vmul.f32 %v1975_v62, %v1975_v62  ;;  %v2656_v36 = vunpack.c.h.bf16 %v1568_v49 }
  0xca   : > { %v584_v53 = vadd.f32 %v583_v32, %v582_v20  ;;  %v1983_v15 = vsub.f32 %v2653_v37, %v1778_v45  ;;  %v1991_v20 = vsub.f32 %v2654_v24, %v1778_v45  ;;  %v2007_v37 = vsub.f32 %v2656_v36, %v1778_v45 }
  0xcb   : > { %v2658_v24 = vunpack.c.l.bf16 %v1579_v61 }
  0xcc   : > { %v586_v5 = vadd.f32 %v585_v27, %v584_v53  ;;  %v2655_v53 = vunpack.c.l.bf16 %v1568_v49  ;;  %v508_v3 = vmul.f32 %v1983_v15, %v1983_v15  ;;  %2657 = vst [vmem:[#allocation2_spill] sm:$0xff] %v2007_v37  ;;  %v509_v39 = vmul.f32 %v1991_v20, %v1991_v20 }
  0xcd   : > { %v2659_v49 = vunpack.c.h.bf16 %v1579_v61  ;;  %v2662_v61 = vunpack.c.h.bf16 %v1590_v22 }
  0xce   : > { %v588_v32 = vadd.f32 %v587_v28, %v586_v5  ;;  %v1999_v12 = vsub.f32 %v2655_v53, %v1778_v45  ;;  %v593_v28 = vsel %vm276_vm0, %v506_v16, 0.0  ;;  %v2015_v53 = vsub.f32 %v2658_v24, %v1778_v45 }
  0xcf   : > { %v2023_v36 = vsub.f32 %v2659_v49, %v1778_v45  ;;  %v2661_v24 = vunpack.c.l.bf16 %v1590_v22  ;;  %v2039_v49 = vsub.f32 %v2662_v61, %v1778_v45  ;;  %v2665_v22 = vunpack.c.h.bf16 %v1601_v43 }
  0xd0   : > { %v590_v27 = vadd.f32 %v589_v60, %v588_v32  ;;  %v595_v60 = vsel %vm276_vm0, %v507_v8, 0.0  ;;  %v510_v16 = vmul.f32 %v1999_v12, %v1999_v12  ;;  %v511_v8 = vmul.f32 %v2007_v37, %v2007_v37 }
  0xd1   : > { %2660 = vst [vmem:[#allocation3_spill] sm:$0xff] %v2023_v36  ;;  %v2031_v40 = vsub.f32 %v2661_v24, %v1778_v45  ;;  %v2664_v24 = vunpack.c.l.bf16 %v1601_v43  ;;  %v2055_v61 = vsub.f32 %v2665_v22, %v1778_v45  ;;  %v2668_v43 = vunpack.c.h.bf16 %v1612_v10 }
  0xd2   : > { %v592_v5 = vadd.f32 %v591_v9, %v590_v27  ;;  %v597_v9 = vsel %vm276_vm0, %v508_v3, 0.0  ;;  %v512_v3 = vmul.f32 %v2015_v53, %v2015_v53  ;;  %2663 = vst [vmem:[#allocation4_spill] sm:$0xff] %v2039_v49 }
  0xd3   : > { %v2047_v37 = vsub.f32 %v2664_v24, %v1778_v45  ;;  %2666 = vst [vmem:[#allocation5_spill] sm:$0xff] %v2055_v61  ;;  %v2667_v24 = vunpack.c.l.bf16 %v1612_v10  ;;  %v2071_v22 = vsub.f32 %v2668_v43, %v1778_v45  ;;  %v2671_v10 = vunpack.c.h.bf16 %v1623_v47 }
  0xd4   : > { %v594_v32 = vadd.f32 %v593_v28, %v592_v5  ;;  %v599_v28 = vsel %vm276_vm0, %v509_v39, 0.0  ;;  %v513_v39 = vmul.f32 %v2023_v36, %v2023_v36 }
  0xd5   : > { %v2063_v36 = vsub.f32 %v2667_v24, %v1778_v45  ;;  %2669 = vst [vmem:[#allocation6_spill] sm:$0xff] %v2071_v22  ;;  %v2670_v24 = vunpack.c.l.bf16 %v1623_v47  ;;  %v2087_v43 = vsub.f32 %v2671_v10, %v1778_v45  ;;  %v2674_v47 = vunpack.c.h.bf16 %v1634_v14 }
  0xd6   : > { %v596_v27 = vadd.f32 %v595_v60, %v594_v32  ;;  %v601_v60 = vsel %vm276_vm0, %v510_v16, 0.0  ;;  %v514_v16 = vmul.f32 %v2031_v40, %v2031_v40 }
  0xd7   : > { %2672 = vst [vmem:[#allocation7_spill] sm:$0xff] %v2087_v43  ;;  %v2103_v10 = vsub.f32 %v2674_v47, %v1778_v45 }
  0xd8   : > { %v598_v5 = vadd.f32 %v597_v9, %v596_v27  ;;  %v603_v9 = vsel %vm276_vm0, %v511_v8, 0.0  ;;  %v515_v8 = vmul.f32 %v2039_v49, %v2039_v49  ;;  %v2079_v49 = vsub.f32 %v2670_v24, %v1778_v45 }
  0xd9   : > { %v2673_v24 = vunpack.c.l.bf16 %v1634_v14  ;;  %2675 = vst [vmem:[#allocation8_spill] sm:$0xff] %v2103_v10  ;;  %v2677_v14 = vunpack.c.h.bf16 %v1645_v42 }
  0xda   : > { %v600_v32 = vadd.f32 %v599_v28, %v598_v5  ;;  %v605_v28 = vsel %vm276_vm0, %v512_v3, 0.0  ;;  %v516_v3 = vmul.f32 %v2047_v37, %v2047_v37 }
  0xdb   : > { %v2119_v47 = vsub.f32 %v2677_v14, %v1778_v45 }
  0xdc   : > { %v602_v27 = vadd.f32 %v601_v60, %v600_v32  ;;  %v607_v60 = vsel %vm276_vm0, %v513_v39, 0.0  ;;  %v517_v39 = vmul.f32 %v2055_v61, %v2055_v61  ;;  %v2095_v61 = vsub.f32 %v2673_v24, %v1778_v45 }
  0xdd   : > { %v2676_v24 = vunpack.c.l.bf16 %v1645_v42  ;;  %2678 = vst [vmem:[#allocation9_spill] sm:$0xff] %v2119_v47  ;;  %v2680_v42 = vunpack.c.h.bf16 %v1656_v63 }
  0xde   : > { %v604_v5 = vadd.f32 %v603_v9, %v602_v27  ;;  %v609_v9 = vsel %vm276_vm0, %v514_v16, 0.0  ;;  %v518_v16 = vmul.f32 %v2063_v36, %v2063_v36 }
  0xdf   : > { %v2135_v14 = vsub.f32 %v2680_v42, %v1778_v45 }
  0xe0   : > { %v606_v32 = vadd.f32 %v605_v28, %v604_v5  ;;  %v611_v28 = vsel %vm276_vm0, %v515_v8, 0.0  ;;  %v519_v8 = vmul.f32 %v2071_v22, %v2071_v22  ;;  %v2111_v22 = vsub.f32 %v2676_v24, %v1778_v45 }
  0xe1   : > { %v2679_v24 = vunpack.c.l.bf16 %v1656_v63  ;;  %2681 = vst [vmem:[#allocation10_spill] sm:$0xff] %v2135_v14  ;;  %v2683_v63 = vunpack.c.h.bf16 %v1667_v38 }
  0xe2   : > { %v608_v27 = vadd.f32 %v607_v60, %v606_v32  ;;  %v613_v60 = vsel %vm276_vm0, %v516_v3, 0.0  ;;  %v520_v3 = vmul.f32 %v2079_v49, %v2079_v49 }
  0xe3   : > { %v2151_v42 = vsub.f32 %v2683_v63, %v1778_v45 }
  0xe4   : > { %v610_v5 = vadd.f32 %v609_v9, %v608_v27  ;;  %v615_v9 = vsel %vm276_vm0, %v517_v39, 0.0  ;;  %v521_v39 = vmul.f32 %v2087_v43, %v2087_v43  ;;  %v2127_v43 = vsub.f32 %v2679_v24, %v1778_v45 }
  0xe5   : > { %v2682_v24 = vunpack.c.l.bf16 %v1667_v38  ;;  %2684 = vst [vmem:[#allocation11_spill] sm:$0xff] %v2151_v42  ;;  %v2686_v38 = vunpack.c.h.bf16 %v1678_v59 }
  0xe6   : > { %v612_v32 = vadd.f32 %v611_v28, %v610_v5  ;;  %v617_v28 = vsel %vm276_vm0, %v518_v16, 0.0  ;;  %v522_v16 = vmul.f32 %v2095_v61, %v2095_v61 }
  0xe7   : > { %v2167_v63 = vsub.f32 %v2686_v38, %v1778_v45 }
  0xe8   : > { %v614_v27 = vadd.f32 %v613_v60, %v612_v32  ;;  %v619_v60 = vsel %vm276_vm0, %v519_v8, 0.0  ;;  %v523_v8 = vmul.f32 %v2103_v10, %v2103_v10  ;;  %v2143_v10 = vsub.f32 %v2682_v24, %v1778_v45 }
  0xe9   : > { %v2685_v24 = vunpack.c.l.bf16 %v1678_v59  ;;  %2687 = vst [vmem:[#allocation12_spill] sm:$0xff] %v2167_v63  ;;  %v2689_v59 = vunpack.c.h.bf16 %v1689_v35 }
  0xea   : > { %v616_v5 = vadd.f32 %v615_v9, %v614_v27  ;;  %v621_v9 = vsel %vm276_vm0, %v520_v3, 0.0  ;;  %v524_v3 = vmul.f32 %v2111_v22, %v2111_v22 }
  0xeb   : > { %v2183_v38 = vsub.f32 %v2689_v59, %v1778_v45 }
  0xec   : > { %v618_v32 = vadd.f32 %v617_v28, %v616_v5  ;;  %v623_v28 = vsel %vm276_vm0, %v521_v39, 0.0  ;;  %v525_v39 = vmul.f32 %v2119_v47, %v2119_v47  ;;  %v2159_v47 = vsub.f32 %v2685_v24, %v1778_v45 }
  0xed   : > { %v2688_v24 = vunpack.c.l.bf16 %v1689_v35  ;;  %2690 = vst [vmem:[#allocation13_spill] sm:$0xff] %v2183_v38  ;;  %v2692_v35 = vunpack.c.h.bf16 %v1700_v50 }
  0xee   : > { %v620_v27 = vadd.f32 %v619_v60, %v618_v32  ;;  %v625_v60 = vsel %vm276_vm0, %v522_v16, 0.0  ;;  %v526_v16 = vmul.f32 %v2127_v43, %v2127_v43 }
  0xef   : > { %v2199_v59 = vsub.f32 %v2692_v35, %v1778_v45 }
  0xf0   : > { %v622_v5 = vadd.f32 %v621_v9, %v620_v27  ;;  %v627_v9 = vsel %vm276_vm0, %v523_v8, 0.0  ;;  %v527_v8 = vmul.f32 %v2135_v14, %v2135_v14  ;;  %v2175_v14 = vsub.f32 %v2688_v24, %v1778_v45 }
  0xf1   : > { %v2691_v24 = vunpack.c.l.bf16 %v1700_v50  ;;  %2693 = vst [vmem:[#allocation14_spill] sm:$0xff] %v2199_v59  ;;  %v2695_v50 = vunpack.c.h.bf16 %v1711_v19 }
  0xf2   : > { %v624_v32 = vadd.f32 %v623_v28, %v622_v5  ;;  %v629_v28 = vsel %vm276_vm0, %v524_v3, 0.0  ;;  %v528_v3 = vmul.f32 %v2143_v10, %v2143_v10 }
  0xf3   : > { %v2215_v35 = vsub.f32 %v2695_v50, %v1778_v45 }
  0xf4   : > { %v626_v27 = vadd.f32 %v625_v60, %v624_v32  ;;  %v631_v60 = vsel %vm276_vm0, %v525_v39, 0.0  ;;  %v529_v39 = vmul.f32 %v2151_v42, %v2151_v42  ;;  %v2191_v42 = vsub.f32 %v2691_v24, %v1778_v45 }
  0xf5   : > { %v2694_v24 = vunpack.c.l.bf16 %v1711_v19  ;;  %2696 = vst [vmem:[#allocation15_spill] sm:$0xff] %v2215_v35  ;;  %v2699_v19 = vunpack.c.h.bf16 %v1722_v29 }
  0xf6   : > { %v628_v5 = vadd.f32 %v627_v9, %v626_v27  ;;  %v633_v9 = vsel %vm276_vm0, %v526_v16, 0.0  ;;  %v530_v16 = vmul.f32 %v2159_v47, %v2159_v47 }
  0xf7   : > { %v2231_v50 = vsub.f32 %v2699_v19, %v1778_v45 }
  0xf8   : > { %v630_v32 = vadd.f32 %v629_v28, %v628_v5  ;;  %v635_v28 = vsel %vm276_vm0, %v527_v8, 0.0  ;;  %v531_v8 = vmul.f32 %v2167_v63, %v2167_v63  ;;  %v2207_v63 = vsub.f32 %v2694_v24, %v1778_v45 }
  0xf9   : > { %v2697_v24 = vunpack.c.l.bf16 %v1722_v29  ;;  %2700 = vst [vmem:[#allocation17_spill] sm:$0xff] %v2231_v50  ;;  %v2703_v29 = vunpack.c.h.bf16 %v1733_v17 }
  0xfa   : > { %v632_v27 = vadd.f32 %v631_v60, %v630_v32  ;;  %v637_v60 = vsel %vm276_vm0, %v528_v3, 0.0  ;;  %v532_v3 = vmul.f32 %v2175_v14, %v2175_v14 }
  0xfb   : > { %v2247_v19 = vsub.f32 %v2703_v29, %v1778_v45 }
  0xfc   : > { %v634_v5 = vadd.f32 %v633_v9, %v632_v27  ;;  %v639_v9 = vsel %vm276_vm0, %v529_v39, 0.0  ;;  %v533_v39 = vmul.f32 %v2183_v38, %v2183_v38  ;;  %v2223_v38 = vsub.f32 %v2697_v24, %v1778_v45 }
  0xfd   : > { %v2701_v24 = vunpack.c.l.bf16 %v1733_v17  ;;  %2704 = vst [vmem:[#allocation19_spill] sm:$0xff] %v2247_v19  ;;  %v2707_v17 = vunpack.c.h.bf16 %v1748_v31 }
  0xfe   : > { %v636_v32 = vadd.f32 %v635_v28, %v634_v5  ;;  %v641_v28 = vsel %vm276_vm0, %v530_v16, 0.0  ;;  %v534_v16 = vmul.f32 %v2191_v42, %v2191_v42  ;;  %2698 = vst [vmem:[#allocation16_spill] sm:$0xff] %v2223_v38 }
  0xff   : > { %v2263_v29 = vsub.f32 %v2707_v17, %v1778_v45 }
 0x100   : > { %v638_v27 = vadd.f32 %v637_v60, %v636_v32  ;;  %v643_v60 = vsel %vm276_vm0, %v531_v8, 0.0  ;;  %v535_v8 = vmul.f32 %v2199_v59, %v2199_v59  ;;  %v2239_v59 = vsub.f32 %v2701_v24, %v1778_v45 }
 0x101   : > { %v2705_v24 = vunpack.c.l.bf16 %v1748_v31  ;;  %2708 = vst [vmem:[#allocation21_spill] sm:$0xff] %v2263_v29  ;;  %v2711_v31 = vunpack.c.h.bf16 %v1762_v21 }
 0x102   : > { %v640_v5 = vadd.f32 %v639_v9, %v638_v27  ;;  %v645_v9 = vsel %vm276_vm0, %v532_v3, 0.0  ;;  %v536_v3 = vmul.f32 %v2207_v63, %v2207_v63  ;;  %2702 = vst [vmem:[#allocation18_spill] sm:$0xff] %v2239_v59 }
 0x103   : > { %v2279_v17 = vsub.f32 %v2711_v31, %v1778_v45 }
 0x104   : > { %v642_v32 = vadd.f32 %v641_v28, %v640_v5  ;;  %v647_v28 = vsel %vm276_vm0, %v533_v39, 0.0  ;;  %v537_v39 = vmul.f32 %v2215_v35, %v2215_v35  ;;  %v2255_v35 = vsub.f32 %v2705_v24, %v1778_v45 }
 0x105   : > { %v2709_v24 = vunpack.c.l.bf16 %v1762_v21  ;;  %2712 = vst [vmem:[#allocation23_spill] sm:$0xff] %v2279_v17 }
 0x106   : > { %v644_v27 = vadd.f32 %v643_v60, %v642_v32  ;;  %v649_v60 = vsel %vm276_vm0, %v534_v16, 0.0  ;;  %v538_v16 = vmul.f32 %v2223_v38, %v2223_v38  ;;  %2706 = vst [vmem:[#allocation20_spill] sm:$0xff] %v2255_v35 }
 0x108   : > { %v646_v5 = vadd.f32 %v645_v9, %v644_v27  ;;  %v651_v9 = vsel %vm276_vm0, %v535_v8, 0.0  ;;  %v539_v8 = vmul.f32 %v2231_v50, %v2231_v50  ;;  %v2271_v50 = vsub.f32 %v2709_v24, %v1778_v45 }
 0x10a   : > { %v648_v32 = vadd.f32 %v647_v28, %v646_v5  ;;  %v653_v28 = vsel %vm276_vm0, %v536_v3, 0.0  ;;  %v540_v3 = vmul.f32 %v2239_v59, %v2239_v59  ;;  %2710 = vst [vmem:[#allocation22_spill] sm:$0xff] %v2271_v50  ;;  %v544_v24 = vmul.f32 %v2271_v50, %v2271_v50 }
 0x10c   : > { %v650_v27 = vadd.f32 %v649_v60, %v648_v32  ;;  %v655_v60 = vsel %vm276_vm0, %v537_v39, 0.0  ;;  %v541_v39 = vmul.f32 %v2247_v19, %v2247_v19  ;;  %v669_v45 = vsel %vm276_vm0, %v544_v24, 0.0 }
 0x10e   : > { %v652_v5 = vadd.f32 %v651_v9, %v650_v27  ;;  %v657_v9 = vsel %vm276_vm0, %v538_v16, 0.0  ;;  %v542_v16 = vmul.f32 %v2255_v35, %v2255_v35 }
 0x110   : > { %v654_v32 = vadd.f32 %v653_v28, %v652_v5  ;;  %v659_v28 = vsel %vm276_vm0, %v539_v8, 0.0  ;;  %v543_v8 = vmul.f32 %v2263_v29, %v2263_v29  ;;  %v665_v19 = vsel %vm276_vm0, %v542_v16, 0.0 }
 0x112   : > { %v656_v27 = vadd.f32 %v655_v60, %v654_v32  ;;  %v661_v60 = vsel %vm276_vm0, %v540_v3, 0.0  ;;  %v545_v3 = vmul.f32 %v2279_v17, %v2279_v17 }
 0x114   : > { %v658_v5 = vadd.f32 %v657_v9, %v656_v27  ;;  %v663_v9 = vsel %vm276_vm0, %v541_v39, 0.0  ;;  %v671_v31 = vsel %vm276_vm0, %v545_v3, 0.0 }
 0x116   : > { %v660_v32 = vadd.f32 %v659_v28, %v658_v5  ;;  %v667_v28 = vsel %vm276_vm0, %v543_v8, 0.0 }
 0x118   : > { %v662_v27 = vadd.f32 %v661_v60, %v660_v32 }
 0x11a   : > { %v664_v35 = vadd.f32 %v663_v9, %v662_v27 }
 0x11c   : > { %v666_v21 = vadd.f32 %v665_v19, %v664_v35 }
 0x11e   : > { %v668_v5 = vadd.f32 %v667_v28, %v666_v21 }
 0x120   : > { %v670_v29 = vadd.f32 %v669_v45, %v668_v5 }
 0x122   : > { %v672_v39 = vadd.f32 %v671_v31, %v670_v29 }
 0x124   : > { %v673_v60 = vrot.slane %v672_v39, 4 }
 0x126   : > { %v674_v32 = vadd.f32 %v673_v60, %v672_v39 }
 0x128   : > { %v675_v59 = vrot.slane %v674_v32, 2 }
 0x12a   : > { %v676_v50 = vadd.f32 %v675_v59, %v674_v32 }
 0x12c   : > { %v677_v38 = vrot.slane %v676_v50, 1 }
 0x12e   : > { %v678_v16 = vadd.f32 %v677_v38, %v676_v50 }
 0x130   : > { %v679_v9 = vmul.f32 %v678_v16, %v1775_v26 }
 0x132   : > { %v680_v27 = vadd.f32 1e-05, %v679_v9 }
 0x134   : > { %1358 = vrsqrt.f32 %v680_v27  ;;  %vm687_vm2 = vweird.f32 %v680_v27 }
 0x13a   : > { %v1359_v17 = vpop.eup %1358 }
 0x13b   : > { %v682_v8 = vmul.f32 %v1359_v17, %v680_v27  ;;  %vm688_vm3 = vweird.f32 %v1359_v17 }
 0x13c   : > { %vm689_vm4 = vmor %vm687_vm2, %vm688_vm3 }
 0x13d   : > { %v683_v35 = vmul.f32 %v1359_v17, %v682_v8 }
 0x13f   : > { %v684_v19 = vmul.f32 0.5, %v683_v35 }
 0x141   : > { %v685_v24 = vsub.f32 1.5, %v684_v19 }
 0x143   : > { %v686_v3 = vmul.f32 %v1359_v17, %v685_v24 }
 0x145   : > { %v2293_v29 = vsel %vm689_vm4, %v1359_v17, %v686_v3 }
 0x146   : > { %v691_v59 = vmul.f32 %v2293_v29, %v1783_v57  ;;  %v692_v26 = vmul.f32 %v2293_v29, %v1788_v55  ;;  %v693_v38 = vmul.f32 %v2293_v29, %v1793_v51  ;;  %v694_v50 = vmul.f32 %v2293_v29, %v1798_v44 }
 0x147   : > { %v695_v28 = vmul.f32 %v2293_v29, %v1803_v2  ;;  %v696_v17 = vmul.f32 %v2293_v29, %v1814_v1  ;;  %v697_v21 = vmul.f32 %v2293_v29, %v1821_v7  ;;  %v698_v57 = vmul.f32 %v2293_v29, %v1831_v13 }
 0x148   : > { %vm755_vm6 = vcmp.ge.f32.partialorder %v691_v59, 0.0  ;;  %v819_v55 = vmul.f32 0.2, %v691_v59  ;;  %vm756_vm7 = vcmp.ge.f32.partialorder %v692_v26, 0.0  ;;  %v820_v45 = vmul.f32 0.2, %v692_v26 }
 0x149   : > { %vm757_vm8 = vcmp.ge.f32.partialorder %v693_v38, 0.0  ;;  %v821_v51 = vmul.f32 0.2, %v693_v38  ;;  %vm758_vm9 = vcmp.ge.f32.partialorder %v694_v50, 0.0  ;;  %v822_v44 = vmul.f32 0.2, %v694_v50 }
 0x14a   : > { %v883_v2 = vsel %vm755_vm6, %v691_v59, %v819_v55  ;;  %v884_v1 = vsel %vm756_vm7, %v692_v26, %v820_v45  ;;  %vm759_vm10 = vcmp.ge.f32.partialorder %v695_v28, 0.0  ;;  %v823_v7 = vmul.f32 0.2, %v695_v28 }
 0x14b   : > { %v947_v13 = vpack.c.bf16 %v883_v2, %v883_v2  ;;  %v948_v5 = vpack.c.bf16 %v884_v1, %v884_v1  ;;  %v885_v31 = vsel %vm757_vm8, %v693_v38, %v821_v51  ;;  %v886_v39 = vsel %vm758_vm9, %v694_v50, %v822_v44 }
 0x14c   : > { %v949_v60 = vpack.c.bf16 %v885_v31, %v885_v31  ;;  %v950_v32 = vpack.c.bf16 %v886_v39, %v886_v39  ;;  %v887_v16 = vsel %vm759_vm10, %v695_v28, %v823_v7  ;;  %vm760_vm11 = vcmp.ge.f32.partialorder %v696_v17, 0.0 }
 0x14d   : > { %1012 = vst.msk [vmem:[%s2316_s16] sm:$0xf] %vm1011_vm5, %v947_v13  ;;  %v951_v9 = vpack.c.bf16 %v887_v16, %v887_v16  ;;  %v824_v27 = vmul.f32 0.2, %v696_v17  ;;  %vm761_vm12 = vcmp.ge.f32.partialorder %v697_v21, 0.0  ;;  %vm762_vm13 = vcmp.ge.f32.partialorder %v698_v57, 0.0 }
 0x14e   : > { %1013 = vst.msk [vmem:[%s2316_s16 + $0x4] sm:$0xf] %vm1011_vm5, %v948_v5  ;;  %v825_v8 = vmul.f32 0.2, %v697_v21  ;;  %v826_v35 = vmul.f32 0.2, %v698_v57  ;;  %v699_v19 = vmul.f32 %v2293_v29, %v1839_v56  ;;  %v700_v24 = vmul.f32 %v2293_v29, %v1847_v11 }
 0x14f   : > { %1014 = vst.msk [vmem:[%s2316_s16 + $0x8] sm:$0xf] %vm1011_vm5, %v949_v60  ;;  %v888_v3 = vsel %vm760_vm11, %v696_v17, %v824_v27  ;;  %v701_v59 = vmul.f32 %v2293_v29, %v1855_v23  ;;  %v702_v26 = vmul.f32 %v2293_v29, %v1863_v18  ;;  %v703_v38 = vmul.f32 %v2293_v29, %v1871_v30 }
 0x150   : > { %1015 = vst.msk [vmem:[%s2316_s16 + $0xc] sm:$0xf] %vm1011_vm5, %v950_v32  ;;  %v952_v56 = vpack.c.bf16 %v888_v3, %v888_v3  ;;  %v889_v50 = vsel %vm761_vm12, %v697_v21, %v825_v8  ;;  %v890_v28 = vsel %vm762_vm13, %v698_v57, %v826_v35  ;;  %vm763_vm14 = vcmp.ge.f32.partialorder %v699_v19, 0.0 }
 0x151   : > { %1016 = vst.msk [vmem:[%s2316_s16 + $0x10] sm:$0xf] %vm1011_vm5, %v951_v9  ;;  %v953_v11 = vpack.c.bf16 %v889_v50, %v889_v50  ;;  %v954_v17 = vpack.c.bf16 %v890_v28, %v890_v28  ;;  %v827_v55 = vmul.f32 0.2, %v699_v19  ;;  %vm764_vm15 = vcmp.ge.f32.partialorder %v700_v24, 0.0 }
 0x152   : > { %1017 = vst.msk [vmem:[%s2316_s16 + $0x14] sm:$0xf] %vm1011_vm5, %v952_v56  ;;  %v828_v23 = vmul.f32 0.2, %v700_v24  ;;  %vm765_vm0 = vcmp.ge.f32.partialorder %v701_v59, 0.0  ;;  %vm766_vm1 = vcmp.ge.f32.partialorder %v702_v26, 0.0  ;;  %v704_v18 = vmul.f32 %v2293_v29, %v1879_v25 }
 0x153   : > { %1018 = vst.msk [vmem:[%s2316_s16 + $0x18] sm:$0xf] %vm1011_vm5, %v953_v11  ;;  %v891_v30 = vsel %vm763_vm14, %v699_v19, %v827_v55  ;;  %v829_v21 = vmul.f32 0.2, %v701_v59  ;;  %v830_v57 = vmul.f32 0.2, %v702_v26  ;;  %v705_v45 = vmul.f32 %v2293_v29, %v1887_v54 }
 0x154   : > { %1019 = vst.msk [vmem:[%s2316_s16 + $0x1c] sm:$0xf] %vm1011_vm5, %v954_v17  ;;  %v955_v51 = vpack.c.bf16 %v891_v30, %v891_v30  ;;  %v892_v44 = vsel %vm764_vm15, %v700_v24, %v828_v23  ;;  %vm767_vm2 = vcmp.ge.f32.partialorder %v703_v38, 0.0  ;;  %v831_v2 = vmul.f32 0.2, %v703_v38 }
 0x155   : > { %v956_v1 = vpack.c.bf16 %v892_v44, %v892_v44  ;;  %v893_v7 = vsel %vm765_vm0, %v701_v59, %v829_v21  ;;  %v894_v13 = vsel %vm766_vm1, %v702_v26, %v830_v57  ;;  %vm768_vm3 = vcmp.ge.f32.partialorder %v704_v18, 0.0 }
 0x156   : > { %1020 = vst.msk [vmem:[%s2316_s16 + $0x20] sm:$0xf] %vm1011_vm5, %v955_v51  ;;  %v957_v25 = vpack.c.bf16 %v893_v7, %v893_v7  ;;  %v958_v5 = vpack.c.bf16 %v894_v13, %v894_v13  ;;  %v895_v31 = vsel %vm767_vm2, %v703_v38, %v831_v2  ;;  %v832_v39 = vmul.f32 0.2, %v704_v18 }
 0x157   : > { %1021 = vst.msk [vmem:[%s2316_s16 + $0x24] sm:$0xf] %vm1011_vm5, %v956_v1  ;;  %v959_v54 = vpack.c.bf16 %v895_v31, %v895_v31  ;;  %vm769_vm4 = vcmp.ge.f32.partialorder %v705_v45, 0.0  ;;  %v833_v60 = vmul.f32 0.2, %v705_v45  ;;  %v706_v32 = vmul.f32 %v2293_v29, %v1895_v41 }
 0x158   : > { %1022 = vst.msk [vmem:[%s2316_s16 + $0x28] sm:$0xf] %vm1011_vm5, %v957_v25  ;;  %v896_v16 = vsel %vm768_vm3, %v704_v18, %v832_v39  ;;  %v707_v9 = vmul.f32 %v2293_v29, %v1903_v4  ;;  %v708_v27 = vmul.f32 %v2293_v29, %v1911_v58  ;;  %v709_v8 = vmul.f32 %v2293_v29, %v1919_v52 }
 0x159   : > { %1023 = vst.msk [vmem:[%s2316_s16 + $0x2c] sm:$0xf] %vm1011_vm5, %v958_v5  ;;  %v960_v35 = vpack.c.bf16 %v896_v16, %v896_v16  ;;  %v897_v19 = vsel %vm769_vm4, %v705_v45, %v833_v60  ;;  %vm770_vm6 = vcmp.ge.f32.partialorder %v706_v32, 0.0  ;;  %v834_v41 = vmul.f32 0.2, %v706_v32 }
 0x15a   : > { %1024 = vst.msk [vmem:[%s2316_s16 + $0x30] sm:$0xf] %vm1011_vm5, %v959_v54  ;;  %v961_v24 = vpack.c.bf16 %v897_v19, %v897_v19  ;;  %vm771_vm7 = vcmp.ge.f32.partialorder %v707_v9, 0.0  ;;  %v835_v3 = vmul.f32 0.2, %v707_v9  ;;  %vm772_vm8 = vcmp.ge.f32.partialorder %v708_v27, 0.0 }
 0x15b   : > { %1025 = vst.msk [vmem:[%s2316_s16 + $0x34] sm:$0xf] %vm1011_vm5, %v960_v35  ;;  %v898_v4 = vsel %vm770_vm6, %v706_v32, %v834_v41  ;;  %v836_v58 = vmul.f32 0.2, %v708_v27  ;;  %vm773_vm9 = vcmp.ge.f32.partialorder %v709_v8, 0.0  ;;  %v710_v52 = vmul.f32 %v2293_v29, %v1927_v33 }
 0x15c   : > { %1026 = vst.msk [vmem:[%s2316_s16 + $0x38] sm:$0xf] %vm1011_vm5, %v961_v24  ;;  %v962_v59 = vpack.c.bf16 %v898_v4, %v898_v4  ;;  %v899_v26 = vsel %vm771_vm7, %v707_v9, %v835_v3  ;;  %v837_v38 = vmul.f32 0.2, %v709_v8  ;;  %v711_v56 = vmul.f32 %v2293_v29, %v1935_v0  ;;  %v2714_v24 = vld [vmem:[#allocation3_spill] sm:$0xff] }
 0x15d   : > { %v963_v50 = vpack.c.bf16 %v899_v26, %v899_v26  ;;  %v900_v28 = vsel %vm772_vm8, %v708_v27, %v836_v58  ;;  %vm774_vm10 = vcmp.ge.f32.partialorder %v710_v52, 0.0  ;;  %v838_v11 = vmul.f32 0.2, %v710_v52 }
 0x15e   : > { %1027 = vst.msk [vmem:[%s2316_s16 + $0x3c] sm:$0xf] %vm1011_vm5, %v962_v59  ;;  %v964_v17 = vpack.c.bf16 %v900_v28, %v900_v28  ;;  %v901_v55 = vsel %vm773_vm9, %v709_v8, %v837_v38  ;;  %vm775_vm11 = vcmp.ge.f32.partialorder %v711_v56, 0.0  ;;  %v839_v33 = vmul.f32 0.2, %v711_v56  ;;  %v2713_v8 = vld [vmem:[#allocation2_spill] sm:$0xff] }
 0x15f   : > { %1028 = vst.msk [vmem:[%s2316_s16 + $0x40] sm:$0xf] %vm1011_vm5, %v963_v50  ;;  %v965_v23 = vpack.c.bf16 %v901_v55, %v901_v55  ;;  %v902_v18 = vsel %vm774_vm10, %v710_v52, %v838_v11  ;;  %v712_v30 = vmul.f32 %v2293_v29, %v1943_v48  ;;  %v713_v0 = vmul.f32 %v2293_v29, %v1951_v34  ;;  %v2715_v52 = vld [vmem:[#allocation4_spill] sm:$0xff] }
 0x160   : > { %1029 = vst.msk [vmem:[%s2316_s16 + $0x44] sm:$0xf] %vm1011_vm5, %v964_v17  ;;  %v966_v21 = vpack.c.bf16 %v902_v18, %v902_v18  ;;  %v903_v57 = vsel %vm775_vm11, %v711_v56, %v839_v33  ;;  %v714_v45 = vmul.f32 %v2293_v29, %v1959_v46  ;;  %v715_v51 = vmul.f32 %v2293_v29, %v1967_v6 }
 0x161   : > { %1030 = vst.msk [vmem:[%s2316_s16 + $0x48] sm:$0xf] %vm1011_vm5, %v965_v23  ;;  %v967_v44 = vpack.c.bf16 %v903_v57, %v903_v57  ;;  %vm776_vm12 = vcmp.ge.f32.partialorder %v712_v30, 0.0  ;;  %v840_v2 = vmul.f32 0.2, %v712_v30  ;;  %vm777_vm13 = vcmp.ge.f32.partialorder %v713_v0, 0.0 }
 0x162   : > { %1031 = vst.msk [vmem:[%s2316_s16 + $0x4c] sm:$0xf] %vm1011_vm5, %v966_v21  ;;  %v841_v48 = vmul.f32 0.2, %v713_v0  ;;  %vm778_vm14 = vcmp.ge.f32.partialorder %v714_v45, 0.0  ;;  %vm779_vm15 = vcmp.ge.f32.partialorder %v715_v51, 0.0  ;;  %v716_v34 = vmul.f32 %v2293_v29, %v1975_v62 }
 0x163   : > { %1032 = vst.msk [vmem:[%s2316_s16 + $0x50] sm:$0xf] %vm1011_vm5, %v967_v44  ;;  %v904_v46 = vsel %vm776_vm12, %v712_v30, %v840_v2  ;;  %v842_v1 = vmul.f32 0.2, %v714_v45  ;;  %v843_v6 = vmul.f32 0.2, %v715_v51  ;;  %v717_v7 = vmul.f32 %v2293_v29, %v1983_v15 }
 0x164   : > { %v968_v13 = vpack.c.bf16 %v904_v46, %v904_v46  ;;  %v905_v25 = vsel %vm777_vm13, %v713_v0, %v841_v48  ;;  %vm780_vm0 = vcmp.ge.f32.partialorder %v716_v34, 0.0  ;;  %v844_v5 = vmul.f32 0.2, %v716_v34 }
 0x165   : > { %v969_v31 = vpack.c.bf16 %v905_v25, %v905_v25  ;;  %v906_v39 = vsel %vm778_vm14, %v714_v45, %v842_v1  ;;  %v907_v54 = vsel %vm779_vm15, %v715_v51, %v843_v6  ;;  %vm781_vm1 = vcmp.ge.f32.partialorder %v717_v7, 0.0  ;;  %v2716_v45 = vld [vmem:[#allocation5_spill] sm:$0xff] }
 0x166   : > { %1033 = vst.msk [vmem:[%s2316_s16 + $0x54] sm:$0xf] %vm1011_vm5, %v968_v13  ;;  %v970_v62 = vpack.c.bf16 %v906_v39, %v906_v39  ;;  %v971_v60 = vpack.c.bf16 %v907_v54, %v907_v54  ;;  %v908_v32 = vsel %vm780_vm0, %v716_v34, %v844_v5  ;;  %v845_v16 = vmul.f32 0.2, %v717_v7  ;;  %v2717_v34 = vld [vmem:[#allocation6_spill] sm:$0xff] }
 0x167   : > { %1034 = vst.msk [vmem:[%s2316_s16 + $0x58] sm:$0xf] %vm1011_vm5, %v969_v31  ;;  %v972_v15 = vpack.c.bf16 %v908_v32, %v908_v32  ;;  %v718_v9 = vmul.f32 %v2293_v29, %v1991_v20  ;;  %v719_v27 = vmul.f32 %v2293_v29, %v1999_v12  ;;  %v720_v35 = vmul.f32 %v2293_v29, %v2713_v8 }
 0x168   : > { %1035 = vst.msk [vmem:[%s2316_s16 + $0x5c] sm:$0xf] %vm1011_vm5, %v970_v62  ;;  %v909_v19 = vsel %vm781_vm1, %v717_v7, %v845_v16  ;;  %v721_v41 = vmul.f32 %v2293_v29, %v2015_v53  ;;  %v722_v3 = vmul.f32 %v2293_v29, %v2714_v24  ;;  %v723_v4 = vmul.f32 %v2293_v29, %v2031_v40  ;;  %v2719_v24 = vld [vmem:[#allocation8_spill] sm:$0xff] }
 0x169   : > { %1036 = vst.msk [vmem:[%s2316_s16 + $0x60] sm:$0xf] %vm1011_vm5, %v971_v60  ;;  %v973_v20 = vpack.c.bf16 %v909_v19, %v909_v19  ;;  %vm782_vm2 = vcmp.ge.f32.partialorder %v718_v9, 0.0  ;;  %v846_v12 = vmul.f32 0.2, %v718_v9  ;;  %vm783_vm3 = vcmp.ge.f32.partialorder %v719_v27, 0.0 }
 0x16a   : > { %1037 = vst.msk [vmem:[%s2316_s16 + $0x64] sm:$0xf] %vm1011_vm5, %v972_v15  ;;  %v847_v58 = vmul.f32 0.2, %v719_v27  ;;  %vm784_vm4 = vcmp.ge.f32.partialorder %v720_v35, 0.0  ;;  %vm785_vm6 = vcmp.ge.f32.partialorder %v721_v41, 0.0  ;;  %v724_v53 = vmul.f32 %v2293_v29, %v2715_v52 }
 0x16b   : > { %1038 = vst.msk [vmem:[%s2316_s16 + $0x68] sm:$0xf] %vm1011_vm5, %v973_v20  ;;  %v910_v59 = vsel %vm782_vm2, %v718_v9, %v846_v12  ;;  %v848_v26 = vmul.f32 0.2, %v720_v35  ;;  %v849_v40 = vmul.f32 0.2, %v721_v41  ;;  %v725_v38 = vmul.f32 %v2293_v29, %v2047_v37 }
 0x16c   : > { %v974_v56 = vpack.c.bf16 %v910_v59, %v910_v59  ;;  %v911_v50 = vsel %vm783_vm3, %v719_v27, %v847_v58  ;;  %vm786_vm7 = vcmp.ge.f32.partialorder %v722_v3, 0.0  ;;  %v850_v28 = vmul.f32 0.2, %v722_v3  ;;  %v2720_v12 = vld [vmem:[#allocation9_spill] sm:$0xff] }
 0x16d   : > { %v975_v11 = vpack.c.bf16 %v911_v50, %v911_v50  ;;  %v912_v17 = vsel %vm784_vm4, %v720_v35, %v848_v26  ;;  %v913_v55 = vsel %vm785_vm6, %v721_v41, %v849_v40  ;;  %vm787_vm8 = vcmp.ge.f32.partialorder %v723_v4, 0.0  ;;  %v2721_v26 = vld [vmem:[#allocation10_spill] sm:$0xff] }
 0x16e   : > { %1039 = vst.msk [vmem:[%s2316_s16 + $0x6c] sm:$0xf] %vm1011_vm5, %v974_v56  ;;  %v976_v33 = vpack.c.bf16 %v912_v17, %v912_v17  ;;  %v977_v23 = vpack.c.bf16 %v913_v55, %v913_v55  ;;  %v914_v18 = vsel %vm786_vm7, %v722_v3, %v850_v28  ;;  %v851_v30 = vmul.f32 0.2, %v723_v4 }
 0x16f   : > { %1040 = vst.msk [vmem:[%s2316_s16 + $0x70] sm:$0xf] %vm1011_vm5, %v975_v11  ;;  %v978_v37 = vpack.c.bf16 %v914_v18, %v914_v18  ;;  %vm788_vm9 = vcmp.ge.f32.partialorder %v724_v53, 0.0  ;;  %v852_v0 = vmul.f32 0.2, %v724_v53  ;;  %vm789_vm10 = vcmp.ge.f32.partialorder %v725_v38, 0.0 }
 0x170   : > { %1041 = vst.msk [vmem:[%s2316_s16 + $0x74] sm:$0xf] %vm1011_vm5, %v976_v33  ;;  %v915_v21 = vsel %vm787_vm8, %v723_v4, %v851_v30  ;;  %v853_v57 = vmul.f32 0.2, %v725_v38  ;;  %v726_v51 = vmul.f32 %v2293_v29, %v2716_v45  ;;  %v727_v44 = vmul.f32 %v2293_v29, %v2063_v36 }
 0x171   : > { %1042 = vst.msk [vmem:[%s2316_s16 + $0x78] sm:$0xf] %vm1011_vm5, %v977_v23  ;;  %v979_v2 = vpack.c.bf16 %v915_v21, %v915_v21  ;;  %v916_v48 = vsel %vm788_vm9, %v724_v53, %v852_v0  ;;  %v728_v46 = vmul.f32 %v2293_v29, %v2717_v34  ;;  %v729_v1 = vmul.f32 %v2293_v29, %v2079_v49  ;;  %v2718_v49 = vld [vmem:[#allocation7_spill] sm:$0xff]  ;;  %v2724_v34 = vld [vmem:[#allocation13_spill] sm:$0xff] }
 0x172   : > { %1043 = vst.msk [vmem:[%s2316_s16 + $0x7c] sm:$0xf] %vm1011_vm5, %v978_v37  ;;  %v980_v6 = vpack.c.bf16 %v916_v48, %v916_v48  ;;  %v917_v7 = vsel %vm789_vm10, %v725_v38, %v853_v57  ;;  %vm790_vm11 = vcmp.ge.f32.partialorder %v726_v51, 0.0  ;;  %v854_v13 = vmul.f32 0.2, %v726_v51  ;;  %v2722_v21 = vld [vmem:[#allocation11_spill] sm:$0xff] }
 0x173   : > { %1044 = vst.msk [vmem:[%s2316_s16 + $0x80] sm:$0xf] %vm1011_vm5, %v979_v2  ;;  %v981_v36 = vpack.c.bf16 %v917_v7, %v917_v7  ;;  %vm791_vm12 = vcmp.ge.f32.partialorder %v727_v44, 0.0  ;;  %v855_v25 = vmul.f32 0.2, %v727_v44  ;;  %vm792_vm13 = vcmp.ge.f32.partialorder %v728_v46, 0.0 }
 0x174   : > { %1045 = vst.msk [vmem:[%s2316_s16 + $0x84] sm:$0xf] %vm1011_vm5, %v980_v6  ;;  %v918_v5 = vsel %vm790_vm11, %v726_v51, %v854_v13  ;;  %v856_v31 = vmul.f32 0.2, %v728_v46  ;;  %vm793_vm14 = vcmp.ge.f32.partialorder %v729_v1, 0.0  ;;  %v730_v39 = vmul.f32 %v2293_v29, %v2718_v49  ;;  %v2723_v51 = vld [vmem:[#allocation12_spill] sm:$0xff] }
 0x175   : > { %1046 = vst.msk [vmem:[%s2316_s16 + $0x88] sm:$0xf] %vm1011_vm5, %v981_v36  ;;  %v982_v54 = vpack.c.bf16 %v918_v5, %v918_v5  ;;  %v919_v62 = vsel %vm791_vm12, %v727_v44, %v855_v25  ;;  %v857_v60 = vmul.f32 0.2, %v729_v1  ;;  %v731_v32 = vmul.f32 %v2293_v29, %v2095_v61  ;;  %v2725_v13 = vld [vmem:[#allocation14_spill] sm:$0xff] }
 0x176   : > { %v983_v16 = vpack.c.bf16 %v919_v62, %v919_v62  ;;  %v920_v15 = vsel %vm792_vm13, %v728_v46, %v856_v31  ;;  %vm794_vm15 = vcmp.ge.f32.partialorder %v730_v39, 0.0  ;;  %v858_v9 = vmul.f32 0.2, %v730_v39 }
 0x177   : > { %1047 = vst.msk [vmem:[%s2316_s16 + $0x8c] sm:$0xf] %vm1011_vm5, %v982_v54  ;;  %v984_v27 = vpack.c.bf16 %v920_v15, %v920_v15  ;;  %v921_v8 = vsel %vm793_vm14, %v729_v1, %v857_v60  ;;  %vm795_vm0 = vcmp.ge.f32.partialorder %v731_v32, 0.0  ;;  %v859_v35 = vmul.f32 0.2, %v731_v32 }
 0x178   : > { %1048 = vst.msk [vmem:[%s2316_s16 + $0x90] sm:$0xf] %vm1011_vm5, %v983_v16  ;;  %v985_v19 = vpack.c.bf16 %v921_v8, %v921_v8  ;;  %v922_v41 = vsel %vm794_vm15, %v730_v39, %v858_v9  ;;  %v732_v3 = vmul.f32 %v2293_v29, %v2719_v24  ;;  %v733_v61 = vmul.f32 %v2293_v29, %v2111_v22  ;;  %v2727_v24 = vld [vmem:[#allocation16_spill] sm:$0xff] }
 0x179   : > { %1049 = vst.msk [vmem:[%s2316_s16 + $0x94] sm:$0xf] %vm1011_vm5, %v984_v27  ;;  %v986_v4 = vpack.c.bf16 %v922_v41, %v922_v41  ;;  %v923_v20 = vsel %vm795_vm0, %v731_v32, %v859_v35  ;;  %v734_v58 = vmul.f32 %v2293_v29, %v2720_v12  ;;  %v735_v52 = vmul.f32 %v2293_v29, %v2127_v43 }
 0x17a   : > { %1050 = vst.msk [vmem:[%s2316_s16 + $0x98] sm:$0xf] %vm1011_vm5, %v985_v19  ;;  %v987_v53 = vpack.c.bf16 %v923_v20, %v923_v20  ;;  %vm796_vm1 = vcmp.ge.f32.partialorder %v732_v3, 0.0  ;;  %v860_v59 = vmul.f32 0.2, %v732_v3  ;;  %vm797_vm2 = vcmp.ge.f32.partialorder %v733_v61, 0.0 }
 0x17b   : > { %1051 = vst.msk [vmem:[%s2316_s16 + $0x9c] sm:$0xf] %vm1011_vm5, %v986_v4  ;;  %v861_v22 = vmul.f32 0.2, %v733_v61  ;;  %vm798_vm3 = vcmp.ge.f32.partialorder %v734_v58, 0.0  ;;  %vm799_vm4 = vcmp.ge.f32.partialorder %v735_v52, 0.0  ;;  %v736_v40 = vmul.f32 %v2293_v29, %v2721_v26 }
 0x17c   : > { %1052 = vst.msk [vmem:[%s2316_s16 + $0xa0] sm:$0xf] %vm1011_vm5, %v987_v53  ;;  %v924_v38 = vsel %vm796_vm1, %v732_v3, %v860_v59  ;;  %v862_v56 = vmul.f32 0.2, %v734_v58  ;;  %v863_v43 = vmul.f32 0.2, %v735_v52  ;;  %v737_v50 = vmul.f32 %v2293_v29, %v2143_v10 }
 0x17d   : > { %v988_v28 = vpack.c.bf16 %v924_v38, %v924_v38  ;;  %v925_v11 = vsel %vm797_vm2, %v733_v61, %v861_v22  ;;  %vm800_vm6 = vcmp.ge.f32.partialorder %v736_v40, 0.0  ;;  %v864_v17 = vmul.f32 0.2, %v736_v40  ;;  %v2726_v19 = vld [vmem:[#allocation15_spill] sm:$0xff]  ;;  %v2728_v20 = vld [vmem:[#allocation17_spill] sm:$0xff] }
 0x17e   : > { %v989_v55 = vpack.c.bf16 %v925_v11, %v925_v11  ;;  %v926_v33 = vsel %vm798_vm3, %v734_v58, %v862_v56  ;;  %v927_v23 = vsel %vm799_vm4, %v735_v52, %v863_v43  ;;  %vm801_vm7 = vcmp.ge.f32.partialorder %v737_v50, 0.0  ;;  %v2729_v58 = vld [vmem:[#allocation18_spill] sm:$0xff]  ;;  %v2730_v43 = vld [vmem:[#allocation19_spill] sm:$0xff] }
 0x17f   : > { %1053 = vst.msk [vmem:[%s2316_s16 + $0xa4] sm:$0xf] %vm1011_vm5, %v988_v28  ;;  %v990_v18 = vpack.c.bf16 %v926_v33, %v926_v33  ;;  %v991_v30 = vpack.c.bf16 %v927_v23, %v927_v23  ;;  %v928_v37 = vsel %vm800_vm6, %v736_v40, %v864_v17  ;;  %v865_v0 = vmul.f32 0.2, %v737_v50 }
 0x180   : > { %1054 = vst.msk [vmem:[%s2316_s16 + $0xa8] sm:$0xf] %vm1011_vm5, %v989_v55  ;;  %v992_v10 = vpack.c.bf16 %v928_v37, %v928_v37  ;;  %v738_v57 = vmul.f32 %v2293_v29, %v2722_v21  ;;  %v739_v45 = vmul.f32 %v2293_v29, %v2159_v47  ;;  %v740_v44 = vmul.f32 %v2293_v29, %v2723_v51  ;;  %v2731_v55 = vld [vmem:[#allocation20_spill] sm:$0xff] }
 0x181   : > { %1055 = vst.msk [vmem:[%s2316_s16 + $0xac] sm:$0xf] %vm1011_vm5, %v990_v18  ;;  %v929_v2 = vsel %vm801_vm7, %v737_v50, %v865_v0  ;;  %v741_v48 = vmul.f32 %v2293_v29, %v2175_v14  ;;  %v742_v46 = vmul.f32 %v2293_v29, %v2724_v34  ;;  %v743_v1 = vmul.f32 %v2293_v29, %v2191_v42 }
 0x182   : > { %1056 = vst.msk [vmem:[%s2316_s16 + $0xb0] sm:$0xf] %vm1011_vm5, %v991_v30  ;;  %v993_v6 = vpack.c.bf16 %v929_v2, %v929_v2  ;;  %vm802_vm8 = vcmp.ge.f32.partialorder %v738_v57, 0.0  ;;  %v866_v47 = vmul.f32 0.2, %v738_v57  ;;  %vm803_vm9 = vcmp.ge.f32.partialorder %v739_v45, 0.0 }
 0x183   : > { %1057 = vst.msk [vmem:[%s2316_s16 + $0xb4] sm:$0xf] %vm1011_vm5, %v992_v10  ;;  %v867_v7 = vmul.f32 0.2, %v739_v45  ;;  %vm804_vm10 = vcmp.ge.f32.partialorder %v740_v44, 0.0  ;;  %vm805_vm11 = vcmp.ge.f32.partialorder %v741_v48, 0.0  ;;  %v744_v14 = vmul.f32 %v2293_v29, %v2725_v13 }
 0x184   : > { %1058 = vst.msk [vmem:[%s2316_s16 + $0xb8] sm:$0xf] %vm1011_vm5, %v993_v6  ;;  %v930_v36 = vsel %vm802_vm8, %v738_v57, %v866_v47  ;;  %v868_v25 = vmul.f32 0.2, %v740_v44  ;;  %v869_v42 = vmul.f32 0.2, %v741_v48  ;;  %v745_v5 = vmul.f32 %v2293_v29, %v2207_v63 }
 0x185   : > { %v994_v31 = vpack.c.bf16 %v930_v36, %v930_v36  ;;  %v931_v49 = vsel %vm803_vm9, %v739_v45, %v867_v7  ;;  %vm806_vm12 = vcmp.ge.f32.partialorder %v742_v46, 0.0  ;;  %v870_v39 = vmul.f32 0.2, %v742_v46  ;;  %v2732_v45 = vld [vmem:[#allocation21_spill] sm:$0xff] }
 0x186   : > { %v995_v54 = vpack.c.bf16 %v931_v49, %v931_v49  ;;  %v932_v62 = vsel %vm804_vm10, %v740_v44, %v868_v25  ;;  %v933_v60 = vsel %vm805_vm11, %v741_v48, %v869_v42  ;;  %vm807_vm13 = vcmp.ge.f32.partialorder %v743_v1, 0.0  ;;  %v2733_v44 = vld [vmem:[#allocation22_spill] sm:$0xff] }
 0x187   : > { %1059 = vst.msk [vmem:[%s2316_s16 + $0xbc] sm:$0xf] %vm1011_vm5, %v994_v31  ;;  %v996_v32 = vpack.c.bf16 %v932_v62, %v932_v62  ;;  %v997_v16 = vpack.c.bf16 %v933_v60, %v933_v60  ;;  %v934_v15 = vsel %vm806_vm12, %v742_v46, %v870_v39  ;;  %v871_v9 = vmul.f32 0.2, %v743_v1  ;;  %v2734_v46 = vld [vmem:[#allocation23_spill] sm:$0xff] }
 0x188   : > { %1060 = vst.msk [vmem:[%s2316_s16 + $0xc0] sm:$0xf] %vm1011_vm5, %v995_v54  ;;  %v998_v63 = vpack.c.bf16 %v934_v15, %v934_v15  ;;  %vm808_vm14 = vcmp.ge.f32.partialorder %v744_v14, 0.0  ;;  %v872_v27 = vmul.f32 0.2, %v744_v14  ;;  %vm809_vm15 = vcmp.ge.f32.partialorder %v745_v5, 0.0 }
 0x189   : > { %1061 = vst.msk [vmem:[%s2316_s16 + $0xc4] sm:$0xf] %vm1011_vm5, %v996_v32  ;;  %v935_v8 = vsel %vm807_vm13, %v743_v1, %v871_v9  ;;  %v873_v35 = vmul.f32 0.2, %v745_v5  ;;  %v746_v41 = vmul.f32 %v2293_v29, %v2726_v19  ;;  %v747_v3 = vmul.f32 %v2293_v29, %v2727_v24 }
 0x18a   : > { %1062 = vst.msk [vmem:[%s2316_s16 + $0xc8] sm:$0xf] %vm1011_vm5, %v997_v16  ;;  %v999_v61 = vpack.c.bf16 %v935_v8, %v935_v8  ;;  %v936_v4 = vsel %vm808_vm14, %v744_v14, %v872_v27  ;;  %v748_v12 = vmul.f32 %v2293_v29, %v2728_v20  ;;  %v749_v52 = vmul.f32 %v2293_v29, %v2729_v58 }
 0x18b   : > { %1063 = vst.msk [vmem:[%s2316_s16 + $0xcc] sm:$0xf] %vm1011_vm5, %v998_v63  ;;  %v1000_v53 = vpack.c.bf16 %v936_v4, %v936_v4  ;;  %v937_v59 = vsel %vm809_vm15, %v745_v5, %v873_v35  ;;  %vm810_vm0 = vcmp.ge.f32.partialorder %v746_v41, 0.0  ;;  %v874_v22 = vmul.f32 0.2, %v746_v41 }
 0x18c   : > { %1064 = vst.msk [vmem:[%s2316_s16 + $0xd0] sm:$0xf] %vm1011_vm5, %v999_v61  ;;  %v1001_v26 = vpack.c.bf16 %v937_v59, %v937_v59  ;;  %vm811_vm1 = vcmp.ge.f32.partialorder %v747_v3, 0.0  ;;  %v875_v40 = vmul.f32 0.2, %v747_v3  ;;  %vm812_vm2 = vcmp.ge.f32.partialorder %v748_v12, 0.0 }
 0x18d   : > { %1065 = vst.msk [vmem:[%s2316_s16 + $0xd4] sm:$0xf] %vm1011_vm5, %v1000_v53  ;;  %v938_v38 = vsel %vm810_vm0, %v746_v41, %v874_v22  ;;  %v876_v56 = vmul.f32 0.2, %v748_v12  ;;  %vm813_vm3 = vcmp.ge.f32.partialorder %v749_v52, 0.0  ;;  %v750_v50 = vmul.f32 %v2293_v29, %v2730_v43 }
 0x18e   : > { %1066 = vst.msk [vmem:[%s2316_s16 + $0xd8] sm:$0xf] %vm1011_vm5, %v1001_v26  ;;  %v1002_v28 = vpack.c.bf16 %v938_v38, %v938_v38  ;;  %v939_v11 = vsel %vm811_vm1, %v747_v3, %v875_v40  ;;  %v877_v17 = vmul.f32 0.2, %v749_v52  ;;  %v751_v33 = vmul.f32 %v2293_v29, %v2731_v55 }
 0x18f   : > { %v1003_v23 = vpack.c.bf16 %v939_v11, %v939_v11  ;;  %v940_v18 = vsel %vm812_vm2, %v748_v12, %v876_v56  ;;  %vm814_vm4 = vcmp.ge.f32.partialorder %v750_v50, 0.0  ;;  %v878_v30 = vmul.f32 0.2, %v750_v50 }
 0x190   : > { %1067 = vst.msk [vmem:[%s2316_s16 + $0xdc] sm:$0xf] %vm1011_vm5, %v1002_v28  ;;  %v1004_v37 = vpack.c.bf16 %v940_v18, %v940_v18  ;;  %v941_v0 = vsel %vm813_vm3, %v749_v52, %v877_v17  ;;  %vm815_vm6 = vcmp.ge.f32.partialorder %v751_v33, 0.0  ;;  %v879_v10 = vmul.f32 0.2, %v751_v33 }
 0x191   : > { %1068 = vst.msk [vmem:[%s2316_s16 + $0xe0] sm:$0xf] %vm1011_vm5, %v1003_v23  ;;  %v1005_v21 = vpack.c.bf16 %v941_v0, %v941_v0  ;;  %v942_v57 = vsel %vm814_vm4, %v750_v50, %v878_v30  ;;  %v752_v51 = vmul.f32 %v2293_v29, %v2732_v45  ;;  %v753_v2 = vmul.f32 %v2293_v29, %v2733_v44 }
 0x192   : > { %1069 = vst.msk [vmem:[%s2316_s16 + $0xe4] sm:$0xf] %vm1011_vm5, %v1004_v37  ;;  %v1006_v48 = vpack.c.bf16 %v942_v57, %v942_v57  ;;  %v943_v34 = vsel %vm815_vm6, %v751_v33, %v879_v10  ;;  %v754_v1 = vmul.f32 %v2293_v29, %v2734_v46 }
 0x193   : > { %1070 = vst.msk [vmem:[%s2316_s16 + $0xe8] sm:$0xf] %vm1011_vm5, %v1005_v21  ;;  %v1007_v6 = vpack.c.bf16 %v943_v34, %v943_v34  ;;  %vm816_vm7 = vcmp.ge.f32.partialorder %v752_v51, 0.0  ;;  %v880_v47 = vmul.f32 0.2, %v752_v51  ;;  %vm817_vm8 = vcmp.ge.f32.partialorder %v753_v2, 0.0 }
 0x194   : > { %1071 = vst.msk [vmem:[%s2316_s16 + $0xec] sm:$0xf] %vm1011_vm5, %v1006_v48  ;;  %v881_v7 = vmul.f32 0.2, %v753_v2  ;;  %vm818_vm9 = vcmp.ge.f32.partialorder %v754_v1, 0.0 }
 0x195   : > { %1072 = vst.msk [vmem:[%s2316_s16 + $0xf0] sm:$0xf] %vm1011_vm5, %v1007_v6  ;;  %v944_v13 = vsel %vm816_vm7, %v752_v51, %v880_v47  ;;  %v882_v14 = vmul.f32 0.2, %v754_v1 }
 0x196   : > { %v1008_v36 = vpack.c.bf16 %v944_v13, %v944_v13  ;;  %v945_v25 = vsel %vm817_vm8, %v753_v2, %v881_v7 }
 0x197   : > { %v1009_v29 = vpack.c.bf16 %v945_v25, %v945_v25  ;;  %v946_v42 = vsel %vm818_vm9, %v754_v1, %v882_v14 }
 0x198   : > { %1073 = vst.msk [vmem:[%s2316_s16 + $0xf4] sm:$0xf] %vm1011_vm5, %v1008_v36  ;;  %v1010_v5 = vpack.c.bf16 %v946_v42, %v946_v42 }
 0x199   : > { %1074 = vst.msk [vmem:[%s2316_s16 + $0xf8] sm:$0xf] %vm1011_vm5, %v1009_v29 }
 0x19a   : > { %1075 = vst.msk [vmem:[%s2316_s16 + $0xfc] sm:$0xf] %vm1011_vm5, %v1010_v5 }
 0x19b PF: > { %s11_s8 = sadd.s32 1, %s1382_s8   ;;  %s2735_s6 = smov %s1378_s7 }
 0x19c   : > { %p8_p5 = scmp.ge.s32.totalorder %s11_s8, 4   ;;  %s2736_s7 = smov %s2738_s9 }
 0x19e   :  { %10 = sbr.rel (!%p8_p5) target bundleno = 2 (0x2), region = 54 }

// kernel: _lambda_.9
= control target key start
LH: loop header
LB: loop body
LE: loop exit
PB: predicated region body
PF: predicated region fallthrough
CT: control target
= control target key end

     0   :  { %s3610_s12 = smov 0   ;;  %s3612_s13 = smov 0   ;;  %s4038_s0 = inlined_call_operand.vmem [shape: bf16[1024,512], index: 0, kind: input, shape index: {}]   ;;  %s4039_s1 = inlined_call_operand.vmem [shape: bf16[512,128], index: 1, kind: input, shape index: {}]   ;;  %s4040_s2 = inlined_call_operand.vmem [shape: f32[1,128], index: 2, kind: input, shape index: {}]   ;;  %s4041_s3 = inlined_call_operand.vmem [shape: bf16[1024,128], index: 3, kind: output, shape index: {}]  }
   0x1   :  { %s3614_s14 = smov 0  }
   0x2 LB: > { %s32_s2 = sadd.s32 1, %s3584_s13  ;;  %p2542_p0 = scmp.ge.s32.totalorder %s3588_s14, 1  ;;  %s3588_s14 = sphi %s3614_s14, %s13_s14   ;;  %s3584_s13 = sphi %s3612_s13, %s4043_s13   ;;  %s3580_s12 = sphi %s3610_s12, %s4042_s12  }
   0x3   : > { %p34_p1 = scmp.ge.s32.totalorder %s32_s2, 2  ;;  %p191_p2 = scmp.lt.s32.totalorder %s3588_s14, 3 }
   0x5   : > { %s4045_s2 = smov (%p34_p1, %s32_s2), 0  ;;  %p192_p3 = pnand %p2542_p0, %p191_p2 }
   0x6   : > { %s2543_s15 = sshll.u32 (!%p192_p3), %s3580_s12, 6 }
   0x7   : > { %195 = sbr.rel (%p192_p3) target bundleno = 689 (0x2b1), region = 32  ;;  %p236_p4 = scmp.lt.s32.totalorder (!%p192_p3), %s2543_s15, 127 }
   0xc   : > { %v3326_v0 = vld [vmem:[%s4039_s1 + $0x38] sm:$0xff]  ;;  %v3325_v4 = vld [vmem:[%s4039_s1 + $0x30] sm:$0xff]  ;;  %v3324_v8 = vld [vmem:[%s4039_s1 + $0x28] sm:$0xff]  ;;  %s4047_s15 = smov (!%p236_p4, %s2543_s15), 127 }
   0xd   : > { %v3334_v1 = vld [vmem:[%s4039_s1 + $0x78] sm:$0xff]  ;;  %1423 = vmatpush.bf16.msra.mxu0 %v3326_v0  ;;  %v3333_v5 = vld [vmem:[%s4039_s1 + $0x70] sm:$0xff]  ;;  %v3332_v9 = vld [vmem:[%s4039_s1 + $0x68] sm:$0xff]  ;;  %s3190_s16 = sshll.u32 %s4047_s15, 4  ;;  %s2547_s8 = sshll.u32 %s4047_s15, 2 }
   0xe   : > { %v3342_v2 = vld [vmem:[%s4039_s1 + $0xb8] sm:$0xff]  ;;  %1592 = vmatpush.bf16.msra.mxu1 %v3334_v1  ;;  %v3341_v6 = vld [vmem:[%s4039_s1 + $0xb0] sm:$0xff]  ;;  %v3340_v10 = vld [vmem:[%s4039_s1 + $0xa8] sm:$0xff]  ;;  %s3715_s23 = scalar_lea.vmem %s4038_s0, %s3190_s16  ;;  %s3819_s11 = scalar_lea.vmem %s4041_s3, %s2547_s8 }
   0xf   : > { %v3350_v3 = vld [vmem:[%s4039_s1 + $0xf8] sm:$0xff]  ;;  %1761 = vmatpush.bf16.msra.mxu2 %v3342_v2  ;;  %v3349_v7 = vld [vmem:[%s4039_s1 + $0xf0] sm:$0xff]  ;;  %v3348_v11 = vld [vmem:[%s4039_s1 + $0xe8] sm:$0xff] }
  0x10   : > { %1930 = vmatpush.bf16.msra.mxu3 %v3350_v3  ;;  %v3323_v12 = vld [vmem:[%s4039_s1 + $0x20] sm:$0xff]  ;;  %v3322_v16 = vld [vmem:[%s4039_s1 + $0x18] sm:$0xff]  ;;  %v3321_v20 = vld [vmem:[%s4039_s1 + $0x10] sm:$0xff] }
  0x11   : > { %1424 = vmatpush.bf16.msra.mxu0 %v3325_v4  ;;  %v3331_v13 = vld [vmem:[%s4039_s1 + $0x60] sm:$0xff]  ;;  %v3330_v17 = vld [vmem:[%s4039_s1 + $0x58] sm:$0xff]  ;;  %v3329_v21 = vld [vmem:[%s4039_s1 + $0x50] sm:$0xff] }
  0x12   : > { %1593 = vmatpush.bf16.msra.mxu1 %v3333_v5  ;;  %v3339_v14 = vld [vmem:[%s4039_s1 + $0xa0] sm:$0xff]  ;;  %v3338_v18 = vld [vmem:[%s4039_s1 + $0x98] sm:$0xff]  ;;  %v3337_v22 = vld [vmem:[%s4039_s1 + $0x90] sm:$0xff] }
  0x13   : > { %1762 = vmatpush.bf16.msra.mxu2 %v3341_v6  ;;  %v3347_v15 = vld [vmem:[%s4039_s1 + $0xe0] sm:$0xff]  ;;  %v3346_v19 = vld [vmem:[%s4039_s1 + $0xd8] sm:$0xff]  ;;  %v3345_v23 = vld [vmem:[%s4039_s1 + $0xd0] sm:$0xff] }
  0x14   : > { %1931 = vmatpush.bf16.msra.mxu3 %v3349_v7  ;;  %v3320_v24 = vld [vmem:[%s4039_s1 + $0x8] sm:$0xff]  ;;  %v3319_v28 = vld [vmem:[%s4039_s1] sm:$0xff]  ;;  %v3193_v33 = vld [vmem:[%s3715_s23 + $0xc] sm:$0xf0] }
  0x15   : > { %1425 = vmatpush.bf16.msra.mxu0 %v3324_v8  ;;  %v3328_v25 = vld [vmem:[%s4039_s1 + $0x48] sm:$0xff]  ;;  %v3327_v29 = vld [vmem:[%s4039_s1 + $0x40] sm:$0xff]  ;;  %v2552_v35 = vld [vmem:[%s3715_s23 + $0x10] sm:$0xf0] }
  0x16   : > { %1594 = vmatpush.bf16.msra.mxu1 %v3332_v9  ;;  %v3336_v26 = vld [vmem:[%s4039_s1 + $0x88] sm:$0xff]  ;;  %v3335_v30 = vld [vmem:[%s4039_s1 + $0x80] sm:$0xff]  ;;  %v3194_v37 = vld [vmem:[%s3715_s23 + $0x14] sm:$0xf0] }
  0x17   : > { %1763 = vmatpush.bf16.msra.mxu2 %v3340_v10  ;;  %v3344_v27 = vld [vmem:[%s4039_s1 + $0xc8] sm:$0xff]  ;;  %v3343_v31 = vld [vmem:[%s4039_s1 + $0xc0] sm:$0xff]  ;;  %v2560_v39 = vld [vmem:[%s3715_s23 + $0x18] sm:$0xf0] }
  0x18   : > { %1932 = vmatpush.bf16.msra.mxu3 %v3348_v11  ;;  %v2550_v32 = vld [vmem:[%s3715_s23] sm:$0xf]  ;;  %v3191_v34 = vld [vmem:[%s3715_s23 + $0x4] sm:$0xf]  ;;  %v2558_v36 = vld [vmem:[%s3715_s23 + $0x8] sm:$0xf] }
  0x19   : > { %1426 = vmatpush.bf16.msra.mxu0 %v3323_v12  ;;  %v3192_v38 = vld [vmem:[%s3715_s23 + $0xc] sm:$0xf]  ;;  %v2551_v40 = vor.u32 %v3193_v33, %v2550_v32  ;;  %v2555_v41 = vor.u32 %v3191_v34, %v2552_v35  ;;  %v2559_v42 = vor.u32 %v3194_v37, %v2558_v36  ;;  %v2566_v44 = vld [vmem:[%s3715_s23 + $0x20] sm:$0xf]  ;;  %v3197_v45 = vld [vmem:[%s3715_s23 + $0x2c] sm:$0xf0] }
  0x1a   : > { %1595 = vmatpush.bf16.msra.mxu1 %v3331_v13  ;;  %v2563_v43 = vor.u32 %v3192_v38, %v2560_v39  ;;  %v3195_v46 = vld [vmem:[%s3715_s23 + $0x24] sm:$0xf]  ;;  %v2568_v47 = vld [vmem:[%s3715_s23 + $0x30] sm:$0xf0]  ;;  %v2574_v48 = vld [vmem:[%s3715_s23 + $0x28] sm:$0xf]  ;;  %v2567_v52 = vor.u32 %v3197_v45, %v2566_v44 }
  0x1b   : > { %1764 = vmatpush.bf16.msra.mxu2 %v3339_v14  ;;  %v3198_v49 = vld [vmem:[%s3715_s23 + $0x34] sm:$0xf0]  ;;  %v3196_v50 = vld [vmem:[%s3715_s23 + $0x2c] sm:$0xf]  ;;  %v2576_v51 = vld [vmem:[%s3715_s23 + $0x38] sm:$0xf0]  ;;  %v2571_v53 = vor.u32 %v3195_v46, %v2568_v47 }
  0x1c   : > { %1933 = vmatpush.bf16.msra.mxu3 %v3347_v15  ;;  %v2575_v54 = vor.u32 %v3198_v49, %v2574_v48  ;;  %v2579_v55 = vor.u32 %v3196_v50, %v2576_v51  ;;  %v2582_v56 = vld [vmem:[%s3715_s23 + $0x40] sm:$0xf]  ;;  %v3201_v57 = vld [vmem:[%s3715_s23 + $0x4c] sm:$0xf0]  ;;  %v3199_v58 = vld [vmem:[%s3715_s23 + $0x44] sm:$0xf] }
  0x1d   : > { %1427 = vmatpush.bf16.msra.mxu0 %v3322_v16  ;;  %v2584_v59 = vld [vmem:[%s3715_s23 + $0x50] sm:$0xf0]  ;;  %v2590_v60 = vld [vmem:[%s3715_s23 + $0x48] sm:$0xf]  ;;  %v3202_v61 = vld [vmem:[%s3715_s23 + $0x54] sm:$0xf0]  ;;  %v2583_v0 = vor.u32 %v3201_v57, %v2582_v56 }
  0x1e   : > { %1596 = vmatpush.bf16.msra.mxu1 %v3330_v17  ;;  %v3200_v62 = vld [vmem:[%s3715_s23 + $0x4c] sm:$0xf]  ;;  %v2592_v63 = vld [vmem:[%s3715_s23 + $0x58] sm:$0xf0]  ;;  %v2587_v1 = vor.u32 %v3199_v58, %v2584_v59  ;;  %v2591_v2 = vor.u32 %v3202_v61, %v2590_v60  ;;  %v2598_v4 = vld [vmem:[%s3715_s23 + $0x60] sm:$0xf] }
  0x1f   : > { %1765 = vmatpush.bf16.msra.mxu2 %v3338_v18  ;;  %v2595_v3 = vor.u32 %v3200_v62, %v2592_v63  ;;  %v3205_v5 = vld [vmem:[%s3715_s23 + $0x6c] sm:$0xf0]  ;;  %v3203_v6 = vld [vmem:[%s3715_s23 + $0x64] sm:$0xf]  ;;  %v2600_v7 = vld [vmem:[%s3715_s23 + $0x70] sm:$0xf0] }
  0x20   : > { %1934 = vmatpush.bf16.msra.mxu3 %v3346_v19  ;;  %v2606_v8 = vld [vmem:[%s3715_s23 + $0x68] sm:$0xf]  ;;  %v3206_v9 = vld [vmem:[%s3715_s23 + $0x74] sm:$0xf0]  ;;  %v3204_v10 = vld [vmem:[%s3715_s23 + $0x6c] sm:$0xf]  ;;  %v2599_v12 = vor.u32 %v3205_v5, %v2598_v4  ;;  %v2603_v13 = vor.u32 %v3203_v6, %v2600_v7 }
  0x21   : > { %1428 = vmatpush.bf16.msra.mxu0 %v3321_v20  ;;  %v2608_v11 = vld [vmem:[%s3715_s23 + $0x78] sm:$0xf0]  ;;  %v2607_v14 = vor.u32 %v3206_v9, %v2606_v8  ;;  %v2614_v16 = vld [vmem:[%s3715_s23 + $0x80] sm:$0xf]  ;;  %v3209_v17 = vld [vmem:[%s3715_s23 + $0x8c] sm:$0xf0] }
  0x22   : > { %1597 = vmatpush.bf16.msra.mxu1 %v3329_v21  ;;  %v2611_v15 = vor.u32 %v3204_v10, %v2608_v11  ;;  %v3207_v18 = vld [vmem:[%s3715_s23 + $0x84] sm:$0xf]  ;;  %v2616_v19 = vld [vmem:[%s3715_s23 + $0x90] sm:$0xf0]  ;;  %v2622_v20 = vld [vmem:[%s3715_s23 + $0x88] sm:$0xf] }
  0x23   : > { %1766 = vmatpush.bf16.msra.mxu2 %v3337_v22  ;;  %v3210_v21 = vld [vmem:[%s3715_s23 + $0x94] sm:$0xf0]  ;;  %v3208_v22 = vld [vmem:[%s3715_s23 + $0x8c] sm:$0xf]  ;;  %v2638_v32 = vld [vmem:[%s3715_s23 + $0xa8] sm:$0xf] }
  0x24   : > { %1935 = vmatpush.bf16.msra.mxu3 %v3345_v23  ;;  %v2624_v23 = vld [vmem:[%s3715_s23 + $0x98] sm:$0xf0]  ;;  %v3214_v33 = vld [vmem:[%s3715_s23 + $0xb4] sm:$0xf0]  ;;  %v3212_v34 = vld [vmem:[%s3715_s23 + $0xac] sm:$0xf] }
  0x25   : > { %1429 = vmatpush.bf16.msra.mxu0 %v3320_v24  ;;  %v2615_v24 = vor.u32 %v3209_v17, %v2614_v16  ;;  %v2640_v35 = vld [vmem:[%s3715_s23 + $0xb8] sm:$0xf0]  ;;  %v2639_v38 = vor.u32 %v3214_v33, %v2638_v32  ;;  %v2654_v44 = vld [vmem:[%s3715_s23 + $0xc8] sm:$0xf]  ;;  %v3218_v45 = vld [vmem:[%s3715_s23 + $0xd4] sm:$0xf0] }
  0x26   : > { %1598 = vmatpush.bf16.msra.mxu1 %v3328_v25  ;;  %v2619_v25 = vor.u32 %v3207_v18, %v2616_v19  ;;  %v2643_v39 = vor.u32 %v3212_v34, %v2640_v35  ;;  %v3216_v46 = vld [vmem:[%s3715_s23 + $0xcc] sm:$0xf]  ;;  %v2656_v47 = vld [vmem:[%s3715_s23 + $0xd8] sm:$0xf0]  ;;  %v2655_v50 = vor.u32 %v3218_v45, %v2654_v44  ;;  %v2670_v56 = vld [vmem:[%s3715_s23 + $0xe8] sm:$0xf] }
  0x27   : > { %1767 = vmatpush.bf16.msra.mxu2 %v3336_v26  ;;  %v2623_v26 = vor.u32 %v3210_v21, %v2622_v20  ;;  %v2659_v51 = vor.u32 %v3216_v46, %v2656_v47  ;;  %v3222_v57 = vld [vmem:[%s3715_s23 + $0xf4] sm:$0xf0]  ;;  %v3220_v58 = vld [vmem:[%s3715_s23 + $0xec] sm:$0xf]  ;;  %v2672_v59 = vld [vmem:[%s3715_s23 + $0xf8] sm:$0xf0] }
  0x28   : > { %1936 = vmatpush.bf16.msra.mxu3 %v3344_v27  ;;  %v2627_v27 = vor.u32 %v3208_v22, %v2624_v23  ;;  %v2671_v62 = vor.u32 %v3222_v57, %v2670_v56  ;;  %v2675_v63 = vor.u32 %v3220_v58, %v2672_v59  ;;  %v2686_v4 = vld [vmem:[%s3715_s23 + $0x108] sm:$0xf]  ;;  %v3226_v5 = vld [vmem:[%s3715_s23 + $0x114] sm:$0xf0]  ;;  %v3224_v6 = vld [vmem:[%s3715_s23 + $0x10c] sm:$0xf] }
  0x29   : > { %1430 = vmatpush.bf16.msra.mxu0 %v3319_v28  ;;  %v2630_v28 = vld [vmem:[%s3715_s23 + $0xa0] sm:$0xf]  ;;  %v2688_v7 = vld [vmem:[%s3715_s23 + $0x118] sm:$0xf0]  ;;  %v3229_v20 = vld [vmem:[%s3715_s23 + $0x12c] sm:$0xf0] }
  0x2a   : > { %1599 = vmatpush.bf16.msra.mxu1 %v3327_v29  ;;  %v3213_v29 = vld [vmem:[%s3715_s23 + $0xac] sm:$0xf0]  ;;  %v2694_v19 = vld [vmem:[%s3715_s23 + $0x120] sm:$0xf]  ;;  %v3227_v21 = vld [vmem:[%s3715_s23 + $0x124] sm:$0xf] }
  0x2b   : > { %1768 = vmatpush.bf16.msra.mxu2 %v3335_v30  ;;  %v3211_v30 = vld [vmem:[%s3715_s23 + $0xa4] sm:$0xf]  ;;  %v2631_v36 = vor.u32 %v3213_v29, %v2630_v28  ;;  %v2696_v22 = vld [vmem:[%s3715_s23 + $0x130] sm:$0xf0]  ;;  %v2702_v23 = vld [vmem:[%s3715_s23 + $0x128] sm:$0xf] }
  0x2c   : > { %1937 = vmatpush.bf16.msra.mxu3 %v3343_v31  ;;  %1431 = vmatmul.bf16.vlgmr.msra.gmra.mxu0 %v2551_v40  ;;  %v2632_v31 = vld [vmem:[%s3715_s23 + $0xb0] sm:$0xf0]  ;;  %v2646_v40 = vld [vmem:[%s3715_s23 + $0xc0] sm:$0xf]  ;;  %v2699_v32 = vor.u32 %v3227_v21, %v2696_v22  ;;  %v3233_v47 = vld [vmem:[%s3715_s23 + $0x14c] sm:$0xf0] }
  0x2d   : > { %1600 = vmatmul.bf16.vlgmr.msra.gmra.mxu1 %v2555_v41  ;;  %v2635_v37 = vor.u32 %v3211_v30, %v2632_v31  ;;  %v3217_v41 = vld [vmem:[%s3715_s23 + $0xcc] sm:$0xf0]  ;;  %v2695_v31 = vor.u32 %v3229_v20, %v2694_v19  ;;  %v2710_v46 = vld [vmem:[%s3715_s23 + $0x140] sm:$0xf] }
  0x2e   : > { %1769 = vmatmul.bf16.vlgmr.msra.gmra.mxu2 %v2559_v42  ;;  %v3215_v42 = vld [vmem:[%s3715_s23 + $0xc4] sm:$0xf]  ;;  %v2647_v48 = vor.u32 %v3217_v41, %v2646_v40  ;;  %v2711_v58 = vor.u32 %v3233_v47, %v2710_v46 }
  0x2f   : > { %1938 = vmatmul.bf16.vlgmr.msra.gmra.mxu3 %v2563_v43  ;;  %v2648_v43 = vld [vmem:[%s3715_s23 + $0xd0] sm:$0xf0] }
  0x30   : > { %v2651_v49 = vor.u32 %v3215_v42, %v2648_v43 }
  0x3c   : > { %1436 = vmatmul.bf16.gmra.mxu0 %v2567_v52  ;;  %v2662_v52 = vld [vmem:[%s3715_s23 + $0xe0] sm:$0xf] }
  0x3d   : > { %1605 = vmatmul.bf16.gmra.mxu1 %v2571_v53  ;;  %v3221_v53 = vld [vmem:[%s3715_s23 + $0xec] sm:$0xf0] }
  0x3e   : > { %1774 = vmatmul.bf16.gmra.mxu2 %v2575_v54  ;;  %v3219_v54 = vld [vmem:[%s3715_s23 + $0xe4] sm:$0xf]  ;;  %v2663_v60 = vor.u32 %v3221_v53, %v2662_v52  ;;  %v3232_v52 = vld [vmem:[%s3715_s23 + $0x14c] sm:$0xf]  ;;  %v2720_v53 = vld [vmem:[%s3715_s23 + $0x158] sm:$0xf0] }
  0x3f   : > { %1943 = vmatmul.bf16.gmra.mxu3 %v2579_v55  ;;  %v2664_v55 = vld [vmem:[%s3715_s23 + $0xf0] sm:$0xf0] }
  0x40   : > { %v2667_v61 = vor.u32 %v3219_v54, %v2664_v55 }
  0x4c   : > { %1441 = vmatmul.bf16.gmra.mxu0 %v2583_v0  ;;  %v2678_v0 = vld [vmem:[%s3715_s23 + $0x100] sm:$0xf] }
  0x4d   : > { %1610 = vmatmul.bf16.gmra.mxu1 %v2587_v1  ;;  %v3225_v1 = vld [vmem:[%s3715_s23 + $0x10c] sm:$0xf0] }
  0x4e   : > { %1779 = vmatmul.bf16.gmra.mxu2 %v2591_v2  ;;  %v3223_v2 = vld [vmem:[%s3715_s23 + $0x104] sm:$0xf]  ;;  %v2679_v8 = vor.u32 %v3225_v1, %v2678_v0  ;;  %v2723_v0 = vor.u32 %v3232_v52, %v2720_v53 }
  0x4f   : > { %1948 = vmatmul.bf16.gmra.mxu3 %v2595_v3  ;;  %v2680_v3 = vld [vmem:[%s3715_s23 + $0x110] sm:$0xf0] }
  0x50   : > { %v2683_v9 = vor.u32 %v3223_v2, %v2680_v3 }
  0x5c   : > { %1446 = vmatmul.bf16.gmra.mxu0 %v2599_v12  ;;  %v2687_v12 = vor.u32 %v3226_v5, %v2686_v4 }
  0x5d   : > { %1615 = vmatmul.bf16.gmra.mxu1 %v2603_v13  ;;  %v2691_v13 = vor.u32 %v3224_v6, %v2688_v7 }
  0x5e   : > { %1784 = vmatmul.bf16.gmra.mxu2 %v2607_v14 }
  0x5f   : > { %1953 = vmatmul.bf16.gmra.mxu3 %v2611_v15 }
  0x6c   : > { %1451 = vmatmul.bf16.gmra.mxu0 %v2615_v24  ;;  %v3230_v24 = vld [vmem:[%s3715_s23 + $0x134] sm:$0xf0] }
  0x6d   : > { %1620 = vmatmul.bf16.gmra.mxu1 %v2619_v25  ;;  %v3228_v25 = vld [vmem:[%s3715_s23 + $0x12c] sm:$0xf] }
  0x6e   : > { %1789 = vmatmul.bf16.gmra.mxu2 %v2623_v26  ;;  %v2704_v26 = vld [vmem:[%s3715_s23 + $0x138] sm:$0xf0] }
  0x6f   : > { %1958 = vmatmul.bf16.gmra.mxu3 %v2627_v27 }
  0x7c   : > { %1456 = vmatmul.bf16.gmra.mxu0 %v2631_v36  ;;  %v2703_v36 = vor.u32 %v3230_v24, %v2702_v23 }
  0x7d   : > { %1625 = vmatmul.bf16.gmra.mxu1 %v2635_v37  ;;  %v2707_v37 = vor.u32 %v3228_v25, %v2704_v26 }
  0x7e   : > { %1794 = vmatmul.bf16.gmra.mxu2 %v2639_v38 }
  0x7f   : > { %1963 = vmatmul.bf16.gmra.mxu3 %v2643_v39 }
  0x8c   : > { %1461 = vmatmul.bf16.gmra.mxu0 %v2647_v48  ;;  %v3231_v48 = vld [vmem:[%s3715_s23 + $0x144] sm:$0xf] }
  0x8d   : > { %1630 = vmatmul.bf16.gmra.mxu1 %v2651_v49  ;;  %v2712_v49 = vld [vmem:[%s3715_s23 + $0x150] sm:$0xf0] }
  0x8e   : > { %1799 = vmatmul.bf16.gmra.mxu2 %v2655_v50  ;;  %v2718_v50 = vld [vmem:[%s3715_s23 + $0x148] sm:$0xf]  ;;  %v2715_v59 = vor.u32 %v3231_v48, %v2712_v49 }
  0x8f   : > { %1968 = vmatmul.bf16.gmra.mxu3 %v2659_v51  ;;  %v3234_v51 = vld [vmem:[%s3715_s23 + $0x154] sm:$0xf0] }
  0x9c   : > { %1466 = vmatmul.bf16.gmra.mxu0 %v2663_v60 }
  0x9d   : > { %1635 = vmatmul.bf16.gmra.mxu1 %v2667_v61 }
  0x9e   : > { %1804 = vmatmul.bf16.gmra.mxu2 %v2671_v62 }
  0x9f   : > { %1973 = vmatmul.bf16.gmra.mxu3 %v2675_v63  ;;  %v2719_v63 = vor.u32 %v3234_v51, %v2718_v50 }
  0xa9   : > { %v1432_v10 = vpop.f32.mrf.mxu0 }
  0xaa   : > { %v1601_v11 = vpop.f32.mrf.mxu1 }
  0xab   : > { %v1602_v18 = vadd.f32 %v1601_v11, %v1432_v10  ;;  %v3237_v10 = vld [vmem:[%s3715_s23 + $0x16c] sm:$0xf0]  ;;  %v3235_v11 = vld [vmem:[%s3715_s23 + $0x164] sm:$0xf] }
  0xac   : > { %1471 = vmatmul.bf16.gmra.mxu0 %v2679_v8 }
  0xad   : > { %1640 = vmatmul.bf16.gmra.mxu1 %v2683_v9  ;;  %v2726_v9 = vld [vmem:[%s3715_s23 + $0x160] sm:$0xf] }
  0xae   : > { %1809 = vmatmul.bf16.gmra.mxu2 %v2687_v12  ;;  %v2728_v12 = vld [vmem:[%s3715_s23 + $0x170] sm:$0xf0]  ;;  %v2727_v21 = vor.u32 %v3237_v10, %v2726_v9 }
  0xaf   : > { %1978 = vmatmul.bf16.gmra.mxu3 %v2691_v13  ;;  %v2734_v13 = vld [vmem:[%s3715_s23 + $0x168] sm:$0xf]  ;;  %v2731_v22 = vor.u32 %v3235_v11, %v2728_v12 }
  0xb1   : > { %v1770_v14 = vpop.f32.mrf.mxu2  ;;  %v1434_v16 = vpop.f32.mrf.mxu0 }
  0xb2   : > { %v1939_v15 = vpop.f32.mrf.mxu3  ;;  %v1603_v17 = vpop.f32.mrf.mxu1  ;;  %v1771_v27 = vadd.f32 %v1770_v14, %v1602_v18  ;;  %v3238_v14 = vld [vmem:[%s3715_s23 + $0x174] sm:$0xf0] }
  0xb3   : > { %v1604_v28 = vadd.f32 %v1603_v17, %v1434_v16  ;;  %v2736_v16 = vld [vmem:[%s3715_s23 + $0x178] sm:$0xf0]  ;;  %v2735_v26 = vor.u32 %v3238_v14, %v2734_v13 }
  0xb4   : > { %v1940_v38 = vadd.f32 %v1939_v15, %v1771_v27  ;;  %v3236_v15 = vld [vmem:[%s3715_s23 + $0x16c] sm:$0xf] }
  0xb5   : > { %v2739_v27 = vor.u32 %v3236_v15, %v2736_v16 }
  0xb9   : > { %v1772_v29 = vpop.f32.mrf.mxu2  ;;  %v1437_v34 = vpop.f32.mrf.mxu0 }
  0xba   : > { %v1941_v30 = vpop.f32.mrf.mxu3  ;;  %v1773_v33 = vadd.f32 %v1772_v29, %v1604_v28  ;;  %v1606_v35 = vpop.f32.mrf.mxu1 }
  0xbb   : > { %v1607_v45 = vadd.f32 %v1606_v35, %v1437_v34 }
  0xbc   : > { %v1942_v39 = vadd.f32 %v1941_v30, %v1773_v33  ;;  %1476 = vmatmul.bf16.gmra.mxu0 %v2695_v31 }
  0xbd   : > { %1645 = vmatmul.bf16.gmra.mxu1 %v2699_v32 }
  0xbe   : > { %v3354_v40 = vpack.c.bf16 %v1942_v39, %v1940_v38  ;;  %1814 = vmatmul.bf16.gmra.mxu2 %v2703_v36  ;;  %v2742_v36 = vld [vmem:[%s3715_s23 + $0x180] sm:$0xf]  ;;  %v3239_v38 = vld [vmem:[%s3715_s23 + $0x184] sm:$0xf]  ;;  %v2744_v39 = vld [vmem:[%s3715_s23 + $0x190] sm:$0xf0] }
  0xbf   : > { %1983 = vmatmul.bf16.gmra.mxu3 %v2707_v37  ;;  %v3241_v37 = vld [vmem:[%s3715_s23 + $0x18c] sm:$0xf0]  ;;  %v2747_v49 = vor.u32 %v3239_v38, %v2744_v39 }
  0xc0   : > { %3355 = vst [vmem:[%s3819_s11] sm:$0xff] %v3354_v40   ;;  %v2750_v40 = vld [vmem:[%s3715_s23 + $0x188] sm:$0xf]  ;;  %v2743_v48 = vor.u32 %v3241_v37, %v2742_v36 }
  0xc1   : > { %v1775_v41 = vpop.f32.mrf.mxu2  ;;  %v1439_v43 = vpop.f32.mrf.mxu0 }
  0xc2   : > { %v1944_v42 = vpop.f32.mrf.mxu3  ;;  %v1608_v44 = vpop.f32.mrf.mxu1  ;;  %v1776_v54 = vadd.f32 %v1775_v41, %v1607_v45  ;;  %v3242_v41 = vld [vmem:[%s3715_s23 + $0x194] sm:$0xf0] }
  0xc3   : > { %v1609_v55 = vadd.f32 %v1608_v44, %v1439_v43  ;;  %v2752_v43 = vld [vmem:[%s3715_s23 + $0x198] sm:$0xf0]  ;;  %v2751_v53 = vor.u32 %v3242_v41, %v2750_v40 }
  0xc4   : > { %v1945_v1 = vadd.f32 %v1944_v42, %v1776_v54  ;;  %v3240_v42 = vld [vmem:[%s3715_s23 + $0x18c] sm:$0xf] }
  0xc5   : > { %v2755_v54 = vor.u32 %v3240_v42, %v2752_v43 }
  0xc9   : > { %v1777_v56 = vpop.f32.mrf.mxu2  ;;  %v1442_v61 = vpop.f32.mrf.mxu0 }
  0xca   : > { %v1946_v57 = vpop.f32.mrf.mxu3  ;;  %v1778_v60 = vadd.f32 %v1777_v56, %v1609_v55  ;;  %v1611_v62 = vpop.f32.mrf.mxu1 }
  0xcb   : > { %v1612_v8 = vadd.f32 %v1611_v62, %v1442_v61 }
  0xcc   : > { %v1947_v2 = vadd.f32 %v1946_v57, %v1778_v60  ;;  %1481 = vmatmul.bf16.gmra.mxu0 %v2711_v58 }
  0xcd   : > { %1650 = vmatmul.bf16.gmra.mxu1 %v2715_v59 }
  0xce   : > { %v3359_v3 = vpack.c.bf16 %v1947_v2, %v1945_v1  ;;  %1819 = vmatmul.bf16.gmra.mxu2 %v2719_v63  ;;  %v2758_v63 = vld [vmem:[%s3715_s23 + $0x1a0] sm:$0xf]  ;;  %v3243_v1 = vld [vmem:[%s3715_s23 + $0x1a4] sm:$0xf]  ;;  %v2760_v2 = vld [vmem:[%s3715_s23 + $0x1b0] sm:$0xf0] }
  0xcf   : > { %1988 = vmatmul.bf16.gmra.mxu3 %v2723_v0  ;;  %v3245_v0 = vld [vmem:[%s3715_s23 + $0x1ac] sm:$0xf0]  ;;  %v2763_v12 = vor.u32 %v3243_v1, %v2760_v2 }
  0xd0   : > { %3511 = vst [vmem:[%s3819_s11 + $0x8] sm:$0xff] %v3359_v3   ;;  %v2766_v3 = vld [vmem:[%s3715_s23 + $0x1a8] sm:$0xf]  ;;  %v2759_v11 = vor.u32 %v3245_v0, %v2758_v63 }
  0xd1   : > { %v1780_v4 = vpop.f32.mrf.mxu2  ;;  %v1444_v6 = vpop.f32.mrf.mxu0 }
  0xd2   : > { %v1949_v5 = vpop.f32.mrf.mxu3  ;;  %v1613_v7 = vpop.f32.mrf.mxu1  ;;  %v1781_v17 = vadd.f32 %v1780_v4, %v1612_v8  ;;  %v3246_v4 = vld [vmem:[%s3715_s23 + $0x1b4] sm:$0xf0] }
  0xd3   : > { %v1614_v18 = vadd.f32 %v1613_v7, %v1444_v6  ;;  %v2768_v6 = vld [vmem:[%s3715_s23 + $0x1b8] sm:$0xf0]  ;;  %v2767_v16 = vor.u32 %v3246_v4, %v2766_v3 }
  0xd4   : > { %v1950_v28 = vadd.f32 %v1949_v5, %v1781_v17  ;;  %v3244_v5 = vld [vmem:[%s3715_s23 + $0x1ac] sm:$0xf] }
  0xd5   : > { %v2771_v17 = vor.u32 %v3244_v5, %v2768_v6 }
  0xd9   : > { %v1782_v19 = vpop.f32.mrf.mxu2  ;;  %v1447_v24 = vpop.f32.mrf.mxu0 }
  0xda   : > { %v1951_v20 = vpop.f32.mrf.mxu3  ;;  %v1783_v23 = vadd.f32 %v1782_v19, %v1614_v18  ;;  %v1616_v25 = vpop.f32.mrf.mxu1 }
  0xdb   : > { %v1617_v35 = vadd.f32 %v1616_v25, %v1447_v24 }
  0xdc   : > { %v1952_v29 = vadd.f32 %v1951_v20, %v1783_v23  ;;  %1486 = vmatmul.bf16.gmra.mxu0 %v2727_v21 }
  0xdd   : > { %1655 = vmatmul.bf16.gmra.mxu1 %v2731_v22 }
  0xde   : > { %v3364_v30 = vpack.c.bf16 %v1952_v29, %v1950_v28  ;;  %1824 = vmatmul.bf16.gmra.mxu2 %v2735_v26  ;;  %v2774_v26 = vld [vmem:[%s3715_s23 + $0x1c0] sm:$0xf]  ;;  %v3247_v28 = vld [vmem:[%s3715_s23 + $0x1c4] sm:$0xf]  ;;  %v2776_v29 = vld [vmem:[%s3715_s23 + $0x1d0] sm:$0xf0] }
  0xdf   : > { %1993 = vmatmul.bf16.gmra.mxu3 %v2739_v27  ;;  %v3249_v27 = vld [vmem:[%s3715_s23 + $0x1cc] sm:$0xf0]  ;;  %v2779_v39 = vor.u32 %v3247_v28, %v2776_v29 }
  0xe0   : > { %3512 = vst [vmem:[%s3819_s11 + $0x10] sm:$0xff] %v3364_v30   ;;  %v2782_v30 = vld [vmem:[%s3715_s23 + $0x1c8] sm:$0xf]  ;;  %v2775_v38 = vor.u32 %v3249_v27, %v2774_v26 }
  0xe1   : > { %v1785_v31 = vpop.f32.mrf.mxu2  ;;  %v1449_v33 = vpop.f32.mrf.mxu0 }
  0xe2   : > { %v1954_v32 = vpop.f32.mrf.mxu3  ;;  %v1618_v34 = vpop.f32.mrf.mxu1  ;;  %v1786_v44 = vadd.f32 %v1785_v31, %v1617_v35  ;;  %v3250_v31 = vld [vmem:[%s3715_s23 + $0x1d4] sm:$0xf0] }
  0xe3   : > { %v1619_v45 = vadd.f32 %v1618_v34, %v1449_v33  ;;  %v2784_v33 = vld [vmem:[%s3715_s23 + $0x1d8] sm:$0xf0]  ;;  %v2783_v43 = vor.u32 %v3250_v31, %v2782_v30 }
  0xe4   : > { %v1955_v55 = vadd.f32 %v1954_v32, %v1786_v44  ;;  %v3248_v32 = vld [vmem:[%s3715_s23 + $0x1cc] sm:$0xf] }
  0xe5   : > { %v2787_v44 = vor.u32 %v3248_v32, %v2784_v33 }
  0xe9   : > { %v1787_v46 = vpop.f32.mrf.mxu2  ;;  %v1452_v51 = vpop.f32.mrf.mxu0 }
  0xea   : > { %v1956_v47 = vpop.f32.mrf.mxu3  ;;  %v1788_v50 = vadd.f32 %v1787_v46, %v1619_v45  ;;  %v1621_v52 = vpop.f32.mrf.mxu1 }
  0xeb   : > { %v1622_v62 = vadd.f32 %v1621_v52, %v1452_v51 }
  0xec   : > { %v1957_v56 = vadd.f32 %v1956_v47, %v1788_v50  ;;  %1491 = vmatmul.bf16.gmra.mxu0 %v2743_v48 }
  0xed   : > { %1660 = vmatmul.bf16.gmra.mxu1 %v2747_v49 }
  0xee   : > { %v3369_v57 = vpack.c.bf16 %v1957_v56, %v1955_v55  ;;  %1829 = vmatmul.bf16.gmra.mxu2 %v2751_v53  ;;  %v2790_v53 = vld [vmem:[%s3715_s23 + $0x1e0] sm:$0xf]  ;;  %v3251_v55 = vld [vmem:[%s3715_s23 + $0x1e4] sm:$0xf]  ;;  %v2792_v56 = vld [vmem:[%s3715_s23 + $0x1f0] sm:$0xf0] }
  0xef   : > { %1998 = vmatmul.bf16.gmra.mxu3 %v2755_v54  ;;  %v3253_v54 = vld [vmem:[%s3715_s23 + $0x1ec] sm:$0xf0]  ;;  %v2795_v2 = vor.u32 %v3251_v55, %v2792_v56 }
  0xf0   : > { %3513 = vst [vmem:[%s3819_s11 + $0x18] sm:$0xff] %v3369_v57   ;;  %v2798_v57 = vld [vmem:[%s3715_s23 + $0x1e8] sm:$0xf]  ;;  %v2791_v1 = vor.u32 %v3253_v54, %v2790_v53 }
  0xf1   : > { %v1790_v58 = vpop.f32.mrf.mxu2  ;;  %v1454_v60 = vpop.f32.mrf.mxu0 }
  0xf2   : > { %v1959_v59 = vpop.f32.mrf.mxu3  ;;  %v1623_v61 = vpop.f32.mrf.mxu1  ;;  %v1791_v7 = vadd.f32 %v1790_v58, %v1622_v62  ;;  %v3254_v58 = vld [vmem:[%s3715_s23 + $0x1f4] sm:$0xf0] }
  0xf3   : > { %v1624_v8 = vadd.f32 %v1623_v61, %v1454_v60  ;;  %v2800_v60 = vld [vmem:[%s3715_s23 + $0x1f8] sm:$0xf0]  ;;  %v2799_v6 = vor.u32 %v3254_v58, %v2798_v57 }
  0xf4   : > { %v1960_v18 = vadd.f32 %v1959_v59, %v1791_v7  ;;  %v3252_v59 = vld [vmem:[%s3715_s23 + $0x1ec] sm:$0xf] }
  0xf5   : > { %v2803_v7 = vor.u32 %v3252_v59, %v2800_v60 }
  0xf9   : > { %v1792_v9 = vpop.f32.mrf.mxu2  ;;  %v1457_v14 = vpop.f32.mrf.mxu0 }
  0xfa   : > { %v1961_v10 = vpop.f32.mrf.mxu3  ;;  %v1793_v13 = vadd.f32 %v1792_v9, %v1624_v8  ;;  %v1626_v15 = vpop.f32.mrf.mxu1 }
  0xfb   : > { %v1627_v25 = vadd.f32 %v1626_v15, %v1457_v14 }
  0xfc   : > { %v1962_v19 = vadd.f32 %v1961_v10, %v1793_v13  ;;  %1496 = vmatmul.bf16.gmra.mxu0 %v2759_v11 }
  0xfd   : > { %1665 = vmatmul.bf16.gmra.mxu1 %v2763_v12 }
  0xfe   : > { %v3374_v20 = vpack.c.bf16 %v1962_v19, %v1960_v18  ;;  %1834 = vmatmul.bf16.gmra.mxu2 %v2767_v16  ;;  %v2806_v16 = vld [vmem:[%s3715_s23 + $0x200] sm:$0xf]  ;;  %v3255_v18 = vld [vmem:[%s3715_s23 + $0x204] sm:$0xf]  ;;  %v2808_v19 = vld [vmem:[%s3715_s23 + $0x210] sm:$0xf0] }
  0xff   : > { %2003 = vmatmul.bf16.gmra.mxu3 %v2771_v17  ;;  %v3257_v17 = vld [vmem:[%s3715_s23 + $0x20c] sm:$0xf0]  ;;  %v2811_v29 = vor.u32 %v3255_v18, %v2808_v19 }
 0x100   : > { %3514 = vst [vmem:[%s3819_s11 + $0x20] sm:$0xff] %v3374_v20   ;;  %v2814_v20 = vld [vmem:[%s3715_s23 + $0x208] sm:$0xf]  ;;  %v2807_v28 = vor.u32 %v3257_v17, %v2806_v16 }
 0x101   : > { %v1795_v21 = vpop.f32.mrf.mxu2  ;;  %v1459_v23 = vpop.f32.mrf.mxu0 }
 0x102   : > { %v1964_v22 = vpop.f32.mrf.mxu3  ;;  %v1628_v24 = vpop.f32.mrf.mxu1  ;;  %v1796_v34 = vadd.f32 %v1795_v21, %v1627_v25  ;;  %v3258_v21 = vld [vmem:[%s3715_s23 + $0x214] sm:$0xf0] }
 0x103   : > { %v1629_v35 = vadd.f32 %v1628_v24, %v1459_v23  ;;  %v2816_v23 = vld [vmem:[%s3715_s23 + $0x218] sm:$0xf0]  ;;  %v2815_v33 = vor.u32 %v3258_v21, %v2814_v20 }
 0x104   : > { %v1965_v45 = vadd.f32 %v1964_v22, %v1796_v34  ;;  %v3256_v22 = vld [vmem:[%s3715_s23 + $0x20c] sm:$0xf] }
 0x105   : > { %v2819_v34 = vor.u32 %v3256_v22, %v2816_v23 }
 0x109   : > { %v1797_v36 = vpop.f32.mrf.mxu2  ;;  %v1462_v41 = vpop.f32.mrf.mxu0 }
 0x10a   : > { %v1966_v37 = vpop.f32.mrf.mxu3  ;;  %v1798_v40 = vadd.f32 %v1797_v36, %v1629_v35  ;;  %v1631_v42 = vpop.f32.mrf.mxu1 }
 0x10b   : > { %v1632_v52 = vadd.f32 %v1631_v42, %v1462_v41 }
 0x10c   : > { %v1967_v46 = vadd.f32 %v1966_v37, %v1798_v40  ;;  %1501 = vmatmul.bf16.gmra.mxu0 %v2775_v38 }
 0x10d   : > { %1670 = vmatmul.bf16.gmra.mxu1 %v2779_v39 }
 0x10e   : > { %v3379_v47 = vpack.c.bf16 %v1967_v46, %v1965_v45  ;;  %1839 = vmatmul.bf16.gmra.mxu2 %v2783_v43  ;;  %v2822_v43 = vld [vmem:[%s3715_s23 + $0x220] sm:$0xf]  ;;  %v3259_v45 = vld [vmem:[%s3715_s23 + $0x224] sm:$0xf]  ;;  %v2824_v46 = vld [vmem:[%s3715_s23 + $0x230] sm:$0xf0] }
 0x10f   : > { %2008 = vmatmul.bf16.gmra.mxu3 %v2787_v44  ;;  %v3261_v44 = vld [vmem:[%s3715_s23 + $0x22c] sm:$0xf0]  ;;  %v2827_v56 = vor.u32 %v3259_v45, %v2824_v46 }
 0x110   : > { %3515 = vst [vmem:[%s3819_s11 + $0x28] sm:$0xff] %v3379_v47   ;;  %v2830_v47 = vld [vmem:[%s3715_s23 + $0x228] sm:$0xf]  ;;  %v2823_v55 = vor.u32 %v3261_v44, %v2822_v43 }
 0x111   : > { %v1800_v48 = vpop.f32.mrf.mxu2  ;;  %v1464_v50 = vpop.f32.mrf.mxu0 }
 0x112   : > { %v1969_v49 = vpop.f32.mrf.mxu3  ;;  %v1633_v51 = vpop.f32.mrf.mxu1  ;;  %v1801_v61 = vadd.f32 %v1800_v48, %v1632_v52  ;;  %v3262_v48 = vld [vmem:[%s3715_s23 + $0x234] sm:$0xf0] }
 0x113   : > { %v1634_v62 = vadd.f32 %v1633_v51, %v1464_v50  ;;  %v2832_v50 = vld [vmem:[%s3715_s23 + $0x238] sm:$0xf0]  ;;  %v2831_v60 = vor.u32 %v3262_v48, %v2830_v47 }
 0x114   : > { %v1970_v8 = vadd.f32 %v1969_v49, %v1801_v61  ;;  %v3260_v49 = vld [vmem:[%s3715_s23 + $0x22c] sm:$0xf] }
 0x115   : > { %v2835_v61 = vor.u32 %v3260_v49, %v2832_v50 }
 0x119   : > { %v1802_v63 = vpop.f32.mrf.mxu2  ;;  %v1467_v4 = vpop.f32.mrf.mxu0 }
 0x11a   : > { %v1971_v0 = vpop.f32.mrf.mxu3  ;;  %v1803_v3 = vadd.f32 %v1802_v63, %v1634_v62  ;;  %v1636_v5 = vpop.f32.mrf.mxu1 }
 0x11b   : > { %v1637_v15 = vadd.f32 %v1636_v5, %v1467_v4 }
 0x11c   : > { %v1972_v9 = vadd.f32 %v1971_v0, %v1803_v3  ;;  %1506 = vmatmul.bf16.gmra.mxu0 %v2791_v1 }
 0x11d   : > { %1675 = vmatmul.bf16.gmra.mxu1 %v2795_v2 }
 0x11e   : > { %v3384_v10 = vpack.c.bf16 %v1972_v9, %v1970_v8  ;;  %1844 = vmatmul.bf16.gmra.mxu2 %v2799_v6  ;;  %v2838_v6 = vld [vmem:[%s3715_s23 + $0x240] sm:$0xf]  ;;  %v3263_v8 = vld [vmem:[%s3715_s23 + $0x244] sm:$0xf]  ;;  %v2840_v9 = vld [vmem:[%s3715_s23 + $0x250] sm:$0xf0] }
 0x11f   : > { %2013 = vmatmul.bf16.gmra.mxu3 %v2803_v7  ;;  %v3265_v7 = vld [vmem:[%s3715_s23 + $0x24c] sm:$0xf0]  ;;  %v2843_v19 = vor.u32 %v3263_v8, %v2840_v9 }
 0x120   : > { %3516 = vst [vmem:[%s3819_s11 + $0x30] sm:$0xff] %v3384_v10   ;;  %v2846_v10 = vld [vmem:[%s3715_s23 + $0x248] sm:$0xf]  ;;  %v2839_v18 = vor.u32 %v3265_v7, %v2838_v6 }
 0x121   : > { %v1805_v11 = vpop.f32.mrf.mxu2  ;;  %v1469_v13 = vpop.f32.mrf.mxu0 }
 0x122   : > { %v1974_v12 = vpop.f32.mrf.mxu3  ;;  %v1638_v14 = vpop.f32.mrf.mxu1  ;;  %v1806_v24 = vadd.f32 %v1805_v11, %v1637_v15  ;;  %v3266_v11 = vld [vmem:[%s3715_s23 + $0x254] sm:$0xf0] }
 0x123   : > { %v1639_v25 = vadd.f32 %v1638_v14, %v1469_v13  ;;  %v2848_v13 = vld [vmem:[%s3715_s23 + $0x258] sm:$0xf0]  ;;  %v2847_v23 = vor.u32 %v3266_v11, %v2846_v10 }
 0x124   : > { %v1975_v35 = vadd.f32 %v1974_v12, %v1806_v24  ;;  %v3264_v12 = vld [vmem:[%s3715_s23 + $0x24c] sm:$0xf] }
 0x125   : > { %v2851_v24 = vor.u32 %v3264_v12, %v2848_v13 }
 0x129   : > { %v1807_v26 = vpop.f32.mrf.mxu2  ;;  %v1472_v31 = vpop.f32.mrf.mxu0 }
 0x12a   : > { %v1976_v27 = vpop.f32.mrf.mxu3  ;;  %v1808_v30 = vadd.f32 %v1807_v26, %v1639_v25  ;;  %v1641_v32 = vpop.f32.mrf.mxu1 }
 0x12b   : > { %v1642_v42 = vadd.f32 %v1641_v32, %v1472_v31 }
 0x12c   : > { %v1977_v36 = vadd.f32 %v1976_v27, %v1808_v30  ;;  %1511 = vmatmul.bf16.gmra.mxu0 %v2807_v28 }
 0x12d   : > { %1680 = vmatmul.bf16.gmra.mxu1 %v2811_v29 }
 0x12e   : > { %v3389_v37 = vpack.c.bf16 %v1977_v36, %v1975_v35  ;;  %1849 = vmatmul.bf16.gmra.mxu2 %v2815_v33  ;;  %v2854_v33 = vld [vmem:[%s3715_s23 + $0x260] sm:$0xf]  ;;  %v3267_v35 = vld [vmem:[%s3715_s23 + $0x264] sm:$0xf]  ;;  %v2856_v36 = vld [vmem:[%s3715_s23 + $0x270] sm:$0xf0] }
 0x12f   : > { %2018 = vmatmul.bf16.gmra.mxu3 %v2819_v34  ;;  %v3269_v34 = vld [vmem:[%s3715_s23 + $0x26c] sm:$0xf0]  ;;  %v2859_v46 = vor.u32 %v3267_v35, %v2856_v36 }
 0x130   : > { %3517 = vst [vmem:[%s3819_s11 + $0x38] sm:$0xff] %v3389_v37   ;;  %v2862_v37 = vld [vmem:[%s3715_s23 + $0x268] sm:$0xf]  ;;  %v2855_v45 = vor.u32 %v3269_v34, %v2854_v33 }
 0x131   : > { %v1810_v38 = vpop.f32.mrf.mxu2  ;;  %v1474_v40 = vpop.f32.mrf.mxu0 }
 0x132   : > { %v1979_v39 = vpop.f32.mrf.mxu3  ;;  %v1643_v41 = vpop.f32.mrf.mxu1  ;;  %v1811_v51 = vadd.f32 %v1810_v38, %v1642_v42  ;;  %v3270_v38 = vld [vmem:[%s3715_s23 + $0x274] sm:$0xf0] }
 0x133   : > { %v1644_v52 = vadd.f32 %v1643_v41, %v1474_v40  ;;  %v2864_v40 = vld [vmem:[%s3715_s23 + $0x278] sm:$0xf0]  ;;  %v2863_v50 = vor.u32 %v3270_v38, %v2862_v37 }
 0x134   : > { %v1980_v62 = vadd.f32 %v1979_v39, %v1811_v51  ;;  %v3268_v39 = vld [vmem:[%s3715_s23 + $0x26c] sm:$0xf] }
 0x135   : > { %v2867_v51 = vor.u32 %v3268_v39, %v2864_v40 }
 0x139   : > { %v1812_v53 = vpop.f32.mrf.mxu2  ;;  %v1477_v58 = vpop.f32.mrf.mxu0 }
 0x13a   : > { %v1981_v54 = vpop.f32.mrf.mxu3  ;;  %v1813_v57 = vadd.f32 %v1812_v53, %v1644_v52  ;;  %v1646_v59 = vpop.f32.mrf.mxu1 }
 0x13b   : > { %v1647_v5 = vadd.f32 %v1646_v59, %v1477_v58 }
 0x13c   : > { %v1982_v63 = vadd.f32 %v1981_v54, %v1813_v57  ;;  %1516 = vmatmul.bf16.gmra.mxu0 %v2823_v55 }
 0x13d   : > { %1685 = vmatmul.bf16.gmra.mxu1 %v2827_v56 }
 0x13e   : > { %v3394_v0 = vpack.c.bf16 %v1982_v63, %v1980_v62  ;;  %1854 = vmatmul.bf16.gmra.mxu2 %v2831_v60  ;;  %v2870_v60 = vld [vmem:[%s3715_s23 + $0x280] sm:$0xf]  ;;  %v3271_v62 = vld [vmem:[%s3715_s23 + $0x284] sm:$0xf]  ;;  %v2872_v63 = vld [vmem:[%s3715_s23 + $0x290] sm:$0xf0] }
 0x13f   : > { %2023 = vmatmul.bf16.gmra.mxu3 %v2835_v61  ;;  %v3273_v61 = vld [vmem:[%s3715_s23 + $0x28c] sm:$0xf0]  ;;  %v2875_v9 = vor.u32 %v3271_v62, %v2872_v63 }
 0x140   : > { %3518 = vst [vmem:[%s3819_s11 + $0x40] sm:$0xff] %v3394_v0   ;;  %v2878_v0 = vld [vmem:[%s3715_s23 + $0x288] sm:$0xf]  ;;  %v2871_v8 = vor.u32 %v3273_v61, %v2870_v60 }
 0x141   : > { %v1815_v1 = vpop.f32.mrf.mxu2  ;;  %v1479_v3 = vpop.f32.mrf.mxu0 }
 0x142   : > { %v1984_v2 = vpop.f32.mrf.mxu3  ;;  %v1648_v4 = vpop.f32.mrf.mxu1  ;;  %v1816_v14 = vadd.f32 %v1815_v1, %v1647_v5  ;;  %v3274_v1 = vld [vmem:[%s3715_s23 + $0x294] sm:$0xf0] }
 0x143   : > { %v1649_v15 = vadd.f32 %v1648_v4, %v1479_v3  ;;  %v2880_v3 = vld [vmem:[%s3715_s23 + $0x298] sm:$0xf0]  ;;  %v2879_v13 = vor.u32 %v3274_v1, %v2878_v0 }
 0x144   : > { %v1985_v25 = vadd.f32 %v1984_v2, %v1816_v14  ;;  %v3272_v2 = vld [vmem:[%s3715_s23 + $0x28c] sm:$0xf] }
 0x145   : > { %v2883_v14 = vor.u32 %v3272_v2, %v2880_v3 }
 0x149   : > { %v1817_v16 = vpop.f32.mrf.mxu2  ;;  %v1482_v21 = vpop.f32.mrf.mxu0 }
 0x14a   : > { %v1986_v17 = vpop.f32.mrf.mxu3  ;;  %v1818_v20 = vadd.f32 %v1817_v16, %v1649_v15  ;;  %v1651_v22 = vpop.f32.mrf.mxu1 }
 0x14b   : > { %v1652_v32 = vadd.f32 %v1651_v22, %v1482_v21 }
 0x14c   : > { %v1987_v26 = vadd.f32 %v1986_v17, %v1818_v20  ;;  %1521 = vmatmul.bf16.gmra.mxu0 %v2839_v18 }
 0x14d   : > { %1690 = vmatmul.bf16.gmra.mxu1 %v2843_v19 }
 0x14e   : > { %v3399_v27 = vpack.c.bf16 %v1987_v26, %v1985_v25  ;;  %1859 = vmatmul.bf16.gmra.mxu2 %v2847_v23  ;;  %v2886_v23 = vld [vmem:[%s3715_s23 + $0x2a0] sm:$0xf]  ;;  %v3275_v25 = vld [vmem:[%s3715_s23 + $0x2a4] sm:$0xf]  ;;  %v2888_v26 = vld [vmem:[%s3715_s23 + $0x2b0] sm:$0xf0] }
 0x14f   : > { %2028 = vmatmul.bf16.gmra.mxu3 %v2851_v24  ;;  %v3277_v24 = vld [vmem:[%s3715_s23 + $0x2ac] sm:$0xf0]  ;;  %v2891_v36 = vor.u32 %v3275_v25, %v2888_v26 }
 0x150   : > { %3519 = vst [vmem:[%s3819_s11 + $0x48] sm:$0xff] %v3399_v27   ;;  %v2894_v27 = vld [vmem:[%s3715_s23 + $0x2a8] sm:$0xf]  ;;  %v2887_v35 = vor.u32 %v3277_v24, %v2886_v23 }
 0x151   : > { %v1820_v28 = vpop.f32.mrf.mxu2  ;;  %v1484_v30 = vpop.f32.mrf.mxu0 }
 0x152   : > { %v1989_v29 = vpop.f32.mrf.mxu3  ;;  %v1653_v31 = vpop.f32.mrf.mxu1  ;;  %v1821_v41 = vadd.f32 %v1820_v28, %v1652_v32  ;;  %v3278_v28 = vld [vmem:[%s3715_s23 + $0x2b4] sm:$0xf0] }
 0x153   : > { %v1654_v42 = vadd.f32 %v1653_v31, %v1484_v30  ;;  %v2896_v30 = vld [vmem:[%s3715_s23 + $0x2b8] sm:$0xf0]  ;;  %v2895_v40 = vor.u32 %v3278_v28, %v2894_v27 }
 0x154   : > { %v1990_v52 = vadd.f32 %v1989_v29, %v1821_v41  ;;  %v3276_v29 = vld [vmem:[%s3715_s23 + $0x2ac] sm:$0xf] }
 0x155   : > { %v2899_v41 = vor.u32 %v3276_v29, %v2896_v30 }
 0x159   : > { %v1822_v43 = vpop.f32.mrf.mxu2  ;;  %v1487_v48 = vpop.f32.mrf.mxu0 }
 0x15a   : > { %v1991_v44 = vpop.f32.mrf.mxu3  ;;  %v1823_v47 = vadd.f32 %v1822_v43, %v1654_v42  ;;  %v1656_v49 = vpop.f32.mrf.mxu1 }
 0x15b   : > { %v1657_v59 = vadd.f32 %v1656_v49, %v1487_v48 }
 0x15c   : > { %v1992_v53 = vadd.f32 %v1991_v44, %v1823_v47  ;;  %1526 = vmatmul.bf16.gmra.mxu0 %v2855_v45 }
 0x15d   : > { %1695 = vmatmul.bf16.gmra.mxu1 %v2859_v46 }
 0x15e   : > { %v3404_v54 = vpack.c.bf16 %v1992_v53, %v1990_v52  ;;  %1864 = vmatmul.bf16.gmra.mxu2 %v2863_v50  ;;  %v2902_v50 = vld [vmem:[%s3715_s23 + $0x2c0] sm:$0xf]  ;;  %v3279_v52 = vld [vmem:[%s3715_s23 + $0x2c4] sm:$0xf]  ;;  %v2904_v53 = vld [vmem:[%s3715_s23 + $0x2d0] sm:$0xf0] }
 0x15f   : > { %2033 = vmatmul.bf16.gmra.mxu3 %v2867_v51  ;;  %v3281_v51 = vld [vmem:[%s3715_s23 + $0x2cc] sm:$0xf0]  ;;  %v2907_v63 = vor.u32 %v3279_v52, %v2904_v53 }
 0x160   : > { %3520 = vst [vmem:[%s3819_s11 + $0x50] sm:$0xff] %v3404_v54   ;;  %v2910_v54 = vld [vmem:[%s3715_s23 + $0x2c8] sm:$0xf]  ;;  %v2903_v62 = vor.u32 %v3281_v51, %v2902_v50 }
 0x161   : > { %v1825_v55 = vpop.f32.mrf.mxu2  ;;  %v1489_v57 = vpop.f32.mrf.mxu0 }
 0x162   : > { %v1994_v56 = vpop.f32.mrf.mxu3  ;;  %v1658_v58 = vpop.f32.mrf.mxu1  ;;  %v1826_v4 = vadd.f32 %v1825_v55, %v1657_v59  ;;  %v3282_v55 = vld [vmem:[%s3715_s23 + $0x2d4] sm:$0xf0] }
 0x163   : > { %v1659_v5 = vadd.f32 %v1658_v58, %v1489_v57  ;;  %v2912_v57 = vld [vmem:[%s3715_s23 + $0x2d8] sm:$0xf0]  ;;  %v2911_v3 = vor.u32 %v3282_v55, %v2910_v54 }
 0x164   : > { %v1995_v15 = vadd.f32 %v1994_v56, %v1826_v4  ;;  %v3280_v56 = vld [vmem:[%s3715_s23 + $0x2cc] sm:$0xf] }
 0x165   : > { %v2915_v4 = vor.u32 %v3280_v56, %v2912_v57 }
 0x169   : > { %v1827_v6 = vpop.f32.mrf.mxu2  ;;  %v1492_v11 = vpop.f32.mrf.mxu0 }
 0x16a   : > { %v1996_v7 = vpop.f32.mrf.mxu3  ;;  %v1828_v10 = vadd.f32 %v1827_v6, %v1659_v5  ;;  %v1661_v12 = vpop.f32.mrf.mxu1 }
 0x16b   : > { %v1662_v22 = vadd.f32 %v1661_v12, %v1492_v11 }
 0x16c   : > { %v1997_v16 = vadd.f32 %v1996_v7, %v1828_v10  ;;  %1531 = vmatmul.bf16.gmra.mxu0 %v2871_v8 }
 0x16d   : > { %1700 = vmatmul.bf16.gmra.mxu1 %v2875_v9 }
 0x16e   : > { %v3409_v17 = vpack.c.bf16 %v1997_v16, %v1995_v15  ;;  %1869 = vmatmul.bf16.gmra.mxu2 %v2879_v13  ;;  %v2918_v13 = vld [vmem:[%s3715_s23 + $0x2e0] sm:$0xf]  ;;  %v3283_v15 = vld [vmem:[%s3715_s23 + $0x2e4] sm:$0xf]  ;;  %v2920_v16 = vld [vmem:[%s3715_s23 + $0x2f0] sm:$0xf0] }
 0x16f   : > { %2038 = vmatmul.bf16.gmra.mxu3 %v2883_v14  ;;  %v3285_v14 = vld [vmem:[%s3715_s23 + $0x2ec] sm:$0xf0]  ;;  %v2923_v26 = vor.u32 %v3283_v15, %v2920_v16 }
 0x170   : > { %3521 = vst [vmem:[%s3819_s11 + $0x58] sm:$0xff] %v3409_v17   ;;  %v2926_v17 = vld [vmem:[%s3715_s23 + $0x2e8] sm:$0xf]  ;;  %v2919_v25 = vor.u32 %v3285_v14, %v2918_v13 }
 0x171   : > { %v1830_v18 = vpop.f32.mrf.mxu2  ;;  %v1494_v20 = vpop.f32.mrf.mxu0 }
 0x172   : > { %v1999_v19 = vpop.f32.mrf.mxu3  ;;  %v1663_v21 = vpop.f32.mrf.mxu1  ;;  %v1831_v31 = vadd.f32 %v1830_v18, %v1662_v22  ;;  %v3286_v18 = vld [vmem:[%s3715_s23 + $0x2f4] sm:$0xf0] }
 0x173   : > { %v1664_v32 = vadd.f32 %v1663_v21, %v1494_v20  ;;  %v2928_v20 = vld [vmem:[%s3715_s23 + $0x2f8] sm:$0xf0]  ;;  %v2927_v30 = vor.u32 %v3286_v18, %v2926_v17 }
 0x174   : > { %v2000_v42 = vadd.f32 %v1999_v19, %v1831_v31  ;;  %v3284_v19 = vld [vmem:[%s3715_s23 + $0x2ec] sm:$0xf] }
 0x175   : > { %v2931_v31 = vor.u32 %v3284_v19, %v2928_v20 }
 0x179   : > { %v1832_v33 = vpop.f32.mrf.mxu2  ;;  %v1497_v38 = vpop.f32.mrf.mxu0 }
 0x17a   : > { %v2001_v34 = vpop.f32.mrf.mxu3  ;;  %v1833_v37 = vadd.f32 %v1832_v33, %v1664_v32  ;;  %v1666_v39 = vpop.f32.mrf.mxu1 }
 0x17b   : > { %v1667_v49 = vadd.f32 %v1666_v39, %v1497_v38 }
 0x17c   : > { %v2002_v43 = vadd.f32 %v2001_v34, %v1833_v37  ;;  %1536 = vmatmul.bf16.gmra.mxu0 %v2887_v35 }
 0x17d   : > { %1705 = vmatmul.bf16.gmra.mxu1 %v2891_v36 }
 0x17e   : > { %v3414_v44 = vpack.c.bf16 %v2002_v43, %v2000_v42  ;;  %1874 = vmatmul.bf16.gmra.mxu2 %v2895_v40  ;;  %v2934_v40 = vld [vmem:[%s3715_s23 + $0x300] sm:$0xf]  ;;  %v3287_v42 = vld [vmem:[%s3715_s23 + $0x304] sm:$0xf]  ;;  %v2936_v43 = vld [vmem:[%s3715_s23 + $0x310] sm:$0xf0] }
 0x17f   : > { %2043 = vmatmul.bf16.gmra.mxu3 %v2899_v41  ;;  %v3289_v41 = vld [vmem:[%s3715_s23 + $0x30c] sm:$0xf0]  ;;  %v2939_v53 = vor.u32 %v3287_v42, %v2936_v43 }
 0x180   : > { %3522 = vst [vmem:[%s3819_s11 + $0x60] sm:$0xff] %v3414_v44   ;;  %v2942_v44 = vld [vmem:[%s3715_s23 + $0x308] sm:$0xf]  ;;  %v2935_v52 = vor.u32 %v3289_v41, %v2934_v40 }
 0x181   : > { %v1835_v45 = vpop.f32.mrf.mxu2  ;;  %v1499_v47 = vpop.f32.mrf.mxu0 }
 0x182   : > { %v2004_v46 = vpop.f32.mrf.mxu3  ;;  %v1668_v48 = vpop.f32.mrf.mxu1  ;;  %v1836_v58 = vadd.f32 %v1835_v45, %v1667_v49  ;;  %v3290_v45 = vld [vmem:[%s3715_s23 + $0x314] sm:$0xf0] }
 0x183   : > { %v1669_v59 = vadd.f32 %v1668_v48, %v1499_v47  ;;  %v2944_v47 = vld [vmem:[%s3715_s23 + $0x318] sm:$0xf0]  ;;  %v2943_v57 = vor.u32 %v3290_v45, %v2942_v44 }
 0x184   : > { %v2005_v5 = vadd.f32 %v2004_v46, %v1836_v58  ;;  %v3288_v46 = vld [vmem:[%s3715_s23 + $0x30c] sm:$0xf] }
 0x185   : > { %v2947_v58 = vor.u32 %v3288_v46, %v2944_v47 }
 0x189   : > { %v1837_v60 = vpop.f32.mrf.mxu2  ;;  %v1502_v1 = vpop.f32.mrf.mxu0 }
 0x18a   : > { %v2006_v61 = vpop.f32.mrf.mxu3  ;;  %v1838_v0 = vadd.f32 %v1837_v60, %v1669_v59  ;;  %v1671_v2 = vpop.f32.mrf.mxu1 }
 0x18b   : > { %v1672_v12 = vadd.f32 %v1671_v2, %v1502_v1 }
 0x18c   : > { %v2007_v6 = vadd.f32 %v2006_v61, %v1838_v0  ;;  %1541 = vmatmul.bf16.gmra.mxu0 %v2903_v62 }
 0x18d   : > { %1710 = vmatmul.bf16.gmra.mxu1 %v2907_v63 }
 0x18e   : > { %v3419_v7 = vpack.c.bf16 %v2007_v6, %v2005_v5  ;;  %1879 = vmatmul.bf16.gmra.mxu2 %v2911_v3  ;;  %v2950_v3 = vld [vmem:[%s3715_s23 + $0x320] sm:$0xf]  ;;  %v3291_v5 = vld [vmem:[%s3715_s23 + $0x324] sm:$0xf]  ;;  %v2952_v6 = vld [vmem:[%s3715_s23 + $0x330] sm:$0xf0] }
 0x18f   : > { %2048 = vmatmul.bf16.gmra.mxu3 %v2915_v4  ;;  %v3293_v4 = vld [vmem:[%s3715_s23 + $0x32c] sm:$0xf0]  ;;  %v2955_v16 = vor.u32 %v3291_v5, %v2952_v6 }
 0x190   : > { %3523 = vst [vmem:[%s3819_s11 + $0x68] sm:$0xff] %v3419_v7   ;;  %v2958_v7 = vld [vmem:[%s3715_s23 + $0x328] sm:$0xf]  ;;  %v2951_v15 = vor.u32 %v3293_v4, %v2950_v3 }
 0x191   : > { %v1840_v8 = vpop.f32.mrf.mxu2  ;;  %v1504_v10 = vpop.f32.mrf.mxu0 }
 0x192   : > { %v2009_v9 = vpop.f32.mrf.mxu3  ;;  %v1673_v11 = vpop.f32.mrf.mxu1  ;;  %v1841_v21 = vadd.f32 %v1840_v8, %v1672_v12  ;;  %v3294_v8 = vld [vmem:[%s3715_s23 + $0x334] sm:$0xf0] }
 0x193   : > { %v1674_v22 = vadd.f32 %v1673_v11, %v1504_v10  ;;  %v2960_v10 = vld [vmem:[%s3715_s23 + $0x338] sm:$0xf0]  ;;  %v2959_v20 = vor.u32 %v3294_v8, %v2958_v7 }
 0x194   : > { %v2010_v32 = vadd.f32 %v2009_v9, %v1841_v21  ;;  %v3292_v9 = vld [vmem:[%s3715_s23 + $0x32c] sm:$0xf] }
 0x195   : > { %v2963_v21 = vor.u32 %v3292_v9, %v2960_v10 }
 0x199   : > { %v1842_v23 = vpop.f32.mrf.mxu2  ;;  %v1507_v28 = vpop.f32.mrf.mxu0 }
 0x19a   : > { %v2011_v24 = vpop.f32.mrf.mxu3  ;;  %v1843_v27 = vadd.f32 %v1842_v23, %v1674_v22  ;;  %v1676_v29 = vpop.f32.mrf.mxu1 }
 0x19b   : > { %v1677_v39 = vadd.f32 %v1676_v29, %v1507_v28 }
 0x19c   : > { %v2012_v33 = vadd.f32 %v2011_v24, %v1843_v27  ;;  %1546 = vmatmul.bf16.gmra.mxu0 %v2919_v25 }
 0x19d   : > { %1715 = vmatmul.bf16.gmra.mxu1 %v2923_v26 }
 0x19e   : > { %v3424_v34 = vpack.c.bf16 %v2012_v33, %v2010_v32  ;;  %1884 = vmatmul.bf16.gmra.mxu2 %v2927_v30  ;;  %v2966_v30 = vld [vmem:[%s3715_s23 + $0x340] sm:$0xf]  ;;  %v3295_v32 = vld [vmem:[%s3715_s23 + $0x344] sm:$0xf]  ;;  %v2968_v33 = vld [vmem:[%s3715_s23 + $0x350] sm:$0xf0] }
 0x19f   : > { %2053 = vmatmul.bf16.gmra.mxu3 %v2931_v31  ;;  %v3297_v31 = vld [vmem:[%s3715_s23 + $0x34c] sm:$0xf0]  ;;  %v2971_v43 = vor.u32 %v3295_v32, %v2968_v33 }
 0x1a0   : > { %3524 = vst [vmem:[%s3819_s11 + $0x70] sm:$0xff] %v3424_v34   ;;  %v2974_v34 = vld [vmem:[%s3715_s23 + $0x348] sm:$0xf]  ;;  %v2967_v42 = vor.u32 %v3297_v31, %v2966_v30 }
 0x1a1   : > { %v1845_v35 = vpop.f32.mrf.mxu2  ;;  %v1509_v37 = vpop.f32.mrf.mxu0 }
 0x1a2   : > { %v2014_v36 = vpop.f32.mrf.mxu3  ;;  %v1678_v38 = vpop.f32.mrf.mxu1  ;;  %v1846_v48 = vadd.f32 %v1845_v35, %v1677_v39  ;;  %v3298_v35 = vld [vmem:[%s3715_s23 + $0x354] sm:$0xf0] }
 0x1a3   : > { %v1679_v49 = vadd.f32 %v1678_v38, %v1509_v37  ;;  %v2976_v37 = vld [vmem:[%s3715_s23 + $0x358] sm:$0xf0]  ;;  %v2975_v47 = vor.u32 %v3298_v35, %v2974_v34 }
 0x1a4   : > { %v2015_v59 = vadd.f32 %v2014_v36, %v1846_v48  ;;  %v3296_v36 = vld [vmem:[%s3715_s23 + $0x34c] sm:$0xf] }
 0x1a5   : > { %v2979_v48 = vor.u32 %v3296_v36, %v2976_v37 }
 0x1a9   : > { %v1847_v50 = vpop.f32.mrf.mxu2  ;;  %v1512_v55 = vpop.f32.mrf.mxu0 }
 0x1aa   : > { %v2016_v51 = vpop.f32.mrf.mxu3  ;;  %v1848_v54 = vadd.f32 %v1847_v50, %v1679_v49  ;;  %v1681_v56 = vpop.f32.mrf.mxu1 }
 0x1ab   : > { %v1682_v2 = vadd.f32 %v1681_v56, %v1512_v55 }
 0x1ac   : > { %v2017_v60 = vadd.f32 %v2016_v51, %v1848_v54  ;;  %1551 = vmatmul.bf16.gmra.mxu0 %v2935_v52 }
 0x1ad   : > { %1720 = vmatmul.bf16.gmra.mxu1 %v2939_v53 }
 0x1ae   : > { %v3429_v61 = vpack.c.bf16 %v2017_v60, %v2015_v59  ;;  %1889 = vmatmul.bf16.gmra.mxu2 %v2943_v57  ;;  %v2982_v57 = vld [vmem:[%s3715_s23 + $0x360] sm:$0xf]  ;;  %v3299_v59 = vld [vmem:[%s3715_s23 + $0x364] sm:$0xf]  ;;  %v2984_v60 = vld [vmem:[%s3715_s23 + $0x370] sm:$0xf0] }
 0x1af   : > { %2058 = vmatmul.bf16.gmra.mxu3 %v2947_v58  ;;  %v3301_v58 = vld [vmem:[%s3715_s23 + $0x36c] sm:$0xf0]  ;;  %v2987_v6 = vor.u32 %v3299_v59, %v2984_v60 }
 0x1b0   : > { %3525 = vst [vmem:[%s3819_s11 + $0x78] sm:$0xff] %v3429_v61   ;;  %v2990_v61 = vld [vmem:[%s3715_s23 + $0x368] sm:$0xf]  ;;  %v2983_v5 = vor.u32 %v3301_v58, %v2982_v57 }
 0x1b1   : > { %v1850_v62 = vpop.f32.mrf.mxu2  ;;  %v1514_v0 = vpop.f32.mrf.mxu0 }
 0x1b2   : > { %v2019_v63 = vpop.f32.mrf.mxu3  ;;  %v1683_v1 = vpop.f32.mrf.mxu1  ;;  %v1851_v11 = vadd.f32 %v1850_v62, %v1682_v2  ;;  %v3302_v62 = vld [vmem:[%s3715_s23 + $0x374] sm:$0xf0] }
 0x1b3   : > { %v1684_v12 = vadd.f32 %v1683_v1, %v1514_v0  ;;  %v2992_v0 = vld [vmem:[%s3715_s23 + $0x378] sm:$0xf0]  ;;  %v2991_v10 = vor.u32 %v3302_v62, %v2990_v61 }
 0x1b4   : > { %v2020_v22 = vadd.f32 %v2019_v63, %v1851_v11  ;;  %v3300_v63 = vld [vmem:[%s3715_s23 + $0x36c] sm:$0xf] }
 0x1b5   : > { %v2995_v11 = vor.u32 %v3300_v63, %v2992_v0 }
 0x1b9   : > { %v1852_v13 = vpop.f32.mrf.mxu2  ;;  %v1517_v18 = vpop.f32.mrf.mxu0 }
 0x1ba   : > { %v2021_v14 = vpop.f32.mrf.mxu3  ;;  %v1853_v17 = vadd.f32 %v1852_v13, %v1684_v12  ;;  %v1686_v19 = vpop.f32.mrf.mxu1 }
 0x1bb   : > { %v1687_v29 = vadd.f32 %v1686_v19, %v1517_v18 }
 0x1bc   : > { %v2022_v23 = vadd.f32 %v2021_v14, %v1853_v17  ;;  %1556 = vmatmul.bf16.gmra.mxu0 %v2951_v15 }
 0x1bd   : > { %1725 = vmatmul.bf16.gmra.mxu1 %v2955_v16 }
 0x1be   : > { %v3434_v24 = vpack.c.bf16 %v2022_v23, %v2020_v22  ;;  %1894 = vmatmul.bf16.gmra.mxu2 %v2959_v20  ;;  %v2998_v20 = vld [vmem:[%s3715_s23 + $0x380] sm:$0xf]  ;;  %v3303_v22 = vld [vmem:[%s3715_s23 + $0x384] sm:$0xf]  ;;  %v3000_v23 = vld [vmem:[%s3715_s23 + $0x390] sm:$0xf0] }
 0x1bf   : > { %2063 = vmatmul.bf16.gmra.mxu3 %v2963_v21  ;;  %v3305_v21 = vld [vmem:[%s3715_s23 + $0x38c] sm:$0xf0]  ;;  %v3003_v33 = vor.u32 %v3303_v22, %v3000_v23 }
 0x1c0   : > { %3526 = vst [vmem:[%s3819_s11 + $0x80] sm:$0xff] %v3434_v24   ;;  %v3006_v24 = vld [vmem:[%s3715_s23 + $0x388] sm:$0xf]  ;;  %v2999_v32 = vor.u32 %v3305_v21, %v2998_v20 }
 0x1c1   : > { %v1855_v25 = vpop.f32.mrf.mxu2  ;;  %v1519_v27 = vpop.f32.mrf.mxu0 }
 0x1c2   : > { %v2024_v26 = vpop.f32.mrf.mxu3  ;;  %v1688_v28 = vpop.f32.mrf.mxu1  ;;  %v1856_v38 = vadd.f32 %v1855_v25, %v1687_v29  ;;  %v3306_v25 = vld [vmem:[%s3715_s23 + $0x394] sm:$0xf0] }
 0x1c3   : > { %v1689_v39 = vadd.f32 %v1688_v28, %v1519_v27  ;;  %v3008_v27 = vld [vmem:[%s3715_s23 + $0x398] sm:$0xf0]  ;;  %v3007_v37 = vor.u32 %v3306_v25, %v3006_v24 }
 0x1c4   : > { %v2025_v49 = vadd.f32 %v2024_v26, %v1856_v38  ;;  %v3304_v26 = vld [vmem:[%s3715_s23 + $0x38c] sm:$0xf] }
 0x1c5   : > { %v3011_v38 = vor.u32 %v3304_v26, %v3008_v27 }
 0x1c9   : > { %v1857_v40 = vpop.f32.mrf.mxu2  ;;  %v1522_v45 = vpop.f32.mrf.mxu0 }
 0x1ca   : > { %v2026_v41 = vpop.f32.mrf.mxu3  ;;  %v1858_v44 = vadd.f32 %v1857_v40, %v1689_v39  ;;  %v1691_v46 = vpop.f32.mrf.mxu1 }
 0x1cb   : > { %v1692_v56 = vadd.f32 %v1691_v46, %v1522_v45 }
 0x1cc   : > { %v2027_v50 = vadd.f32 %v2026_v41, %v1858_v44  ;;  %1561 = vmatmul.bf16.gmra.mxu0 %v2967_v42 }
 0x1cd   : > { %1730 = vmatmul.bf16.gmra.mxu1 %v2971_v43 }
 0x1ce   : > { %v3439_v51 = vpack.c.bf16 %v2027_v50, %v2025_v49  ;;  %1899 = vmatmul.bf16.gmra.mxu2 %v2975_v47  ;;  %v3014_v47 = vld [vmem:[%s3715_s23 + $0x3a0] sm:$0xf]  ;;  %v3307_v49 = vld [vmem:[%s3715_s23 + $0x3a4] sm:$0xf]  ;;  %v3016_v50 = vld [vmem:[%s3715_s23 + $0x3b0] sm:$0xf0] }
 0x1cf   : > { %2068 = vmatmul.bf16.gmra.mxu3 %v2979_v48  ;;  %v3309_v48 = vld [vmem:[%s3715_s23 + $0x3ac] sm:$0xf0]  ;;  %v3019_v60 = vor.u32 %v3307_v49, %v3016_v50 }
 0x1d0   : > { %3527 = vst [vmem:[%s3819_s11 + $0x88] sm:$0xff] %v3439_v51   ;;  %v3022_v51 = vld [vmem:[%s3715_s23 + $0x3a8] sm:$0xf]  ;;  %v3015_v59 = vor.u32 %v3309_v48, %v3014_v47 }
 0x1d1   : > { %v1860_v52 = vpop.f32.mrf.mxu2  ;;  %v1524_v54 = vpop.f32.mrf.mxu0 }
 0x1d2   : > { %v2029_v53 = vpop.f32.mrf.mxu3  ;;  %v1693_v55 = vpop.f32.mrf.mxu1  ;;  %v1861_v1 = vadd.f32 %v1860_v52, %v1692_v56  ;;  %v3310_v52 = vld [vmem:[%s3715_s23 + $0x3b4] sm:$0xf0] }
 0x1d3   : > { %v1694_v2 = vadd.f32 %v1693_v55, %v1524_v54  ;;  %v3024_v54 = vld [vmem:[%s3715_s23 + $0x3b8] sm:$0xf0]  ;;  %v3023_v0 = vor.u32 %v3310_v52, %v3022_v51 }
 0x1d4   : > { %v2030_v12 = vadd.f32 %v2029_v53, %v1861_v1  ;;  %v3308_v53 = vld [vmem:[%s3715_s23 + $0x3ac] sm:$0xf] }
 0x1d5   : > { %v3027_v1 = vor.u32 %v3308_v53, %v3024_v54 }
 0x1d9   : > { %v1862_v3 = vpop.f32.mrf.mxu2  ;;  %v1527_v8 = vpop.f32.mrf.mxu0 }
 0x1da   : > { %v2031_v4 = vpop.f32.mrf.mxu3  ;;  %v1863_v7 = vadd.f32 %v1862_v3, %v1694_v2  ;;  %v1696_v9 = vpop.f32.mrf.mxu1 }
 0x1db   : > { %v1697_v19 = vadd.f32 %v1696_v9, %v1527_v8 }
 0x1dc   : > { %v2032_v13 = vadd.f32 %v2031_v4, %v1863_v7  ;;  %1566 = vmatmul.bf16.gmra.mxu0 %v2983_v5 }
 0x1dd   : > { %1735 = vmatmul.bf16.gmra.mxu1 %v2987_v6 }
 0x1de   : > { %v3444_v14 = vpack.c.bf16 %v2032_v13, %v2030_v12  ;;  %1904 = vmatmul.bf16.gmra.mxu2 %v2991_v10  ;;  %v3030_v10 = vld [vmem:[%s3715_s23 + $0x3c0] sm:$0xf]  ;;  %v3311_v12 = vld [vmem:[%s3715_s23 + $0x3c4] sm:$0xf]  ;;  %v3032_v13 = vld [vmem:[%s3715_s23 + $0x3d0] sm:$0xf0] }
 0x1df   : > { %2073 = vmatmul.bf16.gmra.mxu3 %v2995_v11  ;;  %v3313_v11 = vld [vmem:[%s3715_s23 + $0x3cc] sm:$0xf0]  ;;  %v3035_v23 = vor.u32 %v3311_v12, %v3032_v13 }
 0x1e0   : > { %3528 = vst [vmem:[%s3819_s11 + $0x90] sm:$0xff] %v3444_v14   ;;  %v3038_v14 = vld [vmem:[%s3715_s23 + $0x3c8] sm:$0xf]  ;;  %v3031_v22 = vor.u32 %v3313_v11, %v3030_v10 }
 0x1e1   : > { %v1865_v15 = vpop.f32.mrf.mxu2  ;;  %v1529_v17 = vpop.f32.mrf.mxu0 }
 0x1e2   : > { %v2034_v16 = vpop.f32.mrf.mxu3  ;;  %v1698_v18 = vpop.f32.mrf.mxu1  ;;  %v1866_v28 = vadd.f32 %v1865_v15, %v1697_v19  ;;  %v3314_v15 = vld [vmem:[%s3715_s23 + $0x3d4] sm:$0xf0] }
 0x1e3   : > { %v1699_v29 = vadd.f32 %v1698_v18, %v1529_v17  ;;  %v3040_v17 = vld [vmem:[%s3715_s23 + $0x3d8] sm:$0xf0]  ;;  %v3039_v27 = vor.u32 %v3314_v15, %v3038_v14 }
 0x1e4   : > { %v2035_v39 = vadd.f32 %v2034_v16, %v1866_v28  ;;  %v3312_v16 = vld [vmem:[%s3715_s23 + $0x3cc] sm:$0xf] }
 0x1e5   : > { %v3043_v28 = vor.u32 %v3312_v16, %v3040_v17 }
 0x1e9   : > { %v1867_v30 = vpop.f32.mrf.mxu2  ;;  %v1532_v35 = vpop.f32.mrf.mxu0 }
 0x1ea   : > { %v2036_v31 = vpop.f32.mrf.mxu3  ;;  %v1868_v34 = vadd.f32 %v1867_v30, %v1699_v29  ;;  %v1701_v36 = vpop.f32.mrf.mxu1 }
 0x1eb   : > { %v1702_v46 = vadd.f32 %v1701_v36, %v1532_v35 }
 0x1ec   : > { %v2037_v40 = vadd.f32 %v2036_v31, %v1868_v34  ;;  %1571 = vmatmul.bf16.gmra.mxu0 %v2999_v32 }
 0x1ed   : > { %1740 = vmatmul.bf16.gmra.mxu1 %v3003_v33 }
 0x1ee   : > { %v3449_v41 = vpack.c.bf16 %v2037_v40, %v2035_v39  ;;  %1909 = vmatmul.bf16.gmra.mxu2 %v3007_v37  ;;  %v3046_v37 = vld [vmem:[%s3715_s23 + $0x3e0] sm:$0xf]  ;;  %v3315_v39 = vld [vmem:[%s3715_s23 + $0x3e4] sm:$0xf]  ;;  %v3048_v40 = vld [vmem:[%s3715_s23 + $0x3f0] sm:$0xf0] }
 0x1ef   : > { %2078 = vmatmul.bf16.gmra.mxu3 %v3011_v38  ;;  %v3317_v38 = vld [vmem:[%s3715_s23 + $0x3ec] sm:$0xf0]  ;;  %v3051_v50 = vor.u32 %v3315_v39, %v3048_v40 }
 0x1f0   : > { %3529 = vst [vmem:[%s3819_s11 + $0x98] sm:$0xff] %v3449_v41   ;;  %v3054_v41 = vld [vmem:[%s3715_s23 + $0x3e8] sm:$0xf]  ;;  %v3047_v49 = vor.u32 %v3317_v38, %v3046_v37 }
 0x1f1   : > { %v1870_v42 = vpop.f32.mrf.mxu2  ;;  %v1534_v44 = vpop.f32.mrf.mxu0 }
 0x1f2   : > { %v2039_v43 = vpop.f32.mrf.mxu3  ;;  %v1703_v45 = vpop.f32.mrf.mxu1  ;;  %v1871_v55 = vadd.f32 %v1870_v42, %v1702_v46  ;;  %v3318_v42 = vld [vmem:[%s3715_s23 + $0x3f4] sm:$0xf0] }
 0x1f3   : > { %v1704_v56 = vadd.f32 %v1703_v45, %v1534_v44  ;;  %v3056_v44 = vld [vmem:[%s3715_s23 + $0x3f8] sm:$0xf0]  ;;  %v3055_v54 = vor.u32 %v3318_v42, %v3054_v41 }
 0x1f4   : > { %v2040_v2 = vadd.f32 %v2039_v43, %v1871_v55  ;;  %v3316_v43 = vld [vmem:[%s3715_s23 + $0x3ec] sm:$0xf] }
 0x1f5   : > { %v3059_v55 = vor.u32 %v3316_v43, %v3056_v44 }
 0x1f9   : > { %v1872_v57 = vpop.f32.mrf.mxu2  ;;  %v1537_v62 = vpop.f32.mrf.mxu0 }
 0x1fa   : > { %v2041_v58 = vpop.f32.mrf.mxu3  ;;  %v1873_v61 = vadd.f32 %v1872_v57, %v1704_v56  ;;  %v1706_v63 = vpop.f32.mrf.mxu1 }
 0x1fb   : > { %v1707_v9 = vadd.f32 %v1706_v63, %v1537_v62 }
 0x1fc   : > { %v2042_v3 = vadd.f32 %v2041_v58, %v1873_v61  ;;  %1576 = vmatmul.bf16.gmra.mxu0 %v3015_v59 }
 0x1fd   : > { %1745 = vmatmul.bf16.gmra.mxu1 %v3019_v60 }
 0x1fe   : > { %v3454_v4 = vpack.c.bf16 %v2042_v3, %v2040_v2  ;;  %1914 = vmatmul.bf16.gmra.mxu2 %v3023_v0 }
 0x1ff   : > { %2083 = vmatmul.bf16.gmra.mxu3 %v3027_v1 }
 0x200   : > { %3530 = vst [vmem:[%s3819_s11 + $0xa0] sm:$0xff] %v3454_v4  }
 0x201   : > { %v1875_v5 = vpop.f32.mrf.mxu2  ;;  %v1539_v7 = vpop.f32.mrf.mxu0 }
 0x202   : > { %v2044_v6 = vpop.f32.mrf.mxu3  ;;  %v1708_v8 = vpop.f32.mrf.mxu1  ;;  %v1876_v18 = vadd.f32 %v1875_v5, %v1707_v9 }
 0x203   : > { %v1709_v19 = vadd.f32 %v1708_v8, %v1539_v7 }
 0x204   : > { %v2045_v29 = vadd.f32 %v2044_v6, %v1876_v18 }
 0x209   : > { %v1877_v20 = vpop.f32.mrf.mxu2  ;;  %v1542_v25 = vpop.f32.mrf.mxu0 }
 0x20a   : > { %v2046_v21 = vpop.f32.mrf.mxu3  ;;  %v1878_v24 = vadd.f32 %v1877_v20, %v1709_v19  ;;  %v1711_v26 = vpop.f32.mrf.mxu1 }
 0x20b   : > { %v1712_v36 = vadd.f32 %v1711_v26, %v1542_v25 }
 0x20c   : > { %v2047_v30 = vadd.f32 %v2046_v21, %v1878_v24  ;;  %1581 = vmatmul.bf16.gmra.mxu0 %v3031_v22 }
 0x20d   : > { %1750 = vmatmul.bf16.gmra.mxu1 %v3035_v23 }
 0x20e   : > { %v3459_v31 = vpack.c.bf16 %v2047_v30, %v2045_v29  ;;  %1919 = vmatmul.bf16.gmra.mxu2 %v3039_v27 }
 0x20f   : > { %2088 = vmatmul.bf16.gmra.mxu3 %v3043_v28 }
 0x210   : > { %3531 = vst [vmem:[%s3819_s11 + $0xa8] sm:$0xff] %v3459_v31  }
 0x211   : > { %v1880_v32 = vpop.f32.mrf.mxu2  ;;  %v1544_v34 = vpop.f32.mrf.mxu0 }
 0x212   : > { %v2049_v33 = vpop.f32.mrf.mxu3  ;;  %v1713_v35 = vpop.f32.mrf.mxu1  ;;  %v1881_v45 = vadd.f32 %v1880_v32, %v1712_v36 }
 0x213   : > { %v1714_v46 = vadd.f32 %v1713_v35, %v1544_v34 }
 0x214   : > { %v2050_v56 = vadd.f32 %v2049_v33, %v1881_v45 }
 0x219   : > { %v1882_v47 = vpop.f32.mrf.mxu2  ;;  %v1547_v52 = vpop.f32.mrf.mxu0 }
 0x21a   : > { %v2051_v48 = vpop.f32.mrf.mxu3  ;;  %v1883_v51 = vadd.f32 %v1882_v47, %v1714_v46  ;;  %v1716_v53 = vpop.f32.mrf.mxu1 }
 0x21b   : > { %v1717_v63 = vadd.f32 %v1716_v53, %v1547_v52 }
 0x21c   : > { %v2052_v57 = vadd.f32 %v2051_v48, %v1883_v51  ;;  %1586 = vmatmul.bf16.gmra.mxu0 %v3047_v49 }
 0x21d   : > { %1755 = vmatmul.bf16.gmra.mxu1 %v3051_v50 }
 0x21e   : > { %v3464_v58 = vpack.c.bf16 %v2052_v57, %v2050_v56  ;;  %1924 = vmatmul.bf16.gmra.mxu2 %v3055_v54 }
 0x21f   : > { %2093 = vmatmul.bf16.gmra.mxu3 %v3059_v55 }
 0x220   : > { %3532 = vst [vmem:[%s3819_s11 + $0xb0] sm:$0xff] %v3464_v58  }
 0x221   : > { %v1885_v59 = vpop.f32.mrf.mxu2  ;;  %v1549_v61 = vpop.f32.mrf.mxu0 }
 0x222   : > { %v2054_v60 = vpop.f32.mrf.mxu3  ;;  %v1718_v62 = vpop.f32.mrf.mxu1  ;;  %v1886_v0 = vadd.f32 %v1885_v59, %v1717_v63 }
 0x223   : > { %v1719_v1 = vadd.f32 %v1718_v62, %v1549_v61 }
 0x224   : > { %v2055_v7 = vadd.f32 %v2054_v60, %v1886_v0 }
 0x229   : > { %v1887_v2 = vpop.f32.mrf.mxu2  ;;  %v1552_v5 = vpop.f32.mrf.mxu0 }
 0x22a   : > { %v2056_v3 = vpop.f32.mrf.mxu3  ;;  %v1888_v4 = vadd.f32 %v1887_v2, %v1719_v1  ;;  %v1721_v6 = vpop.f32.mrf.mxu1 }
 0x22b   : > { %v1722_v14 = vadd.f32 %v1721_v6, %v1552_v5 }
 0x22c   : > { %v2057_v8 = vadd.f32 %v2056_v3, %v1888_v4 }
 0x22e   : > { %v3469_v9 = vpack.c.bf16 %v2057_v8, %v2055_v7 }
 0x230   : > { %3533 = vst [vmem:[%s3819_s11 + $0xb8] sm:$0xff] %v3469_v9  }
 0x231   : > { %v1890_v10 = vpop.f32.mrf.mxu2  ;;  %v1554_v12 = vpop.f32.mrf.mxu0 }
 0x232   : > { %v2059_v11 = vpop.f32.mrf.mxu3  ;;  %v1723_v13 = vpop.f32.mrf.mxu1  ;;  %v1891_v15 = vadd.f32 %v1890_v10, %v1722_v14 }
 0x233   : > { %v1724_v16 = vadd.f32 %v1723_v13, %v1554_v12 }
 0x234   : > { %v2060_v22 = vadd.f32 %v2059_v11, %v1891_v15 }
 0x239   : > { %v1892_v17 = vpop.f32.mrf.mxu2  ;;  %v1557_v20 = vpop.f32.mrf.mxu0 }
 0x23a   : > { %v2061_v18 = vpop.f32.mrf.mxu3  ;;  %v1893_v19 = vadd.f32 %v1892_v17, %v1724_v16  ;;  %v1726_v21 = vpop.f32.mrf.mxu1 }
 0x23b   : > { %v1727_v29 = vadd.f32 %v1726_v21, %v1557_v20 }
 0x23c   : > { %v2062_v23 = vadd.f32 %v2061_v18, %v1893_v19 }
 0x23e   : > { %v3474_v24 = vpack.c.bf16 %v2062_v23, %v2060_v22 }
 0x240   : > { %3534 = vst [vmem:[%s3819_s11 + $0xc0] sm:$0xff] %v3474_v24  }
 0x241   : > { %v1895_v25 = vpop.f32.mrf.mxu2  ;;  %v1559_v27 = vpop.f32.mrf.mxu0 }
 0x242   : > { %v2064_v26 = vpop.f32.mrf.mxu3  ;;  %v1728_v28 = vpop.f32.mrf.mxu1  ;;  %v1896_v30 = vadd.f32 %v1895_v25, %v1727_v29 }
 0x243   : > { %v1729_v31 = vadd.f32 %v1728_v28, %v1559_v27 }
 0x244   : > { %v2065_v37 = vadd.f32 %v2064_v26, %v1896_v30 }
 0x249   : > { %v1897_v32 = vpop.f32.mrf.mxu2  ;;  %v1562_v35 = vpop.f32.mrf.mxu0 }
 0x24a   : > { %v2066_v33 = vpop.f32.mrf.mxu3  ;;  %v1898_v34 = vadd.f32 %v1897_v32, %v1729_v31  ;;  %v1731_v36 = vpop.f32.mrf.mxu1 }
 0x24b   : > { %v1732_v44 = vadd.f32 %v1731_v36, %v1562_v35 }
 0x24c   : > { %v2067_v38 = vadd.f32 %v2066_v33, %v1898_v34 }
 0x24e   : > { %v3479_v39 = vpack.c.bf16 %v2067_v38, %v2065_v37 }
 0x250   : > { %3535 = vst [vmem:[%s3819_s11 + $0xc8] sm:$0xff] %v3479_v39  }
 0x251   : > { %v1900_v40 = vpop.f32.mrf.mxu2  ;;  %v1564_v42 = vpop.f32.mrf.mxu0 }
 0x252   : > { %v2069_v41 = vpop.f32.mrf.mxu3  ;;  %v1733_v43 = vpop.f32.mrf.mxu1  ;;  %v1901_v45 = vadd.f32 %v1900_v40, %v1732_v44 }
 0x253   : > { %v1734_v46 = vadd.f32 %v1733_v43, %v1564_v42 }
 0x254   : > { %v2070_v52 = vadd.f32 %v2069_v41, %v1901_v45 }
 0x259   : > { %v1902_v47 = vpop.f32.mrf.mxu2  ;;  %v1567_v50 = vpop.f32.mrf.mxu0 }
 0x25a   : > { %v2071_v48 = vpop.f32.mrf.mxu3  ;;  %v1903_v49 = vadd.f32 %v1902_v47, %v1734_v46  ;;  %v1736_v51 = vpop.f32.mrf.mxu1 }
 0x25b   : > { %v1737_v59 = vadd.f32 %v1736_v51, %v1567_v50 }
 0x25c   : > { %v2072_v53 = vadd.f32 %v2071_v48, %v1903_v49 }
 0x25e   : > { %v3484_v54 = vpack.c.bf16 %v2072_v53, %v2070_v52 }
 0x260   : > { %3536 = vst [vmem:[%s3819_s11 + $0xd0] sm:$0xff] %v3484_v54  }
 0x261   : > { %v1905_v55 = vpop.f32.mrf.mxu2  ;;  %v1569_v57 = vpop.f32.mrf.mxu0 }
 0x262   : > { %v2074_v56 = vpop.f32.mrf.mxu3  ;;  %v1738_v58 = vpop.f32.mrf.mxu1  ;;  %v1906_v60 = vadd.f32 %v1905_v55, %v1737_v59 }
 0x263   : > { %v1739_v61 = vadd.f32 %v1738_v58, %v1569_v57 }
 0x264   : > { %v2075_v3 = vadd.f32 %v2074_v56, %v1906_v60 }
 0x269   : > { %v1907_v62 = vpop.f32.mrf.mxu2  ;;  %v1572_v1 = vpop.f32.mrf.mxu0 }
 0x26a   : > { %v2076_v63 = vpop.f32.mrf.mxu3  ;;  %v1908_v0 = vadd.f32 %v1907_v62, %v1739_v61  ;;  %v1741_v2 = vpop.f32.mrf.mxu1 }
 0x26b   : > { %v1742_v10 = vadd.f32 %v1741_v2, %v1572_v1 }
 0x26c   : > { %v2077_v4 = vadd.f32 %v2076_v63, %v1908_v0 }
 0x26e   : > { %v3489_v5 = vpack.c.bf16 %v2077_v4, %v2075_v3 }
 0x270   : > { %3537 = vst [vmem:[%s3819_s11 + $0xd8] sm:$0xff] %v3489_v5  }
 0x271   : > { %v1910_v6 = vpop.f32.mrf.mxu2  ;;  %v1574_v8 = vpop.f32.mrf.mxu0 }
 0x272   : > { %v2079_v7 = vpop.f32.mrf.mxu3  ;;  %v1743_v9 = vpop.f32.mrf.mxu1  ;;  %v1911_v11 = vadd.f32 %v1910_v6, %v1742_v10 }
 0x273   : > { %v1744_v12 = vadd.f32 %v1743_v9, %v1574_v8 }
 0x274   : > { %v2080_v18 = vadd.f32 %v2079_v7, %v1911_v11 }
 0x279   : > { %v1912_v13 = vpop.f32.mrf.mxu2  ;;  %v1577_v16 = vpop.f32.mrf.mxu0 }
 0x27a   : > { %v2081_v14 = vpop.f32.mrf.mxu3  ;;  %v1913_v15 = vadd.f32 %v1912_v13, %v1744_v12  ;;  %v1746_v17 = vpop.f32.mrf.mxu1 }
 0x27b   : > { %v1747_v25 = vadd.f32 %v1746_v17, %v1577_v16 }
 0x27c   : > { %v2082_v19 = vadd.f32 %v2081_v14, %v1913_v15 }
 0x27e   : > { %v3494_v20 = vpack.c.bf16 %v2082_v19, %v2080_v18 }
 0x280   : > { %3538 = vst [vmem:[%s3819_s11 + $0xe0] sm:$0xff] %v3494_v20  }
 0x281   : > { %v1915_v21 = vpop.f32.mrf.mxu2  ;;  %v1579_v23 = vpop.f32.mrf.mxu0 }
 0x282   : > { %v2084_v22 = vpop.f32.mrf.mxu3  ;;  %v1748_v24 = vpop.f32.mrf.mxu1  ;;  %v1916_v26 = vadd.f32 %v1915_v21, %v1747_v25 }
 0x283   : > { %v1749_v27 = vadd.f32 %v1748_v24, %v1579_v23 }
 0x284   : > { %v2085_v33 = vadd.f32 %v2084_v22, %v1916_v26 }
 0x289   : > { %v1917_v28 = vpop.f32.mrf.mxu2  ;;  %v1582_v31 = vpop.f32.mrf.mxu0 }
 0x28a   : > { %v2086_v29 = vpop.f32.mrf.mxu3  ;;  %v1918_v30 = vadd.f32 %v1917_v28, %v1749_v27  ;;  %v1751_v32 = vpop.f32.mrf.mxu1 }
 0x28b   : > { %v1752_v40 = vadd.f32 %v1751_v32, %v1582_v31 }
 0x28c   : > { %v2087_v34 = vadd.f32 %v2086_v29, %v1918_v30 }
 0x28e   : > { %v3499_v35 = vpack.c.bf16 %v2087_v34, %v2085_v33 }
 0x290   : > { %3539 = vst [vmem:[%s3819_s11 + $0xe8] sm:$0xff] %v3499_v35  }
 0x291   : > { %v1920_v36 = vpop.f32.mrf.mxu2  ;;  %v1584_v38 = vpop.f32.mrf.mxu0 }
 0x292   : > { %v2089_v37 = vpop.f32.mrf.mxu3  ;;  %v1753_v39 = vpop.f32.mrf.mxu1  ;;  %v1921_v41 = vadd.f32 %v1920_v36, %v1752_v40 }
 0x293   : > { %v1754_v42 = vadd.f32 %v1753_v39, %v1584_v38 }
 0x294   : > { %v2090_v48 = vadd.f32 %v2089_v37, %v1921_v41 }
 0x299   : > { %v1922_v43 = vpop.f32.mrf.mxu2  ;;  %v1587_v46 = vpop.f32.mrf.mxu0 }
 0x29a   : > { %v2091_v44 = vpop.f32.mrf.mxu3  ;;  %v1923_v45 = vadd.f32 %v1922_v43, %v1754_v42  ;;  %v1756_v47 = vpop.f32.mrf.mxu1 }
 0x29b   : > { %v1757_v53 = vadd.f32 %v1756_v47, %v1587_v46 }
 0x29c   : > { %v2092_v49 = vadd.f32 %v2091_v44, %v1923_v45 }
 0x29e   : > { %v3504_v50 = vpack.c.bf16 %v2092_v49, %v2090_v48 }
 0x2a0   : > { %3540 = vst [vmem:[%s3819_s11 + $0xf0] sm:$0xff] %v3504_v50  }
 0x2a1   : > { %v1925_v51 = vpop.f32.mrf.mxu2  ;;  %v1589_v54 = vpop.f32.mrf.mxu0 }
 0x2a2   : > { %v2094_v52 = vpop.f32.mrf.mxu3  ;;  %v1758_v55 = vpop.f32.mrf.mxu1  ;;  %v1926_v56 = vadd.f32 %v1925_v51, %v1757_v53 }
 0x2a3   : > { %v1759_v57 = vadd.f32 %v1758_v55, %v1589_v54 }
 0x2a4   : > { %v2095_v61 = vadd.f32 %v2094_v52, %v1926_v56 }
 0x2a9   : > { %v1927_v58 = vpop.f32.mrf.mxu2 }
 0x2aa   : > { %v1928_v59 = vadd.f32 %v1927_v58, %v1759_v57  ;;  %v2096_v60 = vpop.f32.mrf.mxu3 }
 0x2ac   : > { %v2097_v62 = vadd.f32 %v2096_v60, %v1928_v59 }
 0x2ae   : > { %v3509_v63 = vpack.c.bf16 %v2097_v62, %v2095_v61 }
 0x2b0   : > { %3541 = vst [vmem:[%s3819_s11 + $0xf8] sm:$0xff] %v3509_v63  }
 0x2b1 PF: > { %s13_s14 = sadd.s32 1, %s3588_s14   ;;  %s4042_s12 = smov %s3584_s13 }
 0x2b2   : > { %p10_p5 = scmp.ge.s32.totalorder %s13_s14, 4   ;;  %s4043_s13 = smov %s4045_s2 }
 0x2b4   :  { %12 = sbr.rel (!%p10_p5) target bundleno = 2 (0x2), region = 76 }

// kernel: _lambda_.12
= control target key start
LH: loop header
LB: loop body
LE: loop exit
PB: predicated region body
PF: predicated region fallthrough
CT: control target
= control target key end

     0   :  { %s471_s6 = smov 0   ;;  %s473_s7 = smov 0   ;;  %s545_s0 = inlined_call_operand.vmem [shape: bf16[2,64,32], index: 0, kind: input, shape index: {}]   ;;  %s546_s1 = inlined_call_operand.vmem [shape: bf16[2,64,32], index: 1, kind: output, shape index: {}]  }
   0x1   :  { %s475_s8 = smov 0  }
   0x2 LB: > { %s23_s9 = sadd.s32 1, %s454_s7  ;;  %p379_p0 = scmp.ge.s32.totalorder %s458_s8, 1  ;;  %s458_s8 = sphi %s475_s8, %s11_s8   ;;  %s454_s7 = sphi %s473_s7, %s548_s7   ;;  %s450_s6 = sphi %s471_s6, %s547_s6  }
   0x3   : > { %p25_p1 = scmp.ge.s32.totalorder %s23_s9, 2  ;;  %p106_p2 = scmp.lt.s32.totalorder %s458_s8, 3 }
   0x5   : > { %s550_s9 = smov (%p25_p1, %s23_s9), 0  ;;  %p107_p3 = pnand %p379_p0, %p106_p2 }
   0x6   : > { %p132_p4 = scmp.lt.s32.totalorder (!%p107_p3), %s450_s6, 1 }
   0x7   : > { %110 = sbr.rel (%p107_p3) target bundleno = 115 (0x73), region = 24 }
   0xc   : > { %s552_s6 = smov (!%p132_p4, %s450_s6), 1  ;;  %vm164_vm0 = vcmask 261120   ;;  %v460_v7 = vmov 64.0   ;;  %vm283_vm5 = vcmask 257024  }
   0xd   : > { %s386_s10 = sshll.u32 %s552_s6, 5  ;;  %432 = vrcp.f32 %v460_v7 }
   0xe   : > { %s139_s13 = scalar_lea.vmem %s545_s0, %s386_s10  ;;  %s518_s16 = scalar_lea.vmem %s546_s1, %s386_s10 }
   0xf   : > { %v389_v0 = vld [vmem:[%s139_s13] sm:$0xff]   ;;  %v404_v1 = vld [vmem:[%s139_s13 + $0x8] sm:$0xff]   ;;  %v405_v2 = vld [vmem:[%s139_s13 + $0x10] sm:$0xff]  }
  0x10   : > { %v390_v3 = vunpack.c.l.bf16 %v389_v0  ;;  %v391_v4 = vunpack.c.h.bf16 %v389_v0  ;;  %v394_v5 = vunpack.c.l.bf16 %v404_v1  ;;  %v395_v6 = vunpack.c.h.bf16 %v404_v1  ;;  %v406_v12 = vld [vmem:[%s139_s13 + $0x18] sm:$0xff]  }
  0x11   : > { %v398_v8 = vunpack.c.l.bf16 %v405_v2  ;;  %v399_v14 = vunpack.c.h.bf16 %v405_v2  ;;  %v402_v17 = vunpack.c.l.bf16 %v406_v12  ;;  %v403_v21 = vunpack.c.h.bf16 %v406_v12 }
  0x12   : > { %v165_v9 = vsel %vm164_vm0, %v390_v3, 0.0  ;;  %v166_v10 = vsel %vm164_vm0, %v391_v4, 0.0  ;;  %v168_v11 = vsel %vm164_vm0, %v394_v5, 0.0  ;;  %v170_v15 = vsel %vm164_vm0, %v395_v6, 0.0 }
  0x13   : > { %v167_v13 = vadd.f32 %v166_v10, %v165_v9  ;;  %v172_v18 = vsel %vm164_vm0, %v398_v8, 0.0  ;;  %v433_v19 = vpop.eup %432  ;;  %v174_v22 = vsel %vm164_vm0, %v399_v14, 0.0  ;;  %v176_v24 = vsel %vm164_vm0, %v402_v17, 0.0 }
  0x14   : > { %v187_v25 = vmul.f32 64.0, %v433_v19  ;;  %v178_v27 = vsel %vm164_vm0, %v403_v21, 0.0  ;;  %vm191_vm1 = vweird.f32 %v433_v19 }
  0x15   : > { %v169_v16 = vadd.f32 %v168_v11, %v167_v13 }
  0x16   : > { %v188_v29 = vsub.f32 1.0, %v187_v25 }
  0x17   : > { %v171_v20 = vadd.f32 %v170_v15, %v169_v16 }
  0x18   : > { %v189_v32 = vmul.f32 %v433_v19, %v188_v29 }
  0x19   : > { %v173_v23 = vadd.f32 %v172_v18, %v171_v20 }
  0x1a   : > { %v190_v35 = vadd.f32 %v433_v19, %v189_v32 }
  0x1b   : > { %v175_v26 = vadd.f32 %v174_v22, %v173_v23 }
  0x1c   : > { %v192_v38 = vsel %vm191_vm1, %v433_v19, %v190_v35 }
  0x1d   : > { %v177_v28 = vadd.f32 %v176_v24, %v175_v26 }
  0x1f   : > { %v179_v30 = vadd.f32 %v178_v27, %v177_v28 }
  0x21   : > { %v180_v31 = vrot.slane %v179_v30, 4 }
  0x23   : > { %v181_v33 = vadd.f32 %v180_v31, %v179_v30 }
  0x25   : > { %v182_v34 = vrot.slane %v181_v33, 2 }
  0x27   : > { %v183_v36 = vadd.f32 %v182_v34, %v181_v33 }
  0x29   : > { %v184_v37 = vrot.slane %v183_v36, 1 }
  0x2b   : > { %v185_v39 = vadd.f32 %v184_v37, %v183_v36 }
  0x2d   : > { %v193_v40 = vmul.f32 %v192_v38, %v185_v39 }
  0x2f   : > { %v194_v41 = vsub.f32 %v390_v3, %v193_v40  ;;  %v195_v42 = vsub.f32 %v391_v4, %v193_v40  ;;  %v196_v43 = vsub.f32 %v394_v5, %v193_v40  ;;  %v197_v44 = vsub.f32 %v395_v6, %v193_v40 }
  0x30   : > { %v198_v45 = vsub.f32 %v398_v8, %v193_v40  ;;  %v199_v46 = vsub.f32 %v399_v14, %v193_v40  ;;  %v200_v51 = vsub.f32 %v402_v17, %v193_v40  ;;  %v201_v57 = vsub.f32 %v403_v21, %v193_v40 }
  0x31   : > { %v202_v47 = vmul.f32 %v194_v41, %v194_v41  ;;  %v203_v48 = vmul.f32 %v195_v42, %v195_v42  ;;  %v204_v49 = vmul.f32 %v196_v43, %v196_v43  ;;  %v205_v50 = vmul.f32 %v197_v44, %v197_v44 }
  0x32   : > { %v206_v52 = vmul.f32 %v198_v45, %v198_v45  ;;  %v207_v58 = vmul.f32 %v199_v46, %v199_v46  ;;  %v208_v61 = vmul.f32 %v200_v51, %v200_v51  ;;  %v209_v0 = vmul.f32 %v201_v57, %v201_v57 }
  0x33   : > { %v210_v53 = vsel %vm164_vm0, %v202_v47, 0.0  ;;  %v211_v54 = vsel %vm164_vm0, %v203_v48, 0.0  ;;  %v213_v55 = vsel %vm164_vm0, %v204_v49, 0.0  ;;  %v215_v59 = vsel %vm164_vm0, %v205_v50, 0.0 }
  0x34   : > { %v212_v56 = vadd.f32 %v211_v54, %v210_v53  ;;  %v217_v62 = vsel %vm164_vm0, %v206_v52, 0.0  ;;  %v219_v1 = vsel %vm164_vm0, %v207_v58, 0.0  ;;  %v221_v3 = vsel %vm164_vm0, %v208_v61, 0.0 }
  0x35   : > { %v223_v5 = vsel %vm164_vm0, %v209_v0, 0.0 }
  0x36   : > { %v214_v60 = vadd.f32 %v213_v55, %v212_v56 }
  0x38   : > { %v216_v63 = vadd.f32 %v215_v59, %v214_v60 }
  0x3a   : > { %v218_v2 = vadd.f32 %v217_v62, %v216_v63 }
  0x3c   : > { %v220_v4 = vadd.f32 %v219_v1, %v218_v2 }
  0x3e   : > { %v222_v6 = vadd.f32 %v221_v3, %v220_v4 }
  0x40   : > { %v224_v7 = vadd.f32 %v223_v5, %v222_v6 }
  0x42   : > { %v225_v8 = vrot.slane %v224_v7, 4 }
  0x44   : > { %v226_v9 = vadd.f32 %v225_v8, %v224_v7 }
  0x46   : > { %v227_v10 = vrot.slane %v226_v9, 2 }
  0x48   : > { %v228_v11 = vadd.f32 %v227_v10, %v226_v9 }
  0x4a   : > { %v229_v12 = vrot.slane %v228_v11, 1 }
  0x4c   : > { %v230_v13 = vadd.f32 %v229_v12, %v228_v11 }
  0x4e   : > { %v231_v14 = vmul.f32 %v230_v13, %v192_v38 }
  0x50   : > { %v232_v15 = vadd.f32 1e-05, %v231_v14 }
  0x52   : > { %434 = vrsqrt.f32 %v232_v15  ;;  %vm239_vm2 = vweird.f32 %v232_v15 }
  0x58   : > { %v435_v16 = vpop.eup %434 }
  0x59   : > { %v234_v17 = vmul.f32 %v435_v16, %v232_v15  ;;  %vm240_vm3 = vweird.f32 %v435_v16 }
  0x5a   : > { %vm241_vm4 = vmor %vm239_vm2, %vm240_vm3 }
  0x5b   : > { %v235_v18 = vmul.f32 %v435_v16, %v234_v17 }
  0x5d   : > { %v236_v19 = vmul.f32 0.5, %v235_v18 }
  0x5f   : > { %v237_v20 = vsub.f32 1.5, %v236_v19 }
  0x61   : > { %v238_v21 = vmul.f32 %v435_v16, %v237_v20 }
  0x63   : > { %v242_v22 = vsel %vm241_vm4, %v435_v16, %v238_v21 }
  0x64   : > { %v243_v23 = vmul.f32 %v242_v22, %v194_v41  ;;  %v244_v24 = vmul.f32 %v242_v22, %v195_v42  ;;  %v245_v25 = vmul.f32 %v242_v22, %v196_v43  ;;  %v246_v26 = vmul.f32 %v242_v22, %v197_v44 }
  0x65   : > { %v247_v27 = vmul.f32 %v242_v22, %v198_v45  ;;  %v248_v28 = vmul.f32 %v242_v22, %v199_v46  ;;  %v249_v29 = vmul.f32 %v242_v22, %v200_v51  ;;  %v250_v30 = vmul.f32 %v242_v22, %v201_v57 }
  0x66   : > { %vm251_vm6 = vcmp.ge.f32.partialorder %v243_v23, 0.0  ;;  %v259_v31 = vmul.f32 0.2, %v243_v23  ;;  %vm252_vm7 = vcmp.ge.f32.partialorder %v244_v24, 0.0  ;;  %v260_v32 = vmul.f32 0.2, %v244_v24 }
  0x67   : > { %vm253_vm8 = vcmp.ge.f32.partialorder %v245_v25, 0.0  ;;  %v261_v33 = vmul.f32 0.2, %v245_v25  ;;  %vm254_vm9 = vcmp.ge.f32.partialorder %v246_v26, 0.0  ;;  %v262_v34 = vmul.f32 0.2, %v246_v26 }
  0x68   : > { %v267_v35 = vsel %vm251_vm6, %v243_v23, %v259_v31  ;;  %v268_v36 = vsel %vm252_vm7, %v244_v24, %v260_v32  ;;  %vm255_vm10 = vcmp.ge.f32.partialorder %v247_v27, 0.0  ;;  %v263_v37 = vmul.f32 0.2, %v247_v27 }
  0x69   : > { %v275_v38 = vpack.c.bf16 %v267_v35, %v267_v35  ;;  %v276_v39 = vpack.c.bf16 %v268_v36, %v268_v36  ;;  %v269_v40 = vsel %vm253_vm8, %v245_v25, %v261_v33  ;;  %v270_v41 = vsel %vm254_vm9, %v246_v26, %v262_v34 }
  0x6a   : > { %v277_v42 = vpack.c.bf16 %v269_v40, %v269_v40  ;;  %v278_v43 = vpack.c.bf16 %v270_v41, %v270_v41  ;;  %v271_v44 = vsel %vm255_vm10, %v247_v27, %v263_v37  ;;  %vm256_vm11 = vcmp.ge.f32.partialorder %v248_v28, 0.0 }
  0x6b   : > { %284 = vst.msk [vmem:[%s518_s16] sm:$0xf] %vm283_vm5, %v275_v38  ;;  %v279_v45 = vpack.c.bf16 %v271_v44, %v271_v44  ;;  %v264_v46 = vmul.f32 0.2, %v248_v28  ;;  %vm257_vm12 = vcmp.ge.f32.partialorder %v249_v29, 0.0  ;;  %vm258_vm13 = vcmp.ge.f32.partialorder %v250_v30, 0.0 }
  0x6c   : > { %285 = vst.msk [vmem:[%s518_s16 + $0x4] sm:$0xf] %vm283_vm5, %v276_v39  ;;  %v265_v47 = vmul.f32 0.2, %v249_v29  ;;  %v266_v48 = vmul.f32 0.2, %v250_v30 }
  0x6d   : > { %286 = vst.msk [vmem:[%s518_s16 + $0x8] sm:$0xf] %vm283_vm5, %v277_v42  ;;  %v272_v49 = vsel %vm256_vm11, %v248_v28, %v264_v46 }
  0x6e   : > { %287 = vst.msk [vmem:[%s518_s16 + $0xc] sm:$0xf] %vm283_vm5, %v278_v43  ;;  %v280_v50 = vpack.c.bf16 %v272_v49, %v272_v49  ;;  %v273_v51 = vsel %vm257_vm12, %v249_v29, %v265_v47  ;;  %v274_v52 = vsel %vm258_vm13, %v250_v30, %v266_v48 }
  0x6f   : > { %288 = vst.msk [vmem:[%s518_s16 + $0x10] sm:$0xf] %vm283_vm5, %v279_v45  ;;  %v281_v53 = vpack.c.bf16 %v273_v51, %v273_v51  ;;  %v282_v54 = vpack.c.bf16 %v274_v52, %v274_v52 }
  0x70   : > { %289 = vst.msk [vmem:[%s518_s16 + $0x14] sm:$0xf] %vm283_vm5, %v280_v50 }
  0x71   : > { %290 = vst.msk [vmem:[%s518_s16 + $0x18] sm:$0xf] %vm283_vm5, %v281_v53 }
  0x72   : > { %291 = vst.msk [vmem:[%s518_s16 + $0x1c] sm:$0xf] %vm283_vm5, %v282_v54 }
  0x73 PF: > { %s11_s8 = sadd.s32 1, %s458_s8   ;;  %s547_s6 = smov %s454_s7 }
  0x74   : > { %p8_p5 = scmp.ge.s32.totalorder %s11_s8, 4   ;;  %s548_s7 = smov %s550_s9 }
  0x76   :  { %10 = sbr.rel (!%p8_p5) target bundleno = 2 (0x2), region = 54 }

// kernel: _lambda_.11
= control target key start
LH: loop header
LB: loop body
LE: loop exit
PB: predicated region body
PF: predicated region fallthrough
CT: control target
= control target key end

     0   :  { %s2780_s1 = inlined_call_operand.vmem [shape: bf16[1024,128], index: 1, kind: input, shape index: {}]   ;;  %s2781_s2 = inlined_call_operand.vmem [shape: f32[1,128], index: 2, kind: input, shape index: {}]   ;;  %s2782_s0 = inlined_call_operand.vmem [shape: bf16[128,1024], index: 0, kind: input, shape index: {}]   ;;  %s2783_s3 = inlined_call_operand.vmem [shape: bf16[128,128], index: 3, kind: output, shape index: {}]  }
   0x1   :  { %v2008_v0 = vld [vmem:[%s2780_s1 + $0x38] sm:$0xff]  ;;  %v2007_v4 = vld [vmem:[%s2780_s1 + $0x30] sm:$0xff]  ;;  %v2006_v8 = vld [vmem:[%s2780_s1 + $0x28] sm:$0xff] }
   0x2   :  { %v2016_v1 = vld [vmem:[%s2780_s1 + $0x78] sm:$0xff]  ;;  %946 = vmatpush.bf16.msra.mxu0 %v2008_v0  ;;  %v2015_v5 = vld [vmem:[%s2780_s1 + $0x70] sm:$0xff]  ;;  %v2014_v9 = vld [vmem:[%s2780_s1 + $0x68] sm:$0xff] }
   0x3   :  { %v2024_v2 = vld [vmem:[%s2780_s1 + $0xb8] sm:$0xff]  ;;  %995 = vmatpush.bf16.msra.mxu1 %v2016_v1  ;;  %v2023_v6 = vld [vmem:[%s2780_s1 + $0xb0] sm:$0xff]  ;;  %v2022_v10 = vld [vmem:[%s2780_s1 + $0xa8] sm:$0xff] }
   0x4   :  { %v2032_v3 = vld [vmem:[%s2780_s1 + $0xf8] sm:$0xff]  ;;  %1044 = vmatpush.bf16.msra.mxu2 %v2024_v2  ;;  %v2031_v7 = vld [vmem:[%s2780_s1 + $0xf0] sm:$0xff]  ;;  %v2030_v11 = vld [vmem:[%s2780_s1 + $0xe8] sm:$0xff] }
   0x5   :  { %1093 = vmatpush.bf16.msra.mxu3 %v2032_v3  ;;  %v2005_v12 = vld [vmem:[%s2780_s1 + $0x20] sm:$0xff]  ;;  %v2004_v16 = vld [vmem:[%s2780_s1 + $0x18] sm:$0xff]  ;;  %v2003_v20 = vld [vmem:[%s2780_s1 + $0x10] sm:$0xff] }
   0x6   :  { %947 = vmatpush.bf16.msra.mxu0 %v2007_v4  ;;  %v2013_v13 = vld [vmem:[%s2780_s1 + $0x60] sm:$0xff]  ;;  %v2012_v17 = vld [vmem:[%s2780_s1 + $0x58] sm:$0xff]  ;;  %v2011_v21 = vld [vmem:[%s2780_s1 + $0x50] sm:$0xff] }
   0x7   :  { %996 = vmatpush.bf16.msra.mxu1 %v2015_v5  ;;  %v2021_v14 = vld [vmem:[%s2780_s1 + $0xa0] sm:$0xff]  ;;  %v2020_v18 = vld [vmem:[%s2780_s1 + $0x98] sm:$0xff]  ;;  %v2019_v22 = vld [vmem:[%s2780_s1 + $0x90] sm:$0xff] }
   0x8   :  { %1045 = vmatpush.bf16.msra.mxu2 %v2023_v6  ;;  %v2029_v15 = vld [vmem:[%s2780_s1 + $0xe0] sm:$0xff]  ;;  %v2028_v19 = vld [vmem:[%s2780_s1 + $0xd8] sm:$0xff]  ;;  %v2027_v23 = vld [vmem:[%s2780_s1 + $0xd0] sm:$0xff] }
   0x9   :  { %1094 = vmatpush.bf16.msra.mxu3 %v2031_v7  ;;  %v2002_v24 = vld [vmem:[%s2780_s1 + $0x8] sm:$0xff]  ;;  %v2001_v28 = vld [vmem:[%s2780_s1] sm:$0xff]  ;;  %v2056_v40 = vld [vmem:[%s2780_s1 + $0x1b8] sm:$0xff] }
   0xa   :  { %948 = vmatpush.bf16.msra.mxu0 %v2006_v8  ;;  %v2010_v25 = vld [vmem:[%s2780_s1 + $0x48] sm:$0xff]  ;;  %v2009_v29 = vld [vmem:[%s2780_s1 + $0x40] sm:$0xff]  ;;  %v2040_v41 = vld [vmem:[%s2780_s1 + $0x138] sm:$0xff] }
   0xb   :  { %997 = vmatpush.bf16.msra.mxu1 %v2014_v9  ;;  %v2018_v26 = vld [vmem:[%s2780_s1 + $0x88] sm:$0xff]  ;;  %v2017_v30 = vld [vmem:[%s2780_s1 + $0x80] sm:$0xff]  ;;  %v2064_v46 = vld [vmem:[%s2780_s1 + $0x1f8] sm:$0xff] }
   0xc   :  { %1046 = vmatpush.bf16.msra.mxu2 %v2022_v10  ;;  %v2026_v27 = vld [vmem:[%s2780_s1 + $0xc8] sm:$0xff]  ;;  %v2025_v31 = vld [vmem:[%s2780_s1 + $0xc0] sm:$0xff]  ;;  %v2048_v47 = vld [vmem:[%s2780_s1 + $0x178] sm:$0xff] }
   0xd   :  { %1095 = vmatpush.bf16.msra.mxu3 %v2030_v11  ;;  %v1427_v32 = vld [vmem:[%s2782_s0] sm:$0xf]  ;;  %v1937_v34 = vld [vmem:[%s2782_s0 + $0x4] sm:$0xf]  ;;  %v1435_v36 = vld [vmem:[%s2782_s0 + $0x8] sm:$0xf] }
   0xe   :  { %949 = vmatpush.bf16.msra.mxu0 %v2005_v12  ;;  %v1941_v33 = vld [vmem:[%s2782_s0 + $0x1c] sm:$0xf0]  ;;  %v1429_v35 = vld [vmem:[%s2782_s0 + $0x20] sm:$0xf0]  ;;  %v1942_v37 = vld [vmem:[%s2782_s0 + $0x24] sm:$0xf0] }
   0xf   :  { %998 = vmatpush.bf16.msra.mxu1 %v2013_v13  ;;  %v1938_v38 = vld [vmem:[%s2782_s0 + $0xc] sm:$0xf]  ;;  %v1428_v42 = vor.u32 %v1941_v33, %v1427_v32  ;;  %v1432_v43 = vor.u32 %v1937_v34, %v1429_v35  ;;  %v1436_v44 = vor.u32 %v1942_v37, %v1435_v36  ;;  %v2055_v48 = vld [vmem:[%s2780_s1 + $0x1b0] sm:$0xff]  ;;  %v1459_v56 = vld [vmem:[%s2782_s0 + $0x40] sm:$0xf] }
  0x10   :  { %1047 = vmatpush.bf16.msra.mxu2 %v2021_v14  ;;  %v1437_v39 = vld [vmem:[%s2782_s0 + $0x28] sm:$0xf0]  ;;  %v2039_v49 = vld [vmem:[%s2780_s1 + $0x130] sm:$0xff]  ;;  %v1949_v57 = vld [vmem:[%s2782_s0 + $0x5c] sm:$0xf0] }
  0x11   :  { %1096 = vmatpush.bf16.msra.mxu3 %v2029_v15  ;;  %v1440_v45 = vor.u32 %v1938_v38, %v1437_v39  ;;  %v2063_v50 = vld [vmem:[%s2780_s1 + $0x1f0] sm:$0xff]  ;;  %v2054_v52 = vld [vmem:[%s2780_s1 + $0x1a8] sm:$0xff]  ;;  %v1945_v58 = vld [vmem:[%s2782_s0 + $0x44] sm:$0xf]  ;;  %v1460_v0 = vor.u32 %v1949_v57, %v1459_v56 }
  0x12   :  { %950 = vmatpush.bf16.msra.mxu0 %v2004_v16  ;;  %v2047_v51 = vld [vmem:[%s2780_s1 + $0x170] sm:$0xff]  ;;  %v2038_v53 = vld [vmem:[%s2780_s1 + $0x128] sm:$0xff]  ;;  %v1461_v59 = vld [vmem:[%s2782_s0 + $0x60] sm:$0xf0] }
  0x13   :  { %999 = vmatpush.bf16.msra.mxu1 %v2012_v17  ;;  %v2062_v54 = vld [vmem:[%s2780_s1 + $0x1e8] sm:$0xff]  ;;  %v1464_v1 = vor.u32 %v1945_v58, %v1461_v59  ;;  %v2053_v4 = vld [vmem:[%s2780_s1 + $0x1a0] sm:$0xff]  ;;  %v2051_v36 = vld [vmem:[%s2780_s1 + $0x190] sm:$0xff] }
  0x14   :  { %1048 = vmatpush.bf16.msra.mxu2 %v2020_v18  ;;  %v2046_v55 = vld [vmem:[%s2780_s1 + $0x168] sm:$0xff]  ;;  %v2037_v5 = vld [vmem:[%s2780_s1 + $0x120] sm:$0xff]  ;;  %v2035_v37 = vld [vmem:[%s2780_s1 + $0x110] sm:$0xff] }
  0x15   :  { %1097 = vmatpush.bf16.msra.mxu3 %v2028_v19  ;;  %v1467_v60 = vld [vmem:[%s2782_s0 + $0x48] sm:$0xf]  ;;  %v1946_v62 = vld [vmem:[%s2782_s0 + $0x4c] sm:$0xf]  ;;  %v2061_v6 = vld [vmem:[%s2780_s1 + $0x1e0] sm:$0xff] }
  0x16   :  { %951 = vmatpush.bf16.msra.mxu0 %v2003_v20  ;;  %v1950_v61 = vld [vmem:[%s2782_s0 + $0x64] sm:$0xf0]  ;;  %v1469_v63 = vld [vmem:[%s2782_s0 + $0x68] sm:$0xf0]  ;;  %v2045_v7 = vld [vmem:[%s2780_s1 + $0x160] sm:$0xff] }
  0x17   :  { %1000 = vmatpush.bf16.msra.mxu1 %v2011_v21  ;;  %v1468_v2 = vor.u32 %v1950_v61, %v1467_v60  ;;  %v1472_v3 = vor.u32 %v1946_v62, %v1469_v63  ;;  %v1491_v8 = vld [vmem:[%s2782_s0 + $0x80] sm:$0xf]  ;;  %v1953_v10 = vld [vmem:[%s2782_s0 + $0x84] sm:$0xf]  ;;  %v1499_v12 = vld [vmem:[%s2782_s0 + $0x88] sm:$0xf] }
  0x18   :  { %1049 = vmatpush.bf16.msra.mxu2 %v2019_v22  ;;  %v1957_v9 = vld [vmem:[%s2782_s0 + $0x9c] sm:$0xf0]  ;;  %v1493_v11 = vld [vmem:[%s2782_s0 + $0xa0] sm:$0xf0]  ;;  %v1958_v13 = vld [vmem:[%s2782_s0 + $0xa4] sm:$0xf0] }
  0x19   :  { %1098 = vmatpush.bf16.msra.mxu3 %v2027_v23  ;;  %v1954_v14 = vld [vmem:[%s2782_s0 + $0x8c] sm:$0xf]  ;;  %v1492_v16 = vor.u32 %v1957_v9, %v1491_v8  ;;  %v1496_v17 = vor.u32 %v1953_v10, %v1493_v11  ;;  %v1500_v18 = vor.u32 %v1958_v13, %v1499_v12  ;;  %v2052_v20 = vld [vmem:[%s2780_s1 + $0x198] sm:$0xff]  ;;  %v2059_v38 = vld [vmem:[%s2780_s1 + $0x1d0] sm:$0xff] }
  0x1a   :  { %952 = vmatpush.bf16.msra.mxu0 %v2002_v24  ;;  %v1501_v15 = vld [vmem:[%s2782_s0 + $0xa8] sm:$0xf0]  ;;  %v2036_v21 = vld [vmem:[%s2780_s1 + $0x118] sm:$0xff]  ;;  %v1523_v24 = vld [vmem:[%s2782_s0 + $0xc0] sm:$0xf] }
  0x1b   :  { %1001 = vmatpush.bf16.msra.mxu1 %v2010_v25  ;;  %v1504_v19 = vor.u32 %v1954_v14, %v1501_v15  ;;  %v2060_v22 = vld [vmem:[%s2780_s1 + $0x1d8] sm:$0xff]  ;;  %v1965_v25 = vld [vmem:[%s2782_s0 + $0xdc] sm:$0xf0]  ;;  %v2043_v39 = vld [vmem:[%s2780_s1 + $0x150] sm:$0xff] }
  0x1c   :  { %1050 = vmatpush.bf16.msra.mxu2 %v2018_v26  ;;  %v2044_v23 = vld [vmem:[%s2780_s1 + $0x158] sm:$0xff]  ;;  %v1961_v26 = vld [vmem:[%s2782_s0 + $0xc4] sm:$0xf]  ;;  %v1524_v32 = vor.u32 %v1965_v25, %v1523_v24  ;;  %v1587_v56 = vld [vmem:[%s2782_s0 + $0x140] sm:$0xf] }
  0x1d   :  { %1099 = vmatpush.bf16.msra.mxu3 %v2026_v27  ;;  %v1525_v27 = vld [vmem:[%s2782_s0 + $0xe0] sm:$0xf0]  ;;  %v1981_v57 = vld [vmem:[%s2782_s0 + $0x15c] sm:$0xf0]  ;;  %v1595_v60 = vld [vmem:[%s2782_s0 + $0x148] sm:$0xf] }
  0x1e   :  { %953 = vmatpush.bf16.msra.mxu0 %v2001_v28  ;;  %v1531_v28 = vld [vmem:[%s2782_s0 + $0xc8] sm:$0xf]  ;;  %v1528_v33 = vor.u32 %v1961_v26, %v1525_v27  ;;  %v1977_v58 = vld [vmem:[%s2782_s0 + $0x144] sm:$0xf]  ;;  %v1978_v62 = vld [vmem:[%s2782_s0 + $0x14c] sm:$0xf] }
  0x1f   :  { %1002 = vmatpush.bf16.msra.mxu1 %v2009_v29  ;;  %v1966_v29 = vld [vmem:[%s2782_s0 + $0xe4] sm:$0xf0]  ;;  %v1589_v59 = vld [vmem:[%s2782_s0 + $0x160] sm:$0xf0]  ;;  %v1597_v63 = vld [vmem:[%s2782_s0 + $0x168] sm:$0xf0] }
  0x20   :  { %1051 = vmatpush.bf16.msra.mxu2 %v2017_v30  ;;  %v1962_v30 = vld [vmem:[%s2782_s0 + $0xcc] sm:$0xf]  ;;  %v1532_v34 = vor.u32 %v1966_v29, %v1531_v28  ;;  %v1982_v61 = vld [vmem:[%s2782_s0 + $0x164] sm:$0xf0]  ;;  %v1619_v8 = vld [vmem:[%s2782_s0 + $0x180] sm:$0xf] }
  0x21   :  { %1100 = vmatpush.bf16.msra.mxu3 %v2025_v31  ;;  %954 = vmatmul.bf16.vlgmr.msra.gmra.mxu0 %v1428_v42  ;;  %v1533_v31 = vld [vmem:[%s2782_s0 + $0xe8] sm:$0xf0]  ;;  %v1969_v42 = vld [vmem:[%s2782_s0 + $0x104] sm:$0xf]  ;;  %v1989_v9 = vld [vmem:[%s2782_s0 + $0x19c] sm:$0xf0] }
  0x22   :  { %1142 = vmatpush.bf16.msrb.mxu0 %v2040_v41  ;;  %1003 = vmatmul.bf16.vlgmr.msra.gmra.mxu1 %v1432_v43  ;;  %v1536_v35 = vor.u32 %v1962_v30, %v1533_v31  ;;  %v1973_v41 = vld [vmem:[%s2782_s0 + $0x11c] sm:$0xf0]  ;;  %v1557_v43 = vld [vmem:[%s2782_s0 + $0x120] sm:$0xf0]  ;;  %v1627_v12 = vld [vmem:[%s2782_s0 + $0x188] sm:$0xf] }
  0x23   :  { %1052 = vmatmul.bf16.vlgmr.msra.gmra.mxu2 %v1436_v44  ;;  %1191 = vmatpush.bf16.msrb.mxu1 %v2048_v47  ;;  %v1563_v44 = vld [vmem:[%s2782_s0 + $0x108] sm:$0xf]  ;;  %v1565_v47 = vld [vmem:[%s2782_s0 + $0x128] sm:$0xf0]  ;;  %v1985_v10 = vld [vmem:[%s2782_s0 + $0x184] sm:$0xf] }
  0x24   :  { %1240 = vmatpush.bf16.msrb.mxu2 %v2056_v40  ;;  %1101 = vmatmul.bf16.vlgmr.msra.gmra.mxu3 %v1440_v45  ;;  %v1555_v40 = vld [vmem:[%s2782_s0 + $0x100] sm:$0xf]  ;;  %v1974_v45 = vld [vmem:[%s2782_s0 + $0x124] sm:$0xf0]  ;;  %v1621_v11 = vld [vmem:[%s2782_s0 + $0x1a0] sm:$0xf0] }
  0x25   :  { %1289 = vmatpush.bf16.msrb.mxu3 %v2064_v46  ;;  %v1970_v46 = vld [vmem:[%s2782_s0 + $0x10c] sm:$0xf]  ;;  %v1990_v13 = vld [vmem:[%s2782_s0 + $0x1a4] sm:$0xf0] }
  0x26   :  { %1143 = vmatpush.bf16.msrb.mxu0 %v2039_v49  ;;  %v1560_v49 = vor.u32 %v1969_v42, %v1557_v43  ;;  %v1986_v14 = vld [vmem:[%s2782_s0 + $0x18c] sm:$0xf]  ;;  %v1659_v24 = vld [vmem:[%s2782_s0 + $0x1c8] sm:$0xf] }
  0x27   :  { %1192 = vmatpush.bf16.msrb.mxu1 %v2047_v51  ;;  %v1568_v51 = vor.u32 %v1970_v46, %v1565_v47  ;;  %v1629_v15 = vld [vmem:[%s2782_s0 + $0x1a8] sm:$0xf0]  ;;  %v1998_v25 = vld [vmem:[%s2782_s0 + $0x1e4] sm:$0xf0] }
  0x28   :  { %1241 = vmatpush.bf16.msrb.mxu2 %v2055_v48  ;;  %v1556_v48 = vor.u32 %v1973_v41, %v1555_v40  ;;  %v1994_v26 = vld [vmem:[%s2782_s0 + $0x1cc] sm:$0xf]  ;;  %v1660_v30 = vor.u32 %v1998_v25, %v1659_v24 }
  0x29   :  { %1290 = vmatpush.bf16.msrb.mxu3 %v2063_v50  ;;  %v1564_v50 = vor.u32 %v1974_v45, %v1563_v44  ;;  %v1661_v27 = vld [vmem:[%s2782_s0 + $0x1e8] sm:$0xf0] }
  0x2a   :  { %1144 = vmatpush.bf16.msrb.mxu0 %v2038_v53  ;;  %v2034_v53 = vld [vmem:[%s2780_s1 + $0x108] sm:$0xff]  ;;  %v1664_v31 = vor.u32 %v1994_v26, %v1661_v27 }
  0x2b   :  { %1193 = vmatpush.bf16.msrb.mxu1 %v2046_v55  ;;  %v2042_v55 = vld [vmem:[%s2780_s1 + $0x148] sm:$0xff] }
  0x2c   :  { %1242 = vmatpush.bf16.msrb.mxu2 %v2054_v52  ;;  %v2050_v52 = vld [vmem:[%s2780_s1 + $0x188] sm:$0xff] }
  0x2d   :  { %1291 = vmatpush.bf16.msrb.mxu3 %v2062_v54  ;;  %v2058_v54 = vld [vmem:[%s2780_s1 + $0x1c8] sm:$0xff] }
  0x2e   :  { %1145 = vmatpush.bf16.msrb.mxu0 %v2037_v5  ;;  %v2033_v5 = vld [vmem:[%s2780_s1 + $0x100] sm:$0xff] }
  0x2f   :  { %1194 = vmatpush.bf16.msrb.mxu1 %v2045_v7  ;;  %v2041_v7 = vld [vmem:[%s2780_s1 + $0x140] sm:$0xff] }
  0x30   :  { %1243 = vmatpush.bf16.msrb.mxu2 %v2053_v4  ;;  %v2049_v4 = vld [vmem:[%s2780_s1 + $0x180] sm:$0xff] }
  0x31   :  { %959 = vmatmul.bf16.gmra.mxu0 %v1460_v0  ;;  %1292 = vmatpush.bf16.msrb.mxu3 %v2061_v6  ;;  %v1588_v0 = vor.u32 %v1981_v57, %v1587_v56  ;;  %v2057_v6 = vld [vmem:[%s2780_s1 + $0x1c0] sm:$0xff]  ;;  %v1947_v56 = vld [vmem:[%s2782_s0 + $0x54] sm:$0xf] }
  0x32   :  { %1008 = vmatmul.bf16.gmra.mxu1 %v1464_v1  ;;  %1146 = vmatpush.bf16.msrb.mxu0 %v2036_v21  ;;  %v1592_v1 = vor.u32 %v1977_v58, %v1589_v59  ;;  %v1997_v21 = vld [vmem:[%s2782_s0 + $0x1dc] sm:$0xf0]  ;;  %v1477_v57 = vld [vmem:[%s2782_s0 + $0x70] sm:$0xf0]  ;;  %v1483_v58 = vld [vmem:[%s2782_s0 + $0x58] sm:$0xf] }
  0x33   :  { %1057 = vmatmul.bf16.gmra.mxu2 %v1468_v2  ;;  %1195 = vmatpush.bf16.msrb.mxu1 %v2044_v23  ;;  %v1596_v2 = vor.u32 %v1982_v61, %v1595_v60  ;;  %v1653_v23 = vld [vmem:[%s2782_s0 + $0x1e0] sm:$0xf0]  ;;  %v1952_v59 = vld [vmem:[%s2782_s0 + $0x74] sm:$0xf0]  ;;  %v1948_v60 = vld [vmem:[%s2782_s0 + $0x5c] sm:$0xf] }
  0x34   :  { %1106 = vmatmul.bf16.gmra.mxu3 %v1472_v3  ;;  %1244 = vmatpush.bf16.msrb.mxu2 %v2052_v20  ;;  %v1600_v3 = vor.u32 %v1978_v62, %v1597_v63  ;;  %v1651_v20 = vld [vmem:[%s2782_s0 + $0x1c0] sm:$0xf]  ;;  %v1485_v61 = vld [vmem:[%s2782_s0 + $0x78] sm:$0xf0] }
  0x35   :  { %1293 = vmatpush.bf16.msrb.mxu3 %v2060_v22  ;;  %v1993_v22 = vld [vmem:[%s2782_s0 + $0x1c4] sm:$0xf]  ;;  %v1652_v28 = vor.u32 %v1997_v21, %v1651_v20  ;;  %v1515_v20 = vld [vmem:[%s2782_s0 + $0x98] sm:$0xf] }
  0x36   :  { %1147 = vmatpush.bf16.msrb.mxu0 %v2035_v37  ;;  %v1656_v29 = vor.u32 %v1993_v22, %v1653_v23  ;;  %v1944_v37 = vld [vmem:[%s2782_s0 + $0x34] sm:$0xf0]  ;;  %v1956_v22 = vld [vmem:[%s2782_s0 + $0x9c] sm:$0xf] }
  0x37   :  { %1196 = vmatpush.bf16.msrb.mxu1 %v2043_v39  ;;  %v1453_v39 = vld [vmem:[%s2782_s0 + $0x38] sm:$0xf0]  ;;  %v1960_v21 = vld [vmem:[%s2782_s0 + $0xb4] sm:$0xf0] }
  0x38   :  { %1245 = vmatpush.bf16.msrb.mxu2 %v2051_v36  ;;  %v1451_v36 = vld [vmem:[%s2782_s0 + $0x18] sm:$0xf]  ;;  %v1517_v23 = vld [vmem:[%s2782_s0 + $0xb8] sm:$0xf0] }
  0x39   :  { %1294 = vmatpush.bf16.msrb.mxu3 %v2059_v38  ;;  %v1940_v38 = vld [vmem:[%s2782_s0 + $0x1c] sm:$0xf]  ;;  %v1452_v44 = vor.u32 %v1944_v37, %v1451_v36 }
  0x3a   :  { %1148 = vmatpush.bf16.msrb.mxu0 %v2034_v53  ;;  %v1456_v45 = vor.u32 %v1940_v38, %v1453_v39 }
  0x3b   :  { %1197 = vmatpush.bf16.msrb.mxu1 %v2042_v55  ;;  %v1951_v55 = vld [vmem:[%s2782_s0 + $0x6c] sm:$0xf0] }
  0x3c   :  { %1246 = vmatpush.bf16.msrb.mxu2 %v2050_v52 }
  0x3d   :  { %1295 = vmatpush.bf16.msrb.mxu3 %v2058_v54  ;;  %v1475_v54 = vld [vmem:[%s2782_s0 + $0x50] sm:$0xf] }
  0x3e   :  { %1149 = vmatpush.bf16.msrb.mxu0 %v2033_v5  ;;  %v1484_v5 = vor.u32 %v1952_v59, %v1483_v58 }
  0x3f   :  { %1198 = vmatpush.bf16.msrb.mxu1 %v2041_v7 }
  0x40   :  { %1247 = vmatpush.bf16.msrb.mxu2 %v2049_v4 }
  0x41   :  { %964 = vmatmul.bf16.gmra.mxu0 %v1492_v16  ;;  %1296 = vmatpush.bf16.msrb.mxu3 %v2057_v6  ;;  %v1620_v16 = vor.u32 %v1989_v9, %v1619_v8  ;;  %v1488_v6 = vor.u32 %v1948_v60, %v1485_v61 }
  0x42   :  { %1013 = vmatmul.bf16.gmra.mxu1 %v1496_v17  ;;  %v1624_v17 = vor.u32 %v1985_v10, %v1621_v11 }
  0x43   :  { %1062 = vmatmul.bf16.gmra.mxu2 %v1500_v18  ;;  %v1628_v18 = vor.u32 %v1990_v13, %v1627_v12 }
  0x44   :  { %1111 = vmatmul.bf16.gmra.mxu3 %v1504_v19  ;;  %v1632_v19 = vor.u32 %v1986_v14, %v1629_v15 }
  0x51   :  { %969 = vmatmul.bf16.gmra.mxu0 %v1524_v32  ;;  %v1443_v32 = vld [vmem:[%s2782_s0 + $0x10] sm:$0xf] }
  0x52   :  { %1018 = vmatmul.bf16.gmra.mxu1 %v1528_v33  ;;  %v1943_v33 = vld [vmem:[%s2782_s0 + $0x2c] sm:$0xf0] }
  0x53   :  { %1067 = vmatmul.bf16.gmra.mxu2 %v1532_v34  ;;  %v1939_v34 = vld [vmem:[%s2782_s0 + $0x14] sm:$0xf]  ;;  %v1444_v40 = vor.u32 %v1943_v33, %v1443_v32  ;;  %v1520_v32 = vor.u32 %v1956_v22, %v1517_v23 }
  0x54   :  { %1116 = vmatmul.bf16.gmra.mxu3 %v1536_v35  ;;  %v1445_v35 = vld [vmem:[%s2782_s0 + $0x30] sm:$0xf0] }
  0x55   :  { %v1448_v41 = vor.u32 %v1939_v34, %v1445_v35 }
  0x61   :  { %974 = vmatmul.bf16.gmra.mxu0 %v1556_v48 }
  0x62   :  { %1023 = vmatmul.bf16.gmra.mxu1 %v1560_v49 }
  0x63   :  { %1072 = vmatmul.bf16.gmra.mxu2 %v1564_v50 }
  0x64   :  { %1121 = vmatmul.bf16.gmra.mxu3 %v1568_v51 }
  0x71   :  { %979 = vmatmul.bf16.gmra.mxu0 %v1588_v0  ;;  %v1476_v0 = vor.u32 %v1951_v55, %v1475_v54 }
  0x72   :  { %1028 = vmatmul.bf16.gmra.mxu1 %v1592_v1  ;;  %v1480_v1 = vor.u32 %v1947_v56, %v1477_v57 }
  0x73   :  { %1077 = vmatmul.bf16.gmra.mxu2 %v1596_v2 }
  0x74   :  { %1126 = vmatmul.bf16.gmra.mxu3 %v1600_v3 }
  0x81   :  { %984 = vmatmul.bf16.gmra.mxu0 %v1620_v16  ;;  %v1507_v16 = vld [vmem:[%s2782_s0 + $0x90] sm:$0xf] }
  0x82   :  { %1033 = vmatmul.bf16.gmra.mxu1 %v1624_v17  ;;  %v1959_v17 = vld [vmem:[%s2782_s0 + $0xac] sm:$0xf0] }
  0x83   :  { %1082 = vmatmul.bf16.gmra.mxu2 %v1628_v18  ;;  %v1955_v18 = vld [vmem:[%s2782_s0 + $0x94] sm:$0xf]  ;;  %v1508_v26 = vor.u32 %v1959_v17, %v1507_v16 }
  0x84   :  { %1131 = vmatmul.bf16.gmra.mxu3 %v1632_v19  ;;  %v1509_v19 = vld [vmem:[%s2782_s0 + $0xb0] sm:$0xf0] }
  0x85   :  { %v1512_v27 = vor.u32 %v1955_v18, %v1509_v19 }
  0x91   :  { %989 = vmatmul.bf16.gmra.mxu0 %v1652_v28 }
  0x92   :  { %1038 = vmatmul.bf16.gmra.mxu1 %v1656_v29 }
  0x93   :  { %1087 = vmatmul.bf16.gmra.mxu2 %v1660_v30 }
  0x94   :  { %1136 = vmatmul.bf16.gmra.mxu3 %v1664_v31  ;;  %v1516_v31 = vor.u32 %v1960_v21, %v1515_v20 }
  0x9e   :  { %v955_v42 = vpop.f32.mrf.mxu0 }
  0x9f   :  { %v1004_v43 = vpop.f32.mrf.mxu1 }
  0xa0   :  { %v1005_v46 = vadd.f32 %v1004_v43, %v955_v42  ;;  %v1539_v42 = vld [vmem:[%s2782_s0 + $0xd0] sm:$0xf] }
  0xa1   :  { %1150 = vmatmul.bf16.vlgmr.msrb.gmra.mxu0 %v1444_v40  ;;  %v1967_v43 = vld [vmem:[%s2782_s0 + $0xec] sm:$0xf0] }
  0xa2   :  { %1199 = vmatmul.bf16.vlgmr.msrb.gmra.mxu1 %v1448_v41 }
  0xa3   :  { %1248 = vmatmul.bf16.vlgmr.msrb.gmra.mxu2 %v1452_v44  ;;  %v1963_v44 = vld [vmem:[%s2782_s0 + $0xd4] sm:$0xf] }
  0xa4   :  { %1297 = vmatmul.bf16.vlgmr.msrb.gmra.mxu3 %v1456_v45  ;;  %v1541_v45 = vld [vmem:[%s2782_s0 + $0xf0] sm:$0xf0] }
  0xa5   :  { %v1544_v54 = vor.u32 %v1963_v44, %v1541_v45 }
  0xa6   :  { %v1053_v47 = vpop.f32.mrf.mxu2  ;;  %v957_v50 = vpop.f32.mrf.mxu0 }
  0xa7   :  { %v1102_v48 = vpop.f32.mrf.mxu3  ;;  %v1054_v49 = vadd.f32 %v1053_v47, %v1005_v46  ;;  %v1006_v51 = vpop.f32.mrf.mxu1  ;;  %v1547_v46 = vld [vmem:[%s2782_s0 + $0xd8] sm:$0xf] }
  0xa8   :  { %v1007_v52 = vadd.f32 %v1006_v51, %v957_v50  ;;  %v1968_v47 = vld [vmem:[%s2782_s0 + $0xf4] sm:$0xf0] }
  0xa9   :  { %v2540_v53 = vadd.f32 %v1102_v48, %v1054_v49  ;;  %v1964_v48 = vld [vmem:[%s2782_s0 + $0xdc] sm:$0xf]  ;;  %v1548_v58 = vor.u32 %v1968_v47, %v1547_v46 }
  0xaa   :  { %v1549_v49 = vld [vmem:[%s2782_s0 + $0xf8] sm:$0xf0] }
  0xab   :  { %v1552_v59 = vor.u32 %v1964_v48, %v1549_v49 }
  0xae   :  { %v1055_v62 = vpop.f32.mrf.mxu2  ;;  %v960_v3 = vpop.f32.mrf.mxu0 }
  0xaf   :  { %v1104_v63 = vpop.f32.mrf.mxu3  ;;  %v1056_v2 = vadd.f32 %v1055_v62, %v1007_v52  ;;  %v1009_v4 = vpop.f32.mrf.mxu1  ;;  %v1540_v52 = vor.u32 %v1967_v43, %v1539_v42  ;;  %v1613_v42 = vld [vmem:[%s2782_s0 + $0x178] sm:$0xf0] }
  0xb0   :  { %v1010_v7 = vadd.f32 %v1009_v4, %v960_v3 }
  0xb1   :  { %v2566_v8 = vadd.f32 %v1104_v63, %v1056_v2  ;;  %1155 = vmatmul.bf16.gmra.mxu0 %v1476_v0 }
  0xb2   :  { %1204 = vmatmul.bf16.gmra.mxu1 %v1480_v1 }
  0xb3   :  { %1253 = vmatmul.bf16.gmra.mxu2 %v1484_v5  ;;  %v1571_v5 = vld [vmem:[%s2782_s0 + $0x110] sm:$0xf] }
  0xb4   :  { %1302 = vmatmul.bf16.gmra.mxu3 %v1488_v6  ;;  %v1975_v6 = vld [vmem:[%s2782_s0 + $0x12c] sm:$0xf0] }
  0xb5   :  { %v1572_v17 = vor.u32 %v1975_v6, %v1571_v5  ;;  %v1992_v5 = vld [vmem:[%s2782_s0 + $0x1b4] sm:$0xf0]  ;;  %v1988_v6 = vld [vmem:[%s2782_s0 + $0x19c] sm:$0xf] }
  0xb6   :  { %v1058_v9 = vpop.f32.mrf.mxu2  ;;  %v962_v12 = vpop.f32.mrf.mxu0 }
  0xb7   :  { %v1107_v10 = vpop.f32.mrf.mxu3  ;;  %v1059_v11 = vadd.f32 %v1058_v9, %v1010_v7  ;;  %v1011_v13 = vpop.f32.mrf.mxu1  ;;  %v1971_v7 = vld [vmem:[%s2782_s0 + $0x114] sm:$0xf] }
  0xb8   :  { %v1012_v14 = vadd.f32 %v1011_v13, %v962_v12  ;;  %v1573_v9 = vld [vmem:[%s2782_s0 + $0x130] sm:$0xf0]  ;;  %v1972_v12 = vld [vmem:[%s2782_s0 + $0x11c] sm:$0xf] }
  0xb9   :  { %v2568_v15 = vadd.f32 %v1107_v10, %v1059_v11  ;;  %v1579_v10 = vld [vmem:[%s2782_s0 + $0x118] sm:$0xf]  ;;  %v1581_v13 = vld [vmem:[%s2782_s0 + $0x138] sm:$0xf0]  ;;  %v1576_v18 = vor.u32 %v1971_v7, %v1573_v9 }
  0xba   :  { %v1976_v11 = vld [vmem:[%s2782_s0 + $0x134] sm:$0xf0]  ;;  %v1584_v23 = vor.u32 %v1972_v12, %v1581_v13  ;;  %v1645_v7 = vld [vmem:[%s2782_s0 + $0x1b8] sm:$0xf0] }
  0xbb   :  { %v1580_v22 = vor.u32 %v1976_v11, %v1579_v10 }
  0xbe   :  { %v1060_v24 = vpop.f32.mrf.mxu2  ;;  %v965_v29 = vpop.f32.mrf.mxu0 }
  0xbf   :  { %v1109_v25 = vpop.f32.mrf.mxu3  ;;  %v1061_v28 = vadd.f32 %v1060_v24, %v1012_v14  ;;  %v1014_v30 = vpop.f32.mrf.mxu1 }
  0xc0   :  { %v1015_v33 = vadd.f32 %v1014_v30, %v965_v29 }
  0xc1   :  { %v2594_v34 = vadd.f32 %v1109_v25, %v1061_v28  ;;  %1160 = vmatmul.bf16.gmra.mxu0 %v1508_v26 }
  0xc2   :  { %1209 = vmatmul.bf16.gmra.mxu1 %v1512_v27 }
  0xc3   :  { %1258 = vmatmul.bf16.gmra.mxu2 %v1516_v31 }
  0xc4   :  { %1307 = vmatmul.bf16.gmra.mxu3 %v1520_v32 }
  0xc6   :  { %v1063_v35 = vpop.f32.mrf.mxu2  ;;  %v967_v38 = vpop.f32.mrf.mxu0 }
  0xc7   :  { %v1112_v36 = vpop.f32.mrf.mxu3  ;;  %v1064_v37 = vadd.f32 %v1063_v35, %v1015_v33  ;;  %v1016_v39 = vpop.f32.mrf.mxu1  ;;  %v1603_v33 = vld [vmem:[%s2782_s0 + $0x150] sm:$0xf] }
  0xc8   :  { %v1017_v40 = vadd.f32 %v1016_v39, %v967_v38  ;;  %v1983_v35 = vld [vmem:[%s2782_s0 + $0x16c] sm:$0xf0]  ;;  %v1611_v38 = vld [vmem:[%s2782_s0 + $0x158] sm:$0xf] }
  0xc9   :  { %v2596_v41 = vadd.f32 %v1112_v36, %v1064_v37  ;;  %v1979_v36 = vld [vmem:[%s2782_s0 + $0x154] sm:$0xf]  ;;  %v1984_v39 = vld [vmem:[%s2782_s0 + $0x174] sm:$0xf0]  ;;  %v1604_v45 = vor.u32 %v1983_v35, %v1603_v33 }
  0xca   :  { %v1605_v37 = vld [vmem:[%s2782_s0 + $0x170] sm:$0xf0]  ;;  %v1675_v35 = vld [vmem:[%s2782_s0 + $0x1d8] sm:$0xf] }
  0xcb   :  { %v1608_v46 = vor.u32 %v1979_v36, %v1605_v37  ;;  %v1669_v33 = vld [vmem:[%s2782_s0 + $0x1f0] sm:$0xf0]  ;;  %v2000_v36 = vld [vmem:[%s2782_s0 + $0x1f4] sm:$0xf0]  ;;  %v1996_v37 = vld [vmem:[%s2782_s0 + $0x1dc] sm:$0xf] }
  0xce   :  { %v1065_v50 = vpop.f32.mrf.mxu2  ;;  %v970_v56 = vpop.f32.mrf.mxu0 }
  0xcf   :  { %v1114_v51 = vpop.f32.mrf.mxu3  ;;  %v1066_v55 = vadd.f32 %v1065_v50, %v1017_v40  ;;  %v1019_v57 = vpop.f32.mrf.mxu1  ;;  %v1980_v40 = vld [vmem:[%s2782_s0 + $0x15c] sm:$0xf]  ;;  %v1612_v50 = vor.u32 %v1984_v39, %v1611_v38 }
  0xd0   :  { %v1020_v60 = vadd.f32 %v1019_v57, %v970_v56  ;;  %v1677_v38 = vld [vmem:[%s2782_s0 + $0x1f8] sm:$0xf0] }
  0xd1   :  { %v2622_v61 = vadd.f32 %v1114_v51, %v1066_v55  ;;  %1165 = vmatmul.bf16.gmra.mxu0 %v1540_v52  ;;  %v1616_v51 = vor.u32 %v1980_v40, %v1613_v42 }
  0xd2   :  { %1214 = vmatmul.bf16.gmra.mxu1 %v1544_v54 }
  0xd3   :  { %1263 = vmatmul.bf16.gmra.mxu2 %v1548_v58 }
  0xd4   :  { %1312 = vmatmul.bf16.gmra.mxu3 %v1552_v59 }
  0xd6   :  { %v1068_v62 = vpop.f32.mrf.mxu2  ;;  %v972_v1 = vpop.f32.mrf.mxu0 }
  0xd7   :  { %v1117_v63 = vpop.f32.mrf.mxu3  ;;  %v1069_v0 = vadd.f32 %v1068_v62, %v1020_v60  ;;  %v1021_v2 = vpop.f32.mrf.mxu1 }
  0xd8   :  { %v1022_v3 = vadd.f32 %v1021_v2, %v972_v1  ;;  %v1987_v1 = vld [vmem:[%s2782_s0 + $0x194] sm:$0xf] }
  0xd9   :  { %v2624_v4 = vadd.f32 %v1117_v63, %v1069_v0  ;;  %v1635_v63 = vld [vmem:[%s2782_s0 + $0x190] sm:$0xf]  ;;  %v1637_v2 = vld [vmem:[%s2782_s0 + $0x1b0] sm:$0xf0] }
  0xda   :  { %v1991_v0 = vld [vmem:[%s2782_s0 + $0x1ac] sm:$0xf0]  ;;  %v1640_v12 = vor.u32 %v1987_v1, %v1637_v2 }
  0xdb   :  { %v1636_v11 = vor.u32 %v1991_v0, %v1635_v63 }
  0xde   :  { %v1070_v14 = vpop.f32.mrf.mxu2  ;;  %v975_v20 = vpop.f32.mrf.mxu0 }
  0xdf   :  { %v1119_v16 = vpop.f32.mrf.mxu3  ;;  %v1071_v19 = vadd.f32 %v1070_v14, %v1022_v3  ;;  %v1024_v21 = vpop.f32.mrf.mxu1  ;;  %v1643_v3 = vld [vmem:[%s2782_s0 + $0x198] sm:$0xf] }
  0xe0   :  { %v1025_v24 = vadd.f32 %v1024_v21, %v975_v20 }
  0xe1   :  { %v2650_v25 = vadd.f32 %v1119_v16, %v1071_v19  ;;  %1170 = vmatmul.bf16.gmra.mxu0 %v1572_v17  ;;  %v1644_v17 = vor.u32 %v1992_v5, %v1643_v3 }
  0xe2   :  { %1219 = vmatmul.bf16.gmra.mxu1 %v1576_v18  ;;  %v1648_v18 = vor.u32 %v1988_v6, %v1645_v7 }
  0xe3   :  { %1268 = vmatmul.bf16.gmra.mxu2 %v1580_v22 }
  0xe4   :  { %1317 = vmatmul.bf16.gmra.mxu3 %v1584_v23 }
  0xe6   :  { %v1073_v26 = vpop.f32.mrf.mxu2  ;;  %v977_v29 = vpop.f32.mrf.mxu0 }
  0xe7   :  { %v1122_v27 = vpop.f32.mrf.mxu3  ;;  %v1074_v28 = vadd.f32 %v1073_v26, %v1025_v24  ;;  %v1026_v30 = vpop.f32.mrf.mxu1 }
  0xe8   :  { %v1027_v31 = vadd.f32 %v1026_v30, %v977_v29  ;;  %v1667_v29 = vld [vmem:[%s2782_s0 + $0x1d0] sm:$0xf] }
  0xe9   :  { %v2652_v32 = vadd.f32 %v1122_v27, %v1074_v28  ;;  %v1999_v30 = vld [vmem:[%s2782_s0 + $0x1ec] sm:$0xf0] }
  0xea   :  { %v1668_v42 = vor.u32 %v1999_v30, %v1667_v29 }
  0xee   :  { %v1075_v43 = vpop.f32.mrf.mxu2  ;;  %v980_v48 = vpop.f32.mrf.mxu0 }
  0xef   :  { %v1124_v44 = vpop.f32.mrf.mxu3  ;;  %v1076_v47 = vadd.f32 %v1075_v43, %v1027_v31  ;;  %v1029_v49 = vpop.f32.mrf.mxu1  ;;  %v1995_v31 = vld [vmem:[%s2782_s0 + $0x1d4] sm:$0xf] }
  0xf0   :  { %v1030_v52 = vadd.f32 %v1029_v49, %v980_v48  ;;  %v1672_v43 = vor.u32 %v1995_v31, %v1669_v33  ;;  %v1680_v48 = vor.u32 %v1996_v37, %v1677_v38 }
  0xf1   :  { %v2678_v54 = vadd.f32 %v1124_v44, %v1076_v47  ;;  %1175 = vmatmul.bf16.gmra.mxu0 %v1604_v45  ;;  %v1676_v47 = vor.u32 %v2000_v36, %v1675_v35 }
  0xf2   :  { %1224 = vmatmul.bf16.gmra.mxu1 %v1608_v46 }
  0xf3   :  { %1273 = vmatmul.bf16.gmra.mxu2 %v1612_v50 }
  0xf4   :  { %1322 = vmatmul.bf16.gmra.mxu3 %v1616_v51 }
  0xf6   :  { %v1078_v55 = vpop.f32.mrf.mxu2  ;;  %v982_v58 = vpop.f32.mrf.mxu0 }
  0xf7   :  { %v1127_v56 = vpop.f32.mrf.mxu3  ;;  %v1079_v57 = vadd.f32 %v1078_v55, %v1030_v52  ;;  %v1031_v59 = vpop.f32.mrf.mxu1 }
  0xf8   :  { %v1032_v60 = vadd.f32 %v1031_v59, %v982_v58 }
  0xf9   :  { %v2680_v62 = vadd.f32 %v1127_v56, %v1079_v57 }
  0xfe   :  { %v1080_v9 = vpop.f32.mrf.mxu2  ;;  %v985_v14 = vpop.f32.mrf.mxu0 }
  0xff   :  { %v1129_v10 = vpop.f32.mrf.mxu3  ;;  %v1081_v13 = vadd.f32 %v1080_v9, %v1032_v60  ;;  %v1034_v16 = vpop.f32.mrf.mxu1 }
 0x100   :  { %v1035_v19 = vadd.f32 %v1034_v16, %v985_v14 }
 0x101   :  { %v2706_v20 = vadd.f32 %v1129_v10, %v1081_v13  ;;  %1180 = vmatmul.bf16.gmra.mxu0 %v1636_v11 }
 0x102   :  { %1229 = vmatmul.bf16.gmra.mxu1 %v1640_v12 }
 0x103   :  { %1278 = vmatmul.bf16.gmra.mxu2 %v1644_v17 }
 0x104   :  { %1327 = vmatmul.bf16.gmra.mxu3 %v1648_v18 }
 0x106   :  { %v1083_v21 = vpop.f32.mrf.mxu2  ;;  %v987_v24 = vpop.f32.mrf.mxu0 }
 0x107   :  { %v1132_v22 = vpop.f32.mrf.mxu3  ;;  %v1084_v23 = vadd.f32 %v1083_v21, %v1035_v19  ;;  %v1036_v26 = vpop.f32.mrf.mxu1 }
 0x108   :  { %v1037_v27 = vadd.f32 %v1036_v26, %v987_v24 }
 0x109   :  { %v2708_v28 = vadd.f32 %v1132_v22, %v1084_v23 }
 0x10e   :  { %v1085_v39 = vpop.f32.mrf.mxu2  ;;  %v990_v45 = vpop.f32.mrf.mxu0 }
 0x10f   :  { %v1134_v40 = vpop.f32.mrf.mxu3  ;;  %v1086_v44 = vadd.f32 %v1085_v39, %v1037_v27  ;;  %v1039_v46 = vpop.f32.mrf.mxu1 }
 0x110   :  { %v1040_v49 = vadd.f32 %v1039_v46, %v990_v45 }
 0x111   :  { %v2734_v50 = vadd.f32 %v1134_v40, %v1086_v44  ;;  %1185 = vmatmul.bf16.gmra.mxu0 %v1668_v42 }
 0x112   :  { %1234 = vmatmul.bf16.gmra.mxu1 %v1672_v43 }
 0x113   :  { %1283 = vmatmul.bf16.gmra.mxu2 %v1676_v47 }
 0x114   :  { %1332 = vmatmul.bf16.gmra.mxu3 %v1680_v48 }
 0x116   :  { %v1088_v51 = vpop.f32.mrf.mxu2  ;;  %v992_v56 = vpop.f32.mrf.mxu0 }
 0x117   :  { %v1137_v52 = vpop.f32.mrf.mxu3  ;;  %v1089_v55 = vadd.f32 %v1088_v51, %v1040_v49  ;;  %v1041_v57 = vpop.f32.mrf.mxu1 }
 0x118   :  { %v1042_v58 = vadd.f32 %v1041_v57, %v992_v56 }
 0x119   :  { %v2736_v59 = vadd.f32 %v1137_v52, %v1089_v55 }
 0x11e   :  { %v1090_v60 = vpop.f32.mrf.mxu2  ;;  %v1151_v1 = vpop.f32.mrf.mxu0 }
 0x11f   :  { %v1139_v63 = vpop.f32.mrf.mxu3  ;;  %v1091_v0 = vadd.f32 %v1090_v60, %v1042_v58  ;;  %v1200_v2 = vpop.f32.mrf.mxu1  ;;  %v1152_v7 = vadd.f32 %v1151_v1, %v2540_v53 }
 0x121   :  { %v2738_v3 = vadd.f32 %v1139_v63, %v1091_v0  ;;  %v1201_v12 = vadd.f32 %v1200_v2, %v1152_v7 }
 0x126   :  { %v1249_v5 = vpop.f32.mrf.mxu2  ;;  %v1153_v9 = vpop.f32.mrf.mxu0 }
 0x127   :  { %v1298_v6 = vpop.f32.mrf.mxu3  ;;  %v1202_v10 = vpop.f32.mrf.mxu1  ;;  %v1154_v11 = vadd.f32 %v1153_v9, %v2566_v8  ;;  %v1250_v13 = vadd.f32 %v1249_v5, %v1201_v12 }
 0x129   :  { %v1203_v14 = vadd.f32 %v1202_v10, %v1154_v11  ;;  %v1299_v22 = vadd.f32 %v1298_v6, %v1250_v13 }
 0x12e   :  { %v1251_v16 = vpop.f32.mrf.mxu2  ;;  %v1156_v19 = vpop.f32.mrf.mxu0 }
 0x12f   :  { %v1300_v17 = vpop.f32.mrf.mxu3  ;;  %v1252_v18 = vadd.f32 %v1251_v16, %v1203_v14  ;;  %v1205_v21 = vpop.f32.mrf.mxu1  ;;  %v1157_v27 = vadd.f32 %v1156_v19, %v2568_v15 }
 0x131   :  { %v1301_v23 = vadd.f32 %v1300_v17, %v1252_v18  ;;  %v1206_v31 = vadd.f32 %v1205_v21, %v1157_v27 }
 0x133   :  { %v2068_v24 = vpack.c.bf16 %v1301_v23, %v1299_v22 }
 0x135   :  { %2069 = vst [vmem:[%s2783_s3] sm:$0xff] %v2068_v24  }
 0x136   :  { %v1254_v53 = vpop.f32.mrf.mxu2  ;;  %v1158_v8 = vpop.f32.mrf.mxu0 }
 0x137   :  { %v1303_v26 = vpop.f32.mrf.mxu3  ;;  %v1207_v29 = vpop.f32.mrf.mxu1  ;;  %v1159_v30 = vadd.f32 %v1158_v8, %v2594_v34  ;;  %v1255_v33 = vadd.f32 %v1254_v53, %v1206_v31 }
 0x139   :  { %v1208_v35 = vadd.f32 %v1207_v29, %v1159_v30  ;;  %v1304_v42 = vadd.f32 %v1303_v26, %v1255_v33 }
 0x13e   :  { %v1256_v36 = vpop.f32.mrf.mxu2  ;;  %v1161_v39 = vpop.f32.mrf.mxu0 }
 0x13f   :  { %v1305_v37 = vpop.f32.mrf.mxu3  ;;  %v1257_v38 = vadd.f32 %v1256_v36, %v1208_v35  ;;  %v1210_v40 = vpop.f32.mrf.mxu1  ;;  %v1162_v46 = vadd.f32 %v1161_v39, %v2596_v41 }
 0x141   :  { %v1306_v43 = vadd.f32 %v1305_v37, %v1257_v38  ;;  %v1211_v49 = vadd.f32 %v1210_v40, %v1162_v46 }
 0x143   :  { %v2073_v44 = vpack.c.bf16 %v1306_v43, %v1304_v42 }
 0x145   :  { %2105 = vst [vmem:[%s2783_s3 + $0x8] sm:$0xff] %v2073_v44  }
 0x146   :  { %v1259_v15 = vpop.f32.mrf.mxu2  ;;  %v1163_v34 = vpop.f32.mrf.mxu0 }
 0x147   :  { %v1308_v45 = vpop.f32.mrf.mxu3  ;;  %v1212_v47 = vpop.f32.mrf.mxu1  ;;  %v1164_v48 = vadd.f32 %v1163_v34, %v2622_v61  ;;  %v1260_v51 = vadd.f32 %v1259_v15, %v1211_v49 }
 0x149   :  { %v1213_v52 = vadd.f32 %v1212_v47, %v1164_v48  ;;  %v1309_v63 = vadd.f32 %v1308_v45, %v1260_v51 }
 0x14e   :  { %v1261_v55 = vpop.f32.mrf.mxu2  ;;  %v1166_v58 = vpop.f32.mrf.mxu0 }
 0x14f   :  { %v1310_v56 = vpop.f32.mrf.mxu3  ;;  %v1262_v57 = vadd.f32 %v1261_v55, %v1213_v52  ;;  %v1215_v60 = vpop.f32.mrf.mxu1  ;;  %v1167_v5 = vadd.f32 %v1166_v58, %v2624_v4 }
 0x151   :  { %v1311_v0 = vadd.f32 %v1310_v56, %v1262_v57  ;;  %v1216_v9 = vadd.f32 %v1215_v60, %v1167_v5 }
 0x153   :  { %v2078_v1 = vpack.c.bf16 %v1311_v0, %v1309_v63 }
 0x155   :  { %2106 = vst [vmem:[%s2783_s3 + $0x10] sm:$0xff] %v2078_v1  }
 0x156   :  { %v1264_v41 = vpop.f32.mrf.mxu2  ;;  %v1168_v61 = vpop.f32.mrf.mxu0 }
 0x157   :  { %v1313_v2 = vpop.f32.mrf.mxu3  ;;  %v1217_v6 = vpop.f32.mrf.mxu1  ;;  %v1169_v7 = vadd.f32 %v1168_v61, %v2650_v25  ;;  %v1265_v10 = vadd.f32 %v1264_v41, %v1216_v9 }
 0x159   :  { %v1218_v11 = vadd.f32 %v1217_v6, %v1169_v7  ;;  %v1314_v18 = vadd.f32 %v1313_v2, %v1265_v10 }
 0x15e   :  { %v1266_v12 = vpop.f32.mrf.mxu2  ;;  %v1171_v16 = vpop.f32.mrf.mxu0 }
 0x15f   :  { %v1315_v13 = vpop.f32.mrf.mxu3  ;;  %v1267_v14 = vadd.f32 %v1266_v12, %v1218_v11  ;;  %v1220_v17 = vpop.f32.mrf.mxu1  ;;  %v1172_v23 = vadd.f32 %v1171_v16, %v2652_v32 }
 0x161   :  { %v1316_v19 = vadd.f32 %v1315_v13, %v1267_v14  ;;  %v1221_v26 = vadd.f32 %v1220_v17, %v1172_v23 }
 0x163   :  { %v2083_v21 = vpack.c.bf16 %v1316_v19, %v1314_v18 }
 0x165   :  { %2107 = vst [vmem:[%s2783_s3 + $0x18] sm:$0xff] %v2083_v21  }
 0x166   :  { %v1269_v4 = vpop.f32.mrf.mxu2  ;;  %v1173_v25 = vpop.f32.mrf.mxu0 }
 0x167   :  { %v1318_v22 = vpop.f32.mrf.mxu3  ;;  %v1222_v24 = vpop.f32.mrf.mxu1  ;;  %v1174_v53 = vadd.f32 %v1173_v25, %v2678_v54  ;;  %v1270_v27 = vadd.f32 %v1269_v4, %v1221_v26 }
 0x169   :  { %v1223_v8 = vadd.f32 %v1222_v24, %v1174_v53  ;;  %v1319_v36 = vadd.f32 %v1318_v22, %v1270_v27 }
 0x16e   :  { %v1271_v29 = vpop.f32.mrf.mxu2  ;;  %v1176_v33 = vpop.f32.mrf.mxu0 }
 0x16f   :  { %v1320_v30 = vpop.f32.mrf.mxu3  ;;  %v1272_v31 = vadd.f32 %v1271_v29, %v1223_v8  ;;  %v1225_v35 = vpop.f32.mrf.mxu1  ;;  %v1177_v40 = vadd.f32 %v1176_v33, %v2680_v62 }
 0x171   :  { %v1321_v37 = vadd.f32 %v1320_v30, %v1272_v31  ;;  %v1226_v44 = vadd.f32 %v1225_v35, %v1177_v40 }
 0x173   :  { %v2088_v38 = vpack.c.bf16 %v1321_v37, %v1319_v36 }
 0x175   :  { %2108 = vst [vmem:[%s2783_s3 + $0x20] sm:$0xff] %v2088_v38  }
 0x176   :  { %v1274_v32 = vpop.f32.mrf.mxu2  ;;  %v1178_v54 = vpop.f32.mrf.mxu0 }
 0x177   :  { %v1323_v39 = vpop.f32.mrf.mxu3  ;;  %v1227_v42 = vpop.f32.mrf.mxu1  ;;  %v1179_v43 = vadd.f32 %v1178_v54, %v2706_v20  ;;  %v1275_v15 = vadd.f32 %v1274_v32, %v1226_v44 }
 0x179   :  { %v1228_v45 = vadd.f32 %v1227_v42, %v1179_v43  ;;  %v1324_v51 = vadd.f32 %v1323_v39, %v1275_v15 }
 0x17e   :  { %v1276_v46 = vpop.f32.mrf.mxu2  ;;  %v1181_v48 = vpop.f32.mrf.mxu0 }
 0x17f   :  { %v1325_v34 = vpop.f32.mrf.mxu3  ;;  %v1277_v47 = vadd.f32 %v1276_v46, %v1228_v45  ;;  %v1230_v49 = vpop.f32.mrf.mxu1  ;;  %v1182_v57 = vadd.f32 %v1181_v48, %v2708_v28 }
 0x181   :  { %v1326_v52 = vadd.f32 %v1325_v34, %v1277_v47  ;;  %v1231_v63 = vadd.f32 %v1230_v49, %v1182_v57 }
 0x183   :  { %v2093_v55 = vpack.c.bf16 %v1326_v52, %v1324_v51 }
 0x185   :  { %2109 = vst [vmem:[%s2783_s3 + $0x28] sm:$0xff] %v2093_v55  }
 0x186   :  { %v1279_v62 = vpop.f32.mrf.mxu2  ;;  %v1183_v20 = vpop.f32.mrf.mxu0 }
 0x187   :  { %v1328_v56 = vpop.f32.mrf.mxu3  ;;  %v1232_v58 = vpop.f32.mrf.mxu1  ;;  %v1184_v60 = vadd.f32 %v1183_v20, %v2734_v50  ;;  %v1280_v0 = vadd.f32 %v1279_v62, %v1231_v63 }
 0x189   :  { %v1233_v1 = vadd.f32 %v1232_v58, %v1184_v60  ;;  %v1329_v6 = vadd.f32 %v1328_v56, %v1280_v0 }
 0x18e   :  { %v1281_v41 = vpop.f32.mrf.mxu2  ;;  %v1186_v61 = vpop.f32.mrf.mxu0 }
 0x18f   :  { %v1330_v2 = vpop.f32.mrf.mxu3  ;;  %v1282_v5 = vadd.f32 %v1281_v41, %v1233_v1  ;;  %v1235_v9 = vpop.f32.mrf.mxu1  ;;  %v1187_v12 = vadd.f32 %v1186_v61, %v2736_v59 }
 0x191   :  { %v1331_v7 = vadd.f32 %v1330_v2, %v1282_v5  ;;  %v1236_v14 = vadd.f32 %v1235_v9, %v1187_v12 }
 0x193   :  { %v2098_v10 = vpack.c.bf16 %v1331_v7, %v1329_v6 }
 0x195   :  { %2110 = vst [vmem:[%s2783_s3 + $0x30] sm:$0xff] %v2098_v10  }
 0x196   :  { %v1284_v28 = vpop.f32.mrf.mxu2  ;;  %v1188_v50 = vpop.f32.mrf.mxu0 }
 0x197   :  { %v1333_v11 = vpop.f32.mrf.mxu3  ;;  %v1189_v13 = vadd.f32 %v1188_v50, %v2738_v3  ;;  %v1237_v16 = vpop.f32.mrf.mxu1  ;;  %v1285_v17 = vadd.f32 %v1284_v28, %v1236_v14 }
 0x199   :  { %v1238_v18 = vadd.f32 %v1237_v16, %v1189_v13  ;;  %v1334_v22 = vadd.f32 %v1333_v11, %v1285_v17 }
 0x19e   :  { %v1286_v19 = vpop.f32.mrf.mxu2 }
 0x19f   :  { %v1287_v21 = vadd.f32 %v1286_v19, %v1238_v18  ;;  %v1335_v4 = vpop.f32.mrf.mxu3 }
 0x1a1   :  { %v1336_v23 = vadd.f32 %v1335_v4, %v1287_v21 }
 0x1a3   :  { %v2103_v25 = vpack.c.bf16 %v1336_v23, %v1334_v22 }
 0x1a5   :  { %2111 = vst [vmem:[%s2783_s3 + $0x38] sm:$0xff] %v2103_v25  }

// kernel: _lambda_.14
= control target key start
LH: loop header
LB: loop body
LE: loop exit
PB: predicated region body
PF: predicated region fallthrough
CT: control target
= control target key end

     0   :  { %s406_s6 = smov 0   ;;  %s408_s7 = smov 0   ;;  %s456_s0 = inlined_call_operand.vmem [shape: bf16[2,27,64], index: 0, kind: input, shape index: {}]   ;;  %s457_s1 = inlined_call_operand.vmem [shape: bf16[2,27,64], index: 1, kind: output, shape index: {}]  }
   0x1   :  { %s410_s8 = smov 0  }
   0x2 LB: > { %s23_s9 = sadd.s32 1, %s389_s7  ;;  %p329_p0 = scmp.ge.s32.totalorder %s393_s8, 1  ;;  %s393_s8 = sphi %s410_s8, %s11_s8   ;;  %s389_s7 = sphi %s408_s7, %s459_s7   ;;  %s385_s6 = sphi %s406_s6, %s458_s6  }
   0x3   : > { %p25_p1 = scmp.ge.s32.totalorder %s23_s9, 2  ;;  %p106_p2 = scmp.lt.s32.totalorder %s393_s8, 3 }
   0x5   : > { %s461_s9 = smov (%p25_p1, %s23_s9), 0  ;;  %p107_p3 = pnand %p329_p0, %p106_p2 }
   0x6   : > { %p132_p4 = scmp.lt.s32.totalorder (!%p107_p3), %s385_s6, 1 }
   0x7   : > { %110 = sbr.rel (%p107_p3) target bundleno = 95 (0x5f), region = 24 }
   0xc   : > { %v395_v0 = vmov 27.0   ;;  %s463_s6 = smov (!%p132_p4, %s385_s6), 1  ;;  %vm156_vm0 = vcmask 523264   ;;  %vm162_vm1 = vcmask 518144   ;;  %vm236_vm6 = vcmask 517120  }
   0xd   : > { %367 = vrcp.f32 %v395_v0  ;;  %s336_s10 = sshll.u32 %s463_s6, 4  ;;  %vm237_vm7 = vsmask.f32 1280  ;;  %vm232_vm12 = vcmask 519168  }
   0xe   : > { %s139_s13 = scalar_lea.vmem %s456_s0, %s336_s10  ;;  %s147_s16 = scalar_lea.vmem %s457_s1, %s336_s10  ;;  %vm238_vm13 = vmand %vm236_vm6, %vm237_vm7 }
   0xf   : > { %v339_v1 = vld [vmem:[%s139_s13] sm:$0xff]   ;;  %v150_v2 = vld [vmem:[%s139_s13 + $0x8] sm:$0xf]  ;;  %v151_v3 = vld [vmem:[%s139_s13 + $0xc] sm:$0x3] }
  0x10   : > { %v340_v5 = vunpack.c.l.bf16 %v339_v1  ;;  %v341_v6 = vunpack.c.h.bf16 %v339_v1  ;;  %v154_v7 = vunpack.c.l.bf16 %v150_v2  ;;  %v155_v8 = vunpack.c.l.bf16 %v151_v3 }
  0x12   : > { %v157_v9 = vsel %vm156_vm0, %v340_v5, 0.0  ;;  %v158_v10 = vsel %vm156_vm0, %v341_v6, 0.0  ;;  %v160_v11 = vsel %vm156_vm0, %v154_v7, 0.0  ;;  %v163_v14 = vsel %vm162_vm1, %v155_v8, 0.0 }
  0x13   : > { %v368_v4 = vpop.eup %367  ;;  %v159_v13 = vadd.f32 %v158_v10, %v157_v9 }
  0x14   : > { %v172_v12 = vmul.f32 27.0, %v368_v4  ;;  %vm176_vm2 = vweird.f32 %v368_v4 }
  0x15   : > { %v161_v15 = vadd.f32 %v160_v11, %v159_v13 }
  0x16   : > { %v173_v16 = vsub.f32 1.0, %v172_v12 }
  0x17   : > { %v164_v17 = vadd.f32 %v163_v14, %v161_v15 }
  0x18   : > { %v174_v19 = vmul.f32 %v368_v4, %v173_v16 }
  0x19   : > { %v165_v18 = vrot.slane %v164_v17, 4 }
  0x1a   : > { %v175_v22 = vadd.f32 %v368_v4, %v174_v19 }
  0x1b   : > { %v166_v20 = vadd.f32 %v165_v18, %v164_v17 }
  0x1c   : > { %v177_v25 = vsel %vm176_vm2, %v368_v4, %v175_v22 }
  0x1d   : > { %v167_v21 = vrot.slane %v166_v20, 2 }
  0x1f   : > { %v168_v23 = vadd.f32 %v167_v21, %v166_v20 }
  0x21   : > { %v169_v24 = vrot.slane %v168_v23, 1 }
  0x23   : > { %v170_v26 = vadd.f32 %v169_v24, %v168_v23 }
  0x25   : > { %v178_v27 = vmul.f32 %v177_v25, %v170_v26 }
  0x27   : > { %v179_v28 = vsub.f32 %v340_v5, %v178_v27  ;;  %v180_v29 = vsub.f32 %v341_v6, %v178_v27  ;;  %v181_v30 = vsub.f32 %v154_v7, %v178_v27  ;;  %v182_v31 = vsub.f32 %v155_v8, %v178_v27  ;;  %v239_v8 = vld [vmem:[%s147_s16 + $0xc] sm:$0x3] }
  0x29   : > { %v183_v32 = vmul.f32 %v179_v28, %v179_v28  ;;  %v184_v33 = vmul.f32 %v180_v29, %v180_v29  ;;  %v185_v34 = vmul.f32 %v181_v30, %v181_v30  ;;  %v186_v35 = vmul.f32 %v182_v31, %v182_v31 }
  0x2b   : > { %v187_v36 = vsel %vm156_vm0, %v183_v32, 0.0  ;;  %v188_v37 = vsel %vm156_vm0, %v184_v33, 0.0  ;;  %v190_v38 = vsel %vm156_vm0, %v185_v34, 0.0  ;;  %v192_v40 = vsel %vm162_vm1, %v186_v35, 0.0 }
  0x2c   : > { %v189_v39 = vadd.f32 %v188_v37, %v187_v36 }
  0x2e   : > { %v191_v41 = vadd.f32 %v190_v38, %v189_v39 }
  0x30   : > { %v193_v42 = vadd.f32 %v192_v40, %v191_v41 }
  0x32   : > { %v194_v43 = vrot.slane %v193_v42, 4 }
  0x34   : > { %v195_v44 = vadd.f32 %v194_v43, %v193_v42 }
  0x36   : > { %v196_v45 = vrot.slane %v195_v44, 2 }
  0x38   : > { %v197_v46 = vadd.f32 %v196_v45, %v195_v44 }
  0x3a   : > { %v198_v47 = vrot.slane %v197_v46, 1 }
  0x3c   : > { %v199_v48 = vadd.f32 %v198_v47, %v197_v46 }
  0x3e   : > { %v200_v49 = vmul.f32 %v199_v48, %v177_v25 }
  0x40   : > { %v201_v50 = vadd.f32 1e-05, %v200_v49 }
  0x42   : > { %369 = vrsqrt.f32 %v201_v50  ;;  %vm208_vm3 = vweird.f32 %v201_v50 }
  0x48   : > { %v370_v51 = vpop.eup %369 }
  0x49   : > { %v203_v52 = vmul.f32 %v370_v51, %v201_v50  ;;  %vm209_vm4 = vweird.f32 %v370_v51 }
  0x4a   : > { %vm210_vm5 = vmor %vm208_vm3, %vm209_vm4 }
  0x4b   : > { %v204_v53 = vmul.f32 %v370_v51, %v203_v52 }
  0x4d   : > { %v205_v54 = vmul.f32 0.5, %v204_v53 }
  0x4f   : > { %v206_v55 = vsub.f32 1.5, %v205_v54 }
  0x51   : > { %v207_v56 = vmul.f32 %v370_v51, %v206_v55 }
  0x53   : > { %v211_v57 = vsel %vm210_vm5, %v370_v51, %v207_v56 }
  0x54   : > { %v212_v58 = vmul.f32 %v211_v57, %v179_v28  ;;  %v213_v59 = vmul.f32 %v211_v57, %v180_v29  ;;  %v214_v60 = vmul.f32 %v211_v57, %v181_v30  ;;  %v215_v61 = vmul.f32 %v211_v57, %v182_v31 }
  0x56   : > { %vm216_vm8 = vcmp.ge.f32.partialorder %v212_v58, 0.0  ;;  %v220_v62 = vmul.f32 0.2, %v212_v58  ;;  %vm217_vm9 = vcmp.ge.f32.partialorder %v213_v59, 0.0  ;;  %v221_v63 = vmul.f32 0.2, %v213_v59 }
  0x57   : > { %vm218_vm10 = vcmp.ge.f32.partialorder %v214_v60, 0.0  ;;  %v222_v0 = vmul.f32 0.2, %v214_v60  ;;  %vm219_vm11 = vcmp.ge.f32.partialorder %v215_v61, 0.0  ;;  %v223_v1 = vmul.f32 0.2, %v215_v61 }
  0x58   : > { %v224_v2 = vsel %vm216_vm8, %v212_v58, %v220_v62  ;;  %v225_v3 = vsel %vm217_vm9, %v213_v59, %v221_v63 }
  0x59   : > { %v228_v4 = vpack.c.bf16 %v224_v2, %v224_v2  ;;  %v229_v5 = vpack.c.bf16 %v225_v3, %v225_v3  ;;  %v226_v6 = vsel %vm218_vm10, %v214_v60, %v222_v0  ;;  %v227_v7 = vsel %vm219_vm11, %v215_v61, %v223_v1 }
  0x5a   : > { %v230_v9 = vpack.c.bf16 %v226_v6, %v226_v6  ;;  %v231_v10 = vpack.c.bf16 %v227_v7, %v227_v7 }
  0x5b   : > { %233 = vst.msk [vmem:[%s147_s16] sm:$0xf] %vm232_vm12, %v228_v4 }
  0x5c   : > { %234 = vst.msk [vmem:[%s147_s16 + $0x4] sm:$0xf] %vm232_vm12, %v229_v5  ;;  %v240_v11 = vsel %vm238_vm13, %v231_v10, %v239_v8 }
  0x5d   : > { %235 = vst.msk [vmem:[%s147_s16 + $0x8] sm:$0xf] %vm232_vm12, %v230_v9 }
  0x5e   : > { %241 = vst [vmem:[%s147_s16 + $0xc] sm:$0x3] %v240_v11 }
  0x5f PF: > { %s11_s8 = sadd.s32 1, %s393_s8   ;;  %s458_s6 = smov %s389_s7 }
  0x60   : > { %p8_p5 = scmp.ge.s32.totalorder %s11_s8, 4   ;;  %s459_s7 = smov %s461_s9 }
  0x62   :  { %10 = sbr.rel (!%p8_p5) target bundleno = 2 (0x2), region = 54 }

// kernel: _lambda_.13
= control target key start
LH: loop header
LB: loop body
LE: loop exit
PB: predicated region body
PF: predicated region fallthrough
CT: control target
= control target key end

     0   :  { %s2407_s12 = smov 0   ;;  %s2409_s13 = smov 0   ;;  %s2737_s0 = inlined_call_operand.vmem [shape: bf16[54,2048], index: 0, kind: input, shape index: {}]   ;;  %s2738_s1 = inlined_call_operand.vmem [shape: bf16[2048,128], index: 1, kind: input, shape index: {}]   ;;  %s2739_s2 = inlined_call_operand.vmem [shape: f32[1,128], index: 2, kind: input, shape index: {}]   ;;  %s2740_s3 = inlined_call_operand.vmem [shape: bf16[54,128], index: 3, kind: output, shape index: {}]  }
   0x1   :  { %s2411_s14 = smov 0   ;;  %s2413_s15 = smov 0  }
   0x2   :  { %s2415_s16 = smov 0  }
   0x3 LB: > { %s1671_s2 = sadd.s32 4294967295, %s2376_s16   ;;  %s25_s17 = sadd.s32 1, %s2372_s15  ;;  %s2376_s16 = sphi %s2415_s16, %s13_s16   ;;  %s2372_s15 = sphi %s2413_s15, %s2744_s15   ;;  %s2368_s14 = sphi %s2411_s14, %s2743_s14   ;;  %s2364_s13 = sphi %s2409_s13, %s2742_s13   ;;  %s2360_s12 = sphi %s2407_s12, %s2741_s12  }
   0x4   : > { %p26_p0 = scmp.ge.s32.totalorder %s25_s17, 2  ;;  %p48_p1 = scmp.ne.s32.totalorder %s2364_s13, %s2360_s12 }
   0x5   : > { %p49_p2 = scmp.eq.s32.totalorder %s2376_s16, 0  ;;  %s41_s19 = sadd.s32 1, %s2364_s13 }
   0x6   : > { %s2746_s17 = smov (%p26_p0, %s25_s17), 0  ;;  %p1674_p5 = scmp.ge.s32.totalorder %s2376_s16, 2 }
   0x7   : > { %p50_p3 = por %p49_p2, %p48_p1  ;;  %s37_s18 = ssub.s32 %s2372_s15, %s2746_s17 }
   0x8   : > { %p39_p4 = scmp.eq.s32.totalorder %s37_s18, 0  ;;  %162 = sbr.rel (%p1674_p5) target bundleno = 47 (0x2f), region = 20 }
   0xa   : > { %s2443_s20 = scalar_select %p39_p4, %s2364_s13, %s41_s19  }
   0xd   : > { %165 = sbr.rel (!%p50_p3) target bundleno = 47 (0x2f), region = 24  ;;  %s167_s21 = sand.u32 (%p50_p3), 1, %s2364_s13  }
   0xe   : > { %s2081_s22 = sshll.u32 (%p50_p3), %s2372_s15, 5  ;;  %s1675_s23 = sshll.u32 (%p50_p3), %s167_s21, 8 }
   0xf   : > { %s2451_s26 = scalar_lea.vmem (%p50_p3), %s2737_s0, %s2081_s22   ;;  %s2453_s27 = scalar_lea.vmem (%p50_p3), [#allocation3], %s1675_s23  }
  0x10   : > { %s2455_s28 = smov (%p50_p3), 0  }
  0x12 LB: >> { %v196_v0 = vld [vmem:[%s2451_s26] sm:$0xff]  ;;  %v210_v7 = vld [vmem:[%s2451_s26 + $0x8] sm:$0xff]  ;;  %v224_v14 = vld [vmem:[%s2451_s26 + $0x10] sm:$0xff]  ;;  %s190_s28 = sadd.s32 1, %s2380_s28   ;;  %s2380_s28 = sphi %s2455_s28, %s190_s28  }
  0x13   : >> { %v198_v1 = vld [vmem:[%s2451_s26 + $0x40] sm:$0xff]  ;;  %197 = vst [vmem:[%s2453_s27] sm:$0xff] %v196_v0  ;;  %v212_v8 = vld [vmem:[%s2451_s26 + $0x48] sm:$0xff]  ;;  %v226_v15 = vld [vmem:[%s2451_s26 + $0x50] sm:$0xff]  ;;  %p189_p6 = scmp.ge.s32.totalorder %s190_s28, 1 }
  0x14   : >> { %v200_v2 = vld [vmem:[%s2451_s26 + $0x80] sm:$0xff]  ;;  %199 = vst [vmem:[%s2453_s27 + $0x20] sm:$0xff] %v198_v1  ;;  %v214_v9 = vld [vmem:[%s2451_s26 + $0x88] sm:$0xff]  ;;  %v228_v16 = vld [vmem:[%s2451_s26 + $0x90] sm:$0xff] }
  0x15   : >> { %v202_v3 = vld [vmem:[%s2451_s26 + $0xc0] sm:$0xff]  ;;  %201 = vst [vmem:[%s2453_s27 + $0x40] sm:$0xff] %v200_v2  ;;  %v216_v10 = vld [vmem:[%s2451_s26 + $0xc8] sm:$0xff]  ;;  %v230_v17 = vld [vmem:[%s2451_s26 + $0xd0] sm:$0xff] }
  0x16   : >> { %v204_v4 = vld [vmem:[%s2451_s26 + $0x100] sm:$0xff]  ;;  %203 = vst [vmem:[%s2453_s27 + $0x60] sm:$0xff] %v202_v3  ;;  %v218_v11 = vld [vmem:[%s2451_s26 + $0x108] sm:$0xff]  ;;  %v232_v18 = vld [vmem:[%s2451_s26 + $0x110] sm:$0xff] }
  0x17   : >> { %v206_v5 = vld [vmem:[%s2451_s26 + $0x140] sm:$0xff]  ;;  %205 = vst [vmem:[%s2453_s27 + $0x80] sm:$0xff] %v204_v4  ;;  %v220_v12 = vld [vmem:[%s2451_s26 + $0x148] sm:$0xff]  ;;  %v234_v19 = vld [vmem:[%s2451_s26 + $0x150] sm:$0xff] }
  0x18   : >> { %v208_v6 = vld [vmem:[%s2451_s26 + $0x180] sm:$0xff]  ;;  %207 = vst [vmem:[%s2453_s27 + $0xa0] sm:$0xff] %v206_v5  ;;  %v222_v13 = vld [vmem:[%s2451_s26 + $0x188] sm:$0xff]  ;;  %v236_v20 = vld [vmem:[%s2451_s26 + $0x190] sm:$0xff] }
  0x19   : >> { %209 = vst [vmem:[%s2453_s27 + $0xc0] sm:$0xff] %v208_v6  ;;  %v238_v21 = vld [vmem:[%s2451_s26 + $0x18] sm:$0xff] }
  0x1a   : >> { %211 = vst [vmem:[%s2453_s27 + $0x8] sm:$0xff] %v210_v7  ;;  %v240_v22 = vld [vmem:[%s2451_s26 + $0x58] sm:$0xff] }
  0x1b   : >> { %213 = vst [vmem:[%s2453_s27 + $0x28] sm:$0xff] %v212_v8  ;;  %v242_v23 = vld [vmem:[%s2451_s26 + $0x98] sm:$0xff] }
  0x1c   : >> { %215 = vst [vmem:[%s2453_s27 + $0x48] sm:$0xff] %v214_v9  ;;  %v244_v24 = vld [vmem:[%s2451_s26 + $0xd8] sm:$0xff] }
  0x1d   : >> { %217 = vst [vmem:[%s2453_s27 + $0x68] sm:$0xff] %v216_v10  ;;  %v246_v25 = vld [vmem:[%s2451_s26 + $0x118] sm:$0xff] }
  0x1e   : >> { %219 = vst [vmem:[%s2453_s27 + $0x88] sm:$0xff] %v218_v11  ;;  %v248_v26 = vld [vmem:[%s2451_s26 + $0x158] sm:$0xff] }
  0x1f   : >> { %221 = vst [vmem:[%s2453_s27 + $0xa8] sm:$0xff] %v220_v12  ;;  %v250_v27 = vld [vmem:[%s2451_s26 + $0x198] sm:$0xff] }
  0x20   : >> { %223 = vst [vmem:[%s2453_s27 + $0xc8] sm:$0xff] %v222_v13 }
  0x21   : >> { %225 = vst [vmem:[%s2453_s27 + $0x10] sm:$0xff] %v224_v14 }
  0x22   : >> { %227 = vst [vmem:[%s2453_s27 + $0x30] sm:$0xff] %v226_v15 }
  0x23   : >> { %229 = vst [vmem:[%s2453_s27 + $0x50] sm:$0xff] %v228_v16 }
  0x24   : >> { %231 = vst [vmem:[%s2453_s27 + $0x70] sm:$0xff] %v230_v17 }
  0x25   : >> { %233 = vst [vmem:[%s2453_s27 + $0x90] sm:$0xff] %v232_v18 }
  0x26   : >> { %235 = vst [vmem:[%s2453_s27 + $0xb0] sm:$0xff] %v234_v19 }
  0x27   : >> { %237 = vst [vmem:[%s2453_s27 + $0xd0] sm:$0xff] %v236_v20 }
  0x28   : >> { %239 = vst [vmem:[%s2453_s27 + $0x18] sm:$0xff] %v238_v21 }
  0x29   : >> { %241 = vst [vmem:[%s2453_s27 + $0x38] sm:$0xff] %v240_v22 }
  0x2a   : >> { %243 = vst [vmem:[%s2453_s27 + $0x58] sm:$0xff] %v242_v23  ;;  %192 = sbr.rel (!%p189_p6) target bundleno = 18 (0x12), region = 166 }
  0x2b   : >> { %245 = vst [vmem:[%s2453_s27 + $0x78] sm:$0xff] %v244_v24 }
  0x2c   : >> { %247 = vst [vmem:[%s2453_s27 + $0x98] sm:$0xff] %v246_v25 }
  0x2d   : >> { %249 = vst [vmem:[%s2453_s27 + $0xb8] sm:$0xff] %v248_v26 }
  0x2e   : >> { %251 = vst [vmem:[%s2453_s27 + $0xd8] sm:$0xff] %v250_v27 }
  0x2f PF: > { %p1684_p7 = scmp.ge.s32.totalorder %s2376_s16, 1  ;;  %p306_p8 = scmp.lt.s32.totalorder %s2376_s16, 3 }
  0x31   : > { %p307_p9 = pnand %p1684_p7, %p306_p8 }
  0x32   : > { %s313_s29 = sand.u32 (!%p307_p9), 1, %s2360_s12   ;;  %s1686_s30 = sshll.u32 (!%p307_p9), %s2368_s14, 7 }
  0x33   : > { %310 = sbr.rel (%p307_p9) target bundleno = 390 (0x186), region = 58  ;;  %s1685_s4 = sshll.u32 (!%p307_p9), %s313_s29, 8 }
  0x34   : > { %p348_p10 = scmp.lt.s32.totalorder (!%p307_p9), %s1686_s30, 255  ;;  %s2528_s9 = scalar_lea.vmem (!%p307_p9), [#allocation3], %s1685_s4 }
  0x35   : > { %p1688_p11 = scmp.ne.s32.totalorder (!%p307_p9), %s2368_s14, 0 }
  0x38   : > { %s2748_s30 = smov (!%p348_p10, %s1686_s30), 255  ;;  %365 = sbr.rel (%p1688_p11) target bundleno = 70 (0x46), region = 66 }
  0x39   : > { %s1687_s5 = sshll.u32 %s2748_s30, 2 }
  0x3a   : > { %s2526_s8 = scalar_lea.vmem %s2738_s1, %s1687_s5 }
  0x3d   : > { %v2386_v28 = vmov 0.0  }
  0x3e   : > { %366 = vst [vmem:[#allocation2 + $0x30] sm:$0xff] %v2386_v28 }
  0x3f   : > { %367 = vst [vmem:[#allocation2] sm:$0xff] %v2386_v28 }
  0x40   : > { %368 = vst [vmem:[#allocation2 + $0x18] sm:$0xff] %v2386_v28 }
  0x41   : > { %369 = vst [vmem:[#allocation2 + $0x10] sm:$0xff] %v2386_v28 }
  0x42   : > { %370 = vst [vmem:[#allocation2 + $0x8] sm:$0xff] %v2386_v28 }
  0x43   : > { %371 = vst [vmem:[#allocation2 + $0x20] sm:$0xff] %v2386_v28 }
  0x44   : > { %372 = vst [vmem:[#allocation2 + $0x28] sm:$0xff] %v2386_v28 }
  0x45   : > { %373 = vst [vmem:[#allocation2 + $0x38] sm:$0xff] %v2386_v28 }
  0x46 PF: > { %v2121_v29 = vld [vmem:[%s2526_s8 + $0x38] sm:$0xff]  ;;  %v2120_v33 = vld [vmem:[%s2526_s8 + $0x30] sm:$0xff]  ;;  %v2119_v37 = vld [vmem:[%s2526_s8 + $0x28] sm:$0xff]  ;;  %p2073_p12 = scmp.ne.s32.totalorder %s2368_s14, 1 }
  0x47   : > { %v2129_v30 = vld [vmem:[%s2526_s8 + $0x78] sm:$0xff]  ;;  %1086 = vmatpush.bf16.msra.mxu0 %v2121_v29  ;;  %v2128_v34 = vld [vmem:[%s2526_s8 + $0x70] sm:$0xff]  ;;  %v2127_v38 = vld [vmem:[%s2526_s8 + $0x68] sm:$0xff] }
  0x48   : > { %v2137_v31 = vld [vmem:[%s2526_s8 + $0xb8] sm:$0xff]  ;;  %1115 = vmatpush.bf16.msra.mxu1 %v2129_v30  ;;  %v2136_v35 = vld [vmem:[%s2526_s8 + $0xb0] sm:$0xff]  ;;  %v2135_v39 = vld [vmem:[%s2526_s8 + $0xa8] sm:$0xff] }
  0x49   : > { %v2145_v32 = vld [vmem:[%s2526_s8 + $0xf8] sm:$0xff]  ;;  %1144 = vmatpush.bf16.msra.mxu2 %v2137_v31  ;;  %v2144_v36 = vld [vmem:[%s2526_s8 + $0xf0] sm:$0xff]  ;;  %v2143_v40 = vld [vmem:[%s2526_s8 + $0xe8] sm:$0xff] }
  0x4a   : > { %1173 = vmatpush.bf16.msra.mxu3 %v2145_v32  ;;  %v2118_v41 = vld [vmem:[%s2526_s8 + $0x20] sm:$0xff]  ;;  %v2117_v45 = vld [vmem:[%s2526_s8 + $0x18] sm:$0xff]  ;;  %v2116_v49 = vld [vmem:[%s2526_s8 + $0x10] sm:$0xff] }
  0x4b   : > { %1087 = vmatpush.bf16.msra.mxu0 %v2120_v33  ;;  %v2126_v42 = vld [vmem:[%s2526_s8 + $0x60] sm:$0xff]  ;;  %v2125_v46 = vld [vmem:[%s2526_s8 + $0x58] sm:$0xff]  ;;  %v2124_v50 = vld [vmem:[%s2526_s8 + $0x50] sm:$0xff] }
  0x4c   : > { %1116 = vmatpush.bf16.msra.mxu1 %v2128_v34  ;;  %v2134_v43 = vld [vmem:[%s2526_s8 + $0xa0] sm:$0xff]  ;;  %v2133_v47 = vld [vmem:[%s2526_s8 + $0x98] sm:$0xff]  ;;  %v2132_v51 = vld [vmem:[%s2526_s8 + $0x90] sm:$0xff] }
  0x4d   : > { %1145 = vmatpush.bf16.msra.mxu2 %v2136_v35  ;;  %v2142_v44 = vld [vmem:[%s2526_s8 + $0xe0] sm:$0xff]  ;;  %v2141_v48 = vld [vmem:[%s2526_s8 + $0xd8] sm:$0xff]  ;;  %v2140_v52 = vld [vmem:[%s2526_s8 + $0xd0] sm:$0xff] }
  0x4e   : > { %1174 = vmatpush.bf16.msra.mxu3 %v2144_v36  ;;  %v2115_v53 = vld [vmem:[%s2526_s8 + $0x8] sm:$0xff]  ;;  %v2114_v57 = vld [vmem:[%s2526_s8] sm:$0xff]  ;;  %v2169_v5 = vld [vmem:[%s2526_s8 + $0x1b8] sm:$0xff] }
  0x4f   : > { %1088 = vmatpush.bf16.msra.mxu0 %v2119_v37  ;;  %v2123_v54 = vld [vmem:[%s2526_s8 + $0x48] sm:$0xff]  ;;  %v2122_v58 = vld [vmem:[%s2526_s8 + $0x40] sm:$0xff]  ;;  %v2153_v6 = vld [vmem:[%s2526_s8 + $0x138] sm:$0xff] }
  0x50   : > { %1117 = vmatpush.bf16.msra.mxu1 %v2127_v38  ;;  %v2131_v55 = vld [vmem:[%s2526_s8 + $0x88] sm:$0xff]  ;;  %v2130_v59 = vld [vmem:[%s2526_s8 + $0x80] sm:$0xff]  ;;  %v2177_v11 = vld [vmem:[%s2526_s8 + $0x1f8] sm:$0xff] }
  0x51   : > { %1146 = vmatpush.bf16.msra.mxu2 %v2135_v39  ;;  %v2139_v56 = vld [vmem:[%s2526_s8 + $0xc8] sm:$0xff]  ;;  %v2138_v60 = vld [vmem:[%s2526_s8 + $0xc0] sm:$0xff]  ;;  %v2161_v12 = vld [vmem:[%s2526_s8 + $0x178] sm:$0xff] }
  0x52   : > { %1175 = vmatpush.bf16.msra.mxu3 %v2143_v40  ;;  %v1691_v61 = vld [vmem:[%s2528_s9] sm:$0xf]  ;;  %v2082_v63 = vld [vmem:[%s2528_s9 + $0x4] sm:$0xf]  ;;  %v1699_v1 = vld [vmem:[%s2528_s9 + $0x8] sm:$0xf] }
  0x53   : > { %1089 = vmatpush.bf16.msra.mxu0 %v2118_v41  ;;  %v2086_v62 = vld [vmem:[%s2528_s9 + $0x1c] sm:$0xf0]  ;;  %v1693_v0 = vld [vmem:[%s2528_s9 + $0x20] sm:$0xf0]  ;;  %v2087_v2 = vld [vmem:[%s2528_s9 + $0x24] sm:$0xf0] }
  0x54   : > { %1118 = vmatpush.bf16.msra.mxu1 %v2126_v42  ;;  %v2083_v3 = vld [vmem:[%s2528_s9 + $0xc] sm:$0xf]  ;;  %v1692_v7 = vor.u32 %v2086_v62, %v1691_v61  ;;  %v1696_v8 = vor.u32 %v2082_v63, %v1693_v0  ;;  %v1700_v9 = vor.u32 %v2087_v2, %v1699_v1  ;;  %v2168_v13 = vld [vmem:[%s2526_s8 + $0x1b0] sm:$0xff]  ;;  %v1723_v21 = vld [vmem:[%s2528_s9 + $0x40] sm:$0xf] }
  0x55   : > { %1147 = vmatpush.bf16.msra.mxu2 %v2134_v43  ;;  %v1701_v4 = vld [vmem:[%s2528_s9 + $0x28] sm:$0xf0]  ;;  %v2152_v14 = vld [vmem:[%s2526_s8 + $0x130] sm:$0xff]  ;;  %v2166_v22 = vld [vmem:[%s2526_s8 + $0x1a0] sm:$0xff] }
  0x56   : > { %1176 = vmatpush.bf16.msra.mxu3 %v2142_v44  ;;  %v1704_v10 = vor.u32 %v2083_v3, %v1701_v4  ;;  %v2176_v15 = vld [vmem:[%s2526_s8 + $0x1f0] sm:$0xff]  ;;  %v2167_v17 = vld [vmem:[%s2526_s8 + $0x1a8] sm:$0xff]  ;;  %v2150_v23 = vld [vmem:[%s2526_s8 + $0x120] sm:$0xff] }
  0x57   : > { %1090 = vmatpush.bf16.msra.mxu0 %v2117_v45  ;;  %v2160_v16 = vld [vmem:[%s2526_s8 + $0x170] sm:$0xff]  ;;  %v2151_v18 = vld [vmem:[%s2526_s8 + $0x128] sm:$0xff]  ;;  %v2094_v24 = vld [vmem:[%s2528_s9 + $0x5c] sm:$0xf0] }
  0x58   : > { %1119 = vmatpush.bf16.msra.mxu1 %v2125_v46  ;;  %v2175_v19 = vld [vmem:[%s2526_s8 + $0x1e8] sm:$0xff]  ;;  %v2090_v25 = vld [vmem:[%s2528_s9 + $0x44] sm:$0xf]  ;;  %v2165_v33 = vld [vmem:[%s2526_s8 + $0x198] sm:$0xff]  ;;  %v1724_v35 = vor.u32 %v2094_v24, %v1723_v21 }
  0x59   : > { %1148 = vmatpush.bf16.msra.mxu2 %v2133_v47  ;;  %v2159_v20 = vld [vmem:[%s2526_s8 + $0x168] sm:$0xff]  ;;  %v1725_v26 = vld [vmem:[%s2528_s9 + $0x60] sm:$0xf0]  ;;  %v2149_v34 = vld [vmem:[%s2526_s8 + $0x118] sm:$0xff] }
  0x5a   : > { %1177 = vmatpush.bf16.msra.mxu3 %v2141_v48  ;;  %v1731_v27 = vld [vmem:[%s2528_s9 + $0x48] sm:$0xf]  ;;  %v2091_v29 = vld [vmem:[%s2528_s9 + $0x4c] sm:$0xf]  ;;  %v2174_v31 = vld [vmem:[%s2526_s8 + $0x1e0] sm:$0xff]  ;;  %v1728_v36 = vor.u32 %v2090_v25, %v1725_v26 }
  0x5b   : > { %1091 = vmatpush.bf16.msra.mxu0 %v2116_v49  ;;  %v2095_v28 = vld [vmem:[%s2528_s9 + $0x64] sm:$0xf0]  ;;  %v1733_v30 = vld [vmem:[%s2528_s9 + $0x68] sm:$0xf0]  ;;  %v2158_v32 = vld [vmem:[%s2526_s8 + $0x160] sm:$0xff] }
  0x5c   : > { %1120 = vmatpush.bf16.msra.mxu1 %v2124_v50  ;;  %v1732_v37 = vor.u32 %v2095_v28, %v1731_v27  ;;  %v1736_v38 = vor.u32 %v2091_v29, %v1733_v30  ;;  %v2173_v39 = vld [vmem:[%s2526_s8 + $0x1d8] sm:$0xff]  ;;  %v2164_v41 = vld [vmem:[%s2526_s8 + $0x190] sm:$0xff]  ;;  %v2163_v45 = vld [vmem:[%s2526_s8 + $0x188] sm:$0xff] }
  0x5d   : > { %1149 = vmatpush.bf16.msra.mxu2 %v2132_v51  ;;  %v2157_v40 = vld [vmem:[%s2526_s8 + $0x158] sm:$0xff]  ;;  %v2148_v42 = vld [vmem:[%s2526_s8 + $0x110] sm:$0xff]  ;;  %v2147_v46 = vld [vmem:[%s2526_s8 + $0x108] sm:$0xff] }
  0x5e   : > { %1178 = vmatpush.bf16.msra.mxu3 %v2140_v52  ;;  %v2172_v43 = vld [vmem:[%s2526_s8 + $0x1d0] sm:$0xff]  ;;  %v2171_v47 = vld [vmem:[%s2526_s8 + $0x1c8] sm:$0xff]  ;;  %v1755_v49 = vld [vmem:[%s2528_s9 + $0x80] sm:$0xf] }
  0x5f   : > { %1092 = vmatpush.bf16.msra.mxu0 %v2115_v53  ;;  %v2156_v44 = vld [vmem:[%s2526_s8 + $0x150] sm:$0xff]  ;;  %v2155_v48 = vld [vmem:[%s2526_s8 + $0x148] sm:$0xff]  ;;  %v2162_v50 = vld [vmem:[%s2526_s8 + $0x180] sm:$0xff] }
  0x60   : > { %1121 = vmatpush.bf16.msra.mxu1 %v2123_v54  ;;  %v2146_v51 = vld [vmem:[%s2526_s8 + $0x100] sm:$0xff]  ;;  %v1739_v25 = vld [vmem:[%s2528_s9 + $0x50] sm:$0xf]  ;;  %v2092_v27 = vld [vmem:[%s2528_s9 + $0x54] sm:$0xf] }
  0x61   : > { %1150 = vmatpush.bf16.msra.mxu2 %v2131_v55  ;;  %v2102_v52 = vld [vmem:[%s2528_s9 + $0x9c] sm:$0xf0]  ;;  %v2098_v53 = vld [vmem:[%s2528_s9 + $0x84] sm:$0xf]  ;;  %v1763_v55 = vld [vmem:[%s2528_s9 + $0x88] sm:$0xf] }
  0x62   : > { %1179 = vmatpush.bf16.msra.mxu3 %v2139_v56  ;;  %v1757_v54 = vld [vmem:[%s2528_s9 + $0xa0] sm:$0xf0]  ;;  %v2103_v56 = vld [vmem:[%s2528_s9 + $0xa4] sm:$0xf0]  ;;  %v1756_v61 = vor.u32 %v2102_v52, %v1755_v49  ;;  %v1787_v1 = vld [vmem:[%s2528_s9 + $0xc0] sm:$0xf] }
  0x63   : > { %1093 = vmatpush.bf16.msra.mxu0 %v2114_v57  ;;  %v2099_v57 = vld [vmem:[%s2528_s9 + $0x8c] sm:$0xf]  ;;  %v1760_v62 = vor.u32 %v2098_v53, %v1757_v54  ;;  %v1764_v63 = vor.u32 %v2103_v56, %v1763_v55  ;;  %v2110_v2 = vld [vmem:[%s2528_s9 + $0xdc] sm:$0xf0]  ;;  %v2106_v3 = vld [vmem:[%s2528_s9 + $0xc4] sm:$0xf] }
  0x64   : > { %1122 = vmatpush.bf16.msra.mxu1 %v2122_v58  ;;  %v1765_v58 = vld [vmem:[%s2528_s9 + $0xa8] sm:$0xf0]  ;;  %v1789_v4 = vld [vmem:[%s2528_s9 + $0xe0] sm:$0xf0]  ;;  %v2096_v26 = vld [vmem:[%s2528_s9 + $0x6c] sm:$0xf0] }
  0x65   : > { %1151 = vmatpush.bf16.msra.mxu2 %v2130_v59  ;;  %v2170_v59 = vld [vmem:[%s2526_s8 + $0x1c0] sm:$0xff]  ;;  %v1768_v0 = vor.u32 %v2099_v57, %v1765_v58  ;;  %v1741_v28 = vld [vmem:[%s2528_s9 + $0x70] sm:$0xf0]  ;;  %v1747_v29 = vld [vmem:[%s2528_s9 + $0x58] sm:$0xf] }
  0x66   : > { %1180 = vmatpush.bf16.msra.mxu3 %v2138_v60  ;;  %1094 = vmatmul.bf16.vlgmr.msra.gmra.mxu0 %v1692_v7  ;;  %v2154_v60 = vld [vmem:[%s2526_s8 + $0x140] sm:$0xff]  ;;  %v2107_v7 = vld [vmem:[%s2528_s9 + $0xcc] sm:$0xf]  ;;  %v2097_v30 = vld [vmem:[%s2528_s9 + $0x74] sm:$0xf0] }
  0x67   : > { %1202 = vmatpush.bf16.msrb.mxu0 %v2153_v6  ;;  %1123 = vmatmul.bf16.vlgmr.msra.gmra.mxu1 %v1696_v8  ;;  %v2111_v6 = vld [vmem:[%s2528_s9 + $0xe4] sm:$0xf0]  ;;  %v1797_v8 = vld [vmem:[%s2528_s9 + $0xe8] sm:$0xf0]  ;;  %v1803_v49 = vld [vmem:[%s2528_s9 + $0xd0] sm:$0xf] }
  0x68   : > { %1152 = vmatmul.bf16.vlgmr.msra.gmra.mxu2 %v1700_v9  ;;  %1231 = vmatpush.bf16.msrb.mxu1 %v2161_v12  ;;  %v1788_v9 = vor.u32 %v2110_v2, %v1787_v1  ;;  %v1800_v12 = vor.u32 %v2107_v7, %v1797_v8  ;;  %v1805_v52 = vld [vmem:[%s2528_s9 + $0xf0] sm:$0xf0]  ;;  %v1811_v53 = vld [vmem:[%s2528_s9 + $0xd8] sm:$0xf]  ;;  %v2109_v55 = vld [vmem:[%s2528_s9 + $0xdc] sm:$0xf] }
  0x69   : > { %1260 = vmatpush.bf16.msrb.mxu2 %v2169_v5  ;;  %1181 = vmatmul.bf16.vlgmr.msra.gmra.mxu3 %v1704_v10  ;;  %v1795_v5 = vld [vmem:[%s2528_s9 + $0xc8] sm:$0xf]  ;;  %v1792_v10 = vor.u32 %v2106_v3, %v1789_v4  ;;  %v2113_v54 = vld [vmem:[%s2528_s9 + $0xf4] sm:$0xf0]  ;;  %v1813_v56 = vld [vmem:[%s2528_s9 + $0xf8] sm:$0xf0] }
  0x6a   : > { %1289 = vmatpush.bf16.msrb.mxu3 %v2177_v11  ;;  %v1796_v11 = vor.u32 %v2111_v6, %v1795_v5 }
  0x6b   : > { %1203 = vmatpush.bf16.msrb.mxu0 %v2152_v14  ;;  %v2088_v14 = vld [vmem:[%s2528_s9 + $0x2c] sm:$0xf0] }
  0x6c   : > { %1232 = vmatpush.bf16.msrb.mxu1 %v2160_v16  ;;  %v1709_v16 = vld [vmem:[%s2528_s9 + $0x30] sm:$0xf0] }
  0x6d   : > { %1261 = vmatpush.bf16.msrb.mxu2 %v2168_v13  ;;  %v1707_v13 = vld [vmem:[%s2528_s9 + $0x10] sm:$0xf] }
  0x6e   : > { %1290 = vmatpush.bf16.msrb.mxu3 %v2176_v15  ;;  %v2084_v15 = vld [vmem:[%s2528_s9 + $0x14] sm:$0xf]  ;;  %v1708_v21 = vor.u32 %v2088_v14, %v1707_v13 }
  0x6f   : > { %1204 = vmatpush.bf16.msrb.mxu0 %v2151_v18  ;;  %v2089_v18 = vld [vmem:[%s2528_s9 + $0x34] sm:$0xf0] }
  0x70   : > { %1233 = vmatpush.bf16.msrb.mxu1 %v2159_v20  ;;  %v1717_v20 = vld [vmem:[%s2528_s9 + $0x38] sm:$0xf0] }
  0x71   : > { %1262 = vmatpush.bf16.msrb.mxu2 %v2167_v17  ;;  %v1715_v17 = vld [vmem:[%s2528_s9 + $0x18] sm:$0xf] }
  0x72   : > { %1291 = vmatpush.bf16.msrb.mxu3 %v2175_v19  ;;  %v2085_v19 = vld [vmem:[%s2528_s9 + $0x1c] sm:$0xf] }
  0x73   : > { %1205 = vmatpush.bf16.msrb.mxu0 %v2150_v23  ;;  %v1716_v23 = vor.u32 %v2089_v18, %v1715_v17  ;;  %v1720_v24 = vor.u32 %v2085_v19, %v1717_v20 }
  0x74   : > { %1234 = vmatpush.bf16.msrb.mxu1 %v2158_v32  ;;  %v1749_v32 = vld [vmem:[%s2528_s9 + $0x78] sm:$0xf0] }
  0x75   : > { %1263 = vmatpush.bf16.msrb.mxu2 %v2166_v22  ;;  %v1712_v22 = vor.u32 %v2084_v15, %v1709_v16 }
  0x76   : > { %1292 = vmatpush.bf16.msrb.mxu3 %v2174_v31  ;;  %1099 = vmatmul.bf16.gmra.mxu0 %v1724_v35  ;;  %v2093_v31 = vld [vmem:[%s2528_s9 + $0x5c] sm:$0xf]  ;;  %v1748_v35 = vor.u32 %v2097_v30, %v1747_v29 }
  0x77   : > { %1206 = vmatpush.bf16.msrb.mxu0 %v2149_v34  ;;  %1128 = vmatmul.bf16.gmra.mxu1 %v1728_v36  ;;  %v1744_v34 = vor.u32 %v2092_v27, %v1741_v28  ;;  %v1752_v36 = vor.u32 %v2093_v31, %v1749_v32 }
  0x78   : > { %1157 = vmatmul.bf16.gmra.mxu2 %v1732_v37  ;;  %1235 = vmatpush.bf16.msrb.mxu1 %v2157_v40  ;;  %v1771_v37 = vld [vmem:[%s2528_s9 + $0x90] sm:$0xf]  ;;  %v1773_v40 = vld [vmem:[%s2528_s9 + $0xb0] sm:$0xf0] }
  0x79   : > { %1264 = vmatpush.bf16.msrb.mxu2 %v2165_v33  ;;  %1186 = vmatmul.bf16.gmra.mxu3 %v1736_v38  ;;  %v1740_v33 = vor.u32 %v2096_v26, %v1739_v25  ;;  %v2104_v38 = vld [vmem:[%s2528_s9 + $0xac] sm:$0xf0] }
  0x7a   : > { %1293 = vmatpush.bf16.msrb.mxu3 %v2173_v39  ;;  %v2100_v39 = vld [vmem:[%s2528_s9 + $0x94] sm:$0xf] }
  0x7b   : > { %1207 = vmatpush.bf16.msrb.mxu0 %v2148_v42  ;;  %v2105_v42 = vld [vmem:[%s2528_s9 + $0xb4] sm:$0xf0] }
  0x7c   : > { %1236 = vmatpush.bf16.msrb.mxu1 %v2156_v44  ;;  %v1781_v44 = vld [vmem:[%s2528_s9 + $0xb8] sm:$0xf0] }
  0x7d   : > { %1265 = vmatpush.bf16.msrb.mxu2 %v2164_v41  ;;  %v1779_v41 = vld [vmem:[%s2528_s9 + $0x98] sm:$0xf] }
  0x7e   : > { %1294 = vmatpush.bf16.msrb.mxu3 %v2172_v43  ;;  %v2101_v43 = vld [vmem:[%s2528_s9 + $0x9c] sm:$0xf] }
  0x7f   : > { %1208 = vmatpush.bf16.msrb.mxu0 %v2147_v46  ;;  %v1776_v46 = vor.u32 %v2100_v39, %v1773_v40 }
  0x80   : > { %1237 = vmatpush.bf16.msrb.mxu1 %v2155_v48  ;;  %v1784_v48 = vor.u32 %v2101_v43, %v1781_v44  ;;  %v374_v44 = vld [vmem:[#allocation2 + $0x30] sm:$0xff] }
  0x81   : > { %1266 = vmatpush.bf16.msrb.mxu2 %v2163_v45  ;;  %v1772_v45 = vor.u32 %v2104_v38, %v1771_v37 }
  0x82   : > { %1295 = vmatpush.bf16.msrb.mxu3 %v2171_v47  ;;  %v1780_v47 = vor.u32 %v2105_v42, %v1779_v41 }
  0x83   : > { %1209 = vmatpush.bf16.msrb.mxu0 %v2146_v51  ;;  %v2108_v51 = vld [vmem:[%s2528_s9 + $0xd4] sm:$0xf] }
  0x84   : > { %1238 = vmatpush.bf16.msrb.mxu1 %v2154_v60  ;;  %v1808_v58 = vor.u32 %v2108_v51, %v1805_v52  ;;  %v1816_v60 = vor.u32 %v2109_v55, %v1813_v56 }
  0x85   : > { %1267 = vmatpush.bf16.msrb.mxu2 %v2162_v50  ;;  %v2112_v50 = vld [vmem:[%s2528_s9 + $0xec] sm:$0xf0] }
  0x86   : > { %1296 = vmatpush.bf16.msrb.mxu3 %v2170_v59  ;;  %1104 = vmatmul.bf16.gmra.mxu0 %v1756_v61  ;;  %v1804_v57 = vor.u32 %v2112_v50, %v1803_v49  ;;  %v1812_v59 = vor.u32 %v2113_v54, %v1811_v53 }
  0x87   : > { %1133 = vmatmul.bf16.gmra.mxu1 %v1760_v62 }
  0x88   : > { %1162 = vmatmul.bf16.gmra.mxu2 %v1764_v63 }
  0x89   : > { %1191 = vmatmul.bf16.gmra.mxu3 %v1768_v0 }
  0x96   : > { %1109 = vmatmul.bf16.gmra.mxu0 %v1788_v9 }
  0x97   : > { %1138 = vmatmul.bf16.gmra.mxu1 %v1792_v10 }
  0x98   : > { %1167 = vmatmul.bf16.gmra.mxu2 %v1796_v11 }
  0x99   : > { %1196 = vmatmul.bf16.gmra.mxu3 %v1800_v12 }
  0xa6   : > { %1210 = vmatmul.bf16.vlgmr.msrb.gmra.mxu0 %v1708_v21 }
  0xa7   : > { %1239 = vmatmul.bf16.vlgmr.msrb.gmra.mxu1 %v1712_v22 }
  0xa8   : > { %1268 = vmatmul.bf16.vlgmr.msrb.gmra.mxu2 %v1716_v23 }
  0xa9   : > { %1297 = vmatmul.bf16.vlgmr.msrb.gmra.mxu3 %v1720_v24 }
  0xb6   : > { %1215 = vmatmul.bf16.gmra.mxu0 %v1740_v33 }
  0xb7   : > { %1244 = vmatmul.bf16.gmra.mxu1 %v1744_v34 }
  0xb8   : > { %1273 = vmatmul.bf16.gmra.mxu2 %v1748_v35 }
  0xb9   : > { %1302 = vmatmul.bf16.gmra.mxu3 %v1752_v36 }
  0xc6   : > { %1220 = vmatmul.bf16.gmra.mxu0 %v1772_v45 }
  0xc7   : > { %1249 = vmatmul.bf16.gmra.mxu1 %v1776_v46 }
  0xc8   : > { %1278 = vmatmul.bf16.gmra.mxu2 %v1780_v47 }
  0xc9   : > { %1307 = vmatmul.bf16.gmra.mxu3 %v1784_v48 }
  0xd6   : > { %1225 = vmatmul.bf16.gmra.mxu0 %v1804_v57  ;;  %v375_v57 = vld [vmem:[#allocation2] sm:$0xff] }
  0xd7   : > { %1254 = vmatmul.bf16.gmra.mxu1 %v1808_v58 }
  0xd8   : > { %1283 = vmatmul.bf16.gmra.mxu2 %v1812_v59 }
  0xd9   : > { %1312 = vmatmul.bf16.gmra.mxu3 %v1816_v60 }
  0xe3   : > { %v1095_v61 = vpop.f32.mrf.mxu0 }
  0xe4   : > { %v1124_v62 = vpop.f32.mrf.mxu1 }
  0xe5   : > { %v1125_v27 = vadd.f32 %v1124_v62, %v1095_v61 }
  0xeb   : > { %v1153_v63 = vpop.f32.mrf.mxu2  ;;  %v1097_v1 = vpop.f32.mrf.mxu0 }
  0xec   : > { %v1182_v0 = vpop.f32.mrf.mxu3  ;;  %v1126_v2 = vpop.f32.mrf.mxu1  ;;  %v1154_v28 = vadd.f32 %v1153_v63, %v1125_v27 }
  0xed   : > { %v1127_v34 = vadd.f32 %v1126_v2, %v1097_v1 }
  0xee   : > { %v1183_v31 = vadd.f32 %v1182_v0, %v1154_v28 }
  0xf3   : > { %v1155_v3 = vpop.f32.mrf.mxu2  ;;  %v1100_v5 = vpop.f32.mrf.mxu0 }
  0xf4   : > { %v1184_v4 = vpop.f32.mrf.mxu3  ;;  %v1129_v6 = vpop.f32.mrf.mxu1  ;;  %v1156_v36 = vadd.f32 %v1155_v3, %v1127_v34 }
  0xf5   : > { %v1130_v45 = vadd.f32 %v1129_v6, %v1100_v5  ;;  %v376_v6 = vld [vmem:[#allocation2 + $0x18] sm:$0xff] }
  0xf6   : > { %v1185_v40 = vadd.f32 %v1184_v4, %v1156_v36  ;;  %v377_v36 = vld [vmem:[#allocation2 + $0x10] sm:$0xff] }
  0xfb   : > { %v1158_v7 = vpop.f32.mrf.mxu2  ;;  %v1102_v9 = vpop.f32.mrf.mxu0 }
  0xfc   : > { %v1187_v8 = vpop.f32.mrf.mxu3  ;;  %v1131_v10 = vpop.f32.mrf.mxu1  ;;  %v1159_v48 = vadd.f32 %v1158_v7, %v1130_v45 }
  0xfd   : > { %v1132_v58 = vadd.f32 %v1131_v10, %v1102_v9 }
  0xfe   : > { %v1188_v53 = vadd.f32 %v1187_v8, %v1159_v48 }
 0x103   : > { %v1160_v11 = vpop.f32.mrf.mxu2  ;;  %v1105_v13 = vpop.f32.mrf.mxu0 }
 0x104   : > { %v1189_v12 = vpop.f32.mrf.mxu3  ;;  %v1134_v14 = vpop.f32.mrf.mxu1  ;;  %v1161_v61 = vadd.f32 %v1160_v11, %v1132_v58 }
 0x105   : > { %v1135_v7 = vadd.f32 %v1134_v14, %v1105_v13 }
 0x106   : > { %v1190_v2 = vadd.f32 %v1189_v12, %v1161_v61  ;;  %v380_v61 = vld [vmem:[#allocation2 + $0x28] sm:$0xff] }
 0x10b   : > { %v1163_v15 = vpop.f32.mrf.mxu2  ;;  %v2661_v17 = vpop.f32.mrf.mxu0 }
 0x10c   : > { %v2659_v16 = vpop.f32.mrf.mxu3  ;;  %v2663_v18 = vpop.f32.mrf.mxu1  ;;  %v1164_v28 = vadd.f32 %v1163_v15, %v1135_v7 }
 0x10d   : > { %v1137_v12 = vadd.f32 %v2663_v18, %v2661_v17 }
 0x10e   : > { %v1193_v11 = vadd.f32 %v2659_v16, %v1164_v28 }
 0x113   : > { %v2665_v19 = vpop.f32.mrf.mxu2  ;;  %v2669_v21 = vpop.f32.mrf.mxu0 }
 0x114   : > { %v2667_v20 = vpop.f32.mrf.mxu3  ;;  %v2671_v22 = vpop.f32.mrf.mxu1  ;;  %v1166_v13 = vadd.f32 %v2665_v19, %v1137_v12 }
 0x115   : > { %v1140_v45 = vadd.f32 %v2671_v22, %v2669_v21 }
 0x11b   : > { %v2673_v23 = vpop.f32.mrf.mxu2  ;;  %v2677_v25 = vpop.f32.mrf.mxu0 }
 0x11c   : > { %v2675_v24 = vpop.f32.mrf.mxu3  ;;  %v2679_v26 = vpop.f32.mrf.mxu1  ;;  %v1169_v18 = vadd.f32 %v2673_v23, %v1140_v45 }
 0x123   : > { %v2681_v29 = vpop.f32.mrf.mxu2  ;;  %v1211_v32 = vpop.f32.mrf.mxu0 }
 0x124   : > { %v2683_v30 = vpop.f32.mrf.mxu3  ;;  %v1240_v33 = vpop.f32.mrf.mxu1  ;;  %v1212_v35 = vadd.f32 %v1211_v32, %v1183_v31 }
 0x126   : > { %v1241_v37 = vadd.f32 %v1240_v33, %v1212_v35 }
 0x12b   : > { %v1269_v38 = vpop.f32.mrf.mxu2  ;;  %v1213_v42 = vpop.f32.mrf.mxu0 }
 0x12c   : > { %v1298_v39 = vpop.f32.mrf.mxu3  ;;  %v1270_v41 = vadd.f32 %v1269_v38, %v1241_v37  ;;  %v1242_v43 = vpop.f32.mrf.mxu1  ;;  %v1214_v47 = vadd.f32 %v1213_v42, %v1185_v40 }
 0x12e   : > { %v1299_v46 = vadd.f32 %v1298_v39, %v1270_v41  ;;  %v1243_v50 = vadd.f32 %v1242_v43, %v1214_v47  ;;  %v1195_v41 = vadd.f32 %v2667_v20, %v1166_v13  ;;  %v378_v43 = vld [vmem:[#allocation2 + $0x8] sm:$0xff] }
 0x130   : > { %v1318_v49 = vadd.f32 %v1299_v46, %v374_v44 }
 0x132   : > { %1326 = vst [vmem:[#allocation2 + $0x30] sm:$0xff] %v1318_v49 }
 0x133   : > { %v1271_v51 = vpop.f32.mrf.mxu2  ;;  %v1216_v55 = vpop.f32.mrf.mxu0 }
 0x134   : > { %v1300_v52 = vpop.f32.mrf.mxu3  ;;  %v1272_v54 = vadd.f32 %v1271_v51, %v1243_v50  ;;  %v1245_v56 = vpop.f32.mrf.mxu1  ;;  %v1217_v60 = vadd.f32 %v1216_v55, %v1188_v53  ;;  %v1198_v50 = vadd.f32 %v2675_v24, %v1169_v18  ;;  %v1142_v53 = vadd.f32 %v2679_v26, %v2677_v25 }
 0x136   : > { %v1301_v59 = vadd.f32 %v1300_v52, %v1272_v54  ;;  %v1246_v63 = vadd.f32 %v1245_v56, %v1217_v60  ;;  %v379_v52 = vld [vmem:[#allocation2 + $0x20] sm:$0xff]  ;;  %v1171_v22 = vadd.f32 %v2681_v29, %v1142_v53 }
 0x138   : > { %v1319_v62 = vadd.f32 %v1301_v59, %v375_v57  ;;  %v1200_v59 = vadd.f32 %v2683_v30, %v1171_v22 }
 0x13a   : > { %1327 = vst [vmem:[#allocation2] sm:$0xff] %v1319_v62 }
 0x13b   : > { %v1274_v0 = vpop.f32.mrf.mxu2  ;;  %v1218_v4 = vpop.f32.mrf.mxu0 }
 0x13c   : > { %v1303_v1 = vpop.f32.mrf.mxu3  ;;  %v1275_v3 = vadd.f32 %v1274_v0, %v1246_v63  ;;  %v1247_v5 = vpop.f32.mrf.mxu1  ;;  %v1219_v27 = vadd.f32 %v1218_v4, %v1190_v2 }
 0x13e   : > { %v1304_v8 = vadd.f32 %v1303_v1, %v1275_v3  ;;  %v1248_v9 = vadd.f32 %v1247_v5, %v1219_v27  ;;  %v381_v3 = vld [vmem:[#allocation2 + $0x38] sm:$0xff] }
 0x140   : > { %v1320_v31 = vadd.f32 %v1304_v8, %v376_v6 }
 0x142   : > { %1328 = vst [vmem:[#allocation2 + $0x18] sm:$0xff] %v1320_v31 }
 0x143   : > { %v1276_v10 = vpop.f32.mrf.mxu2  ;;  %v1221_v34 = vpop.f32.mrf.mxu0 }
 0x144   : > { %v1305_v32 = vpop.f32.mrf.mxu3  ;;  %v1277_v33 = vadd.f32 %v1276_v10, %v1248_v9  ;;  %v1250_v35 = vpop.f32.mrf.mxu1  ;;  %v1222_v38 = vadd.f32 %v1221_v34, %v1193_v11 }
 0x146   : > { %v1306_v37 = vadd.f32 %v1305_v32, %v1277_v33  ;;  %v1251_v15 = vadd.f32 %v1250_v35, %v1222_v38 }
 0x148   : > { %v1321_v14 = vadd.f32 %v1306_v37, %v377_v36 }
 0x14a   : > { %1329 = vst [vmem:[#allocation2 + $0x10] sm:$0xff] %v1321_v14 }
 0x14b   : > { %v1279_v39 = vpop.f32.mrf.mxu2  ;;  %v1223_v16 = vpop.f32.mrf.mxu0 }
 0x14c   : > { %v1308_v40 = vpop.f32.mrf.mxu3  ;;  %v1280_v42 = vadd.f32 %v1279_v39, %v1251_v15  ;;  %v1252_v44 = vpop.f32.mrf.mxu1  ;;  %v1224_v17 = vadd.f32 %v1223_v16, %v1195_v41 }
 0x14e   : > { %v1309_v46 = vadd.f32 %v1308_v40, %v1280_v42  ;;  %v1253_v19 = vadd.f32 %v1252_v44, %v1224_v17 }
 0x150   : > { %v1322_v47 = vadd.f32 %v1309_v46, %v378_v43 }
 0x152   : > { %1330 = vst [vmem:[#allocation2 + $0x8] sm:$0xff] %v1322_v47 }
 0x153   : > { %v1281_v48 = vpop.f32.mrf.mxu2  ;;  %v1226_v20 = vpop.f32.mrf.mxu0 }
 0x154   : > { %v1310_v49 = vpop.f32.mrf.mxu3  ;;  %v1282_v51 = vadd.f32 %v1281_v48, %v1253_v19  ;;  %v1227_v55 = vadd.f32 %v1226_v20, %v1198_v50  ;;  %v1255_v21 = vpop.f32.mrf.mxu1 }
 0x156   : > { %v1311_v54 = vadd.f32 %v1310_v49, %v1282_v51  ;;  %v1256_v23 = vadd.f32 %v1255_v21, %v1227_v55 }
 0x158   : > { %v1323_v56 = vadd.f32 %v1311_v54, %v379_v52 }
 0x15a   : > { %1331 = vst [vmem:[#allocation2 + $0x20] sm:$0xff] %v1323_v56 }
 0x15b   : > { %v1284_v57 = vpop.f32.mrf.mxu2  ;;  %v1228_v24 = vpop.f32.mrf.mxu0 }
 0x15c   : > { %v1313_v58 = vpop.f32.mrf.mxu3  ;;  %v1285_v60 = vadd.f32 %v1284_v57, %v1256_v23  ;;  %v1229_v63 = vadd.f32 %v1228_v24, %v1200_v59  ;;  %v1257_v1 = vpop.f32.mrf.mxu1 }
 0x15e   : > { %v1314_v62 = vadd.f32 %v1313_v58, %v1285_v60  ;;  %v1258_v25 = vadd.f32 %v1257_v1, %v1229_v63 }
 0x160   : > { %v1324_v0 = vadd.f32 %v1314_v62, %v380_v61 }
 0x162   : > { %1332 = vst [vmem:[#allocation2 + $0x28] sm:$0xff] %v1324_v0 }
 0x163   : > { %v1286_v26 = vpop.f32.mrf.mxu2 }
 0x164   : > { %v1287_v2 = vadd.f32 %v1286_v26, %v1258_v25  ;;  %v1315_v29 = vpop.f32.mrf.mxu3 }
 0x166   : > { %v1316_v4 = vadd.f32 %v1315_v29, %v1287_v2  ;;  %1337 = sbr.rel (%p2073_p12) target bundleno = 373 (0x175), region = 70 }
 0x168   : > { %v1325_v5 = vadd.f32 %v1316_v4, %v381_v3 }
 0x16a   : > { %1333 = vst [vmem:[#allocation2 + $0x38] sm:$0xff] %v1325_v5 }
 0x16b   : > { %v1338_v30 = vld [vmem:[#allocation2 + $0x30] sm:$0xff]  ;;  %v1339_v6 = vld [vmem:[#allocation2] sm:$0xff]  ;;  %v1340_v7 = vld [vmem:[#allocation2 + $0x18] sm:$0xff] }
 0x16c   : > { %v2181_v8 = vpack.c.bf16 %v1339_v6, %v1338_v30  ;;  %v1341_v27 = vld [vmem:[#allocation2 + $0x10] sm:$0xff]  ;;  %v1342_v28 = vld [vmem:[#allocation2 + $0x8] sm:$0xff]  ;;  %v1343_v31 = vld [vmem:[#allocation2 + $0x20] sm:$0xff] }
 0x16d   : > { %v2186_v9 = vpack.c.bf16 %v1341_v27, %v1340_v7  ;;  %v2191_v10 = vpack.c.bf16 %v1343_v31, %v1342_v28  ;;  %v1344_v32 = vld [vmem:[#allocation2 + $0x28] sm:$0xff] }
 0x16e   : > { %2182 = vst [vmem:[#allocation4] sm:$0xff] %v2181_v8  }
 0x16f   : > { %2198 = vst [vmem:[#allocation4 + $0x8] sm:$0xff] %v2186_v9  }
 0x170   : > { %2199 = vst [vmem:[#allocation4 + $0x10] sm:$0xff] %v2191_v10  }
 0x171   : > { %v1345_v11 = vld [vmem:[#allocation2 + $0x38] sm:$0xff] }
 0x172   : > { %v2196_v33 = vpack.c.bf16 %v1345_v11, %v1344_v32 }
 0x174   : > { %2200 = vst [vmem:[#allocation4 + $0x18] sm:$0xff] %v2196_v33  }
 0x175 PF: > { %p2074_p13 = scmp.ne.s32.totalorder %s1671_s2, 1 }
 0x176   : > { %s2382_s10 = smov (!%p2074_p13), 0  }
 0x177   : > { %1364 = sbr.rel (%p2074_p13) target bundleno = 390 (0x186), region = 74 }
 0x17c LB: >> { %v1392_v34 = vld [vmem:[#allocation4] sm:$0xf]  ;;  %v1394_v35 = vld [vmem:[#allocation4 + $0x4] sm:$0xf]  ;;  %v1396_v36 = vld [vmem:[#allocation4 + $0x8] sm:$0xf]  ;;  %s2384_s10 = sphi %s2382_s10, %s1386_s10  }
 0x17d   : >> { %1393 = vst [vmem:[%s2740_s3] sm:$0xf] %v1392_v34  ;;  %v1398_v12 = vld [vmem:[#allocation4 + $0xc] sm:$0xf]  ;;  %v1400_v37 = vld [vmem:[#allocation4 + $0x10] sm:$0xf]  ;;  %s1386_s10 = sadd.s32 1, %s2384_s10  }
 0x17e   : >> { %1395 = vst [vmem:[%s2740_s3 + $0x4] sm:$0xf] %v1394_v35  ;;  %v1402_v38 = vld [vmem:[#allocation4 + $0x14] sm:$0xf]  ;;  %v1404_v13 = vld [vmem:[#allocation4 + $0x18] sm:$0xf] }
 0x17f   : >> { %1397 = vst [vmem:[%s2740_s3 + $0x8] sm:$0xf] %v1396_v36  ;;  %p1385_p0 = scmp.ge.s32.totalorder %s1386_s10, 1 }
 0x180   : >> { %1399 = vst [vmem:[%s2740_s3 + $0xc] sm:$0xf] %v1398_v12 }
 0x181   : >> { %1401 = vst [vmem:[%s2740_s3 + $0x10] sm:$0xf] %v1400_v37  ;;  %1388 = sbr.rel (!%p1385_p0) target bundleno = 380 (0x17c), region = 188 }
 0x182   : >> { %1403 = vst [vmem:[%s2740_s3 + $0x14] sm:$0xf] %v1402_v38 }
 0x183   : >> { %1405 = vst [vmem:[%s2740_s3 + $0x18] sm:$0xf] %v1404_v13 }
 0x186 PF: > { %s13_s16 = sadd.s32 1, %s2376_s16   ;;  %s2741_s12 = smov %s2364_s13 }
 0x187   : > { %p10_p1 = scmp.ge.s32.totalorder %s13_s16, 4   ;;  %s2742_s13 = smov %s2443_s20 }
 0x188   : > { %s2743_s14 = smov %s2372_s15  ;;  %s2744_s15 = smov %s2746_s17 }
 0x189   :  { %12 = sbr.rel (!%p10_p1) target bundleno = 3 (0x3), region = 210 }

// kernel: _lambda_.15
= control target key start
LH: loop header
LB: loop body
LE: loop exit
PB: predicated region body
PF: predicated region fallthrough
CT: control target
= control target key end

     0   :  { %s1584_s12 = smov 0   ;;  %s1586_s13 = smov 0   ;;  %s1741_s0 = inlined_call_operand.vmem [shape: bf16[16,4096], index: 0, kind: input, shape index: {}]   ;;  %s1742_s1 = inlined_call_operand.vmem [shape: bf16[4096,128], index: 1, kind: input, shape index: {}]   ;;  %s1743_s2 = inlined_call_operand.vmem [shape: f32[1,128], index: 2, kind: input, shape index: {}]   ;;  %s1744_s3 = inlined_call_operand.vmem [shape: bf16[16,128], index: 3, kind: output, shape index: {}]  }
   0x1   :  { %s1588_s14 = smov 0   ;;  %s1590_s15 = smov 0  }
   0x2   :  { %s1592_s16 = smov 0  }
   0x3 LB: > { %s25_s17 = sadd.s32 1, %s1557_s15  ;;  %p48_p1 = scmp.ne.s32.totalorder %s1549_s13, %s1545_s12  ;;  %s1561_s16 = sphi %s1592_s16, %s13_s16   ;;  %s1557_s15 = sphi %s1590_s15, %s1748_s15   ;;  %s1553_s14 = sphi %s1588_s14, %s1747_s14   ;;  %s1549_s13 = sphi %s1586_s13, %s1746_s13   ;;  %s1545_s12 = sphi %s1584_s12, %s1745_s12  }
   0x4   : > { %p26_p0 = scmp.ge.s32.totalorder %s25_s17, 4  ;;  %p49_p2 = scmp.eq.s32.totalorder %s1561_s16, 0 }
   0x5   : > { %s41_s19 = sadd.s32 1, %s1549_s13  ;;  %p1101_p5 = scmp.ge.s32.totalorder %s1561_s16, 4 }
   0x6   : > { %s1750_s17 = smov (%p26_p0, %s25_s17), 0  ;;  %p50_p3 = por %p49_p2, %p48_p1 }
   0x7   : > { %s37_s18 = ssub.s32 %s1557_s15, %s1750_s17  ;;  %162 = sbr.rel (%p1101_p5) target bundleno = 24 (0x18), region = 20 }
   0x8   : > { %p39_p4 = scmp.eq.s32.totalorder %s37_s18, 0 }
   0xa   : > { %s1619_s20 = scalar_select %p39_p4, %s1549_s13, %s41_s19  }
   0xc   : > { %165 = sbr.rel (!%p50_p3) target bundleno = 24 (0x18), region = 24  ;;  %s167_s21 = sand.u32 (%p50_p3), 1, %s1549_s13  }
   0xd   : > { %s1403_s22 = sshll.u32 (%p50_p3), %s1557_s15, 5  ;;  %s1102_s23 = sshll.u32 (%p50_p3), %s167_s21, 6 }
   0xe   : > { %s175_s26 = scalar_lea.vmem (%p50_p3), %s1741_s0, %s1403_s22  ;;  %s169_s27 = scalar_lea.vmem (%p50_p3), [#allocation3], %s1102_s23 }
   0xf   : > { %v188_v0 = vld [vmem:[%s175_s26] sm:$0xff] (%p50_p3)  ;;  %v190_v1 = vld [vmem:[%s175_s26 + $0x8] sm:$0xff] (%p50_p3)  ;;  %v192_v2 = vld [vmem:[%s175_s26 + $0x10] sm:$0xff] (%p50_p3) }
  0x10   : > { %189 = vst [vmem:[%s169_s27] sm:$0xff] (%p50_p3), %v188_v0  ;;  %v194_v3 = vld [vmem:[%s175_s26 + $0x18] sm:$0xff] (%p50_p3)  ;;  %v196_v4 = vld [vmem:[%s175_s26 + $0x80] sm:$0xff] (%p50_p3)  ;;  %v198_v5 = vld [vmem:[%s175_s26 + $0x88] sm:$0xff] (%p50_p3) }
  0x11   : > { %191 = vst [vmem:[%s169_s27 + $0x8] sm:$0xff] %v190_v1  ;;  %v200_v6 = vld [vmem:[%s175_s26 + $0x90] sm:$0xff]  ;;  %v202_v7 = vld [vmem:[%s175_s26 + $0x98] sm:$0xff] }
  0x12   : > { %193 = vst [vmem:[%s169_s27 + $0x10] sm:$0xff] %v192_v2 }
  0x13   : > { %195 = vst [vmem:[%s169_s27 + $0x18] sm:$0xff] %v194_v3 }
  0x14   : > { %197 = vst [vmem:[%s169_s27 + $0x20] sm:$0xff] %v196_v4 }
  0x15   : > { %199 = vst [vmem:[%s169_s27 + $0x28] sm:$0xff] %v198_v5 }
  0x16   : > { %201 = vst [vmem:[%s169_s27 + $0x30] sm:$0xff] %v200_v6 }
  0x17   : > { %203 = vst [vmem:[%s169_s27 + $0x38] sm:$0xff] %v202_v7 }
  0x18 PF: > { %p1105_p6 = scmp.ge.s32.totalorder %s1561_s16, 1  ;;  %p220_p7 = scmp.lt.s32.totalorder %s1561_s16, 5 }
  0x1a   : > { %p221_p8 = pnand %p1105_p6, %p220_p7 }
  0x1b   : > { %s227_s28 = sand.u32 (!%p221_p8), 1, %s1545_s12   ;;  %s1107_s29 = sshll.u32 (!%p221_p8), %s1553_s14, 7 }
  0x1c   : > { %224 = sbr.rel (%p221_p8) target bundleno = 266 (0x10a), region = 51  ;;  %s1106_s30 = sshll.u32 (!%p221_p8), %s227_s28, 6 }
  0x1d   : > { %p267_p9 = scmp.lt.s32.totalorder (!%p221_p8), %s1107_s29, 511  ;;  %s1636_s8 = scalar_lea.vmem (!%p221_p8), [#allocation3], %s1106_s30 }
  0x1e   : > { %p1109_p10 = scmp.ne.s32.totalorder (!%p221_p8), %s1553_s14, 0 }
  0x21   : > { %s1752_s29 = smov (!%p267_p9, %s1107_s29), 511  ;;  %290 = sbr.rel (%p1109_p10) target bundleno = 41 (0x29), region = 59 }
  0x22   : > { %s1108_s4 = sshll.u32 %s1752_s29, 2 }
  0x23   : > { %s1634_s7 = scalar_lea.vmem %s1742_s1, %s1108_s4 }
  0x26   : > { %v1563_v8 = vmov 0.0  }
  0x27   : > { %291 = vst [vmem:[#allocation2] sm:$0xff] %v1563_v8 }
  0x28   : > { %292 = vst [vmem:[#allocation2 + $0x8] sm:$0xff] %v1563_v8 }
  0x29 PF: > { %v1419_v9 = vld [vmem:[%s1634_s7 + $0x38] sm:$0xff]  ;;  %v1418_v13 = vld [vmem:[%s1634_s7 + $0x30] sm:$0xff]  ;;  %v1417_v17 = vld [vmem:[%s1634_s7 + $0x28] sm:$0xff]  ;;  %p1398_p11 = scmp.ne.s32.totalorder %s1553_s14, 3 }
  0x2a   : > { %v1427_v10 = vld [vmem:[%s1634_s7 + $0x78] sm:$0xff]  ;;  %855 = vmatpush.bf16.msra.mxu0 %v1419_v9  ;;  %v1426_v14 = vld [vmem:[%s1634_s7 + $0x70] sm:$0xff]  ;;  %v1425_v18 = vld [vmem:[%s1634_s7 + $0x68] sm:$0xff] }
  0x2b   : > { %v1435_v11 = vld [vmem:[%s1634_s7 + $0xb8] sm:$0xff]  ;;  %869 = vmatpush.bf16.msra.mxu1 %v1427_v10  ;;  %v1434_v15 = vld [vmem:[%s1634_s7 + $0xb0] sm:$0xff]  ;;  %v1433_v19 = vld [vmem:[%s1634_s7 + $0xa8] sm:$0xff] }
  0x2c   : > { %v1443_v12 = vld [vmem:[%s1634_s7 + $0xf8] sm:$0xff]  ;;  %883 = vmatpush.bf16.msra.mxu2 %v1435_v11  ;;  %v1442_v16 = vld [vmem:[%s1634_s7 + $0xf0] sm:$0xff]  ;;  %v1441_v20 = vld [vmem:[%s1634_s7 + $0xe8] sm:$0xff] }
  0x2d   : > { %897 = vmatpush.bf16.msra.mxu3 %v1443_v12  ;;  %v1416_v21 = vld [vmem:[%s1634_s7 + $0x20] sm:$0xff]  ;;  %v1415_v25 = vld [vmem:[%s1634_s7 + $0x18] sm:$0xff]  ;;  %v1414_v29 = vld [vmem:[%s1634_s7 + $0x10] sm:$0xff] }
  0x2e   : > { %856 = vmatpush.bf16.msra.mxu0 %v1418_v13  ;;  %v1424_v22 = vld [vmem:[%s1634_s7 + $0x60] sm:$0xff]  ;;  %v1423_v26 = vld [vmem:[%s1634_s7 + $0x58] sm:$0xff]  ;;  %v1422_v30 = vld [vmem:[%s1634_s7 + $0x50] sm:$0xff] }
  0x2f   : > { %870 = vmatpush.bf16.msra.mxu1 %v1426_v14  ;;  %v1432_v23 = vld [vmem:[%s1634_s7 + $0xa0] sm:$0xff]  ;;  %v1431_v27 = vld [vmem:[%s1634_s7 + $0x98] sm:$0xff]  ;;  %v1430_v31 = vld [vmem:[%s1634_s7 + $0x90] sm:$0xff] }
  0x30   : > { %884 = vmatpush.bf16.msra.mxu2 %v1434_v15  ;;  %v1440_v24 = vld [vmem:[%s1634_s7 + $0xe0] sm:$0xff]  ;;  %v1439_v28 = vld [vmem:[%s1634_s7 + $0xd8] sm:$0xff]  ;;  %v1438_v32 = vld [vmem:[%s1634_s7 + $0xd0] sm:$0xff] }
  0x31   : > { %898 = vmatpush.bf16.msra.mxu3 %v1442_v16  ;;  %v1413_v33 = vld [vmem:[%s1634_s7 + $0x8] sm:$0xff]  ;;  %v1412_v37 = vld [vmem:[%s1634_s7] sm:$0xff]  ;;  %v1451_v41 = vld [vmem:[%s1634_s7 + $0x138] sm:$0xff] }
  0x32   : > { %857 = vmatpush.bf16.msra.mxu0 %v1417_v17  ;;  %v1421_v34 = vld [vmem:[%s1634_s7 + $0x48] sm:$0xff]  ;;  %v1420_v38 = vld [vmem:[%s1634_s7 + $0x40] sm:$0xff]  ;;  %v1459_v42 = vld [vmem:[%s1634_s7 + $0x178] sm:$0xff] }
  0x33   : > { %871 = vmatpush.bf16.msra.mxu1 %v1425_v18  ;;  %v1429_v35 = vld [vmem:[%s1634_s7 + $0x88] sm:$0xff]  ;;  %v1428_v39 = vld [vmem:[%s1634_s7 + $0x80] sm:$0xff]  ;;  %v1120_v43 = vld [vmem:[%s1636_s8 + $0x8] sm:$0xf] }
  0x34   : > { %885 = vmatpush.bf16.msra.mxu2 %v1433_v19  ;;  %v1437_v36 = vld [vmem:[%s1634_s7 + $0xc8] sm:$0xff]  ;;  %v1436_v40 = vld [vmem:[%s1634_s7 + $0xc0] sm:$0xff]  ;;  %v1409_v44 = vld [vmem:[%s1636_s8 + $0x24] sm:$0xf0] }
  0x35   : > { %899 = vmatpush.bf16.msra.mxu3 %v1441_v20  ;;  %v1405_v45 = vld [vmem:[%s1636_s8 + $0xc] sm:$0xf]  ;;  %v1112_v47 = vld [vmem:[%s1636_s8] sm:$0xf]  ;;  %v1404_v49 = vld [vmem:[%s1636_s8 + $0x4] sm:$0xf]  ;;  %v1121_v53 = vor.u32 %v1409_v44, %v1120_v43 }
  0x36   : > { %858 = vmatpush.bf16.msra.mxu0 %v1416_v21  ;;  %v1122_v46 = vld [vmem:[%s1636_s8 + $0x28] sm:$0xf0]  ;;  %v1408_v48 = vld [vmem:[%s1636_s8 + $0x1c] sm:$0xf0]  ;;  %v1114_v50 = vld [vmem:[%s1636_s8 + $0x20] sm:$0xf0] }
  0x37   : > { %872 = vmatpush.bf16.msra.mxu1 %v1424_v22  ;;  %v1467_v51 = vld [vmem:[%s1634_s7 + $0x1b8] sm:$0xff]  ;;  %v1125_v54 = vor.u32 %v1405_v45, %v1122_v46  ;;  %v1113_v55 = vor.u32 %v1408_v48, %v1112_v47  ;;  %v1117_v56 = vor.u32 %v1404_v49, %v1114_v50  ;;  %v1450_v57 = vld [vmem:[%s1634_s7 + $0x130] sm:$0xff]  ;;  %v1449_v61 = vld [vmem:[%s1634_s7 + $0x128] sm:$0xff] }
  0x38   : > { %886 = vmatpush.bf16.msra.mxu2 %v1432_v23  ;;  %v1475_v52 = vld [vmem:[%s1634_s7 + $0x1f8] sm:$0xff]  ;;  %v1458_v58 = vld [vmem:[%s1634_s7 + $0x170] sm:$0xff]  ;;  %v1457_v62 = vld [vmem:[%s1634_s7 + $0x168] sm:$0xff] }
  0x39   : > { %900 = vmatpush.bf16.msra.mxu3 %v1440_v24  ;;  %v1466_v59 = vld [vmem:[%s1634_s7 + $0x1b0] sm:$0xff]  ;;  %v1465_v63 = vld [vmem:[%s1634_s7 + $0x1a8] sm:$0xff]  ;;  %v1448_v1 = vld [vmem:[%s1634_s7 + $0x120] sm:$0xff] }
  0x3a   : > { %859 = vmatpush.bf16.msra.mxu0 %v1415_v25  ;;  %v1474_v60 = vld [vmem:[%s1634_s7 + $0x1f0] sm:$0xff]  ;;  %v1473_v0 = vld [vmem:[%s1634_s7 + $0x1e8] sm:$0xff]  ;;  %v1456_v2 = vld [vmem:[%s1634_s7 + $0x160] sm:$0xff] }
  0x3b   : > { %873 = vmatpush.bf16.msra.mxu1 %v1423_v26  ;;  %v1464_v3 = vld [vmem:[%s1634_s7 + $0x1a0] sm:$0xff]  ;;  %v1447_v5 = vld [vmem:[%s1634_s7 + $0x118] sm:$0xff]  ;;  %v1446_v9 = vld [vmem:[%s1634_s7 + $0x110] sm:$0xff] }
  0x3c   : > { %887 = vmatpush.bf16.msra.mxu2 %v1431_v27  ;;  %v1472_v4 = vld [vmem:[%s1634_s7 + $0x1e0] sm:$0xff]  ;;  %v1455_v6 = vld [vmem:[%s1634_s7 + $0x158] sm:$0xff]  ;;  %v1454_v10 = vld [vmem:[%s1634_s7 + $0x150] sm:$0xff] }
  0x3d   : > { %901 = vmatpush.bf16.msra.mxu3 %v1439_v28  ;;  %v1463_v7 = vld [vmem:[%s1634_s7 + $0x198] sm:$0xff]  ;;  %v1462_v11 = vld [vmem:[%s1634_s7 + $0x190] sm:$0xff]  ;;  %v1445_v13 = vld [vmem:[%s1634_s7 + $0x108] sm:$0xff] }
  0x3e   : > { %860 = vmatpush.bf16.msra.mxu0 %v1414_v29  ;;  %v1471_v8 = vld [vmem:[%s1634_s7 + $0x1d8] sm:$0xff]  ;;  %v1470_v12 = vld [vmem:[%s1634_s7 + $0x1d0] sm:$0xff]  ;;  %v1453_v14 = vld [vmem:[%s1634_s7 + $0x148] sm:$0xff] }
  0x3f   : > { %874 = vmatpush.bf16.msra.mxu1 %v1422_v30  ;;  %v1461_v15 = vld [vmem:[%s1634_s7 + $0x188] sm:$0xff]  ;;  %v1444_v17 = vld [vmem:[%s1634_s7 + $0x100] sm:$0xff] }
  0x40   : > { %888 = vmatpush.bf16.msra.mxu2 %v1430_v31  ;;  %v1469_v16 = vld [vmem:[%s1634_s7 + $0x1c8] sm:$0xff]  ;;  %v1452_v18 = vld [vmem:[%s1634_s7 + $0x140] sm:$0xff] }
  0x41   : > { %902 = vmatpush.bf16.msra.mxu3 %v1438_v32  ;;  %v1460_v19 = vld [vmem:[%s1634_s7 + $0x180] sm:$0xff]  ;;  %v1136_v25 = vld [vmem:[%s1636_s8 + $0x18] sm:$0xf]  ;;  %v1407_v27 = vld [vmem:[%s1636_s8 + $0x1c] sm:$0xf] }
  0x42   : > { %861 = vmatpush.bf16.msra.mxu0 %v1413_v33  ;;  %v1468_v20 = vld [vmem:[%s1634_s7 + $0x1c0] sm:$0xff]  ;;  %v1411_v26 = vld [vmem:[%s1636_s8 + $0x34] sm:$0xf0]  ;;  %v1138_v28 = vld [vmem:[%s1636_s8 + $0x38] sm:$0xf0] }
  0x43   : > { %875 = vmatpush.bf16.msra.mxu1 %v1421_v34  ;;  %v1128_v21 = vld [vmem:[%s1636_s8 + $0x10] sm:$0xf]  ;;  %v1406_v23 = vld [vmem:[%s1636_s8 + $0x14] sm:$0xf]  ;;  %v1137_v31 = vor.u32 %v1411_v26, %v1136_v25  ;;  %v1141_v32 = vor.u32 %v1407_v27, %v1138_v28 }
  0x44   : > { %889 = vmatpush.bf16.msra.mxu2 %v1429_v35  ;;  %v1410_v22 = vld [vmem:[%s1636_s8 + $0x2c] sm:$0xf0]  ;;  %v1130_v24 = vld [vmem:[%s1636_s8 + $0x30] sm:$0xf0] }
  0x45   : > { %903 = vmatpush.bf16.msra.mxu3 %v1437_v36  ;;  %v1129_v29 = vor.u32 %v1410_v22, %v1128_v21  ;;  %v1133_v30 = vor.u32 %v1406_v23, %v1130_v24 }
  0x46   : > { %862 = vmatpush.bf16.msra.mxu0 %v1412_v37 }
  0x47   : > { %876 = vmatpush.bf16.msra.mxu1 %v1420_v38 }
  0x48   : > { %890 = vmatpush.bf16.msra.mxu2 %v1428_v39 }
  0x49   : > { %904 = vmatpush.bf16.msra.mxu3 %v1436_v40  ;;  %863 = vmatmul.bf16.vlgmr.msra.gmra.mxu0 %v1113_v55  ;;  %v293_v55 = vld [vmem:[#allocation2] sm:$0xff] }
  0x4a   : > { %911 = vmatpush.bf16.msrb.mxu0 %v1451_v41  ;;  %877 = vmatmul.bf16.vlgmr.msra.gmra.mxu1 %v1117_v56 }
  0x4b   : > { %925 = vmatpush.bf16.msrb.mxu1 %v1459_v42  ;;  %891 = vmatmul.bf16.vlgmr.msra.gmra.mxu2 %v1121_v53 }
  0x4c   : > { %939 = vmatpush.bf16.msrb.mxu2 %v1467_v51  ;;  %905 = vmatmul.bf16.vlgmr.msra.gmra.mxu3 %v1125_v54 }
  0x4d   : > { %953 = vmatpush.bf16.msrb.mxu3 %v1475_v52 }
  0x4e   : > { %912 = vmatpush.bf16.msrb.mxu0 %v1450_v57 }
  0x4f   : > { %926 = vmatpush.bf16.msrb.mxu1 %v1458_v58 }
  0x50   : > { %940 = vmatpush.bf16.msrb.mxu2 %v1466_v59 }
  0x51   : > { %954 = vmatpush.bf16.msrb.mxu3 %v1474_v60 }
  0x52   : > { %913 = vmatpush.bf16.msrb.mxu0 %v1449_v61 }
  0x53   : > { %927 = vmatpush.bf16.msrb.mxu1 %v1457_v62 }
  0x54   : > { %941 = vmatpush.bf16.msrb.mxu2 %v1465_v63  ;;  %v294_v63 = vld [vmem:[#allocation2 + $0x8] sm:$0xff] }
  0x55   : > { %955 = vmatpush.bf16.msrb.mxu3 %v1473_v0 }
  0x56   : > { %914 = vmatpush.bf16.msrb.mxu0 %v1448_v1 }
  0x57   : > { %928 = vmatpush.bf16.msrb.mxu1 %v1456_v2 }
  0x58   : > { %942 = vmatpush.bf16.msrb.mxu2 %v1464_v3 }
  0x59   : > { %956 = vmatpush.bf16.msrb.mxu3 %v1472_v4 }
  0x5a   : > { %915 = vmatpush.bf16.msrb.mxu0 %v1447_v5 }
  0x5b   : > { %929 = vmatpush.bf16.msrb.mxu1 %v1455_v6 }
  0x5c   : > { %943 = vmatpush.bf16.msrb.mxu2 %v1463_v7 }
  0x5d   : > { %957 = vmatpush.bf16.msrb.mxu3 %v1471_v8 }
  0x5e   : > { %916 = vmatpush.bf16.msrb.mxu0 %v1446_v9 }
  0x5f   : > { %930 = vmatpush.bf16.msrb.mxu1 %v1454_v10 }
  0x60   : > { %944 = vmatpush.bf16.msrb.mxu2 %v1462_v11 }
  0x61   : > { %958 = vmatpush.bf16.msrb.mxu3 %v1470_v12 }
  0x62   : > { %917 = vmatpush.bf16.msrb.mxu0 %v1445_v13 }
  0x63   : > { %931 = vmatpush.bf16.msrb.mxu1 %v1453_v14 }
  0x64   : > { %945 = vmatpush.bf16.msrb.mxu2 %v1461_v15 }
  0x65   : > { %959 = vmatpush.bf16.msrb.mxu3 %v1469_v16 }
  0x66   : > { %918 = vmatpush.bf16.msrb.mxu0 %v1444_v17 }
  0x67   : > { %932 = vmatpush.bf16.msrb.mxu1 %v1452_v18 }
  0x68   : > { %946 = vmatpush.bf16.msrb.mxu2 %v1460_v19 }
  0x69   : > { %960 = vmatpush.bf16.msrb.mxu3 %v1468_v20  ;;  %919 = vmatmul.bf16.vlgmr.msrb.gmra.mxu0 %v1129_v29 }
  0x6a   : > { %933 = vmatmul.bf16.vlgmr.msrb.gmra.mxu1 %v1133_v30 }
  0x6b   : > { %947 = vmatmul.bf16.vlgmr.msrb.gmra.mxu2 %v1137_v31 }
  0x6c   : > { %961 = vmatmul.bf16.vlgmr.msrb.gmra.mxu3 %v1141_v32 }
  0xc6   : > { %v864_v33 = vpop.f32.mrf.mxu0 }
  0xc7   : > { %v878_v34 = vpop.f32.mrf.mxu1 }
  0xc8   : > { %v879_v37 = vadd.f32 %v878_v34, %v864_v33 }
  0xce   : > { %v892_v35 = vpop.f32.mrf.mxu2  ;;  %v866_v38 = vpop.f32.mrf.mxu0 }
  0xcf   : > { %v906_v36 = vpop.f32.mrf.mxu3  ;;  %v880_v39 = vpop.f32.mrf.mxu1  ;;  %v893_v40 = vadd.f32 %v892_v35, %v879_v37 }
  0xd0   : > { %v881_v44 = vadd.f32 %v880_v39, %v866_v38 }
  0xd1   : > { %v907_v43 = vadd.f32 %v906_v36, %v893_v40 }
  0xd6   : > { %v894_v41 = vpop.f32.mrf.mxu2 }
  0xd7   : > { %v908_v42 = vpop.f32.mrf.mxu3  ;;  %v895_v48 = vadd.f32 %v894_v41, %v881_v44 }
  0xd9   : > { %v909_v52 = vadd.f32 %v908_v42, %v895_v48 }
  0xe6   : > { %v920_v45 = vpop.f32.mrf.mxu0 }
  0xe7   : > { %v921_v46 = vadd.f32 %v920_v45, %v907_v43  ;;  %v934_v47 = vpop.f32.mrf.mxu1 }
  0xe9   : > { %v935_v49 = vadd.f32 %v934_v47, %v921_v46 }
  0xee   : > { %v948_v50 = vpop.f32.mrf.mxu2  ;;  %v922_v54 = vpop.f32.mrf.mxu0 }
  0xef   : > { %v962_v51 = vpop.f32.mrf.mxu3  ;;  %v949_v53 = vadd.f32 %v948_v50, %v935_v49  ;;  %v923_v57 = vadd.f32 %v922_v54, %v909_v52  ;;  %v936_v59 = vpop.f32.mrf.mxu1 }
  0xf1   : > { %v963_v56 = vadd.f32 %v962_v51, %v949_v53  ;;  %v937_v60 = vadd.f32 %v936_v59, %v923_v57 }
  0xf3   : > { %v967_v58 = vadd.f32 %v963_v56, %v293_v55 }
  0xf5   : > { %969 = vst [vmem:[#allocation2] sm:$0xff] %v967_v58 }
  0xf6   : > { %v950_v61 = vpop.f32.mrf.mxu2 }
  0xf7   : > { %v951_v62 = vadd.f32 %v950_v61, %v937_v60  ;;  %v964_v0 = vpop.f32.mrf.mxu3 }
  0xf9   : > { %v965_v1 = vadd.f32 %v964_v0, %v951_v62  ;;  %974 = sbr.rel (%p1398_p11) target bundleno = 266 (0x10a), region = 63 }
  0xfb   : > { %v968_v2 = vadd.f32 %v965_v1, %v294_v63 }
  0xfd   : > { %970 = vst [vmem:[#allocation2 + $0x8] sm:$0xff] %v968_v2 }
  0xfe   : > { %v975_v3 = vld [vmem:[#allocation2] sm:$0xff] }
  0xff   : > { %v1522_v5 = vld [vmem:[%s1743_s2] ss:$0 sm:$0xff] }
 0x100   : > { %v981_v6 = vadd.f32 %v1522_v5, %v975_v3 }
 0x104   : > { %v976_v4 = vld [vmem:[#allocation2 + $0x8] sm:$0xff] }
 0x105   : > { %v982_v7 = vadd.f32 %v1522_v5, %v976_v4 }
 0x107   : > { %v1479_v8 = vpack.c.bf16 %v982_v7, %v981_v6 }
 0x109   : > { %1480 = vst [vmem:[%s1744_s3] sm:$0xff] %v1479_v8  }
 0x10a PF: > { %s13_s16 = sadd.s32 1, %s1561_s16   ;;  %s1745_s12 = smov %s1549_s13 }
 0x10b   : > { %p10_p12 = scmp.ge.s32.totalorder %s13_s16, 6   ;;  %s1746_s13 = smov %s1619_s20 }
 0x10c   : > { %s1747_s14 = smov %s1557_s15  ;;  %s1748_s15 = smov %s1750_s17 }
 0x10d   :  { %12 = sbr.rel (!%p10_p12) target bundleno = 3 (0x3), region = 104 }

</bundles_post_ra>
